<compile_context>
chip_gen: v7x
topology: tpu7x:2x2x1
jax: 0.10.0
libtpu: 0.0.40
codegen_flags: <defaults>
</compile_context>

<pallas_src>
import jax
import jax.numpy as jnp
from jax import lax
from jax.experimental import pallas as pl
from jax.experimental.pallas import tpu as pltpu


def _round_up(x, m):
    return ((x + m - 1) // m) * m


# ----------------------------------------------------------------------------
# Kernel
# ----------------------------------------------------------------------------
def _rnn_rollout_kernel(obs_ref, h0_ref, w1_ref, wg_ref, w2_ref, b_ref,
                        q_ref, hout_ref, h_scr):
    """One grid step = one (batch tile, time tile).  Recurrence carried in h_scr."""
    HP = h_scr.shape[1]
    QP = q_ref.shape[2]
    t_tile = obs_ref.shape[0]

    # Initialize the recurrent state from h0 at the first time block of each
    # batch tile (time axis is the innermost, "arbitrary" grid axis).
    @pl.when(pl.program_id(1) == 0)
    def _():
        h_scr[...] = h0_ref[...]

    # Hoist weight / bias loads out of the unrolled time loop.
    w1 = w1_ref[...]                    # (K, HP)
    wg = wg_ref[...]                    # (2*HP, 4*HP)  rows: [x | h], cols: [r|z|i_n|h_n]
    w2 = w2_ref[...]                    # (HP, QP)
    b1 = b_ref[0:1, 0:HP]               # fc1 bias
    bg = b_ref[1:2, :]                  # fused GRU bias [b_ir+b_hr | b_iz+b_hz | b_in | b_hn]
    b2 = b_ref[2:3, 0:QP]               # fc2 bias

    def step(i, h):
        # fc1 + ReLU
        x = jnp.dot(obs_ref[i], w1, preferred_element_type=jnp.float32)
        x = jnp.maximum(x + b1, 0.0)
        # Fused GRUCell: single K = 2*HP matmul over concat([x, h]).
        xh = jnp.concatenate([x, h], axis=-1)                    # (B_TILE, 2*HP)
        g = jnp.dot(xh, wg, preferred_element_type=jnp.float32) + bg
        r = jax.nn.sigmoid(g[:, 0:HP])
        z = jax.nn.sigmoid(g[:, HP:2 * HP])
        n = jnp.tanh(g[:, 2 * HP:3 * HP] + r * g[:, 3 * HP:4 * HP])
        h_new = n + z * (h - n)          # == (1 - z) * n + z * h
        # fc2 (lane-dense QP output)
        q = jnp.dot(h_new, w2, preferred_element_type=jnp.float32) + b2
        q_ref[i] = q.astype(q_ref.dtype)
        return h_new

    h = lax.fori_loop(0, t_tile, step, h_scr[...], unroll=True)
    h_scr[...] = h
    # hout block index is constant over the time axis, so HBM writeback only
    # happens when the batch tile changes / at the end of the grid.
    hout_ref[...] = h.astype(hout_ref.dtype)


# ----------------------------------------------------------------------------
# Host-side parameter packing
# ----------------------------------------------------------------------------
def pack_params(params, input_shape, rnn_hidden_dim, n_actions, *, hp=128, qp=128):
    """Fuse GRU weights/biases and pad to lane-dense (128-wide) layouts.

    Exactness invariant: every padded weight/bias entry is 0 and padded h lanes
    start at 0, so padded lanes remain exactly 0 through the GRU update.
    """
    H = rnn_hidden_dim
    assert H <= hp and n_actions <= qp
    assert H % 8 == 0
    f32 = jnp.float32

    # fc1: (K, HP), padded output columns zero.
    w1 = jnp.zeros((input_shape, hp), f32).at[:, :H].set(params["w1"])

    # Stacked GRU weight (2*HP, 4*HP):
    #   rows 0:HP    (input side x):  [ w_ir | w_iz | w_in |  0   ]
    #   rows HP:2HP  (hidden side h): [ w_hr | w_hz |  0   | w_hn ]
    wg = jnp.zeros((2 * hp, 4 * hp), f32)
    wg = wg.at[0:H, 0 * hp:0 * hp + H].set(params["w_ir"])
    wg = wg.at[0:H, 1 * hp:1 * hp + H].set(params["w_iz"])
    wg = wg.at[0:H, 2 * hp:2 * hp + H].set(params["w_in"])
    wg = wg.at[hp:hp + H, 0 * hp:0 * hp + H].set(params["w_hr"])
    wg = wg.at[hp:hp + H, 1 * hp:1 * hp + H].set(params["w_hz"])
    wg = wg.at[hp:hp + H, 3 * hp:3 * hp + H].set(params["w_hn"])

    # fc2: (HP, QP), padded rows / output columns zero.
    w2 = jnp.zeros((hp, qp), f32).at[:H, :n_actions].set(params["w2"])

    # Packed bias block (3, 4*HP):
    #   row 0: fc1 bias                          (lanes 0:H)
    #   row 1: [b_ir+b_hr | b_iz+b_hz | b_in | b_hn]  (each HP-wide block)
    #   row 2: fc2 bias                          (lanes 0:n_actions)
    b = jnp.zeros((3, 4 * hp), f32)
    b = b.at[0, :H].set(params["b1"][0])
    b = b.at[1, 0 * hp:0 * hp + H].set(params["b_ir"][0] + params["b_hr"][0])
    b = b.at[1, 1 * hp:1 * hp + H].set(params["b_iz"][0] + params["b_hz"][0])
    b = b.at[1, 2 * hp:2 * hp + H].set(params["b_in"][0])
    b = b.at[1, 3 * hp:3 * hp + H].set(params["b_hn"][0])
    b = b.at[2, :n_actions].set(params["b2"][0])

    return {
        "w1": w1, "wg": wg, "w2": w2, "b": b,
        "input_shape": input_shape, "H": H, "HP": hp,
        "n_actions": n_actions, "QP": qp,
    }


# ----------------------------------------------------------------------------
# Wrappers
# ----------------------------------------------------------------------------
def rnn_agent_rollout(obs_seq, h0, packed, *, b_tile=128, t_tile=None):
    """Full rollout in one kernel.

    obs_seq: (T, B, input_shape), h0: (B, H)
    Returns q: (T, B, n_actions), h_last: (B, H).
    """
    T, B, K = obs_seq.shape
    H, HP, QP = packed["H"], packed["HP"], packed["QP"]
    n_actions = packed["n_actions"]
    assert K == packed["input_shape"]
    assert h0.shape == (B, H)

    # Batch tiling: fill MXU rows; pad B to a tile multiple (padded rows are
    # zeros and sliced away).
    bt = b_tile if B >= b_tile else _round_up(max(B, 8), 8)
    BP = _round_up(B, bt)

    # Time tiling: largest divisor of T that is <= 8 (keeps unrolled loop short).
    if t_tile is None:
        t_tile = 1
        for cand in (8, 4, 2, 1):
            if T % cand == 0:
                t_tile = cand
                break
    assert T % t_tile == 0

    obs_p = obs_seq.astype(jnp.float32)
    if BP != B:
        obs_p = jnp.zeros((T, BP, K), jnp.float32).at[:, :B, :].set(obs_p)
    h0_p = jnp.zeros((BP, HP), jnp.float32).at[:B, :H].set(h0.astype(jnp.float32))

    grid = (BP // bt, T // t_tile)

    q_pad, h_pad = pl.pallas_call(
        _rnn_rollout_kernel,
        out_shape=(
            jax.ShapeDtypeStruct((T, BP, QP), jnp.float32),
            jax.ShapeDtypeStruct((BP, HP), jnp.float32),
        ),
        grid_spec=pltpu.PrefetchScalarGridSpec(
            num_scalar_prefetch=0,
            grid=grid,
            in_specs=[
                # observations: (time block, batch block)
                pl.BlockSpec((t_tile, bt, K), lambda b, t: (t, b, 0)),
                # initial hidden state: one block per batch tile
                pl.BlockSpec((bt, HP), lambda b, t: (b, 0)),
                # weights / biases: VMEM-resident (constant index maps)
                pl.BlockSpec((K, HP), lambda b, t: (0, 0)),
                pl.BlockSpec((2 * HP, 4 * HP), lambda b, t: (0, 0)),
                pl.BlockSpec((HP, QP), lambda b, t: (0, 0)),
                pl.BlockSpec((3, 4 * HP), lambda b, t: (0, 0)),
            ],
            out_specs=(
                pl.BlockSpec((t_tile, bt, QP), lambda b, t: (t, b, 0)),
                pl.BlockSpec((bt, HP), lambda b, t: (b, 0)),
            ),
            scratch_shapes=[pltpu.VMEM((bt, HP), jnp.float32)],
        ),
        compiler_params=pltpu.CompilerParams(
            dimension_semantics=("parallel", "arbitrary")),
    )(obs_p, h0_p, packed["w1"], packed["wg"], packed["w2"], packed["b"])

    return q_pad[:, :B, :n_actions], h_pad[:B, :H]


def rnn_agent_forward(inputs, hidden_state, packed, *, b_tile=128):
    """Single-step forward matching PyTorch RNNAgent.forward.

    inputs: (B, input_shape), hidden_state: (B, H) -> (q: (B, n_actions), h: (B, H))
    """
    h_in = hidden_state.reshape(-1, packed["H"])
    q_seq, h = rnn_agent_rollout(inputs[None], h_in, packed, b_tile=b_tile)
    return q_seq[0], h


# ----------------------------------------------------------------------------
# Reference (pure JAX, mirrors the PyTorch module)
# ----------------------------------------------------------------------------
def init_params(key, input_shape, rnn_hidden_dim, n_actions):
    ks = jax.random.split(key, 16)

    def unif(k, shape, fan_in):
        bound = 1.0 / jnp.sqrt(fan_in)
        return jax.random.uniform(k, shape, jnp.float32, -bound, bound)

    H = rnn_hidden_dim
    return {
        "w1": unif(ks[0], (input_shape, H), input_shape),
        "b1": unif(ks[1], (1, H), input_shape),
        "w_ir": unif(ks[2], (H, H), H), "w_iz": unif(ks[3], (H, H), H),
        "w_in": unif(ks[4], (H, H), H), "w_hr": unif(ks[5], (H, H), H),
        "w_hz": unif(ks[6], (H, H), H), "w_hn": unif(ks[7], (H, H), H),
        "b_ir": unif(ks[8], (1, H), H), "b_iz": unif(ks[9], (1, H), H),
        "b_in": unif(ks[10], (1, H), H), "b_hr": unif(ks[11], (1, H), H),
        "b_hz": unif(ks[12], (1, H), H), "b_hn": unif(ks[13], (1, H), H),
        "w2": unif(ks[14], (H, n_actions), H),
        "b2": unif(ks[15], (1, n_actions), H),
    }


def reference_forward(inputs, hidden_state, p):
    x = jnp.maximum(inputs @ p["w1"] + p["b1"], 0.0)
    h = hidden_state
    r = jax.nn.sigmoid(x @ p["w_ir"] + p["b_ir"] + h @ p["w_hr"] + p["b_hr"])
    z = jax.nn.sigmoid(x @ p["w_iz"] + p["b_iz"] + h @ p["w_hz"] + p["b_hz"])
    n = jnp.tanh(x @ p["w_in"] + p["b_in"] + r * (h @ p["w_hn"] + p["b_hn"]))
    h_new = (1.0 - z) * n + z * h
    q = h_new @ p["w2"] + p["b2"]
    return q, h_new


def reference_rollout(obs_seq, h0, p):
    def step(h, x_t):
        q, h_new = reference_forward(x_t, h, p)
        return h_new, q
    h_last, qs = lax.scan(step, h0, obs_seq)
    return qs, h_last


# ----------------------------------------------------------------------------
if __name__ == "__main__":
    input_shape = 48       # per-agent obs dim
    rnn_hidden_dim = 64
    n_actions = 12
    T = 8                  # rollout length
    n_envs, n_agents = 32, 8
    B = n_envs * n_agents  # 256 rows -> two 128-row batch tiles (parallel axis)

    key = jax.random.PRNGKey(0)
    k_param, k_obs, k_h = jax.random.split(key, 3)

    params = init_params(k_param, input_shape, rnn_hidden_dim, n_actions)
    packed = pack_params(params, input_shape, rnn_hidden_dim, n_actions)

    obs_seq = jax.random.normal(k_obs, (T, B, input_shape), jnp.float32)
    h0 = jax.random.normal(k_h, (B, rnn_hidden_dim), jnp.float32)

    # Full rollout through the Pallas kernel (T-loop inside the kernel).
    q, h_last = rnn_agent_rollout(obs_seq, h0, packed)
    q = jax.block_until_ready(q)
    h_last = jax.block_until_ready(h_last)

    q_ref, h_ref = reference_rollout(obs_seq, h0, params)
    assert q.shape == (T, B, n_actions) and h_last.shape == (B, rnn_hidden_dim)
    assert jnp.allclose(q, q_ref, atol=1e-4, rtol=1e-4)
    assert jnp.allclose(h_last, h_ref, atol=1e-4, rtol=1e-4)

    # Single-step interface (matches the PyTorch module's forward signature).
    q1, h1 = rnn_agent_forward(obs_seq[0], h0, packed)
    q1 = jax.block_until_ready(q1)
    q1_ref, h1_ref = reference_forward(obs_seq[0], h0, params)
    assert jnp.allclose(q1, q1_ref, atol=1e-4, rtol=1e-4)
    assert jnp.allclose(h1, h1_ref, atol=1e-4, rtol=1e-4)

    print("KERNEL_OK")
</pallas_src>

<mosaic_0001>
module attributes {stable_mosaic.version = 11 : i64} {
  func.func @_rnn_rollout_kernel(%arg0: i32, %arg1: i32, %arg2: memref<8x128x48xf32, #tpu.memory_space<vmem>>, %arg3: memref<128x128xf32, #tpu.memory_space<vmem>>, %arg4: memref<48x128xf32, #tpu.memory_space<vmem>>, %arg5: memref<256x512xf32, #tpu.memory_space<vmem>>, %arg6: memref<128x128xf32, #tpu.memory_space<vmem>>, %arg7: memref<3x512xf32, #tpu.memory_space<vmem>>, %arg8: memref<8x128x128xf32, #tpu.memory_space<vmem>>, %arg9: memref<128x128xf32, #tpu.memory_space<vmem>>, %arg10: memref<128x128xf32, #tpu.memory_space<vmem>>) attributes {dimension_semantics = [#tpu.dimension_semantics<parallel>, #tpu.dimension_semantics<arbitrary>], iteration_bounds = array<i64: 2, 1>, scalar_prefetch = 0 : i64, scratch_operands = 1 : i64, tpu.core_type = #tpu.core_type<tc>, window_params = [{transform_indices = @transform_0, window_bounds = array<i64: 8, 128, 48>}, {transform_indices = @transform_1, window_bounds = array<i64: 128, 128>}, {pipeline_mode = #tpu.pipeline_mode<synchronous>, transform_indices = @transform_2, window_bounds = array<i64: 48, 128>}, {pipeline_mode = #tpu.pipeline_mode<synchronous>, transform_indices = @transform_3, window_bounds = array<i64: 256, 512>}, {pipeline_mode = #tpu.pipeline_mode<synchronous>, transform_indices = @transform_4, window_bounds = array<i64: 128, 128>}, {pipeline_mode = #tpu.pipeline_mode<synchronous>, transform_indices = @transform_5, window_bounds = array<i64: 3, 512>}, {transform_indices = @transform_6, window_bounds = array<i64: 8, 128, 128>}, {transform_indices = @transform_7, window_bounds = array<i64: 128, 128>}]} {
    %c0_i32 = arith.constant 0 : i32
    %0 = arith.cmpi eq, %arg1, %c0_i32 : i32
    %1 = arith.extui %0 : i1 to i32
    %c0_i32_0 = arith.constant 0 : i32
    %2 = arith.cmpi ne, %1, %c0_i32_0 : i32
    scf.if %2 {
      %c0_96 = arith.constant 0 : index
      %c0_97 = arith.constant 0 : index
      %324 = vector.load %arg3[%c0_96, %c0_97] : memref<128x128xf32, #tpu.memory_space<vmem>>, vector<128x128xf32>
      %c0_98 = arith.constant 0 : index
      %c0_99 = arith.constant 0 : index
      %325 = vector.load %arg10[%c0_98, %c0_99] : memref<128x128xf32, #tpu.memory_space<vmem>>, vector<128x128xf32>
      tpu.vector_store %arg10[%c0_98, %c0_99], %324 {strides = array<i32>} : memref<128x128xf32, #tpu.memory_space<vmem>>, vector<128x128xf32>,
    } else {
    }
    %c0 = arith.constant 0 : index
    %c0_1 = arith.constant 0 : index
    %3 = vector.load %arg4[%c0, %c0_1] : memref<48x128xf32, #tpu.memory_space<vmem>>, vector<48x128xf32>
    %c0_2 = arith.constant 0 : index
    %c0_3 = arith.constant 0 : index
    %4 = vector.load %arg5[%c0_2, %c0_3] : memref<256x512xf32, #tpu.memory_space<vmem>>, vector<256x512xf32>
    %c0_4 = arith.constant 0 : index
    %c0_5 = arith.constant 0 : index
    %5 = vector.load %arg6[%c0_4, %c0_5] : memref<128x128xf32, #tpu.memory_space<vmem>>, vector<128x128xf32>
    %c0_6 = arith.constant 0 : index
    %c0_7 = arith.constant 0 : index
    %6 = vector.load %arg7[%c0_6, %c0_7] : memref<3x512xf32, #tpu.memory_space<vmem>>, vector<1x128xf32>
    %c1 = arith.constant 1 : index
    %c0_8 = arith.constant 0 : index
    %7 = vector.load %arg7[%c1, %c0_8] : memref<3x512xf32, #tpu.memory_space<vmem>>, vector<1x512xf32>
    %c2 = arith.constant 2 : index
    %c0_9 = arith.constant 0 : index
    %8 = vector.load %arg7[%c2, %c0_9] : memref<3x512xf32, #tpu.memory_space<vmem>>, vector<1x128xf32>
    %c0_10 = arith.constant 0 : index
    %c0_11 = arith.constant 0 : index
    %9 = vector.load %arg10[%c0_10, %c0_11] : memref<128x128xf32, #tpu.memory_space<vmem>>, vector<128x128xf32>
    %c0_i32_12 = arith.constant 0 : i32
    %10 = arith.index_cast %c0_i32_12 : i32 to index
    %c0_13 = arith.constant 0 : index
    %c0_14 = arith.constant 0 : index
    %11 = vector.load %arg2[%10, %c0_13, %c0_14] : memref<8x128x48xf32, #tpu.memory_space<vmem>>, vector<1x128x48xf32>
    %12 = vector.shape_cast %11 : vector<1x128x48xf32> to vector<128x48xf32>
    %cst = arith.constant dense<0.000000e+00> : vector<128x128xf32>
    %13 = tpu.matmul %12, %3, %cst {dimension_numbers = #tpu.dot_dimension_numbers<[1], [0], [0], [1], [0, 0, 1, 1], [], []>} : vector<128x48xf32>, vector<48x128xf32>, vector<128x128xf32> -> vector<128x128xf32>
    %14 = vector.broadcast %6 : vector<1x128xf32> to vector<128x128xf32>
    %15 = arith.addf %13, %14 : vector<128x128xf32>
    %cst_15 = arith.constant 0.000000e+00 : f32
    %16 = vector.broadcast %cst_15 : f32 to vector<128x128xf32>
    %17 = arith.maximumf %15, %16 : vector<128x128xf32>
    %18 = tpu.concatenate %17, %9 in 1 : vector<128x128xf32>, vector<128x128xf32> -> vector<128x256xf32>
    %cst_16 = arith.constant dense<0.000000e+00> : vector<128x512xf32>
    %19 = tpu.matmul %18, %4, %cst_16 {dimension_numbers = #tpu.dot_dimension_numbers<[1], [0], [0], [1], [0, 0, 1, 1], [], []>} : vector<128x256xf32>, vector<256x512xf32>, vector<128x512xf32> -> vector<128x512xf32>
    %20 = vector.broadcast %7 : vector<1x512xf32> to vector<128x512xf32>
    %21 = arith.addf %19, %20 : vector<128x512xf32>
    %22 = vector.extract_strided_slice %21 {offsets = [0, 0], sizes = [128, 128], strides = [1, 1]} : vector<128x512xf32> to vector<128x128xf32>
    %23 = arith.negf %22 : vector<128x128xf32>
    %24 = math.exp %23 : vector<128x128xf32>
    %cst_17 = arith.constant 1.000000e+00 : f32
    %25 = vector.broadcast %cst_17 : f32 to vector<128x128xf32>
    %26 = arith.addf %25, %24 : vector<128x128xf32>
    %27 = arith.divf %25, %26 : vector<128x128xf32>
    %28 = vector.extract_strided_slice %21 {offsets = [0, 128], sizes = [128, 128], strides = [1, 1]} : vector<128x512xf32> to vector<128x128xf32>
    %29 = arith.negf %28 : vector<128x128xf32>
    %30 = math.exp %29 : vector<128x128xf32>
    %cst_18 = arith.constant 1.000000e+00 : f32
    %31 = vector.broadcast %cst_18 : f32 to vector<128x128xf32>
    %32 = arith.addf %31, %30 : vector<128x128xf32>
    %33 = arith.divf %31, %32 : vector<128x128xf32>
    %34 = vector.extract_strided_slice %21 {offsets = [0, 256], sizes = [128, 128], strides = [1, 1]} : vector<128x512xf32> to vector<128x128xf32>
    %35 = vector.extract_strided_slice %21 {offsets = [0, 384], sizes = [128, 128], strides = [1, 1]} : vector<128x512xf32> to vector<128x128xf32>
    %36 = arith.mulf %27, %35 : vector<128x128xf32>
    %37 = arith.addf %34, %36 : vector<128x128xf32>
    %38 = math.tanh %37 : vector<128x128xf32>
    %39 = arith.subf %9, %38 : vector<128x128xf32>
    %40 = arith.mulf %33, %39 : vector<128x128xf32>
    %41 = arith.addf %38, %40 : vector<128x128xf32>
    %cst_19 = arith.constant dense<0.000000e+00> : vector<128x128xf32>
    %42 = tpu.matmul %41, %5, %cst_19 {dimension_numbers = #tpu.dot_dimension_numbers<[1], [0], [0], [1], [0, 0, 1, 1], [], []>} : vector<128x128xf32>, vector<128x128xf32>, vector<128x128xf32> -> vector<128x128xf32>
    %43 = vector.broadcast %8 : vector<1x128xf32> to vector<128x128xf32>
    %44 = arith.addf %42, %43 : vector<128x128xf32>
    %45 = arith.index_cast %c0_i32_12 : i32 to index
    %c0_20 = arith.constant 0 : index
    %c0_21 = arith.constant 0 : index
    %46 = vector.load %arg8[%45, %c0_20, %c0_21] : memref<8x128x128xf32, #tpu.memory_space<vmem>>, vector<1x128x128xf32>
    %47 = vector.shape_cast %46 : vector<1x128x128xf32> to vector<128x128xf32>
    %48 = vector.shape_cast %44 : vector<128x128xf32> to vector<1x128x128xf32>
    tpu.vector_store %arg8[%45, %c0_20, %c0_21], %48 {strides = array<i32>} : memref<8x128x128xf32, #tpu.memory_space<vmem>>, vector<1x128x128xf32>,
    %c1_i32 = arith.constant 1 : i32
    %49 = arith.index_cast %c1_i32 : i32 to index
    %c0_22 = arith.constant 0 : index
    %c0_23 = arith.constant 0 : index
    %50 = vector.load %arg2[%49, %c0_22, %c0_23] : memref<8x128x48xf32, #tpu.memory_space<vmem>>, vector<1x128x48xf32>
    %51 = vector.shape_cast %50 : vector<1x128x48xf32> to vector<128x48xf32>
    %cst_24 = arith.constant dense<0.000000e+00> : vector<128x128xf32>
    %52 = tpu.matmul %51, %3, %cst_24 {dimension_numbers = #tpu.dot_dimension_numbers<[1], [0], [0], [1], [0, 0, 1, 1], [], []>} : vector<128x48xf32>, vector<48x128xf32>, vector<128x128xf32> -> vector<128x128xf32>
    %53 = vector.broadcast %6 : vector<1x128xf32> to vector<128x128xf32>
    %54 = arith.addf %52, %53 : vector<128x128xf32>
    %cst_25 = arith.constant 0.000000e+00 : f32
    %55 = vector.broadcast %cst_25 : f32 to vector<128x128xf32>
    %56 = arith.maximumf %54, %55 : vector<128x128xf32>
    %57 = tpu.concatenate %56, %41 in 1 : vector<128x128xf32>, vector<128x128xf32> -> vector<128x256xf32>
    %cst_26 = arith.constant dense<0.000000e+00> : vector<128x512xf32>
    %58 = tpu.matmul %57, %4, %cst_26 {dimension_numbers = #tpu.dot_dimension_numbers<[1], [0], [0], [1], [0, 0, 1, 1], [], []>} : vector<128x256xf32>, vector<256x512xf32>, vector<128x512xf32> -> vector<128x512xf32>
    %59 = vector.broadcast %7 : vector<1x512xf32> to vector<128x512xf32>
    %60 = arith.addf %58, %59 : vector<128x512xf32>
    %61 = vector.extract_strided_slice %60 {offsets = [0, 0], sizes = [128, 128], strides = [1, 1]} : vector<128x512xf32> to vector<128x128xf32>
    %62 = arith.negf %61 : vector<128x128xf32>
    %63 = math.exp %62 : vector<128x128xf32>
    %cst_27 = arith.constant 1.000000e+00 : f32
    %64 = vector.broadcast %cst_27 : f32 to vector<128x128xf32>
    %65 = arith.addf %64, %63 : vector<128x128xf32>
    %66 = arith.divf %64, %65 : vector<128x128xf32>
    %67 = vector.extract_strided_slice %60 {offsets = [0, 128], sizes = [128, 128], strides = [1, 1]} : vector<128x512xf32> to vector<128x128xf32>
    %68 = arith.negf %67 : vector<128x128xf32>
    %69 = math.exp %68 : vector<128x128xf32>
    %cst_28 = arith.constant 1.000000e+00 : f32
    %70 = vector.broadcast %cst_28 : f32 to vector<128x128xf32>
    %71 = arith.addf %70, %69 : vector<128x128xf32>
    %72 = arith.divf %70, %71 : vector<128x128xf32>
    %73 = vector.extract_strided_slice %60 {offsets = [0, 256], sizes = [128, 128], strides = [1, 1]} : vector<128x512xf32> to vector<128x128xf32>
    %74 = vector.extract_strided_slice %60 {offsets = [0, 384], sizes = [128, 128], strides = [1, 1]} : vector<128x512xf32> to vector<128x128xf32>
    %75 = arith.mulf %66, %74 : vector<128x128xf32>
    %76 = arith.addf %73, %75 : vector<128x128xf32>
    %77 = math.tanh %76 : vector<128x128xf32>
    %78 = arith.subf %41, %77 : vector<128x128xf32>
    %79 = arith.mulf %72, %78 : vector<128x128xf32>
    %80 = arith.addf %77, %79 : vector<128x128xf32>
    %cst_29 = arith.constant dense<0.000000e+00> : vector<128x128xf32>
    %81 = tpu.matmul %80, %5, %cst_29 {dimension_numbers = #tpu.dot_dimension_numbers<[1], [0], [0], [1], [0, 0, 1, 1], [], []>} : vector<128x128xf32>, vector<128x128xf32>, vector<128x128xf32> -> vector<128x128xf32>
    %82 = vector.broadcast %8 : vector<1x128xf32> to vector<128x128xf32>
    %83 = arith.addf %81, %82 : vector<128x128xf32>
    %84 = arith.index_cast %c1_i32 : i32 to index
    %c0_30 = arith.constant 0 : index
    %c0_31 = arith.constant 0 : index
    %85 = vector.load %arg8[%84, %c0_30, %c0_31] : memref<8x128x128xf32, #tpu.memory_space<vmem>>, vector<1x128x128xf32>
    %86 = vector.shape_cast %85 : vector<1x128x128xf32> to vector<128x128xf32>
    %87 = vector.shape_cast %83 : vector<128x128xf32> to vector<1x128x128xf32>
    tpu.vector_store %arg8[%84, %c0_30, %c0_31], %87 {strides = array<i32>} : memref<8x128x128xf32, #tpu.memory_space<vmem>>, vector<1x128x128xf32>,
    %c2_i32 = arith.constant 2 : i32
    %88 = arith.index_cast %c2_i32 : i32 to index
    %c0_32 = arith.constant 0 : index
    %c0_33 = arith.constant 0 : index
    %89 = vector.load %arg2[%88, %c0_32, %c0_33] : memref<8x128x48xf32, #tpu.memory_space<vmem>>, vector<1x128x48xf32>
    %90 = vector.shape_cast %89 : vector<1x128x48xf32> to vector<128x48xf32>
    %cst_34 = arith.constant dense<0.000000e+00> : vector<128x128xf32>
    %91 = tpu.matmul %90, %3, %cst_34 {dimension_numbers = #tpu.dot_dimension_numbers<[1], [0], [0], [1], [0, 0, 1, 1], [], []>} : vector<128x48xf32>, vector<48x128xf32>, vector<128x128xf32> -> vector<128x128xf32>
    %92 = vector.broadcast %6 : vector<1x128xf32> to vector<128x128xf32>
    %93 = arith.addf %91, %92 : vector<128x128xf32>
    %cst_35 = arith.constant 0.000000e+00 : f32
    %94 = vector.broadcast %cst_35 : f32 to vector<128x128xf32>
    %95 = arith.maximumf %93, %94 : vector<128x128xf32>
    %96 = tpu.concatenate %95, %80 in 1 : vector<128x128xf32>, vector<128x128xf32> -> vector<128x256xf32>
    %cst_36 = arith.constant dense<0.000000e+00> : vector<128x512xf32>
    %97 = tpu.matmul %96, %4, %cst_36 {dimension_numbers = #tpu.dot_dimension_numbers<[1], [0], [0], [1], [0, 0, 1, 1], [], []>} : vector<128x256xf32>, vector<256x512xf32>, vector<128x512xf32> -> vector<128x512xf32>
    %98 = vector.broadcast %7 : vector<1x512xf32> to vector<128x512xf32>
    %99 = arith.addf %97, %98 : vector<128x512xf32>
    %100 = vector.extract_strided_slice %99 {offsets = [0, 0], sizes = [128, 128], strides = [1, 1]} : vector<128x512xf32> to vector<128x128xf32>
    %101 = arith.negf %100 : vector<128x128xf32>
    %102 = math.exp %101 : vector<128x128xf32>
    %cst_37 = arith.constant 1.000000e+00 : f32
    %103 = vector.broadcast %cst_37 : f32 to vector<128x128xf32>
    %104 = arith.addf %103, %102 : vector<128x128xf32>
    %105 = arith.divf %103, %104 : vector<128x128xf32>
    %106 = vector.extract_strided_slice %99 {offsets = [0, 128], sizes = [128, 128], strides = [1, 1]} : vector<128x512xf32> to vector<128x128xf32>
    %107 = arith.negf %106 : vector<128x128xf32>
    %108 = math.exp %107 : vector<128x128xf32>
    %cst_38 = arith.constant 1.000000e+00 : f32
    %109 = vector.broadcast %cst_38 : f32 to vector<128x128xf32>
    %110 = arith.addf %109, %108 : vector<128x128xf32>
    %111 = arith.divf %109, %110 : vector<128x128xf32>
    %112 = vector.extract_strided_slice %99 {offsets = [0, 256], sizes = [128, 128], strides = [1, 1]} : vector<128x512xf32> to vector<128x128xf32>
    %113 = vector.extract_strided_slice %99 {offsets = [0, 384], sizes = [128, 128], strides = [1, 1]} : vector<128x512xf32> to vector<128x128xf32>
    %114 = arith.mulf %105, %113 : vector<128x128xf32>
    %115 = arith.addf %112, %114 : vector<128x128xf32>
    %116 = math.tanh %115 : vector<128x128xf32>
    %117 = arith.subf %80, %116 : vector<128x128xf32>
    %118 = arith.mulf %111, %117 : vector<128x128xf32>
    %119 = arith.addf %116, %118 : vector<128x128xf32>
    %cst_39 = arith.constant dense<0.000000e+00> : vector<128x128xf32>
    %120 = tpu.matmul %119, %5, %cst_39 {dimension_numbers = #tpu.dot_dimension_numbers<[1], [0], [0], [1], [0, 0, 1, 1], [], []>} : vector<128x128xf32>, vector<128x128xf32>, vector<128x128xf32> -> vector<128x128xf32>
    %121 = vector.broadcast %8 : vector<1x128xf32> to vector<128x128xf32>
    %122 = arith.addf %120, %121 : vector<128x128xf32>
    %123 = arith.index_cast %c2_i32 : i32 to index
    %c0_40 = arith.constant 0 : index
    %c0_41 = arith.constant 0 : index
    %124 = vector.load %arg8[%123, %c0_40, %c0_41] : memref<8x128x128xf32, #tpu.memory_space<vmem>>, vector<1x128x128xf32>
    %125 = vector.shape_cast %124 : vector<1x128x128xf32> to vector<128x128xf32>
    %126 = vector.shape_cast %122 : vector<128x128xf32> to vector<1x128x128xf32>
    tpu.vector_store %arg8[%123, %c0_40, %c0_41], %126 {strides = array<i32>} : memref<8x128x128xf32, #tpu.memory_space<vmem>>, vector<1x128x128xf32>,
    %c3_i32 = arith.constant 3 : i32
    %127 = arith.index_cast %c3_i32 : i32 to index
    %c0_42 = arith.constant 0 : index
    %c0_43 = arith.constant 0 : index
    %128 = vector.load %arg2[%127, %c0_42, %c0_43] : memref<8x128x48xf32, #tpu.memory_space<vmem>>, vector<1x128x48xf32>
    %129 = vector.shape_cast %128 : vector<1x128x48xf32> to vector<128x48xf32>
    %cst_44 = arith.constant dense<0.000000e+00> : vector<128x128xf32>
    %130 = tpu.matmul %129, %3, %cst_44 {dimension_numbers = #tpu.dot_dimension_numbers<[1], [0], [0], [1], [0, 0, 1, 1], [], []>} : vector<128x48xf32>, vector<48x128xf32>, vector<128x128xf32> -> vector<128x128xf32>
    %131 = vector.broadcast %6 : vector<1x128xf32> to vector<128x128xf32>
    %132 = arith.addf %130, %131 : vector<128x128xf32>
    %cst_45 = arith.constant 0.000000e+00 : f32
    %133 = vector.broadcast %cst_45 : f32 to vector<128x128xf32>
    %134 = arith.maximumf %132, %133 : vector<128x128xf32>
    %135 = tpu.concatenate %134, %119 in 1 : vector<128x128xf32>, vector<128x128xf32> -> vector<128x256xf32>
    %cst_46 = arith.constant dense<0.000000e+00> : vector<128x512xf32>
    %136 = tpu.matmul %135, %4, %cst_46 {dimension_numbers = #tpu.dot_dimension_numbers<[1], [0], [0], [1], [0, 0, 1, 1], [], []>} : vector<128x256xf32>, vector<256x512xf32>, vector<128x512xf32> -> vector<128x512xf32>
    %137 = vector.broadcast %7 : vector<1x512xf32> to vector<128x512xf32>
    %138 = arith.addf %136, %137 : vector<128x512xf32>
    %139 = vector.extract_strided_slice %138 {offsets = [0, 0], sizes = [128, 128], strides = [1, 1]} : vector<128x512xf32> to vector<128x128xf32>
    %140 = arith.negf %139 : vector<128x128xf32>
    %141 = math.exp %140 : vector<128x128xf32>
    %cst_47 = arith.constant 1.000000e+00 : f32
    %142 = vector.broadcast %cst_47 : f32 to vector<128x128xf32>
    %143 = arith.addf %142, %141 : vector<128x128xf32>
    %144 = arith.divf %142, %143 : vector<128x128xf32>
    %145 = vector.extract_strided_slice %138 {offsets = [0, 128], sizes = [128, 128], strides = [1, 1]} : vector<128x512xf32> to vector<128x128xf32>
    %146 = arith.negf %145 : vector<128x128xf32>
    %147 = math.exp %146 : vector<128x128xf32>
    %cst_48 = arith.constant 1.000000e+00 : f32
    %148 = vector.broadcast %cst_48 : f32 to vector<128x128xf32>
    %149 = arith.addf %148, %147 : vector<128x128xf32>
    %150 = arith.divf %148, %149 : vector<128x128xf32>
    %151 = vector.extract_strided_slice %138 {offsets = [0, 256], sizes = [128, 128], strides = [1, 1]} : vector<128x512xf32> to vector<128x128xf32>
    %152 = vector.extract_strided_slice %138 {offsets = [0, 384], sizes = [128, 128], strides = [1, 1]} : vector<128x512xf32> to vector<128x128xf32>
    %153 = arith.mulf %144, %152 : vector<128x128xf32>
    %154 = arith.addf %151, %153 : vector<128x128xf32>
    %155 = math.tanh %154 : vector<128x128xf32>
    %156 = arith.subf %119, %155 : vector<128x128xf32>
    %157 = arith.mulf %150, %156 : vector<128x128xf32>
    %158 = arith.addf %155, %157 : vector<128x128xf32>
    %cst_49 = arith.constant dense<0.000000e+00> : vector<128x128xf32>
    %159 = tpu.matmul %158, %5, %cst_49 {dimension_numbers = #tpu.dot_dimension_numbers<[1], [0], [0], [1], [0, 0, 1, 1], [], []>} : vector<128x128xf32>, vector<128x128xf32>, vector<128x128xf32> -> vector<128x128xf32>
    %160 = vector.broadcast %8 : vector<1x128xf32> to vector<128x128xf32>
    %161 = arith.addf %159, %160 : vector<128x128xf32>
    %162 = arith.index_cast %c3_i32 : i32 to index
    %c0_50 = arith.constant 0 : index
    %c0_51 = arith.constant 0 : index
    %163 = vector.load %arg8[%162, %c0_50, %c0_51] : memref<8x128x128xf32, #tpu.memory_space<vmem>>, vector<1x128x128xf32>
    %164 = vector.shape_cast %163 : vector<1x128x128xf32> to vector<128x128xf32>
    %165 = vector.shape_cast %161 : vector<128x128xf32> to vector<1x128x128xf32>
    tpu.vector_store %arg8[%162, %c0_50, %c0_51], %165 {strides = array<i32>} : memref<8x128x128xf32, #tpu.memory_space<vmem>>, vector<1x128x128xf32>,
    %c4_i32 = arith.constant 4 : i32
    %166 = arith.index_cast %c4_i32 : i32 to index
    %c0_52 = arith.constant 0 : index
    %c0_53 = arith.constant 0 : index
    %167 = vector.load %arg2[%166, %c0_52, %c0_53] : memref<8x128x48xf32, #tpu.memory_space<vmem>>, vector<1x128x48xf32>
    %168 = vector.shape_cast %167 : vector<1x128x48xf32> to vector<128x48xf32>
    %cst_54 = arith.constant dense<0.000000e+00> : vector<128x128xf32>
    %169 = tpu.matmul %168, %3, %cst_54 {dimension_numbers = #tpu.dot_dimension_numbers<[1], [0], [0], [1], [0, 0, 1, 1], [], []>} : vector<128x48xf32>, vector<48x128xf32>, vector<128x128xf32> -> vector<128x128xf32>
    %170 = vector.broadcast %6 : vector<1x128xf32> to vector<128x128xf32>
    %171 = arith.addf %169, %170 : vector<128x128xf32>
    %cst_55 = arith.constant 0.000000e+00 : f32
    %172 = vector.broadcast %cst_55 : f32 to vector<128x128xf32>
    %173 = arith.maximumf %171, %172 : vector<128x128xf32>
    %174 = tpu.concatenate %173, %158 in 1 : vector<128x128xf32>, vector<128x128xf32> -> vector<128x256xf32>
    %cst_56 = arith.constant dense<0.000000e+00> : vector<128x512xf32>
    %175 = tpu.matmul %174, %4, %cst_56 {dimension_numbers = #tpu.dot_dimension_numbers<[1], [0], [0], [1], [0, 0, 1, 1], [], []>} : vector<128x256xf32>, vector<256x512xf32>, vector<128x512xf32> -> vector<128x512xf32>
    %176 = vector.broadcast %7 : vector<1x512xf32> to vector<128x512xf32>
    %177 = arith.addf %175, %176 : vector<128x512xf32>
    %178 = vector.extract_strided_slice %177 {offsets = [0, 0], sizes = [128, 128], strides = [1, 1]} : vector<128x512xf32> to vector<128x128xf32>
    %179 = arith.negf %178 : vector<128x128xf32>
    %180 = math.exp %179 : vector<128x128xf32>
    %cst_57 = arith.constant 1.000000e+00 : f32
    %181 = vector.broadcast %cst_57 : f32 to vector<128x128xf32>
    %182 = arith.addf %181, %180 : vector<128x128xf32>
    %183 = arith.divf %181, %182 : vector<128x128xf32>
    %184 = vector.extract_strided_slice %177 {offsets = [0, 128], sizes = [128, 128], strides = [1, 1]} : vector<128x512xf32> to vector<128x128xf32>
    %185 = arith.negf %184 : vector<128x128xf32>
    %186 = math.exp %185 : vector<128x128xf32>
    %cst_58 = arith.constant 1.000000e+00 : f32
    %187 = vector.broadcast %cst_58 : f32 to vector<128x128xf32>
    %188 = arith.addf %187, %186 : vector<128x128xf32>
    %189 = arith.divf %187, %188 : vector<128x128xf32>
    %190 = vector.extract_strided_slice %177 {offsets = [0, 256], sizes = [128, 128], strides = [1, 1]} : vector<128x512xf32> to vector<128x128xf32>
    %191 = vector.extract_strided_slice %177 {offsets = [0, 384], sizes = [128, 128], strides = [1, 1]} : vector<128x512xf32> to vector<128x128xf32>
    %192 = arith.mulf %183, %191 : vector<128x128xf32>
    %193 = arith.addf %190, %192 : vector<128x128xf32>
    %194 = math.tanh %193 : vector<128x128xf32>
    %195 = arith.subf %158, %194 : vector<128x128xf32>
    %196 = arith.mulf %189, %195 : vector<128x128xf32>
    %197 = arith.addf %194, %196 : vector<128x128xf32>
    %cst_59 = arith.constant dense<0.000000e+00> : vector<128x128xf32>
    %198 = tpu.matmul %197, %5, %cst_59 {dimension_numbers = #tpu.dot_dimension_numbers<[1], [0], [0], [1], [0, 0, 1, 1], [], []>} : vector<128x128xf32>, vector<128x128xf32>, vector<128x128xf32> -> vector<128x128xf32>
    %199 = vector.broadcast %8 : vector<1x128xf32> to vector<128x128xf32>
    %200 = arith.addf %198, %199 : vector<128x128xf32>
    %201 = arith.index_cast %c4_i32 : i32 to index
    %c0_60 = arith.constant 0 : index
    %c0_61 = arith.constant 0 : index
    %202 = vector.load %arg8[%201, %c0_60, %c0_61] : memref<8x128x128xf32, #tpu.memory_space<vmem>>, vector<1x128x128xf32>
    %203 = vector.shape_cast %202 : vector<1x128x128xf32> to vector<128x128xf32>
    %204 = vector.shape_cast %200 : vector<128x128xf32> to vector<1x128x128xf32>
    tpu.vector_store %arg8[%201, %c0_60, %c0_61], %204 {strides = array<i32>} : memref<8x128x128xf32, #tpu.memory_space<vmem>>, vector<1x128x128xf32>,
    %c5_i32 = arith.constant 5 : i32
    %205 = arith.index_cast %c5_i32 : i32 to index
    %c0_62 = arith.constant 0 : index
    %c0_63 = arith.constant 0 : index
    %206 = vector.load %arg2[%205, %c0_62, %c0_63] : memref<8x128x48xf32, #tpu.memory_space<vmem>>, vector<1x128x48xf32>
    %207 = vector.shape_cast %206 : vector<1x128x48xf32> to vector<128x48xf32>
    %cst_64 = arith.constant dense<0.000000e+00> : vector<128x128xf32>
    %208 = tpu.matmul %207, %3, %cst_64 {dimension_numbers = #tpu.dot_dimension_numbers<[1], [0], [0], [1], [0, 0, 1, 1], [], []>} : vector<128x48xf32>, vector<48x128xf32>, vector<128x128xf32> -> vector<128x128xf32>
    %209 = vector.broadcast %6 : vector<1x128xf32> to vector<128x128xf32>
    %210 = arith.addf %208, %209 : vector<128x128xf32>
    %cst_65 = arith.constant 0.000000e+00 : f32
    %211 = vector.broadcast %cst_65 : f32 to vector<128x128xf32>
    %212 = arith.maximumf %210, %211 : vector<128x128xf32>
    %213 = tpu.concatenate %212, %197 in 1 : vector<128x128xf32>, vector<128x128xf32> -> vector<128x256xf32>
    %cst_66 = arith.constant dense<0.000000e+00> : vector<128x512xf32>
    %214 = tpu.matmul %213, %4, %cst_66 {dimension_numbers = #tpu.dot_dimension_numbers<[1], [0], [0], [1], [0, 0, 1, 1], [], []>} : vector<128x256xf32>, vector<256x512xf32>, vector<128x512xf32> -> vector<128x512xf32>
    %215 = vector.broadcast %7 : vector<1x512xf32> to vector<128x512xf32>
    %216 = arith.addf %214, %215 : vector<128x512xf32>
    %217 = vector.extract_strided_slice %216 {offsets = [0, 0], sizes = [128, 128], strides = [1, 1]} : vector<128x512xf32> to vector<128x128xf32>
    %218 = arith.negf %217 : vector<128x128xf32>
    %219 = math.exp %218 : vector<128x128xf32>
    %cst_67 = arith.constant 1.000000e+00 : f32
    %220 = vector.broadcast %cst_67 : f32 to vector<128x128xf32>
    %221 = arith.addf %220, %219 : vector<128x128xf32>
    %222 = arith.divf %220, %221 : vector<128x128xf32>
    %223 = vector.extract_strided_slice %216 {offsets = [0, 128], sizes = [128, 128], strides = [1, 1]} : vector<128x512xf32> to vector<128x128xf32>
    %224 = arith.negf %223 : vector<128x128xf32>
    %225 = math.exp %224 : vector<128x128xf32>
    %cst_68 = arith.constant 1.000000e+00 : f32
    %226 = vector.broadcast %cst_68 : f32 to vector<128x128xf32>
    %227 = arith.addf %226, %225 : vector<128x128xf32>
    %228 = arith.divf %226, %227 : vector<128x128xf32>
    %229 = vector.extract_strided_slice %216 {offsets = [0, 256], sizes = [128, 128], strides = [1, 1]} : vector<128x512xf32> to vector<128x128xf32>
    %230 = vector.extract_strided_slice %216 {offsets = [0, 384], sizes = [128, 128], strides = [1, 1]} : vector<128x512xf32> to vector<128x128xf32>
    %231 = arith.mulf %222, %230 : vector<128x128xf32>
    %232 = arith.addf %229, %231 : vector<128x128xf32>
    %233 = math.tanh %232 : vector<128x128xf32>
    %234 = arith.subf %197, %233 : vector<128x128xf32>
    %235 = arith.mulf %228, %234 : vector<128x128xf32>
    %236 = arith.addf %233, %235 : vector<128x128xf32>
    %cst_69 = arith.constant dense<0.000000e+00> : vector<128x128xf32>
    %237 = tpu.matmul %236, %5, %cst_69 {dimension_numbers = #tpu.dot_dimension_numbers<[1], [0], [0], [1], [0, 0, 1, 1], [], []>} : vector<128x128xf32>, vector<128x128xf32>, vector<128x128xf32> -> vector<128x128xf32>
    %238 = vector.broadcast %8 : vector<1x128xf32> to vector<128x128xf32>
    %239 = arith.addf %237, %238 : vector<128x128xf32>
    %240 = arith.index_cast %c5_i32 : i32 to index
    %c0_70 = arith.constant 0 : index
    %c0_71 = arith.constant 0 : index
    %241 = vector.load %arg8[%240, %c0_70, %c0_71] : memref<8x128x128xf32, #tpu.memory_space<vmem>>, vector<1x128x128xf32>
    %242 = vector.shape_cast %241 : vector<1x128x128xf32> to vector<128x128xf32>
    %243 = vector.shape_cast %239 : vector<128x128xf32> to vector<1x128x128xf32>
    tpu.vector_store %arg8[%240, %c0_70, %c0_71], %243 {strides = array<i32>} : memref<8x128x128xf32, #tpu.memory_space<vmem>>, vector<1x128x128xf32>,
    %c6_i32 = arith.constant 6 : i32
    %244 = arith.index_cast %c6_i32 : i32 to index
    %c0_72 = arith.constant 0 : index
    %c0_73 = arith.constant 0 : index
    %245 = vector.load %arg2[%244, %c0_72, %c0_73] : memref<8x128x48xf32, #tpu.memory_space<vmem>>, vector<1x128x48xf32>
    %246 = vector.shape_cast %245 : vector<1x128x48xf32> to vector<128x48xf32>
    %cst_74 = arith.constant dense<0.000000e+00> : vector<128x128xf32>
    %247 = tpu.matmul %246, %3, %cst_74 {dimension_numbers = #tpu.dot_dimension_numbers<[1], [0], [0], [1], [0, 0, 1, 1], [], []>} : vector<128x48xf32>, vector<48x128xf32>, vector<128x128xf32> -> vector<128x128xf32>
    %248 = vector.broadcast %6 : vector<1x128xf32> to vector<128x128xf32>
    %249 = arith.addf %247, %248 : vector<128x128xf32>
    %cst_75 = arith.constant 0.000000e+00 : f32
    %250 = vector.broadcast %cst_75 : f32 to vector<128x128xf32>
    %251 = arith.maximumf %249, %250 : vector<128x128xf32>
    %252 = tpu.concatenate %251, %236 in 1 : vector<128x128xf32>, vector<128x128xf32> -> vector<128x256xf32>
    %cst_76 = arith.constant dense<0.000000e+00> : vector<128x512xf32>
    %253 = tpu.matmul %252, %4, %cst_76 {dimension_numbers = #tpu.dot_dimension_numbers<[1], [0], [0], [1], [0, 0, 1, 1], [], []>} : vector<128x256xf32>, vector<256x512xf32>, vector<128x512xf32> -> vector<128x512xf32>
    %254 = vector.broadcast %7 : vector<1x512xf32> to vector<128x512xf32>
    %255 = arith.addf %253, %254 : vector<128x512xf32>
    %256 = vector.extract_strided_slice %255 {offsets = [0, 0], sizes = [128, 128], strides = [1, 1]} : vector<128x512xf32> to vector<128x128xf32>
    %257 = arith.negf %256 : vector<128x128xf32>
    %258 = math.exp %257 : vector<128x128xf32>
    %cst_77 = arith.constant 1.000000e+00 : f32
    %259 = vector.broadcast %cst_77 : f32 to vector<128x128xf32>
    %260 = arith.addf %259, %258 : vector<128x128xf32>
    %261 = arith.divf %259, %260 : vector<128x128xf32>
    %262 = vector.extract_strided_slice %255 {offsets = [0, 128], sizes = [128, 128], strides = [1, 1]} : vector<128x512xf32> to vector<128x128xf32>
    %263 = arith.negf %262 : vector<128x128xf32>
    %264 = math.exp %263 : vector<128x128xf32>
    %cst_78 = arith.constant 1.000000e+00 : f32
    %265 = vector.broadcast %cst_78 : f32 to vector<128x128xf32>
    %266 = arith.addf %265, %264 : vector<128x128xf32>
    %267 = arith.divf %265, %266 : vector<128x128xf32>
    %268 = vector.extract_strided_slice %255 {offsets = [0, 256], sizes = [128, 128], strides = [1, 1]} : vector<128x512xf32> to vector<128x128xf32>
    %269 = vector.extract_strided_slice %255 {offsets = [0, 384], sizes = [128, 128], strides = [1, 1]} : vector<128x512xf32> to vector<128x128xf32>
    %270 = arith.mulf %261, %269 : vector<128x128xf32>
    %271 = arith.addf %268, %270 : vector<128x128xf32>
    %272 = math.tanh %271 : vector<128x128xf32>
    %273 = arith.subf %236, %272 : vector<128x128xf32>
    %274 = arith.mulf %267, %273 : vector<128x128xf32>
    %275 = arith.addf %272, %274 : vector<128x128xf32>
    %cst_79 = arith.constant dense<0.000000e+00> : vector<128x128xf32>
    %276 = tpu.matmul %275, %5, %cst_79 {dimension_numbers = #tpu.dot_dimension_numbers<[1], [0], [0], [1], [0, 0, 1, 1], [], []>} : vector<128x128xf32>, vector<128x128xf32>, vector<128x128xf32> -> vector<128x128xf32>
    %277 = vector.broadcast %8 : vector<1x128xf32> to vector<128x128xf32>
    %278 = arith.addf %276, %277 : vector<128x128xf32>
    %279 = arith.index_cast %c6_i32 : i32 to index
    %c0_80 = arith.constant 0 : index
    %c0_81 = arith.constant 0 : index
    %280 = vector.load %arg8[%279, %c0_80, %c0_81] : memref<8x128x128xf32, #tpu.memory_space<vmem>>, vector<1x128x128xf32>
    %281 = vector.shape_cast %280 : vector<1x128x128xf32> to vector<128x128xf32>
    %282 = vector.shape_cast %278 : vector<128x128xf32> to vector<1x128x128xf32>
    tpu.vector_store %arg8[%279, %c0_80, %c0_81], %282 {strides = array<i32>} : memref<8x128x128xf32, #tpu.memory_space<vmem>>, vector<1x128x128xf32>,
    %c7_i32 = arith.constant 7 : i32
    %283 = arith.index_cast %c7_i32 : i32 to index
    %c0_82 = arith.constant 0 : index
    %c0_83 = arith.constant 0 : index
    %284 = vector.load %arg2[%283, %c0_82, %c0_83] : memref<8x128x48xf32, #tpu.memory_space<vmem>>, vector<1x128x48xf32>
    %285 = vector.shape_cast %284 : vector<1x128x48xf32> to vector<128x48xf32>
    %cst_84 = arith.constant dense<0.000000e+00> : vector<128x128xf32>
    %286 = tpu.matmul %285, %3, %cst_84 {dimension_numbers = #tpu.dot_dimension_numbers<[1], [0], [0], [1], [0, 0, 1, 1], [], []>} : vector<128x48xf32>, vector<48x128xf32>, vector<128x128xf32> -> vector<128x128xf32>
    %287 = vector.broadcast %6 : vector<1x128xf32> to vector<128x128xf32>
    %288 = arith.addf %286, %287 : vector<128x128xf32>
    %cst_85 = arith.constant 0.000000e+00 : f32
    %289 = vector.broadcast %cst_85 : f32 to vector<128x128xf32>
    %290 = arith.maximumf %288, %289 : vector<128x128xf32>
    %291 = tpu.concatenate %290, %275 in 1 : vector<128x128xf32>, vector<128x128xf32> -> vector<128x256xf32>
    %cst_86 = arith.constant dense<0.000000e+00> : vector<128x512xf32>
    %292 = tpu.matmul %291, %4, %cst_86 {dimension_numbers = #tpu.dot_dimension_numbers<[1], [0], [0], [1], [0, 0, 1, 1], [], []>} : vector<128x256xf32>, vector<256x512xf32>, vector<128x512xf32> -> vector<128x512xf32>
    %293 = vector.broadcast %7 : vector<1x512xf32> to vector<128x512xf32>
    %294 = arith.addf %292, %293 : vector<128x512xf32>
    %295 = vector.extract_strided_slice %294 {offsets = [0, 0], sizes = [128, 128], strides = [1, 1]} : vector<128x512xf32> to vector<128x128xf32>
    %296 = arith.negf %295 : vector<128x128xf32>
    %297 = math.exp %296 : vector<128x128xf32>
    %cst_87 = arith.constant 1.000000e+00 : f32
    %298 = vector.broadcast %cst_87 : f32 to vector<128x128xf32>
    %299 = arith.addf %298, %297 : vector<128x128xf32>
    %300 = arith.divf %298, %299 : vector<128x128xf32>
    %301 = vector.extract_strided_slice %294 {offsets = [0, 128], sizes = [128, 128], strides = [1, 1]} : vector<128x512xf32> to vector<128x128xf32>
    %302 = arith.negf %301 : vector<128x128xf32>
    %303 = math.exp %302 : vector<128x128xf32>
    %cst_88 = arith.constant 1.000000e+00 : f32
    %304 = vector.broadcast %cst_88 : f32 to vector<128x128xf32>
    %305 = arith.addf %304, %303 : vector<128x128xf32>
    %306 = arith.divf %304, %305 : vector<128x128xf32>
    %307 = vector.extract_strided_slice %294 {offsets = [0, 256], sizes = [128, 128], strides = [1, 1]} : vector<128x512xf32> to vector<128x128xf32>
    %308 = vector.extract_strided_slice %294 {offsets = [0, 384], sizes = [128, 128], strides = [1, 1]} : vector<128x512xf32> to vector<128x128xf32>
    %309 = arith.mulf %300, %308 : vector<128x128xf32>
    %310 = arith.addf %307, %309 : vector<128x128xf32>
    %311 = math.tanh %310 : vector<128x128xf32>
    %312 = arith.subf %275, %311 : vector<128x128xf32>
    %313 = arith.mulf %306, %312 : vector<128x128xf32>
    %314 = arith.addf %311, %313 : vector<128x128xf32>
    %cst_89 = arith.constant dense<0.000000e+00> : vector<128x128xf32>
    %315 = tpu.matmul %314, %5, %cst_89 {dimension_numbers = #tpu.dot_dimension_numbers<[1], [0], [0], [1], [0, 0, 1, 1], [], []>} : vector<128x128xf32>, vector<128x128xf32>, vector<128x128xf32> -> vector<128x128xf32>
    %316 = vector.broadcast %8 : vector<1x128xf32> to vector<128x128xf32>
    %317 = arith.addf %315, %316 : vector<128x128xf32>
    %318 = arith.index_cast %c7_i32 : i32 to index
    %c0_90 = arith.constant 0 : index
    %c0_91 = arith.constant 0 : index
    %319 = vector.load %arg8[%318, %c0_90, %c0_91] : memref<8x128x128xf32, #tpu.memory_space<vmem>>, vector<1x128x128xf32>
    %320 = vector.shape_cast %319 : vector<1x128x128xf32> to vector<128x128xf32>
    %321 = vector.shape_cast %317 : vector<128x128xf32> to vector<1x128x128xf32>
    tpu.vector_store %arg8[%318, %c0_90, %c0_91], %321 {strides = array<i32>} : memref<8x128x128xf32, #tpu.memory_space<vmem>>, vector<1x128x128xf32>,
    %c8_i32 = arith.constant 8 : i32
    %c0_92 = arith.constant 0 : index
    %c0_93 = arith.constant 0 : index
    %322 = vector.load %arg10[%c0_92, %c0_93] : memref<128x128xf32, #tpu.memory_space<vmem>>, vector<128x128xf32>
    tpu.vector_store %arg10[%c0_92, %c0_93], %314 {strides = array<i32>} : memref<128x128xf32, #tpu.memory_space<vmem>>, vector<128x128xf32>,
    %c0_94 = arith.constant 0 : index
    %c0_95 = arith.constant 0 : index
    %323 = vector.load %arg9[%c0_94, %c0_95] : memref<128x128xf32, #tpu.memory_space<vmem>>, vector<128x128xf32>
    tpu.vector_store %arg9[%c0_94, %c0_95], %314 {strides = array<i32>} : memref<128x128xf32, #tpu.memory_space<vmem>>, vector<128x128xf32>,
    return
  }
  func.func @transform_0(%arg0: i32, %arg1: i32) -> (i32, i32, i32) {
    %c0_i32 = arith.constant 0 : i32
    %c0_i32_0 = arith.constant 0 : i32
    return %arg1, %arg0, %c0_i32 : i32, i32, i32
  }
  func.func @transform_1(%arg0: i32, %arg1: i32) -> (i32, i32) {
    %c0_i32 = arith.constant 0 : i32
    %c0_i32_0 = arith.constant 0 : i32
    return %arg0, %c0_i32 : i32, i32
  }
  func.func @transform_2(%arg0: i32, %arg1: i32) -> (i32, i32) {
    %c0_i32 = arith.constant 0 : i32
    %c0_i32_0 = arith.constant 0 : i32
    %c0_i32_1 = arith.constant 0 : i32
    return %c0_i32, %c0_i32_0 : i32, i32
  }
  func.func @transform_3(%arg0: i32, %arg1: i32) -> (i32, i32) {
    %c0_i32 = arith.constant 0 : i32
    %c0_i32_0 = arith.constant 0 : i32
    %c0_i32_1 = arith.constant 0 : i32
    return %c0_i32, %c0_i32_0 : i32, i32
  }
  func.func @transform_4(%arg0: i32, %arg1: i32) -> (i32, i32) {
    %c0_i32 = arith.constant 0 : i32
    %c0_i32_0 = arith.constant 0 : i32
    %c0_i32_1 = arith.constant 0 : i32
    return %c0_i32, %c0_i32_0 : i32, i32
  }
  func.func @transform_5(%arg0: i32, %arg1: i32) -> (i32, i32) {
    %c0_i32 = arith.constant 0 : i32
    %c0_i32_0 = arith.constant 0 : i32
    %c0_i32_1 = arith.constant 0 : i32
    return %c0_i32, %c0_i32_0 : i32, i32
  }
  func.func @transform_6(%arg0: i32, %arg1: i32) -> (i32, i32, i32) {
    %c0_i32 = arith.constant 0 : i32
    %c0_i32_0 = arith.constant 0 : i32
    return %arg1, %arg0, %c0_i32 : i32, i32, i32
  }
  func.func @transform_7(%arg0: i32, %arg1: i32) -> (i32, i32) {
    %c0_i32 = arith.constant 0 : i32
    %c0_i32_0 = arith.constant 0 : i32
    return %arg0, %c0_i32 : i32, i32
  }
}

</mosaic_0001>

<bundles_post_ra>
// kernel: tpu_custom_call.1
= control target key start
LH: loop header
LB: loop body
LE: loop exit
PB: predicated region body
PF: predicated region fallthrough
CT: control target
= control target key end

     0   :  { %13 = vsyncpa [#allocation5], 0  ;;  %s19854_s0 = inlined_call_operand.vmem [shape: f32[8,256,48], index: 0, kind: input, shape index: {}]   ;;  %s19855_s1 = inlined_call_operand.vmem [shape: f32[256,128], index: 1, kind: input, shape index: {}]   ;;  %s19856_s2 = inlined_call_operand.vmem [shape: f32[48,128], index: 2, kind: input, shape index: {}]   ;;  %s19857_s3 = inlined_call_operand.vmem [shape: f32[256,512], index: 3, kind: input, shape index: {}]   ;;  %s19858_s4 = inlined_call_operand.vmem [shape: f32[128,128], index: 4, kind: input, shape index: {}]   ;;  %s19859_s5 = inlined_call_operand.vmem [shape: f32[3,512], index: 5, kind: input, shape index: {}]   ;;  %s19860_s6 = inlined_call_operand.hbm [shape: f32[8,256,128], index: 6, kind: output, shape index: {0}]   ;;  %s19861_s7 = inlined_call_operand.hbm [shape: f32[256,128], index: 7, kind: output, shape index: {1}]  }
   0x1   :  { %15 = vsyncpa [#allocation5 + $0x1], 0 }
   0x2   :  { %16 = vsyncpa [#allocation7], 0 }
   0x3   :  { %18 = vsyncpa [#allocation7 + $0x1], 0  ;;  %s14027_s24 = smov 0   ;;  %s14029_s25 = smov 0  }
   0x4   :  { %s14031_s26 = smov 0   ;;  %s14033_s27 = smov 0  }
   0x5   :  { %s14035_s28 = smov 0   ;;  %s14037_s29 = smov 0  }
   0x6 LB: > { %s9320_s30 = sadd.s32 4294967295, %s13975_s29   ;;  %s9321_s8 = sadd.s32 4294967294, %s13975_s29   ;;  %s13975_s29 = sphi %s14037_s29, %s24_s29   ;;  %s13971_s28 = sphi %s14035_s28, %s21248_s28   ;;  %s13967_s27 = sphi %s14033_s27, %s21247_s27   ;;  %s13963_s26 = sphi %s14031_s26, %s21246_s26   ;;  %s13959_s25 = sphi %s14029_s25, %s21245_s25   ;;  %s13955_s24 = sphi %s14027_s24, %s21244_s24  }
   0x7   : > { %s36_s9 = sadd.s32 1, %s13971_s28  ;;  %s45_s10 = sadd.s32 1, %s13963_s26 }
   0x8   : > { %p38_p0 = scmp.ge.s32.totalorder %s36_s9, 2  ;;  %p52_p1 = scmp.ne.s32.totalorder %s13963_s26, %s13959_s25 }
   0x9   : > { %p53_p2 = scmp.eq.s32.totalorder %s13975_s29, 0  ;;  %p194_p3 = scmp.eq.s32.totalorder %s9320_s30, 1 }
   0xa   : > { %s21250_s9 = smov (%p38_p0, %s36_s9), 0  ;;  %p199_p6 = scmp.ne.s32.totalorder %s13959_s25, %s13955_s24 }
   0xb   : > { %p54_p4 = por %p53_p2, %p52_p1  ;;  %p14066_p5 = por %p194_p3, %p52_p1 }
   0xc   : > { %s41_s12 = ssub.s32 %s13971_s28, %s21250_s9  ;;  %p200_p8 = scmp.eq.s32.totalorder %s9321_s8, 1 }
   0xd   : > { %p43_p7 = scmp.eq.s32.totalorder %s41_s12, 0  ;;  %p9323_p10 = scmp.ge.s32.totalorder %s13975_s29, 2 }
   0xe   : > { %p14077_p9 = por %p200_p8, %p199_p6 }
   0xf   : > { %s14075_s13 = scalar_select %p43_p7, %s13963_s26, %s45_s10  }
  0x10   : > { %254 = sbr.rel (%p9323_p10) target bundleno = 91 (0x5b), region = 32 }
  0x17   : > { %257 = sbr.rel (!%p54_p4) target bundleno = 91 (0x5b), region = 36  ;;  %s259_s15 = sand.u32 (%p54_p4), 1, %s13963_s26  }
  0x18   : > { %s9952_s16 = sshll.u32 (%p54_p4), %s13971_s28, 7  ;;  %s9324_s17 = sshll.u32 (%p54_p4), %s259_s15, 10 }
  0x19   : > { %s14089_s20 = scalar_lea.vmem (%p54_p4), %s19854_s0, %s9952_s16  ;;  %s14094_s21 = scalar_lea.vmem (%p54_p4), [#allocation3], %s9324_s17 }
  0x1a   : > { %v549_v0 = vld [vmem:[%s14089_s20] sm:$0xff] (%p54_p4)  ;;  %v551_v1 = vld [vmem:[%s14089_s20 + $0x8] sm:$0xff] (%p54_p4)  ;;  %v553_v2 = vld [vmem:[%s14089_s20 + $0x10] sm:$0xff] (%p54_p4) }
  0x1b   : > { %550 = vst [vmem:[%s14094_s21] sm:$0xff] (%p54_p4), %v549_v0  ;;  %552 = vst [vmem:[%s14094_s21 + $0x8] sm:$0xff] (%p54_p4), %v551_v1  ;;  %v555_v3 = vld [vmem:[%s14089_s20 + $0x18] sm:$0xff] (%p54_p4)  ;;  %v557_v4 = vld [vmem:[%s14089_s20 + $0x20] sm:$0xff] (%p54_p4) }
  0x1c   : > { %554 = vst [vmem:[%s14094_s21 + $0x10] sm:$0xff] (%p54_p4), %v553_v2  ;;  %v559_v5 = vld [vmem:[%s14089_s20 + $0x28] sm:$0xff] (%p54_p4)  ;;  %556 = vst [vmem:[%s14094_s21 + $0x18] sm:$0xff] (%p54_p4), %v555_v3  ;;  %v561_v6 = vld [vmem:[%s14089_s20 + $0x30] sm:$0xff] (%p54_p4) }
  0x1d   : > { %558 = vst [vmem:[%s14094_s21 + $0x20] sm:$0xff] (%p54_p4), %v557_v4  ;;  %560 = vst [vmem:[%s14094_s21 + $0x28] sm:$0xff] (%p54_p4), %v559_v5  ;;  %v563_v7 = vld [vmem:[%s14089_s20 + $0x38] sm:$0xff] (%p54_p4)  ;;  %v565_v8 = vld [vmem:[%s14089_s20 + $0x40] sm:$0xff] (%p54_p4) }
  0x1e   : > { %562 = vst [vmem:[%s14094_s21 + $0x30] sm:$0xff] %v561_v6  ;;  %564 = vst [vmem:[%s14094_s21 + $0x38] sm:$0xff] %v563_v7  ;;  %v567_v9 = vld [vmem:[%s14089_s20 + $0x48] sm:$0xff]  ;;  %v569_v10 = vld [vmem:[%s14089_s20 + $0x50] sm:$0xff] }
  0x1f   : > { %566 = vst [vmem:[%s14094_s21 + $0x40] sm:$0xff] %v565_v8  ;;  %v571_v11 = vld [vmem:[%s14089_s20 + $0x58] sm:$0xff]  ;;  %568 = vst [vmem:[%s14094_s21 + $0x48] sm:$0xff] %v567_v9  ;;  %v573_v12 = vld [vmem:[%s14089_s20 + $0x60] sm:$0xff] }
  0x20   : > { %570 = vst [vmem:[%s14094_s21 + $0x50] sm:$0xff] %v569_v10  ;;  %572 = vst [vmem:[%s14094_s21 + $0x58] sm:$0xff] %v571_v11  ;;  %v575_v13 = vld [vmem:[%s14089_s20 + $0x68] sm:$0xff]  ;;  %v577_v14 = vld [vmem:[%s14089_s20 + $0x70] sm:$0xff] }
  0x21   : > { %574 = vst [vmem:[%s14094_s21 + $0x60] sm:$0xff] %v573_v12  ;;  %576 = vst [vmem:[%s14094_s21 + $0x68] sm:$0xff] %v575_v13  ;;  %v579_v15 = vld [vmem:[%s14089_s20 + $0x78] sm:$0xff]  ;;  %v581_v16 = vld [vmem:[%s14089_s20 + $0x100] sm:$0xff] }
  0x22   : > { %578 = vst [vmem:[%s14094_s21 + $0x70] sm:$0xff] %v577_v14  ;;  %v583_v17 = vld [vmem:[%s14089_s20 + $0x108] sm:$0xff]  ;;  %580 = vst [vmem:[%s14094_s21 + $0x78] sm:$0xff] %v579_v15  ;;  %v585_v18 = vld [vmem:[%s14089_s20 + $0x110] sm:$0xff] }
  0x23   : > { %582 = vst [vmem:[%s14094_s21 + $0x80] sm:$0xff] %v581_v16  ;;  %584 = vst [vmem:[%s14094_s21 + $0x88] sm:$0xff] %v583_v17  ;;  %v587_v19 = vld [vmem:[%s14089_s20 + $0x118] sm:$0xff]  ;;  %v589_v20 = vld [vmem:[%s14089_s20 + $0x120] sm:$0xff] }
  0x24   : > { %586 = vst [vmem:[%s14094_s21 + $0x90] sm:$0xff] %v585_v18  ;;  %588 = vst [vmem:[%s14094_s21 + $0x98] sm:$0xff] %v587_v19  ;;  %v591_v21 = vld [vmem:[%s14089_s20 + $0x128] sm:$0xff]  ;;  %v593_v22 = vld [vmem:[%s14089_s20 + $0x130] sm:$0xff] }
  0x25   : > { %590 = vst [vmem:[%s14094_s21 + $0xa0] sm:$0xff] %v589_v20  ;;  %v595_v23 = vld [vmem:[%s14089_s20 + $0x138] sm:$0xff]  ;;  %592 = vst [vmem:[%s14094_s21 + $0xa8] sm:$0xff] %v591_v21  ;;  %v597_v24 = vld [vmem:[%s14089_s20 + $0x140] sm:$0xff] }
  0x26   : > { %594 = vst [vmem:[%s14094_s21 + $0xb0] sm:$0xff] %v593_v22  ;;  %596 = vst [vmem:[%s14094_s21 + $0xb8] sm:$0xff] %v595_v23  ;;  %v599_v25 = vld [vmem:[%s14089_s20 + $0x148] sm:$0xff]  ;;  %v601_v26 = vld [vmem:[%s14089_s20 + $0x150] sm:$0xff] }
  0x27   : > { %598 = vst [vmem:[%s14094_s21 + $0xc0] sm:$0xff] %v597_v24  ;;  %600 = vst [vmem:[%s14094_s21 + $0xc8] sm:$0xff] %v599_v25  ;;  %v603_v27 = vld [vmem:[%s14089_s20 + $0x158] sm:$0xff]  ;;  %v605_v28 = vld [vmem:[%s14089_s20 + $0x160] sm:$0xff] }
  0x28   : > { %602 = vst [vmem:[%s14094_s21 + $0xd0] sm:$0xff] %v601_v26  ;;  %v607_v29 = vld [vmem:[%s14089_s20 + $0x168] sm:$0xff]  ;;  %604 = vst [vmem:[%s14094_s21 + $0xd8] sm:$0xff] %v603_v27  ;;  %v609_v30 = vld [vmem:[%s14089_s20 + $0x170] sm:$0xff] }
  0x29   : > { %606 = vst [vmem:[%s14094_s21 + $0xe0] sm:$0xff] %v605_v28  ;;  %608 = vst [vmem:[%s14094_s21 + $0xe8] sm:$0xff] %v607_v29  ;;  %v611_v31 = vld [vmem:[%s14089_s20 + $0x178] sm:$0xff]  ;;  %v613_v32 = vld [vmem:[%s14089_s20 + $0x200] sm:$0xff] }
  0x2a   : > { %610 = vst [vmem:[%s14094_s21 + $0xf0] sm:$0xff] %v609_v30  ;;  %612 = vst [vmem:[%s14094_s21 + $0xf8] sm:$0xff] %v611_v31  ;;  %v615_v33 = vld [vmem:[%s14089_s20 + $0x208] sm:$0xff]  ;;  %v617_v34 = vld [vmem:[%s14089_s20 + $0x210] sm:$0xff] }
  0x2b   : > { %614 = vst [vmem:[%s14094_s21 + $0x100] sm:$0xff] %v613_v32  ;;  %v619_v35 = vld [vmem:[%s14089_s20 + $0x218] sm:$0xff]  ;;  %616 = vst [vmem:[%s14094_s21 + $0x108] sm:$0xff] %v615_v33  ;;  %v621_v36 = vld [vmem:[%s14089_s20 + $0x220] sm:$0xff] }
  0x2c   : > { %618 = vst [vmem:[%s14094_s21 + $0x110] sm:$0xff] %v617_v34  ;;  %620 = vst [vmem:[%s14094_s21 + $0x118] sm:$0xff] %v619_v35  ;;  %v623_v37 = vld [vmem:[%s14089_s20 + $0x228] sm:$0xff]  ;;  %v625_v38 = vld [vmem:[%s14089_s20 + $0x230] sm:$0xff] }
  0x2d   : > { %622 = vst [vmem:[%s14094_s21 + $0x120] sm:$0xff] %v621_v36  ;;  %624 = vst [vmem:[%s14094_s21 + $0x128] sm:$0xff] %v623_v37  ;;  %v627_v39 = vld [vmem:[%s14089_s20 + $0x238] sm:$0xff]  ;;  %v629_v40 = vld [vmem:[%s14089_s20 + $0x240] sm:$0xff] }
  0x2e   : > { %626 = vst [vmem:[%s14094_s21 + $0x130] sm:$0xff] %v625_v38  ;;  %v631_v41 = vld [vmem:[%s14089_s20 + $0x248] sm:$0xff]  ;;  %628 = vst [vmem:[%s14094_s21 + $0x138] sm:$0xff] %v627_v39  ;;  %v633_v42 = vld [vmem:[%s14089_s20 + $0x250] sm:$0xff] }
  0x2f   : > { %630 = vst [vmem:[%s14094_s21 + $0x140] sm:$0xff] %v629_v40  ;;  %632 = vst [vmem:[%s14094_s21 + $0x148] sm:$0xff] %v631_v41  ;;  %v635_v43 = vld [vmem:[%s14089_s20 + $0x258] sm:$0xff]  ;;  %v637_v44 = vld [vmem:[%s14089_s20 + $0x260] sm:$0xff] }
  0x30   : > { %634 = vst [vmem:[%s14094_s21 + $0x150] sm:$0xff] %v633_v42  ;;  %636 = vst [vmem:[%s14094_s21 + $0x158] sm:$0xff] %v635_v43  ;;  %v639_v45 = vld [vmem:[%s14089_s20 + $0x268] sm:$0xff]  ;;  %v641_v46 = vld [vmem:[%s14089_s20 + $0x270] sm:$0xff] }
  0x31   : > { %638 = vst [vmem:[%s14094_s21 + $0x160] sm:$0xff] %v637_v44  ;;  %v643_v47 = vld [vmem:[%s14089_s20 + $0x278] sm:$0xff]  ;;  %640 = vst [vmem:[%s14094_s21 + $0x168] sm:$0xff] %v639_v45  ;;  %v645_v48 = vld [vmem:[%s14089_s20 + $0x300] sm:$0xff] }
  0x32   : > { %642 = vst [vmem:[%s14094_s21 + $0x170] sm:$0xff] %v641_v46  ;;  %644 = vst [vmem:[%s14094_s21 + $0x178] sm:$0xff] %v643_v47  ;;  %v647_v49 = vld [vmem:[%s14089_s20 + $0x308] sm:$0xff]  ;;  %v649_v50 = vld [vmem:[%s14089_s20 + $0x310] sm:$0xff] }
  0x33   : > { %646 = vst [vmem:[%s14094_s21 + $0x180] sm:$0xff] %v645_v48  ;;  %648 = vst [vmem:[%s14094_s21 + $0x188] sm:$0xff] %v647_v49  ;;  %v651_v51 = vld [vmem:[%s14089_s20 + $0x318] sm:$0xff]  ;;  %v653_v52 = vld [vmem:[%s14089_s20 + $0x320] sm:$0xff] }
  0x34   : > { %650 = vst [vmem:[%s14094_s21 + $0x190] sm:$0xff] %v649_v50  ;;  %v655_v53 = vld [vmem:[%s14089_s20 + $0x328] sm:$0xff]  ;;  %652 = vst [vmem:[%s14094_s21 + $0x198] sm:$0xff] %v651_v51  ;;  %v657_v54 = vld [vmem:[%s14089_s20 + $0x330] sm:$0xff] }
  0x35   : > { %654 = vst [vmem:[%s14094_s21 + $0x1a0] sm:$0xff] %v653_v52  ;;  %656 = vst [vmem:[%s14094_s21 + $0x1a8] sm:$0xff] %v655_v53  ;;  %v659_v55 = vld [vmem:[%s14089_s20 + $0x338] sm:$0xff]  ;;  %v661_v56 = vld [vmem:[%s14089_s20 + $0x340] sm:$0xff] }
  0x36   : > { %658 = vst [vmem:[%s14094_s21 + $0x1b0] sm:$0xff] %v657_v54  ;;  %660 = vst [vmem:[%s14094_s21 + $0x1b8] sm:$0xff] %v659_v55  ;;  %v663_v57 = vld [vmem:[%s14089_s20 + $0x348] sm:$0xff]  ;;  %v665_v58 = vld [vmem:[%s14089_s20 + $0x350] sm:$0xff] }
  0x37   : > { %662 = vst [vmem:[%s14094_s21 + $0x1c0] sm:$0xff] %v661_v56  ;;  %v667_v59 = vld [vmem:[%s14089_s20 + $0x358] sm:$0xff]  ;;  %664 = vst [vmem:[%s14094_s21 + $0x1c8] sm:$0xff] %v663_v57  ;;  %v669_v60 = vld [vmem:[%s14089_s20 + $0x360] sm:$0xff] }
  0x38   : > { %666 = vst [vmem:[%s14094_s21 + $0x1d0] sm:$0xff] %v665_v58  ;;  %668 = vst [vmem:[%s14094_s21 + $0x1d8] sm:$0xff] %v667_v59  ;;  %v671_v61 = vld [vmem:[%s14089_s20 + $0x368] sm:$0xff]  ;;  %v673_v62 = vld [vmem:[%s14089_s20 + $0x370] sm:$0xff] }
  0x39   : > { %670 = vst [vmem:[%s14094_s21 + $0x1e0] sm:$0xff] %v669_v60  ;;  %672 = vst [vmem:[%s14094_s21 + $0x1e8] sm:$0xff] %v671_v61  ;;  %v675_v63 = vld [vmem:[%s14089_s20 + $0x378] sm:$0xff]  ;;  %v677_v0 = vld [vmem:[%s14089_s20 + $0x400] sm:$0xff] }
  0x3a   : > { %674 = vst [vmem:[%s14094_s21 + $0x1f0] sm:$0xff] %v673_v62  ;;  %v679_v1 = vld [vmem:[%s14089_s20 + $0x408] sm:$0xff]  ;;  %676 = vst [vmem:[%s14094_s21 + $0x1f8] sm:$0xff] %v675_v63  ;;  %v681_v2 = vld [vmem:[%s14089_s20 + $0x410] sm:$0xff] }
  0x3b   : > { %678 = vst [vmem:[%s14094_s21 + $0x200] sm:$0xff] %v677_v0  ;;  %680 = vst [vmem:[%s14094_s21 + $0x208] sm:$0xff] %v679_v1  ;;  %v683_v3 = vld [vmem:[%s14089_s20 + $0x418] sm:$0xff]  ;;  %v685_v4 = vld [vmem:[%s14089_s20 + $0x420] sm:$0xff] }
  0x3c   : > { %682 = vst [vmem:[%s14094_s21 + $0x210] sm:$0xff] %v681_v2  ;;  %684 = vst [vmem:[%s14094_s21 + $0x218] sm:$0xff] %v683_v3  ;;  %v687_v5 = vld [vmem:[%s14089_s20 + $0x428] sm:$0xff]  ;;  %v689_v6 = vld [vmem:[%s14089_s20 + $0x430] sm:$0xff] }
  0x3d   : > { %686 = vst [vmem:[%s14094_s21 + $0x220] sm:$0xff] %v685_v4  ;;  %v691_v7 = vld [vmem:[%s14089_s20 + $0x438] sm:$0xff]  ;;  %688 = vst [vmem:[%s14094_s21 + $0x228] sm:$0xff] %v687_v5  ;;  %v693_v8 = vld [vmem:[%s14089_s20 + $0x440] sm:$0xff] }
  0x3e   : > { %690 = vst [vmem:[%s14094_s21 + $0x230] sm:$0xff] %v689_v6  ;;  %692 = vst [vmem:[%s14094_s21 + $0x238] sm:$0xff] %v691_v7  ;;  %v695_v9 = vld [vmem:[%s14089_s20 + $0x448] sm:$0xff]  ;;  %v697_v10 = vld [vmem:[%s14089_s20 + $0x450] sm:$0xff] }
  0x3f   : > { %694 = vst [vmem:[%s14094_s21 + $0x240] sm:$0xff] %v693_v8  ;;  %696 = vst [vmem:[%s14094_s21 + $0x248] sm:$0xff] %v695_v9  ;;  %v699_v11 = vld [vmem:[%s14089_s20 + $0x458] sm:$0xff]  ;;  %v701_v12 = vld [vmem:[%s14089_s20 + $0x460] sm:$0xff] }
  0x40   : > { %698 = vst [vmem:[%s14094_s21 + $0x250] sm:$0xff] %v697_v10  ;;  %v703_v13 = vld [vmem:[%s14089_s20 + $0x468] sm:$0xff]  ;;  %700 = vst [vmem:[%s14094_s21 + $0x258] sm:$0xff] %v699_v11  ;;  %v705_v14 = vld [vmem:[%s14089_s20 + $0x470] sm:$0xff] }
  0x41   : > { %702 = vst [vmem:[%s14094_s21 + $0x260] sm:$0xff] %v701_v12  ;;  %704 = vst [vmem:[%s14094_s21 + $0x268] sm:$0xff] %v703_v13  ;;  %v707_v15 = vld [vmem:[%s14089_s20 + $0x478] sm:$0xff]  ;;  %v709_v16 = vld [vmem:[%s14089_s20 + $0x500] sm:$0xff] }
  0x42   : > { %706 = vst [vmem:[%s14094_s21 + $0x270] sm:$0xff] %v705_v14  ;;  %708 = vst [vmem:[%s14094_s21 + $0x278] sm:$0xff] %v707_v15  ;;  %v711_v17 = vld [vmem:[%s14089_s20 + $0x508] sm:$0xff]  ;;  %v713_v18 = vld [vmem:[%s14089_s20 + $0x510] sm:$0xff] }
  0x43   : > { %710 = vst [vmem:[%s14094_s21 + $0x280] sm:$0xff] %v709_v16  ;;  %v715_v19 = vld [vmem:[%s14089_s20 + $0x518] sm:$0xff]  ;;  %712 = vst [vmem:[%s14094_s21 + $0x288] sm:$0xff] %v711_v17  ;;  %v717_v20 = vld [vmem:[%s14089_s20 + $0x520] sm:$0xff] }
  0x44   : > { %714 = vst [vmem:[%s14094_s21 + $0x290] sm:$0xff] %v713_v18  ;;  %716 = vst [vmem:[%s14094_s21 + $0x298] sm:$0xff] %v715_v19  ;;  %v719_v21 = vld [vmem:[%s14089_s20 + $0x528] sm:$0xff]  ;;  %v721_v22 = vld [vmem:[%s14089_s20 + $0x530] sm:$0xff] }
  0x45   : > { %718 = vst [vmem:[%s14094_s21 + $0x2a0] sm:$0xff] %v717_v20  ;;  %720 = vst [vmem:[%s14094_s21 + $0x2a8] sm:$0xff] %v719_v21  ;;  %v723_v23 = vld [vmem:[%s14089_s20 + $0x538] sm:$0xff]  ;;  %v725_v24 = vld [vmem:[%s14089_s20 + $0x540] sm:$0xff] }
  0x46   : > { %722 = vst [vmem:[%s14094_s21 + $0x2b0] sm:$0xff] %v721_v22  ;;  %v727_v25 = vld [vmem:[%s14089_s20 + $0x548] sm:$0xff]  ;;  %724 = vst [vmem:[%s14094_s21 + $0x2b8] sm:$0xff] %v723_v23  ;;  %v729_v26 = vld [vmem:[%s14089_s20 + $0x550] sm:$0xff] }
  0x47   : > { %726 = vst [vmem:[%s14094_s21 + $0x2c0] sm:$0xff] %v725_v24  ;;  %728 = vst [vmem:[%s14094_s21 + $0x2c8] sm:$0xff] %v727_v25  ;;  %v731_v27 = vld [vmem:[%s14089_s20 + $0x558] sm:$0xff]  ;;  %v733_v28 = vld [vmem:[%s14089_s20 + $0x560] sm:$0xff] }
  0x48   : > { %730 = vst [vmem:[%s14094_s21 + $0x2d0] sm:$0xff] %v729_v26  ;;  %732 = vst [vmem:[%s14094_s21 + $0x2d8] sm:$0xff] %v731_v27  ;;  %v735_v29 = vld [vmem:[%s14089_s20 + $0x568] sm:$0xff]  ;;  %v737_v30 = vld [vmem:[%s14089_s20 + $0x570] sm:$0xff] }
  0x49   : > { %734 = vst [vmem:[%s14094_s21 + $0x2e0] sm:$0xff] %v733_v28  ;;  %v739_v31 = vld [vmem:[%s14089_s20 + $0x578] sm:$0xff]  ;;  %736 = vst [vmem:[%s14094_s21 + $0x2e8] sm:$0xff] %v735_v29  ;;  %v741_v32 = vld [vmem:[%s14089_s20 + $0x600] sm:$0xff] }
  0x4a   : > { %738 = vst [vmem:[%s14094_s21 + $0x2f0] sm:$0xff] %v737_v30  ;;  %740 = vst [vmem:[%s14094_s21 + $0x2f8] sm:$0xff] %v739_v31  ;;  %v743_v33 = vld [vmem:[%s14089_s20 + $0x608] sm:$0xff]  ;;  %v745_v34 = vld [vmem:[%s14089_s20 + $0x610] sm:$0xff] }
  0x4b   : > { %742 = vst [vmem:[%s14094_s21 + $0x300] sm:$0xff] %v741_v32  ;;  %744 = vst [vmem:[%s14094_s21 + $0x308] sm:$0xff] %v743_v33  ;;  %v747_v35 = vld [vmem:[%s14089_s20 + $0x618] sm:$0xff]  ;;  %v749_v36 = vld [vmem:[%s14089_s20 + $0x620] sm:$0xff] }
  0x4c   : > { %746 = vst [vmem:[%s14094_s21 + $0x310] sm:$0xff] %v745_v34  ;;  %v751_v37 = vld [vmem:[%s14089_s20 + $0x628] sm:$0xff]  ;;  %748 = vst [vmem:[%s14094_s21 + $0x318] sm:$0xff] %v747_v35  ;;  %v753_v38 = vld [vmem:[%s14089_s20 + $0x630] sm:$0xff] }
  0x4d   : > { %750 = vst [vmem:[%s14094_s21 + $0x320] sm:$0xff] %v749_v36  ;;  %752 = vst [vmem:[%s14094_s21 + $0x328] sm:$0xff] %v751_v37  ;;  %v755_v39 = vld [vmem:[%s14089_s20 + $0x638] sm:$0xff]  ;;  %v757_v40 = vld [vmem:[%s14089_s20 + $0x640] sm:$0xff] }
  0x4e   : > { %754 = vst [vmem:[%s14094_s21 + $0x330] sm:$0xff] %v753_v38  ;;  %756 = vst [vmem:[%s14094_s21 + $0x338] sm:$0xff] %v755_v39  ;;  %v759_v41 = vld [vmem:[%s14089_s20 + $0x648] sm:$0xff]  ;;  %v761_v42 = vld [vmem:[%s14089_s20 + $0x650] sm:$0xff] }
  0x4f   : > { %758 = vst [vmem:[%s14094_s21 + $0x340] sm:$0xff] %v757_v40  ;;  %v763_v43 = vld [vmem:[%s14089_s20 + $0x658] sm:$0xff]  ;;  %760 = vst [vmem:[%s14094_s21 + $0x348] sm:$0xff] %v759_v41  ;;  %v765_v44 = vld [vmem:[%s14089_s20 + $0x660] sm:$0xff] }
  0x50   : > { %762 = vst [vmem:[%s14094_s21 + $0x350] sm:$0xff] %v761_v42  ;;  %764 = vst [vmem:[%s14094_s21 + $0x358] sm:$0xff] %v763_v43  ;;  %v767_v45 = vld [vmem:[%s14089_s20 + $0x668] sm:$0xff]  ;;  %v769_v46 = vld [vmem:[%s14089_s20 + $0x670] sm:$0xff] }
  0x51   : > { %766 = vst [vmem:[%s14094_s21 + $0x360] sm:$0xff] %v765_v44  ;;  %768 = vst [vmem:[%s14094_s21 + $0x368] sm:$0xff] %v767_v45  ;;  %v771_v47 = vld [vmem:[%s14089_s20 + $0x678] sm:$0xff]  ;;  %v773_v48 = vld [vmem:[%s14089_s20 + $0x700] sm:$0xff] }
  0x52   : > { %770 = vst [vmem:[%s14094_s21 + $0x370] sm:$0xff] %v769_v46  ;;  %v775_v49 = vld [vmem:[%s14089_s20 + $0x708] sm:$0xff]  ;;  %772 = vst [vmem:[%s14094_s21 + $0x378] sm:$0xff] %v771_v47  ;;  %v777_v50 = vld [vmem:[%s14089_s20 + $0x710] sm:$0xff] }
  0x53   : > { %774 = vst [vmem:[%s14094_s21 + $0x380] sm:$0xff] %v773_v48  ;;  %776 = vst [vmem:[%s14094_s21 + $0x388] sm:$0xff] %v775_v49  ;;  %v779_v51 = vld [vmem:[%s14089_s20 + $0x718] sm:$0xff]  ;;  %v781_v52 = vld [vmem:[%s14089_s20 + $0x720] sm:$0xff] }
  0x54   : > { %778 = vst [vmem:[%s14094_s21 + $0x390] sm:$0xff] %v777_v50  ;;  %780 = vst [vmem:[%s14094_s21 + $0x398] sm:$0xff] %v779_v51  ;;  %v783_v53 = vld [vmem:[%s14089_s20 + $0x728] sm:$0xff]  ;;  %v785_v54 = vld [vmem:[%s14089_s20 + $0x730] sm:$0xff] }
  0x55   : > { %782 = vst [vmem:[%s14094_s21 + $0x3a0] sm:$0xff] %v781_v52  ;;  %v787_v55 = vld [vmem:[%s14089_s20 + $0x738] sm:$0xff]  ;;  %784 = vst [vmem:[%s14094_s21 + $0x3a8] sm:$0xff] %v783_v53  ;;  %v789_v56 = vld [vmem:[%s14089_s20 + $0x740] sm:$0xff] }
  0x56   : > { %786 = vst [vmem:[%s14094_s21 + $0x3b0] sm:$0xff] %v785_v54  ;;  %788 = vst [vmem:[%s14094_s21 + $0x3b8] sm:$0xff] %v787_v55  ;;  %v791_v57 = vld [vmem:[%s14089_s20 + $0x748] sm:$0xff]  ;;  %v793_v58 = vld [vmem:[%s14089_s20 + $0x750] sm:$0xff] }
  0x57   : > { %790 = vst [vmem:[%s14094_s21 + $0x3c0] sm:$0xff] %v789_v56  ;;  %792 = vst [vmem:[%s14094_s21 + $0x3c8] sm:$0xff] %v791_v57  ;;  %v795_v59 = vld [vmem:[%s14089_s20 + $0x758] sm:$0xff]  ;;  %v797_v60 = vld [vmem:[%s14089_s20 + $0x760] sm:$0xff] }
  0x58   : > { %794 = vst [vmem:[%s14094_s21 + $0x3d0] sm:$0xff] %v793_v58  ;;  %v799_v61 = vld [vmem:[%s14089_s20 + $0x768] sm:$0xff]  ;;  %796 = vst [vmem:[%s14094_s21 + $0x3d8] sm:$0xff] %v795_v59  ;;  %v801_v62 = vld [vmem:[%s14089_s20 + $0x770] sm:$0xff] }
  0x59   : > { %798 = vst [vmem:[%s14094_s21 + $0x3e0] sm:$0xff] %v797_v60  ;;  %800 = vst [vmem:[%s14094_s21 + $0x3e8] sm:$0xff] %v799_v61  ;;  %v803_v63 = vld [vmem:[%s14089_s20 + $0x778] sm:$0xff] }
  0x5a   : > { %802 = vst [vmem:[%s14094_s21 + $0x3f0] sm:$0xff] %v801_v62  ;;  %804 = vst [vmem:[%s14094_s21 + $0x3f8] sm:$0xff] %v803_v63 }
  0x5b PF: > { %p9327_p11 = scmp.ge.s32.totalorder %s13975_s29, 1  ;;  %p818_p12 = scmp.lt.s32.totalorder %s13975_s29, 3 }
  0x5d   : > { %p819_p13 = pnand %p9327_p11, %p818_p12 }
  0x5f   : > { %822 = sbr.rel (%p819_p13) target bundleno = 3317 (0xcf5), region = 78 }
  0x66   : > { %v913_v0 = vld [vmem:[%s19856_s2] sm:$0xff]  ;;  %v914_v1 = vld [vmem:[%s19856_s2 + $0x8] sm:$0xff]  ;;  %v915_v2 = vld [vmem:[%s19856_s2 + $0x10] sm:$0xff]  ;;  %s14361_s15 = sand.u32 1, %s13959_s25   ;;  %vm1103_vm0 = vcmask 392192   ;;  %s9331_s23 = sshll.u32 %s13967_s27, 4 }
  0x67   : > { %v14363_v3 = vpack.c.bf16 %v914_v1, %v913_v0  ;;  %v916_v4 = vld [vmem:[%s19856_s2 + $0x18] sm:$0xff]  ;;  %v917_v5 = vld [vmem:[%s19856_s2 + $0x20] sm:$0xff]  ;;  %s19874_s20 = sshll.u32 %s14361_s15, 10  ;;  %v918_v7 = vld [vmem:[%s19856_s2 + $0x28] sm:$0xff]  ;;  %p869_p0 = scmp.lt.s32.totalorder %s9331_s23, 31 }
  0x68   : > { %v14372_v6 = vpack.c.bf16 %v916_v4, %v915_v2  ;;  %v920_v8 = vld [vmem:[%s19857_s3 + $0x8] sm:$0xff]  ;;  %s14386_s12 = scalar_lea.vmem [#allocation3], %s19874_s20  ;;  %v14394_v12 = vpack.c.bf16 %v918_v7, %v917_v5  ;;  %v922_v13 = vld [vmem:[%s19857_s3 + $0x18] sm:$0xff]  ;;  %v919_v15 = vld [vmem:[%s19857_s3] sm:$0xff]  ;;  %s20377_s21 = sshll.u32 %s14361_s15, 10 }
  0x69   : > { %v924_v9 = vld [vmem:[%s19857_s3 + $0x28] sm:$0xff]  ;;  %11124 = vmatprep.subr.bf16.mxu0 %v14363_v3  ;;  %v1083_v10 = vld [vmem:[%s14386_s12] sm:$0xff]  ;;  %v926_v14 = vld [vmem:[%s19857_s3 + $0x38] sm:$0xff]  ;;  %s21252_s23 = smov (!%p869_p0, %s9331_s23), 31  ;;  %s9330_s16 = sshll.u32 %s14361_s15, 7 }
  0x6a   : > { %20205 = vst [vmem:[#allocation12_spill] sm:$0xff] %v14372_v6  ;;  %v14389_v11 = vpack.c.bf16 %v924_v9, %v920_v8  ;;  %11126 = vmatpush3.bf16.msra.mxu0 %v14363_v3  ;;  %10399 = vmatprep.mubr.msk.f32.mxu0 %vm1103_vm0, %v1083_v10  ;;  %20207 = vst [vmem:[#allocation14_spill] sm:$0xff] %v14394_v12  ;;  %v14408_v16 = vpack.c.bf16 %v926_v14, %v922_v13  ;;  %v923_v17 = vld [vmem:[%s19857_s3 + $0x20] sm:$0xff]  ;;  %v921_v18 = vld [vmem:[%s19857_s3 + $0x10] sm:$0xff]  ;;  %s9332_s20 = sshll.u32 %s21252_s23, 3  ;;  %s15816_s23 = scalar_lea.vmem [#allocation4], %s20377_s21 }
  0x6b   : > { %11128 = vmatprep.subr.bf16.mxu0 %v14372_v6  ;;  %v925_v19 = vld [vmem:[%s19857_s3 + $0x30] sm:$0xff]  ;;  %v1084_v20 = vld [vmem:[%s14386_s12 + $0x8] sm:$0xff]  ;;  %v14420_v21 = vpack.c.bf16 %v923_v17, %v919_v15  ;;  %v930_v24 = vld [vmem:[%s19857_s3 + $0x58] sm:$0xff]  ;;  %s14999_s22 = scalar_lea.vmem %s19855_s1, %s9332_s20  ;;  %s19645_s17 = scalar_lea.vmem [#allocation6], %s9330_s16 }
  0x6c   : > { %20206 = vst [vmem:[#allocation13_spill] sm:$0xff] %v14389_v11  ;;  %11136 = vmatprep.subr.bf16.mxu1 %v14389_v11  ;;  %20208 = vst [vmem:[#allocation15_spill] sm:$0xff] %v14408_v16  ;;  %v928_v22 = vld [vmem:[%s19857_s3 + $0x48] sm:$0xff]  ;;  %v934_v26 = vld [vmem:[%s19857_s3 + $0x78] sm:$0xff]  ;;  %v14445_v30 = vpack.c.bf16 %v925_v19, %v921_v18 }
  0x6d   : > { %v932_v23 = vld [vmem:[%s19857_s3 + $0x68] sm:$0xff]  ;;  %v927_v27 = vld [vmem:[%s19857_s3 + $0x40] sm:$0xff]  ;;  %v1085_v29 = vld [vmem:[%s14386_s12 + $0x10] sm:$0xff]  ;;  %11138 = vmatpush1.bf16.msra.mxu1 %v14420_v21  ;;  %v14455_v33 = vpack.c.bf16 %v934_v26, %v930_v24 }
  0x6e   : > { %11130 = vmatpush3.bf16.msra.mxu0 %v14372_v6  ;;  %v14431_v25 = vpack.c.bf16 %v932_v23, %v928_v22  ;;  %v931_v28 = vld [vmem:[%s19857_s3 + $0x60] sm:$0xff]  ;;  %20209 = vst [vmem:[#allocation16_spill] sm:$0xff] %v14445_v30  ;;  %v929_v31 = vld [vmem:[%s19857_s3 + $0x50] sm:$0xff]  ;;  %v936_v32 = vld [vmem:[%s19857_s3 + $0x88] sm:$0xff] }
  0x6f   : > { %11132 = vmatprep.subr.bf16.mxu0 %v14394_v12  ;;  %20210 = vst [vmem:[#allocation17_spill] sm:$0xff] %v14455_v33  ;;  %v14457_v34 = vpack.c.bf16 %v931_v28, %v927_v27  ;;  %v933_v35 = vld [vmem:[%s19857_s3 + $0x70] sm:$0xff]  ;;  %v940_v36 = vld [vmem:[%s19857_s3 + $0xa8] sm:$0xff]  ;;  %v938_v37 = vld [vmem:[%s19857_s3 + $0x98] sm:$0xff] }
  0x70   : > { %11140 = vmatprep.subr.bf16.mxu1 %v14431_v25  ;;  %v14468_v38 = vpack.c.bf16 %v940_v36, %v936_v32  ;;  %v942_v39 = vld [vmem:[%s19857_s3 + $0xb8] sm:$0xff]  ;;  %v935_v40 = vld [vmem:[%s19857_s3 + $0x80] sm:$0xff]  ;;  %v944_v42 = vld [vmem:[%s19857_s3 + $0xc8] sm:$0xff]  ;;  %v14490_v46 = vpack.c.bf16 %v933_v35, %v929_v31 }
  0x71   : > { %20211 = vst [vmem:[#allocation18_spill] sm:$0xff] %v14457_v34  ;;  %v939_v41 = vld [vmem:[%s19857_s3 + $0xa0] sm:$0xff]  ;;  %v948_v43 = vld [vmem:[%s19857_s3 + $0xe8] sm:$0xff]  ;;  %v1086_v44 = vld [vmem:[%s14386_s12 + $0x18] sm:$0xff]  ;;  %11142 = vmatpush1.bf16.msra.mxu1 %v14457_v34  ;;  %v14494_v47 = vpack.c.bf16 %v942_v39, %v938_v37 }
  0x72   : > { %11134 = vmatpush3.bf16.msra.mxu0 %v14394_v12  ;;  %20212 = vst [vmem:[#allocation19_spill] sm:$0xff] %v14468_v38  ;;  %v1087_v45 = vld [vmem:[%s14386_s12 + $0x20] sm:$0xff]  ;;  %20213 = vst [vmem:[#allocation20_spill] sm:$0xff] %v14490_v46  ;;  %v14496_v48 = vpack.c.bf16 %v939_v41, %v935_v40  ;;  %v937_v49 = vld [vmem:[%s19857_s3 + $0x90] sm:$0xff]  ;;  %11144 = vmatprep.subr.bf16.mxu1 %v14468_v38  ;;  %v14508_v52 = vpack.c.bf16 %v948_v43, %v944_v42 }
  0x73   : > { %11200 = vmatprep.subr.bf16.mxu0 %v14408_v16  ;;  %20214 = vst [vmem:[#allocation21_spill] sm:$0xff] %v14494_v47  ;;  %v941_v50 = vld [vmem:[%s19857_s3 + $0xb0] sm:$0xff]  ;;  %v946_v51 = vld [vmem:[%s19857_s3 + $0xd8] sm:$0xff]  ;;  %v943_v54 = vld [vmem:[%s19857_s3 + $0xc0] sm:$0xff] }
  0x74   : > { %20215 = vst [vmem:[#allocation22_spill] sm:$0xff] %v14496_v48  ;;  %20216 = vst [vmem:[#allocation23_spill] sm:$0xff] %v14508_v52  ;;  %v950_v53 = vld [vmem:[%s19857_s3 + $0xf8] sm:$0xff]  ;;  %v947_v55 = vld [vmem:[%s19857_s3 + $0xe0] sm:$0xff]  ;;  %v14530_v60 = vpack.c.bf16 %v941_v50, %v937_v49 }
  0x75   : > { %10400 = vmatmul.mubr.msk.f32.vlgmr.msra.gmra.mrb[0].mxu0 %vm1103_vm0, %v1084_v20  ;;  %v952_v56 = vld [vmem:[%s19857_s3 + $0x108] sm:$0xff]  ;;  %v1089_v59 = vld [vmem:[%s14386_s12 + $0x30] sm:$0xff]  ;;  %11146 = vmatpush1.bf16.msra.mxu1 %v14496_v48  ;;  %v14534_v61 = vpack.c.bf16 %v950_v53, %v946_v51  ;;  %v14536_v62 = vpack.c.bf16 %v947_v55, %v943_v54  ;;  %v954_v1 = vld [vmem:[%s19857_s3 + $0x118] sm:$0xff] }
  0x76   : > { %10402 = vmatprep.mubr.msk.f32.mxu0 %vm1103_vm0, %v1085_v29  ;;  %11202 = vmatpush1.bf16.msra.mxu0 %v14445_v30  ;;  %v956_v57 = vld [vmem:[%s19857_s3 + $0x128] sm:$0xff]  ;;  %20217 = vst [vmem:[#allocation24_spill] sm:$0xff] %v14530_v60  ;;  %v945_v63 = vld [vmem:[%s19857_s3 + $0xd0] sm:$0xff]  ;;  %v958_v4 = vld [vmem:[%s19857_s3 + $0x138] sm:$0xff] }
  0x77   : > { %11204 = vmatprep.subr.bf16.mxu0 %v14455_v33  ;;  %v1088_v58 = vld [vmem:[%s14386_s12 + $0x28] sm:$0xff]  ;;  %20218 = vst [vmem:[#allocation25_spill] sm:$0xff] %v14534_v61  ;;  %20219 = vst [vmem:[#allocation26_spill] sm:$0xff] %v14536_v62  ;;  %v949_v0 = vld [vmem:[%s19857_s3 + $0xf0] sm:$0xff]  ;;  %11148 = vmatprep.subr.bf16.mxu1 %v14508_v52  ;;  %v14548_v2 = vpack.c.bf16 %v956_v57, %v952_v56  ;;  %v14574_v15 = vpack.c.bf16 %v958_v4, %v954_v1 }
  0x78   : > { %v951_v5 = vld [vmem:[%s19857_s3 + $0x100] sm:$0xff]  ;;  %v960_v8 = vld [vmem:[%s19857_s3 + $0x148] sm:$0xff]  ;;  %v1090_v10 = vld [vmem:[%s14386_s12 + $0x38] sm:$0xff]  ;;  %v14570_v14 = vpack.c.bf16 %v949_v0, %v945_v63 }
  0x79   : > { %10403 = vmatmul.mubr.msk.f32.gmra.mrb[2].mxu0 %vm1103_vm0, %v1086_v44  ;;  %20220 = vst [vmem:[#allocation27_spill] sm:$0xff] %v14548_v2  ;;  %v955_v7 = vld [vmem:[%s19857_s3 + $0x120] sm:$0xff]  ;;  %v964_v9 = vld [vmem:[%s19857_s3 + $0x168] sm:$0xff]  ;;  %11150 = vmatpush1.bf16.msra.mxu1 %v14536_v62  ;;  %20222 = vst [vmem:[#allocation29_spill] sm:$0xff] %v14574_v15 }
  0x7a   : > { %10405 = vmatprep.mubr.msk.f32.mxu0 %vm1103_vm0, %v1087_v45  ;;  %11206 = vmatpush1.bf16.msra.mxu0 %v14490_v46  ;;  %v1091_v13 = vld [vmem:[%s14386_s12 + $0x40] sm:$0xff]  ;;  %20221 = vst [vmem:[#allocation28_spill] sm:$0xff] %v14570_v14  ;;  %v14576_v17 = vpack.c.bf16 %v955_v7, %v951_v5  ;;  %v953_v18 = vld [vmem:[%s19857_s3 + $0x110] sm:$0xff]  ;;  %v962_v20 = vld [vmem:[%s19857_s3 + $0x158] sm:$0xff]  ;;  %v14588_v22 = vpack.c.bf16 %v964_v9, %v960_v8 }
  0x7b   : > { %11208 = vmatprep.subr.bf16.mxu0 %v14494_v47  ;;  %v957_v19 = vld [vmem:[%s19857_s3 + $0x130] sm:$0xff]  ;;  %11152 = vmatprep.subr.bf16.mxu1 %v14548_v2  ;;  %v966_v23 = vld [vmem:[%s19857_s3 + $0x178] sm:$0xff]  ;;  %v959_v24 = vld [vmem:[%s19857_s3 + $0x140] sm:$0xff] }
  0x7c   : > { %20223 = vst [vmem:[#allocation30_spill] sm:$0xff] %v14576_v17  ;;  %20224 = vst [vmem:[#allocation31_spill] sm:$0xff] %v14588_v22  ;;  %v963_v26 = vld [vmem:[%s19857_s3 + $0x160] sm:$0xff]  ;;  %v968_v27 = vld [vmem:[%s19857_s3 + $0x188] sm:$0xff]  ;;  %v14610_v32 = vpack.c.bf16 %v957_v19, %v953_v18  ;;  %v14614_v35 = vpack.c.bf16 %v966_v23, %v962_v20 }
  0x7d   : > { %10406 = vmatmul.mubr.msk.f32.gmra.mrb[4].mxu0 %vm1103_vm0, %v1088_v58  ;;  %v972_v28 = vld [vmem:[%s19857_s3 + $0x1a8] sm:$0xff]  ;;  %v1093_v31 = vld [vmem:[%s14386_s12 + $0x50] sm:$0xff]  ;;  %11154 = vmatpush1.bf16.msra.mxu1 %v14576_v17  ;;  %v14616_v36 = vpack.c.bf16 %v963_v26, %v959_v24  ;;  %v970_v40 = vld [vmem:[%s19857_s3 + $0x198] sm:$0xff] }
  0x7e   : > { %10408 = vmatprep.mubr.msk.f32.mxu0 %vm1103_vm0, %v1089_v59  ;;  %11210 = vmatpush1.bf16.msra.mxu0 %v14530_v60  ;;  %v1092_v29 = vld [vmem:[%s14386_s12 + $0x48] sm:$0xff]  ;;  %20225 = vst [vmem:[#allocation32_spill] sm:$0xff] %v14610_v32  ;;  %20226 = vst [vmem:[#allocation33_spill] sm:$0xff] %v14614_v35  ;;  %v961_v37 = vld [vmem:[%s19857_s3 + $0x150] sm:$0xff]  ;;  %v14628_v41 = vpack.c.bf16 %v972_v28, %v968_v27 }
  0x7f   : > { %11212 = vmatprep.subr.bf16.mxu0 %v14534_v61  ;;  %20227 = vst [vmem:[#allocation34_spill] sm:$0xff] %v14616_v36  ;;  %v965_v39 = vld [vmem:[%s19857_s3 + $0x170] sm:$0xff]  ;;  %11156 = vmatprep.subr.bf16.mxu1 %v14588_v22  ;;  %v974_v42 = vld [vmem:[%s19857_s3 + $0x1b8] sm:$0xff]  ;;  %v967_v43 = vld [vmem:[%s19857_s3 + $0x180] sm:$0xff] }
  0x80   : > { %20228 = vst [vmem:[#allocation35_spill] sm:$0xff] %v14628_v41  ;;  %v971_v44 = vld [vmem:[%s19857_s3 + $0x1a0] sm:$0xff]  ;;  %v976_v45 = vld [vmem:[%s19857_s3 + $0x1c8] sm:$0xff]  ;;  %v1094_v50 = vld [vmem:[%s14386_s12 + $0x58] sm:$0xff]  ;;  %v14650_v53 = vpack.c.bf16 %v965_v39, %v961_v37  ;;  %v14654_v54 = vpack.c.bf16 %v974_v42, %v970_v40 }
  0x81   : > { %10409 = vmatmul.mubr.msk.f32.gmra.mrb[6].mxu0 %vm1103_vm0, %v1090_v10  ;;  %v980_v49 = vld [vmem:[%s19857_s3 + $0x1e8] sm:$0xff]  ;;  %v1095_v51 = vld [vmem:[%s14386_s12 + $0x60] sm:$0xff]  ;;  %11158 = vmatpush1.bf16.msra.mxu1 %v14616_v36  ;;  %v14656_v55 = vpack.c.bf16 %v971_v44, %v967_v43  ;;  %v969_v56 = vld [vmem:[%s19857_s3 + $0x190] sm:$0xff] }
  0x82   : > { %10411 = vmatprep.mubr.msk.f32.mxu0 %vm1103_vm0, %v1091_v13  ;;  %11214 = vmatpush1.bf16.msra.mxu0 %v14570_v14  ;;  %20229 = vst [vmem:[#allocation36_spill] sm:$0xff] %v14650_v53  ;;  %20230 = vst [vmem:[#allocation37_spill] sm:$0xff] %v14654_v54  ;;  %v973_v57 = vld [vmem:[%s19857_s3 + $0x1b0] sm:$0xff]  ;;  %v978_v58 = vld [vmem:[%s19857_s3 + $0x1d8] sm:$0xff]  ;;  %v14668_v59 = vpack.c.bf16 %v980_v49, %v976_v45 }
  0x83   : > { %11216 = vmatprep.subr.bf16.mxu0 %v14574_v15  ;;  %20231 = vst [vmem:[#allocation38_spill] sm:$0xff] %v14656_v55  ;;  %11160 = vmatprep.subr.bf16.mxu1 %v14628_v41  ;;  %v982_v63 = vld [vmem:[%s19857_s3 + $0x1f8] sm:$0xff]  ;;  %v975_v0 = vld [vmem:[%s19857_s3 + $0x1c0] sm:$0xff]  ;;  %v984_v4 = vld [vmem:[%s19857_s3 + $0x208] sm:$0xff]  ;;  %v14690_v9 = vpack.c.bf16 %v973_v57, %v969_v56 }
  0x84   : > { %20232 = vst [vmem:[#allocation39_spill] sm:$0xff] %v14668_v59  ;;  %v979_v1 = vld [vmem:[%s19857_s3 + $0x1e0] sm:$0xff]  ;;  %v988_v5 = vld [vmem:[%s19857_s3 + $0x228] sm:$0xff]  ;;  %v1097_v8 = vld [vmem:[%s14386_s12 + $0x70] sm:$0xff]  ;;  %v14694_v10 = vpack.c.bf16 %v982_v63, %v978_v58 }
  0x85   : > { %10412 = vmatmul.mubr.msk.f32.gmra.mrb[8].mxu0 %vm1103_vm0, %v1092_v29  ;;  %v1096_v7 = vld [vmem:[%s14386_s12 + $0x68] sm:$0xff]  ;;  %20233 = vst [vmem:[#allocation40_spill] sm:$0xff] %v14690_v9  ;;  %11162 = vmatpush1.bf16.msra.mxu1 %v14656_v55  ;;  %v14696_v13 = vpack.c.bf16 %v979_v1, %v975_v0  ;;  %v977_v18 = vld [vmem:[%s19857_s3 + $0x1d0] sm:$0xff]  ;;  %v986_v20 = vld [vmem:[%s19857_s3 + $0x218] sm:$0xff]  ;;  %v14708_v23 = vpack.c.bf16 %v988_v5, %v984_v4 }
  0x86   : > { %10414 = vmatprep.mubr.msk.f32.mxu0 %vm1103_vm0, %v1093_v31  ;;  %11218 = vmatpush1.bf16.msra.mxu0 %v14610_v32  ;;  %20234 = vst [vmem:[#allocation41_spill] sm:$0xff] %v14694_v10  ;;  %v981_v19 = vld [vmem:[%s19857_s3 + $0x1f0] sm:$0xff]  ;;  %v990_v24 = vld [vmem:[%s19857_s3 + $0x238] sm:$0xff]  ;;  %v983_v26 = vld [vmem:[%s19857_s3 + $0x200] sm:$0xff] }
  0x87   : > { %11220 = vmatprep.subr.bf16.mxu0 %v14614_v35  ;;  %20235 = vst [vmem:[#allocation42_spill] sm:$0xff] %v14696_v13  ;;  %11164 = vmatprep.subr.bf16.mxu1 %v14668_v59  ;;  %20236 = vst [vmem:[#allocation43_spill] sm:$0xff] %v14708_v23  ;;  %v987_v27 = vld [vmem:[%s19857_s3 + $0x220] sm:$0xff]  ;;  %v992_v28 = vld [vmem:[%s19857_s3 + $0x248] sm:$0xff]  ;;  %v14729_v37 = vpack.c.bf16 %v981_v19, %v977_v18  ;;  %v14733_v39 = vpack.c.bf16 %v990_v24, %v986_v20 }
  0x88   : > { %v996_v29 = vld [vmem:[%s19857_s3 + $0x268] sm:$0xff]  ;;  %v1098_v31 = vld [vmem:[%s14386_s12 + $0x78] sm:$0xff]  ;;  %v14735_v40 = vpack.c.bf16 %v987_v27, %v983_v26  ;;  %v985_v42 = vld [vmem:[%s19857_s3 + $0x210] sm:$0xff] }
  0x89   : > { %10415 = vmatmul.mubr.msk.f32.gmra.mrb[10].mxu0 %vm1103_vm0, %v1094_v50  ;;  %20237 = vst [vmem:[#allocation44_spill] sm:$0xff] %v14729_v37  ;;  %11166 = vmatpush1.bf16.msra.mxu1 %v14696_v13  ;;  %20238 = vst [vmem:[#allocation45_spill] sm:$0xff] %v14733_v39  ;;  %v989_v43 = vld [vmem:[%s19857_s3 + $0x230] sm:$0xff]  ;;  %v994_v44 = vld [vmem:[%s19857_s3 + $0x258] sm:$0xff]  ;;  %v14747_v45 = vpack.c.bf16 %v996_v29, %v992_v28 }
  0x8a   : > { %10417 = vmatprep.mubr.msk.f32.mxu0 %vm1103_vm0, %v1095_v51  ;;  %11222 = vmatpush1.bf16.msra.mxu0 %v14650_v53  ;;  %20239 = vst [vmem:[#allocation46_spill] sm:$0xff] %v14735_v40  ;;  %v998_v49 = vld [vmem:[%s19857_s3 + $0x278] sm:$0xff]  ;;  %v991_v50 = vld [vmem:[%s19857_s3 + $0x240] sm:$0xff]  ;;  %v1000_v56 = vld [vmem:[%s19857_s3 + $0x288] sm:$0xff]  ;;  %v14766_v58 = vpack.c.bf16 %v989_v43, %v985_v42 }
  0x8b   : > { %11224 = vmatprep.subr.bf16.mxu0 %v14654_v54  ;;  %11168 = vmatprep.subr.bf16.mxu1 %v14708_v23  ;;  %20240 = vst [vmem:[#allocation47_spill] sm:$0xff] %v14747_v45  ;;  %v995_v51 = vld [vmem:[%s19857_s3 + $0x260] sm:$0xff]  ;;  %v1004_v57 = vld [vmem:[%s19857_s3 + $0x2a8] sm:$0xff]  ;;  %v14770_v63 = vpack.c.bf16 %v998_v49, %v994_v44  ;;  %v993_v1 = vld [vmem:[%s19857_s3 + $0x250] sm:$0xff] }
  0x8c   : > { %20241 = vst [vmem:[#allocation48_spill] sm:$0xff] %v14766_v58  ;;  %v14772_v0 = vpack.c.bf16 %v995_v51, %v991_v50  ;;  %v997_v4 = vld [vmem:[%s19857_s3 + $0x270] sm:$0xff]  ;;  %v1002_v5 = vld [vmem:[%s19857_s3 + $0x298] sm:$0xff]  ;;  %v999_v18 = vld [vmem:[%s19857_s3 + $0x280] sm:$0xff] }
  0x8d   : > { %10418 = vmatmul.mubr.msk.f32.gmra.mrb[12].mxu0 %vm1103_vm0, %v1096_v7  ;;  %11170 = vmatpush1.bf16.msra.mxu1 %v14735_v40  ;;  %20242 = vst [vmem:[#allocation49_spill] sm:$0xff] %v14770_v63  ;;  %v14784_v7 = vpack.c.bf16 %v1004_v57, %v1000_v56  ;;  %v1003_v19 = vld [vmem:[%s19857_s3 + $0x2a0] sm:$0xff]  ;;  %v1008_v20 = vld [vmem:[%s19857_s3 + $0x2c8] sm:$0xff]  ;;  %v14802_v26 = vpack.c.bf16 %v997_v4, %v993_v1  ;;  %v1001_v29 = vld [vmem:[%s19857_s3 + $0x290] sm:$0xff] }
  0x8e   : > { %10420 = vmatprep.mubr.msk.f32.mxu0 %vm1103_vm0, %v1097_v8  ;;  %11226 = vmatpush1.bf16.msra.mxu0 %v14690_v9  ;;  %20243 = vst [vmem:[#allocation50_spill] sm:$0xff] %v14772_v0  ;;  %v1006_v8 = vld [vmem:[%s19857_s3 + $0x2b8] sm:$0xff]  ;;  %v1012_v24 = vld [vmem:[%s19857_s3 + $0x2e8] sm:$0xff]  ;;  %v14808_v28 = vpack.c.bf16 %v1003_v19, %v999_v18  ;;  %v1007_v49 = vld [vmem:[%s19857_s3 + $0x2c0] sm:$0xff] }
  0x8f   : > { %11228 = vmatprep.subr.bf16.mxu0 %v14694_v10  ;;  %11172 = vmatprep.subr.bf16.mxu1 %v14747_v45  ;;  %20244 = vst [vmem:[#allocation51_spill] sm:$0xff] %v14784_v7  ;;  %20245 = vst [vmem:[#allocation52_spill] sm:$0xff] %v14802_v26  ;;  %v14806_v27 = vpack.c.bf16 %v1006_v8, %v1002_v5  ;;  %v1010_v42 = vld [vmem:[%s19857_s3 + $0x2d8] sm:$0xff]  ;;  %v14820_v43 = vpack.c.bf16 %v1012_v24, %v1008_v20  ;;  %v1011_v50 = vld [vmem:[%s19857_s3 + $0x2e0] sm:$0xff] }
  0x90   : > { %20247 = vst [vmem:[#allocation54_spill] sm:$0xff] %v14808_v28  ;;  %v1014_v44 = vld [vmem:[%s19857_s3 + $0x2f8] sm:$0xff]  ;;  %v1016_v51 = vld [vmem:[%s19857_s3 + $0x308] sm:$0xff]  ;;  %v14844_v4 = vpack.c.bf16 %v1011_v50, %v1007_v49  ;;  %v1009_v5 = vld [vmem:[%s19857_s3 + $0x2d0] sm:$0xff] }
  0x91   : > { %10421 = vmatmul.mubr.msk.f32.gmra.mrb[14].mxu0 %vm1103_vm0, %v1098_v31  ;;  %11174 = vmatpush1.bf16.msra.mxu1 %v14772_v0  ;;  %20246 = vst [vmem:[#allocation53_spill] sm:$0xff] %v14806_v27  ;;  %v1005_v31 = vld [vmem:[%s19857_s3 + $0x2b0] sm:$0xff]  ;;  %20248 = vst [vmem:[#allocation55_spill] sm:$0xff] %v14820_v43  ;;  %v1020_v56 = vld [vmem:[%s19857_s3 + $0x328] sm:$0xff]  ;;  %v14842_v1 = vpack.c.bf16 %v1014_v44, %v1010_v42 }
  0x92   : > { %11230 = vmatpush1.bf16.msra.mxu0 %v14729_v37  ;;  %11176 = vmatprep.subr.bf16.mxu1 %v14784_v7  ;;  %v14838_v57 = vpack.c.bf16 %v1005_v31, %v1001_v29  ;;  %20251 = vst [vmem:[#allocation58_spill] sm:$0xff] %v14844_v4  ;;  %v1013_v8 = vld [vmem:[%s19857_s3 + $0x2f0] sm:$0xff]  ;;  %v1018_v18 = vld [vmem:[%s19857_s3 + $0x318] sm:$0xff]  ;;  %v14856_v19 = vpack.c.bf16 %v1020_v56, %v1016_v51  ;;  %v1015_v24 = vld [vmem:[%s19857_s3 + $0x300] sm:$0xff] }
  0x93   : > { %11232 = vmatprep.subr.bf16.mxu0 %v14733_v39  ;;  %20250 = vst [vmem:[#allocation57_spill] sm:$0xff] %v14842_v1  ;;  %v1022_v20 = vld [vmem:[%s19857_s3 + $0x338] sm:$0xff]  ;;  %v1019_v29 = vld [vmem:[%s19857_s3 + $0x320] sm:$0xff]  ;;  %v1024_v31 = vld [vmem:[%s19857_s3 + $0x348] sm:$0xff]  ;;  %v14874_v44 = vpack.c.bf16 %v1013_v8, %v1009_v5 }
  0x94   : > { %20249 = vst [vmem:[#allocation56_spill] sm:$0xff] %v14838_v57  ;;  %20252 = vst [vmem:[#allocation59_spill] sm:$0xff] %v14856_v19  ;;  %v1028_v42 = vld [vmem:[%s19857_s3 + $0x368] sm:$0xff]  ;;  %v14878_v49 = vpack.c.bf16 %v1022_v20, %v1018_v18  ;;  %v14880_v50 = vpack.c.bf16 %v1019_v29, %v1015_v24  ;;  %v1017_v51 = vld [vmem:[%s19857_s3 + $0x310] sm:$0xff] }
  0x95   : > { %11178 = vmatpush1.bf16.msra.mxu1 %v14808_v28  ;;  %20253 = vst [vmem:[#allocation60_spill] sm:$0xff] %v14874_v44  ;;  %v1021_v56 = vld [vmem:[%s19857_s3 + $0x330] sm:$0xff]  ;;  %v1026_v5 = vld [vmem:[%s19857_s3 + $0x358] sm:$0xff]  ;;  %v14892_v8 = vpack.c.bf16 %v1028_v42, %v1024_v31  ;;  %v1023_v20 = vld [vmem:[%s19857_s3 + $0x340] sm:$0xff] }
  0x96   : > { %11234 = vmatpush1.bf16.msra.mxu0 %v14766_v58  ;;  %11180 = vmatprep.subr.bf16.mxu1 %v14820_v43  ;;  %20254 = vst [vmem:[#allocation61_spill] sm:$0xff] %v14878_v49  ;;  %20255 = vst [vmem:[#allocation62_spill] sm:$0xff] %v14880_v50  ;;  %v1030_v18 = vld [vmem:[%s19857_s3 + $0x378] sm:$0xff]  ;;  %v1027_v24 = vld [vmem:[%s19857_s3 + $0x360] sm:$0xff]  ;;  %v14910_v42 = vpack.c.bf16 %v1021_v56, %v1017_v51 }
  0x97   : > { %11236 = vmatprep.subr.bf16.mxu0 %v14770_v63  ;;  %20256 = vst [vmem:[#allocation63_spill] sm:$0xff] %v14892_v8  ;;  %v1032_v29 = vld [vmem:[%s19857_s3 + $0x388] sm:$0xff]  ;;  %v1025_v43 = vld [vmem:[%s19857_s3 + $0x350] sm:$0xff]  ;;  %v1034_v51 = vld [vmem:[%s19857_s3 + $0x398] sm:$0xff] }
  0x98   : > { %v1036_v31 = vld [vmem:[%s19857_s3 + $0x3a8] sm:$0xff]  ;;  %20257 = vst [vmem:[#allocation64_spill] sm:$0xff] %v14910_v42  ;;  %v1029_v28 = vld [vmem:[%s19857_s3 + $0x370] sm:$0xff] }
  0x99   : > { %11182 = vmatpush1.bf16.msra.mxu1 %v14844_v4  ;;  %v14916_v4 = vpack.c.bf16 %v1027_v24, %v1023_v20  ;;  %v14928_v56 = vpack.c.bf16 %v1036_v31, %v1032_v29  ;;  %v1035_v20 = vld [vmem:[%s19857_s3 + $0x3a0] sm:$0xff]  ;;  %v14940_v24 = vpack.c.bf16 %v1029_v28, %v1025_v43  ;;  %v1040_v43 = vld [vmem:[%s19857_s3 + $0x3c8] sm:$0xff]  ;;  %v1049_v7 = vld [vmem:[%s19858_s4 + $0x10] sm:$0xff] }
  0x9a   : > { %11238 = vmatpush1.bf16.msra.mxu0 %v14802_v26  ;;  %11184 = vmatprep.subr.bf16.mxu1 %v14856_v19  ;;  %v14914_v19 = vpack.c.bf16 %v1030_v18, %v1026_v5  ;;  %v1038_v5 = vld [vmem:[%s19857_s3 + $0x3b8] sm:$0xff]  ;;  %v1031_v18 = vld [vmem:[%s19857_s3 + $0x380] sm:$0xff]  ;;  %v15032_v40 = vld [vmem:[%s14999_s22 + $0x8] sm:$0xff] }
  0x9b   : > { %11240 = vmatprep.subr.bf16.mxu0 %v14806_v27  ;;  %20259 = vst [vmem:[#allocation66_spill] sm:$0xff] %v14916_v4  ;;  %20260 = vst [vmem:[#allocation67_spill] sm:$0xff] %v14928_v56  ;;  %v14944_v29 = vpack.c.bf16 %v1038_v5, %v1034_v51  ;;  %v14946_v31 = vpack.c.bf16 %v1035_v20, %v1031_v18  ;;  %v1044_v51 = vld [vmem:[%s19857_s3 + $0x3e8] sm:$0xff]  ;;  %v1046_v5 = vld [vmem:[%s19857_s3 + $0x3f8] sm:$0xff] }
  0x9c   : > { %20258 = vst [vmem:[#allocation65_spill] sm:$0xff] %v14914_v19  ;;  %20261 = vst [vmem:[#allocation68_spill] sm:$0xff] %v14940_v24  ;;  %v1039_v18 = vld [vmem:[%s19857_s3 + $0x3c0] sm:$0xff]  ;;  %v15040_v55 = vld [vmem:[%s14999_s22 + $0x10] sm:$0xff] }
  0x9d   : > { %11186 = vmatpush1.bf16.msra.mxu1 %v14880_v50  ;;  %20262 = vst [vmem:[#allocation69_spill] sm:$0xff] %v14944_v29  ;;  %20263 = vst [vmem:[#allocation70_spill] sm:$0xff] %v14946_v31  ;;  %v1037_v50 = vld [vmem:[%s19857_s3 + $0x3b0] sm:$0xff] }
  0x9e   : > { %11242 = vmatpush1.bf16.msra.mxu0 %v14838_v57  ;;  %11188 = vmatprep.subr.bf16.mxu1 %v14892_v8  ;;  %v1033_v8 = vld [vmem:[%s19857_s3 + $0x390] sm:$0xff] }
  0x9f   : > { %11244 = vmatprep.subr.bf16.mxu0 %v14842_v1  ;;  %v14956_v28 = vpack.c.bf16 %v1037_v50, %v1033_v8  ;;  %v1042_v50 = vld [vmem:[%s19857_s3 + $0x3d8] sm:$0xff]  ;;  %v14971_v8 = vpack.c.bf16 %v1044_v51, %v1040_v43  ;;  %v1041_v43 = vld [vmem:[%s19857_s3 + $0x3d0] sm:$0xff] }
  0xa0   : > { %v14979_v20 = vpack.c.bf16 %v1046_v5, %v1042_v50  ;;  %v1045_v51 = vld [vmem:[%s19857_s3 + $0x3f0] sm:$0xff]  ;;  %v15004_v50 = vld [vmem:[%s14999_s22] sm:$0xff]  ;;  %v1048_v5 = vld [vmem:[%s19858_s4 + $0x8] sm:$0xff] }
  0xa1   : > { %11190 = vmatpush1.bf16.msra.mxu1 %v14916_v4  ;;  %20264 = vst [vmem:[#allocation71_spill] sm:$0xff] %v14956_v28  ;;  %20265 = vst [vmem:[#allocation72_spill] sm:$0xff] %v14971_v8  ;;  %v14993_v4 = vpack.c.bf16 %v1045_v51, %v1041_v43  ;;  %1398 = vmatprep.mubr.f32.mxu1 %v15004_v50  ;;  %v15021_v43 = vld [vmem:[%s19859_s5] ss:$0 sm:$0xff] }
  0xa2   : > { %11246 = vmatpush1.bf16.msra.mxu0 %v14874_v44  ;;  %11192 = vmatprep.subr.bf16.mxu1 %v14928_v56  ;;  %20266 = vst [vmem:[#allocation73_spill] sm:$0xff] %v14979_v20 }
  0xa3   : > { %11248 = vmatprep.subr.bf16.mxu0 %v14878_v49  ;;  %20268 = vst [vmem:[#allocation75_spill] sm:$0xff] %v14993_v4  ;;  %1559 = vmatprep.mubr.f32.mxu0 %v15004_v50 }
  0xa5   : > { %11194 = vmatpush1.bf16.msra.mxu1 %v14946_v31  ;;  %v1043_v31 = vld [vmem:[%s19857_s3 + $0x3e0] sm:$0xff] }
  0xa6   : > { %11250 = vmatpush1.bf16.msra.mxu0 %v14910_v42  ;;  %11196 = vmatprep.subr.bf16.mxu1 %v14971_v8  ;;  %v14991_v56 = vpack.c.bf16 %v1043_v31, %v1039_v18  ;;  %v1047_v31 = vld [vmem:[%s19858_s4] sm:$0xff] }
  0xa7   : > { %11252 = vmatprep.subr.bf16.mxu0 %v14914_v19  ;;  %v15015_v18 = vpack.c.bf16 %v1048_v5, %v1047_v31  ;;  %v1050_v31 = vld [vmem:[%s19858_s4 + $0x18] sm:$0xff] }
  0xa8   : > { %20267 = vst [vmem:[#allocation74_spill] sm:$0xff] %v14991_v56  ;;  %v15034_v13 = vpack.c.bf16 %v1050_v31, %v1049_v7  ;;  %v15050_v7 = vld [vmem:[%s14999_s22 + $0x18] sm:$0xff] }
  0xa9   : > { %11198 = vmatpush1.bf16.msra.mxu1 %v14991_v56  ;;  %20269 = vst [vmem:[#allocation76_spill] sm:$0xff] %v15015_v18 }
  0xaa   : > { %11254 = vmatpush1.bf16.msra.mxu0 %v14940_v24  ;;  %11264 = vmatprep.subr.bf16.mxu1 %v15015_v18  ;;  %20270 = vst [vmem:[#allocation77_spill] sm:$0xff] %v15034_v13 }
  0xab   : > { %11256 = vmatprep.subr.bf16.mxu0 %v14944_v29 }
  0xae   : > { %11258 = vmatpush1.bf16.msra.mxu0 %v14956_v28 }
  0xaf   : > { %11260 = vmatprep.subr.bf16.mxu0 %v14979_v20 }
  0xb2   : > { %11262 = vmatpush1.bf16.msra.mxu0 %v14993_v4 }
  0xb3   : > { %11296 = vmatprep.subr.bf16.mxu0 %v14363_v3 }
 0x148   : > { %v10401_v51 = vpop.f32.mrb[0].mxu0 }
 0x149   : > { %v1218_v56 = vpop.f32.mrb[1].mxu0  ;;  %v1224_v5 = vadd.f32 %v10401_v51, %v15021_v43 }
 0x14a   : > { %v1219_v8 = vadd.f32 %v15021_v43, %v1218_v56 }
 0x14b   : > { %v1298_v59 = vmax.f32 %v1224_v5, 0.0 }
 0x14c   : > { %v1297_v0 = vmax.f32 %v1219_v8, 0.0  ;;  %v10404_v45 = vpop.f32.mrb[2].mxu0 }
 0x14d   : > { %v1228_v23 = vpop.f32.mrb[3].mxu0 }
 0x14e   : > { %1399 = vmatmul.mubr.f32.vlgmr.msra.gmra.mrb[0].mxu1 %v1297_v0  ;;  %1560 = vmatmul.mubr.f32.vlgmr.msra.gmra.mrb[16].mxu0 %v1297_v0  ;;  %v1229_v56 = vadd.f32 %v15021_v43, %v1228_v23  ;;  %v1234_v0 = vadd.f32 %v10404_v45, %v15021_v43 }
 0x14f   : > { %1404 = vmatprep.mubr.f32.mxu1 %v15032_v40  ;;  %1565 = vmatprep.mubr.f32.mxu0 %v15032_v40 }
 0x150   : > { %v10407_v51 = vpop.f32.mrb[4].mxu0  ;;  %11298 = vmatpush3.bf16.msra.mxu0 %v14363_v3  ;;  %11266 = vmatpush3.bf16.msra.mxu1 %v15015_v18  ;;  %v1299_v23 = vmax.f32 %v1229_v56, 0.0  ;;  %v1300_v45 = vmax.f32 %v1234_v0, 0.0  ;;  %v15059_v56 = vld [vmem:[%s14999_s22 + $0x20] sm:$0xff] }
 0x151   : > { %v1238_v8 = vpop.f32.mrb[5].mxu0  ;;  %11300 = vmatprep.subr.bf16.mxu0 %v14372_v6  ;;  %11268 = vmatprep.subr.bf16.mxu1 %v15034_v13 }
 0x152   : > { %1405 = vmatmul.mubr.f32.gmra.mrb[2].mxu1 %v1298_v59  ;;  %1566 = vmatmul.mubr.f32.gmra.mrb[18].mxu0 %v1298_v59  ;;  %v1239_v59 = vadd.f32 %v15021_v43, %v1238_v8  ;;  %v1244_v8 = vadd.f32 %v10407_v51, %v15021_v43 }
 0x153   : > { %1410 = vmatprep.mubr.f32.mxu1 %v15040_v55  ;;  %1571 = vmatprep.mubr.f32.mxu0 %v15040_v55 }
 0x154   : > { %v10410_v31 = vpop.f32.mrb[6].mxu0  ;;  %11302 = vmatpush3.bf16.msra.mxu0 %v14372_v6  ;;  %11270 = vmatpush3.bf16.msra.mxu1 %v15034_v13  ;;  %v15067_v13 = vld [vmem:[%s14999_s22 + $0x28] sm:$0xff] }
 0x155   : > { %v1248_v5 = vpop.f32.mrb[7].mxu0  ;;  %11304 = vmatprep.subr.bf16.mxu0 %v14394_v12 }
 0x156   : > { %1411 = vmatmul.mubr.f32.gmra.mrb[4].mxu1 %v1299_v23  ;;  %1572 = vmatmul.mubr.f32.gmra.mrb[20].mxu0 %v1299_v23  ;;  %v1301_v23 = vmax.f32 %v1239_v59, 0.0  ;;  %v1302_v59 = vmax.f32 %v1244_v8, 0.0 }
 0x157   : > { %1416 = vmatprep.mubr.f32.mxu1 %v15050_v7  ;;  %1577 = vmatprep.mubr.f32.mxu0 %v15050_v7 }
 0x158   : > { %v10413_v18 = vpop.f32.mrb[8].mxu0  ;;  %11306 = vmatpush3.bf16.msra.mxu0 %v14394_v12  ;;  %v1249_v12 = vadd.f32 %v15021_v43, %v1248_v5  ;;  %v888_v5 = vld [vmem:[%s14999_s22 + $0x38] sm:$0xff] }
 0x159   : > { %v1258_v41 = vpop.f32.mrb[9].mxu0  ;;  %11372 = vmatprep.subr.bf16.mxu0 %v14408_v16 }
 0x15a   : > { %1417 = vmatmul.mubr.f32.gmra.mrb[6].mxu1 %v1300_v45  ;;  %1578 = vmatmul.mubr.f32.gmra.mrb[22].mxu0 %v1300_v45  ;;  %v15073_v45 = vld [vmem:[%s14999_s22 + $0x30] sm:$0xff]  ;;  %v1303_v51 = vmax.f32 %v1249_v12, 0.0  ;;  %v1259_v8 = vadd.f32 %v15021_v43, %v1258_v41 }
 0x15b   : > { %1422 = vmatprep.mubr.f32.mxu1 %v15059_v56  ;;  %1583 = vmatprep.mubr.f32.mxu0 %v15059_v56  ;;  %20271 = vst [vmem:[#allocation78_spill] sm:$0xff] %v15073_v45 }
 0x15c   : > { %v10416_v0 = vpop.f32.mrb[10].mxu0  ;;  %v1305_v12 = vmax.f32 %v1259_v8, 0.0  ;;  %v892_v8 = vld [vmem:[%s14999_s22 + $0x58] sm:$0xff] }
 0x15d   : > { %v1268_v36 = vpop.f32.mrb[11].mxu0 }
 0x15e   : > { %1423 = vmatmul.mubr.f32.gmra.mrb[8].mxu1 %v1301_v23  ;;  %1584 = vmatmul.mubr.f32.gmra.mrb[24].mxu0 %v1301_v23  ;;  %v1254_v23 = vadd.f32 %v10410_v31, %v15021_v43  ;;  %v1264_v31 = vadd.f32 %v10413_v18, %v15021_v43 }
 0x15f   : > { %1428 = vmatprep.mubr.f32.mxu1 %v15067_v13  ;;  %1589 = vmatprep.mubr.f32.mxu0 %v15067_v13 }
 0x160   : > { %v10419_v16 = vpop.f32.mrb[12].mxu0  ;;  %v1304_v2 = vmax.f32 %v1254_v23, 0.0  ;;  %v1306_v41 = vmax.f32 %v1264_v31, 0.0  ;;  %v894_v31 = vld [vmem:[%s14999_s22 + $0x68] sm:$0xff] }
 0x161   : > { %v1278_v6 = vpop.f32.mrb[13].mxu0 }
 0x162   : > { %1429 = vmatmul.mubr.f32.gmra.mrb[10].mxu1 %v1302_v59  ;;  %1590 = vmatmul.mubr.f32.gmra.mrb[26].mxu0 %v1302_v59  ;;  %v889_v59 = vld [vmem:[%s14999_s22 + $0x40] sm:$0xff]  ;;  %v1279_v18 = vadd.f32 %v15021_v43, %v1278_v6 }
 0x163   : > { %1434 = vmatprep.mubr.f32.mxu1 %v15073_v45  ;;  %1595 = vmatprep.mubr.f32.mxu0 %v15073_v45  ;;  %v890_v45 = vld [vmem:[%s14999_s22 + $0x48] sm:$0xff] }
 0x164   : > { %v10422_v22 = vpop.f32.mrb[14].mxu0 }
 0x165   : > { %v1288_v17 = vpop.f32.mrb[15].mxu0 }
 0x166   : > { %1435 = vmatmul.mubr.f32.gmra.mrb[12].mxu1 %v1303_v51  ;;  %1596 = vmatmul.mubr.f32.gmra.mrb[28].mxu0 %v1303_v51  ;;  %v1269_v51 = vadd.f32 %v15021_v43, %v1268_v36 }
 0x167   : > { %1440 = vmatprep.mubr.f32.mxu1 %v888_v5  ;;  %1601 = vmatprep.mubr.f32.mxu0 %v888_v5  ;;  %v891_v5 = vld [vmem:[%s14999_s22 + $0x50] sm:$0xff] }
 0x168   : > { %v1307_v23 = vmax.f32 %v1269_v51, 0.0  ;;  %v895_v51 = vld [vmem:[%s14999_s22 + $0x70] sm:$0xff] }
 0x16a   : > { %1441 = vmatmul.mubr.f32.gmra.mrb[14].mxu1 %v1304_v2  ;;  %1602 = vmatmul.mubr.f32.gmra.mrb[30].mxu0 %v1304_v2  ;;  %v1274_v2 = vadd.f32 %v10416_v0, %v15021_v43  ;;  %v1289_v0 = vadd.f32 %v15021_v43, %v1288_v17 }
 0x16b   : > { %1446 = vmatprep.mubr.f32.mxu1 %v889_v59  ;;  %1607 = vmatprep.mubr.f32.mxu0 %v889_v59  ;;  %v1309_v59 = vmax.f32 %v1279_v18, 0.0  ;;  %v9389_v18 = vld [vmem:[%s14386_s12 + $0xa8] sm:$0xff] }
 0x16c   : > { %v1308_v36 = vmax.f32 %v1274_v2, 0.0  ;;  %v9385_v2 = vld [vmem:[%s14386_s12 + $0x88] sm:$0xff] }
 0x16e   : > { %1447 = vmatmul.mubr.f32.gmra.mrb[16].mxu1 %v1305_v12  ;;  %1608 = vmatmul.mubr.f32.gmra.mrb[32].mxu0 %v1305_v12  ;;  %v1284_v12 = vadd.f32 %v10419_v16, %v15021_v43  ;;  %v1294_v16 = vadd.f32 %v10422_v22, %v15021_v43  ;;  %v9387_v22 = vld [vmem:[%s14386_s12 + $0x98] sm:$0xff]  ;;  %v9388_v43 = vld [vmem:[%s14386_s12 + $0xa0] sm:$0xff] }
 0x16f   : > { %1452 = vmatprep.mubr.f32.mxu1 %v890_v45  ;;  %1613 = vmatprep.mubr.f32.mxu0 %v890_v45  ;;  %v893_v45 = vld [vmem:[%s14999_s22 + $0x60] sm:$0xff] }
 0x170   : > { %v1310_v6 = vmax.f32 %v1284_v12, 0.0  ;;  %v1312_v17 = vmax.f32 %v1294_v16, 0.0  ;;  %v9393_v12 = vld [vmem:[%s14386_s12 + $0xc8] sm:$0xff]  ;;  %v9399_v16 = vld [vmem:[%s14386_s12 + $0xf8] sm:$0xff] }
 0x172   : > { %1453 = vmatmul.mubr.f32.gmra.mrb[18].mxu1 %v1306_v41  ;;  %1614 = vmatmul.mubr.f32.gmra.mrb[34].mxu0 %v1306_v41  ;;  %v1311_v41 = vmax.f32 %v1289_v0, 0.0  ;;  %v9395_v0 = vld [vmem:[%s14386_s12 + $0xd8] sm:$0xff] }
 0x173   : > { %1458 = vmatprep.mubr.f32.mxu1 %v891_v5  ;;  %1619 = vmatprep.mubr.f32.mxu0 %v891_v5  ;;  %v896_v5 = vld [vmem:[%s14999_s22 + $0x78] sm:$0xff] }
 0x176   : > { %1459 = vmatmul.mubr.f32.gmra.mrb[20].mxu1 %v1307_v23  ;;  %1620 = vmatmul.mubr.f32.gmra.mrb[36].mxu0 %v1307_v23  ;;  %v9384_v23 = vld [vmem:[%s14386_s12 + $0x80] sm:$0xff] }
 0x177   : > { %1464 = vmatprep.mubr.f32.mxu1 %v892_v8  ;;  %1625 = vmatprep.mubr.f32.mxu0 %v892_v8  ;;  %v9386_v8 = vld [vmem:[%s14386_s12 + $0x90] sm:$0xff] }
 0x17a   : > { %1465 = vmatmul.mubr.f32.gmra.mrb[22].mxu1 %v1308_v36  ;;  %1626 = vmatmul.mubr.f32.gmra.mrb[38].mxu0 %v1308_v36  ;;  %v9390_v36 = vld [vmem:[%s14386_s12 + $0xb0] sm:$0xff] }
 0x17b   : > { %1470 = vmatprep.mubr.f32.mxu1 %v893_v45  ;;  %1631 = vmatprep.mubr.f32.mxu0 %v893_v45  ;;  %v9391_v45 = vld [vmem:[%s14386_s12 + $0xb8] sm:$0xff] }
 0x17e   : > { %1471 = vmatmul.mubr.f32.gmra.mrb[24].mxu1 %v1309_v59  ;;  %1632 = vmatmul.mubr.f32.gmra.mrb[40].mxu0 %v1309_v59  ;;  %v9392_v59 = vld [vmem:[%s14386_s12 + $0xc0] sm:$0xff] }
 0x17f   : > { %1476 = vmatprep.mubr.f32.mxu1 %v894_v31  ;;  %1637 = vmatprep.mubr.f32.mxu0 %v894_v31  ;;  %v9394_v31 = vld [vmem:[%s14386_s12 + $0xd0] sm:$0xff] }
 0x182   : > { %1477 = vmatmul.mubr.f32.gmra.mrb[26].mxu1 %v1310_v6  ;;  %1638 = vmatmul.mubr.f32.gmra.mrb[42].mxu0 %v1310_v6  ;;  %v9396_v6 = vld [vmem:[%s14386_s12 + $0xe0] sm:$0xff] }
 0x183   : > { %1482 = vmatprep.mubr.f32.mxu1 %v895_v51  ;;  %1643 = vmatprep.mubr.f32.mxu0 %v895_v51  ;;  %v9397_v51 = vld [vmem:[%s14386_s12 + $0xe8] sm:$0xff] }
 0x186   : > { %1483 = vmatmul.mubr.f32.gmra.mrb[28].mxu1 %v1311_v41  ;;  %1644 = vmatmul.mubr.f32.gmra.mrb[44].mxu0 %v1311_v41  ;;  %v9398_v41 = vld [vmem:[%s14386_s12 + $0xf0] sm:$0xff] }
 0x187   : > { %1488 = vmatprep.mubr.f32.mxu1 %v896_v5  ;;  %1649 = vmatprep.mubr.f32.mxu0 %v896_v5  ;;  %v1051_v5 = vld [vmem:[%s19858_s4 + $0x20] sm:$0xff] }
 0x18a   : > { %1489 = vmatmul.mubr.f32.gmra.mrb[30].mxu1 %v1312_v17  ;;  %1650 = vmatmul.mubr.f32.gmra.mrb[46].mxu0 %v1312_v17  ;;  %v1052_v17 = vld [vmem:[%s19858_s4 + $0x28] sm:$0xff] }
 0x18b   : > { %10491 = vmatprep.mubr.msk.f32.mxu0 %vm1103_vm0, %v9384_v23  ;;  %v15156_v23 = vpack.c.bf16 %v1052_v17, %v1051_v5  ;;  %v1314_v5 = vlaneseq }
 0x18d   : > { %20272 = vst [vmem:[#allocation79_spill] sm:$0xff] %v15156_v23  ;;  %11272 = vmatprep.subr.bf16.mxu1 %v15156_v23  ;;  %v15220_v17 = vshrl.u32 %v1314_v5, 7 }
 0x18e   : > { %10492 = vmatmul.mubr.msk.f32.vlgmr.msra.gmra.mrb[48].mxu0 %vm1103_vm0, %v9385_v2  ;;  %11274 = vmatpush3.bf16.msra.mxu1 %v15156_v23  ;;  %v1053_v2 = vld [vmem:[%s19858_s4 + $0x30] sm:$0xff] }
 0x18f   : > { %10494 = vmatprep.mubr.msk.f32.mxu0 %vm1103_vm0, %v9386_v8  ;;  %11374 = vmatpush1.bf16.msra.mxu0 %v14445_v30  ;;  %v1054_v8 = vld [vmem:[%s19858_s4 + $0x38] sm:$0xff] }
 0x190   : > { %11376 = vmatprep.subr.bf16.mxu0 %v14455_v33 }
 0x192   : > { %10495 = vmatmul.mubr.msk.f32.gmra.mrb[50].mxu0 %vm1103_vm0, %v9387_v22  ;;  %v15169_v22 = vpack.c.bf16 %v1054_v8, %v1053_v2  ;;  %v1316_v2 = vsub.s32 0, %v15220_v17  ;;  %v15226_v8 = vld [vmem:[%s19859_s5 + $0x1] ss:$4 sm:$0xf] }
 0x193   : > { %10497 = vmatprep.mubr.msk.f32.mxu0 %vm1103_vm0, %v9388_v43  ;;  %11378 = vmatpush1.bf16.msra.mxu0 %v14490_v46  ;;  %v1055_v43 = vld [vmem:[%s19858_s4 + $0x40] sm:$0xff] }
 0x194   : > { %11380 = vmatprep.subr.bf16.mxu0 %v14494_v47  ;;  %20273 = vst [vmem:[#allocation80_spill] sm:$0xff] %v15169_v22  ;;  %11276 = vmatprep.subr.bf16.mxu1 %v15169_v22 }
 0x195   : > { %11278 = vmatpush3.bf16.msra.mxu1 %v15169_v22 }
 0x196   : > { %10498 = vmatmul.mubr.msk.f32.gmra.mrb[52].mxu0 %vm1103_vm0, %v9389_v18  ;;  %v1056_v18 = vld [vmem:[%s19858_s4 + $0x48] sm:$0xff] }
 0x197   : > { %10500 = vmatprep.mubr.msk.f32.mxu0 %vm1103_vm0, %v9390_v36  ;;  %11382 = vmatpush1.bf16.msra.mxu0 %v14530_v60  ;;  %v15181_v36 = vpack.c.bf16 %v1056_v18, %v1055_v43  ;;  %v1320_v43 = vsub.s32 1, %v15220_v17  ;;  %v15230_v18 = vrot.slane %v15226_v8, %v1316_v2 }
 0x198   : > { %11384 = vmatprep.subr.bf16.mxu0 %v14534_v61 }
 0x199   : > { %20274 = vst [vmem:[#allocation81_spill] sm:$0xff] %v15181_v36  ;;  %11280 = vmatprep.subr.bf16.mxu1 %v15181_v36 }
 0x19a   : > { %10501 = vmatmul.mubr.msk.f32.gmra.mrb[54].mxu0 %vm1103_vm0, %v9391_v45  ;;  %11282 = vmatpush3.bf16.msra.mxu1 %v15181_v36  ;;  %v1057_v45 = vld [vmem:[%s19858_s4 + $0x50] sm:$0xff] }
 0x19b   : > { %10503 = vmatprep.mubr.msk.f32.mxu0 %vm1103_vm0, %v9392_v59  ;;  %11386 = vmatpush1.bf16.msra.mxu0 %v14570_v14  ;;  %v1058_v59 = vld [vmem:[%s19858_s4 + $0x58] sm:$0xff] }
 0x19c   : > { %11388 = vmatprep.subr.bf16.mxu0 %v14574_v15 }
 0x19e   : > { %10504 = vmatmul.mubr.msk.f32.gmra.mrb[56].mxu0 %vm1103_vm0, %v9393_v12  ;;  %v15195_v12 = vpack.c.bf16 %v1058_v59, %v1057_v45  ;;  %v15233_v45 = vrot.slane %v15226_v8, %v1320_v43 }
 0x19f   : > { %10506 = vmatprep.mubr.msk.f32.mxu0 %vm1103_vm0, %v9394_v31  ;;  %11390 = vmatpush1.bf16.msra.mxu0 %v14610_v32  ;;  %v1059_v31 = vld [vmem:[%s19858_s4 + $0x60] sm:$0xff] }
 0x1a0   : > { %11392 = vmatprep.subr.bf16.mxu0 %v14614_v35  ;;  %20275 = vst [vmem:[#allocation82_spill] sm:$0xff] %v15195_v12  ;;  %11284 = vmatprep.subr.bf16.mxu1 %v15195_v12 }
 0x1a1   : > { %11286 = vmatpush3.bf16.msra.mxu1 %v15195_v12 }
 0x1a2   : > { %10507 = vmatmul.mubr.msk.f32.gmra.mrb[58].mxu0 %vm1103_vm0, %v9395_v0  ;;  %v1060_v0 = vld [vmem:[%s19858_s4 + $0x68] sm:$0xff] }
 0x1a3   : > { %10509 = vmatprep.mubr.msk.f32.mxu0 %vm1103_vm0, %v9396_v6  ;;  %11394 = vmatpush1.bf16.msra.mxu0 %v14650_v53  ;;  %v15205_v6 = vpack.c.bf16 %v1060_v0, %v1059_v31 }
 0x1a4   : > { %11396 = vmatprep.subr.bf16.mxu0 %v14654_v54 }
 0x1a5   : > { %20276 = vst [vmem:[#allocation83_spill] sm:$0xff] %v15205_v6  ;;  %11288 = vmatprep.subr.bf16.mxu1 %v15205_v6 }
 0x1a6   : > { %10510 = vmatmul.mubr.msk.f32.gmra.mrb[60].mxu0 %vm1103_vm0, %v9397_v51  ;;  %11290 = vmatpush3.bf16.msra.mxu1 %v15205_v6  ;;  %v1061_v51 = vld [vmem:[%s19858_s4 + $0x70] sm:$0xff] }
 0x1a7   : > { %10512 = vmatprep.mubr.msk.f32.mxu0 %vm1103_vm0, %v9398_v41  ;;  %11398 = vmatpush1.bf16.msra.mxu0 %v14690_v9  ;;  %v1062_v41 = vld [vmem:[%s19858_s4 + $0x78] sm:$0xff] }
 0x1a8   : > { %11400 = vmatprep.subr.bf16.mxu0 %v14694_v10 }
 0x1aa   : > { %10513 = vmatmul.mubr.msk.f32.gmra.mrb[62].mxu0 %vm1103_vm0, %v9399_v16  ;;  %v15215_v16 = vpack.c.bf16 %v1062_v41, %v1061_v51 }
 0x1ab   : > { %11402 = vmatpush1.bf16.msra.mxu0 %v14729_v37 }
 0x1ac   : > { %11404 = vmatprep.subr.bf16.mxu0 %v14733_v39  ;;  %20277 = vst [vmem:[#allocation84_spill] sm:$0xff] %v15215_v16  ;;  %11292 = vmatprep.subr.bf16.mxu1 %v15215_v16 }
 0x1ad   : > { %11294 = vmatpush3.bf16.msra.mxu1 %v15215_v16 }
 0x1ae   : > { %11308 = vmatprep.subr.bf16.mxu1 %v14389_v11 }
 0x1af   : > { %11406 = vmatpush1.bf16.msra.mxu0 %v14766_v58  ;;  %v1328_v58 = vsub.s32 3, %v15220_v17 }
 0x1b0   : > { %11408 = vmatprep.subr.bf16.mxu0 %v14770_v63 }
 0x1b3   : > { %11410 = vmatpush1.bf16.msra.mxu0 %v14802_v26 }
 0x1b4   : > { %11412 = vmatprep.subr.bf16.mxu0 %v14806_v27 }
 0x1b7   : > { %11414 = vmatpush1.bf16.msra.mxu0 %v14838_v57 }
 0x1b8   : > { %11416 = vmatprep.subr.bf16.mxu0 %v14842_v1 }
 0x1bb   : > { %11418 = vmatpush1.bf16.msra.mxu0 %v14874_v44 }
 0x1bc   : > { %11420 = vmatprep.subr.bf16.mxu0 %v14878_v49 }
 0x1bf   : > { %11422 = vmatpush1.bf16.msra.mxu0 %v14910_v42 }
 0x1c0   : > { %11424 = vmatprep.subr.bf16.mxu0 %v14914_v19 }
 0x1c3   : > { %11426 = vmatpush1.bf16.msra.mxu0 %v14940_v24 }
 0x1c4   : > { %11428 = vmatprep.subr.bf16.mxu0 %v14944_v29 }
 0x1c7   : > { %11430 = vmatpush1.bf16.msra.mxu0 %v14956_v28 }
 0x1c8   : > { %11432 = vmatprep.subr.bf16.mxu0 %v14979_v20 }
 0x1cb   : > { %11434 = vmatpush1.bf16.msra.mxu0 %v14993_v4 }
 0x1cc   : > { %11468 = vmatprep.subr.bf16.mxu0 %v14363_v3 }
 0x221   : > { %v1400_v59 = vpop.f32.mrb[0].mxu1  ;;  %v15235_v31 = vpop.f32.mrb[16].mxu0 }
 0x222   : > { %v1401_v0 = vadd.f32 %v1400_v59, %v15230_v18  ;;  %v1402_v51 = vpop.f32.mrb[1].mxu1  ;;  %v15238_v41 = vpop.f32.mrb[17].mxu0 }
 0x223   : > { %v1403_v4 = vadd.f32 %v1402_v51, %v15233_v45 }
 0x224   : > { %v9351_v5 = vmul.f32 -1.442695, %v1401_v0 }
 0x225   : > { %v1406_v20 = vpop.f32.mrb[2].mxu1  ;;  %v15241_v28 = vpop.f32.mrb[18].mxu0  ;;  %v9367_v19 = vmul.f32 -1.442695, %v1403_v4 }
 0x226   : > { %12590 = vpow2.f32 %v9351_v5  ;;  %v1407_v2 = vadd.f32 %v1406_v20, %v15230_v18  ;;  %v1408_v29 = vpop.f32.mrb[3].mxu1  ;;  %v15244_v43 = vpop.f32.mrb[19].mxu0 }
 0x227   : > { %v1409_v24 = vadd.f32 %v1408_v29, %v15233_v45 }
 0x228   : > { %v9352_v42 = vmul.f32 -1.442695, %v1407_v2 }
 0x229   : > { %v1412_v59 = vpop.f32.mrb[4].mxu1  ;;  %v15247_v49 = vpop.f32.mrb[20].mxu0  ;;  %v9368_v1 = vmul.f32 -1.442695, %v1409_v24 }
 0x22a   : > { %12592 = vpow2.f32 %v9352_v42  ;;  %v1413_v0 = vadd.f32 %v1412_v59, %v15230_v18  ;;  %v1414_v51 = vpop.f32.mrb[5].mxu1  ;;  %v15250_v44 = vpop.f32.mrb[21].mxu0 }
 0x22b   : > { %v1415_v5 = vadd.f32 %v1414_v51, %v15233_v45  ;;  %12594 = vpow2.f32 %v9367_v19 }
 0x22c   : > { %v9353_v20 = vmul.f32 -1.442695, %v1413_v0 }
 0x22d   : > { %v9369_v57 = vmul.f32 -1.442695, %v1415_v5  ;;  %v1418_v27 = vpop.f32.mrb[6].mxu1  ;;  %v15253_v26 = vpop.f32.mrb[22].mxu0 }
 0x22e   : > { %12596 = vpow2.f32 %v9353_v20  ;;  %v1419_v4 = vadd.f32 %v1418_v27, %v15230_v18  ;;  %v1420_v29 = vpop.f32.mrb[7].mxu1  ;;  %v15256_v2 = vpop.f32.mrb[23].mxu0 }
 0x22f   : > { %12598 = vpow2.f32 %v9368_v1  ;;  %v1421_v24 = vadd.f32 %v1420_v29, %v15233_v45 }
 0x230   : > { %v12591_v42 = vpop.eup %12590  ;;  %12600 = vpow2.f32 %v9369_v57  ;;  %v9354_v59 = vmul.f32 -1.442695, %v1419_v4 }
 0x231   : > { %v1704_v63 = vadd.f32 1.0, %v12591_v42  ;;  %v1424_v51 = vpop.f32.mrb[8].mxu1  ;;  %v15259_v19 = vpop.f32.mrb[24].mxu0  ;;  %v9370_v1 = vmul.f32 -1.442695, %v1421_v24  ;;  %v15273_v24 = vrot.slane %v15226_v8, %v1328_v58 }
 0x232   : > { %12602 = vpow2.f32 %v9354_v59  ;;  %v1425_v0 = vadd.f32 %v1424_v51, %v15230_v18  ;;  %v1426_v5 = vpop.f32.mrb[9].mxu1  ;;  %v15262_v20 = vpop.f32.mrb[25].mxu0  ;;  %v1324_v59 = vsub.s32 2, %v15220_v17 }
 0x233   : > { %12604 = vrcp.f32 %v1704_v63  ;;  %v1427_v57 = vadd.f32 %v1426_v5, %v15233_v45 }
 0x234   : > { %v12593_v27 = vpop.eup %12592  ;;  %v9355_v39 = vmul.f32 -1.442695, %v1425_v0  ;;  %v15278_v17 = vrot.slane %v15226_v8, %v1324_v59 }
 0x235   : > { %v1705_v4 = vadd.f32 1.0, %v12593_v27  ;;  %v1430_v29 = vpop.f32.mrb[10].mxu1  ;;  %v15266_v42 = vpop.f32.mrb[26].mxu0  ;;  %v9371_v0 = vmul.f32 -1.442695, %v1427_v57 }
 0x236   : > { %v12595_v37 = vpop.eup %12594  ;;  %12606 = vpow2.f32 %v9355_v39  ;;  %v1431_v51 = vadd.f32 %v1430_v29, %v15230_v18  ;;  %v1432_v10 = vpop.f32.mrb[11].mxu1 }
 0x237   : > { %v15270_v9 = vpop.f32.mrb[27].mxu0  ;;  %12608 = vrcp.f32 %v1705_v4  ;;  %v1800_v11 = vadd.f32 1.0, %v12595_v37  ;;  %v1433_v58 = vadd.f32 %v1432_v10, %v15233_v45  ;;  %v1564_v37 = vadd.f32 %v15238_v41, %v15273_v24 }
 0x238   : > { %v12597_v63 = vpop.eup %12596  ;;  %12610 = vpow2.f32 %v9370_v1  ;;  %v9356_v5 = vmul.f32 -1.442695, %v1431_v51 }
 0x239   : > { %v12599_v27 = vpop.eup %12598  ;;  %v1706_v54 = vadd.f32 1.0, %v12597_v63  ;;  %v1436_v53 = vpop.f32.mrb[12].mxu1  ;;  %v9372_v41 = vmul.f32 -1.442695, %v1433_v58  ;;  %v1568_v58 = vadd.f32 %v15241_v28, %v15278_v17 }
 0x23a   : > { %v15275_v16 = vpop.f32.mrb[28].mxu0  ;;  %v12601_v39 = vpop.eup %12600  ;;  %12612 = vpow2.f32 %v9356_v5  ;;  %v1437_v4 = vadd.f32 %v1436_v53, %v15230_v18  ;;  %v1801_v57 = vadd.f32 1.0, %v12599_v27  ;;  %v1562_v53 = vadd.f32 %v15235_v31, %v15278_v17 }
 0x23b   : > { %v1438_v29 = vpop.f32.mrb[13].mxu1  ;;  %v15281_v35 = vpop.f32.mrb[29].mxu0  ;;  %12614 = vrcp.f32 %v1706_v54  ;;  %v1802_v8 = vadd.f32 1.0, %v12601_v39  ;;  %v1570_v39 = vadd.f32 %v15244_v43, %v15273_v24 }
 0x23c   : > { %v12603_v1 = vpop.eup %12602  ;;  %12616 = vpow2.f32 %v9371_v0  ;;  %v9357_v51 = vmul.f32 -1.442695, %v1437_v4  ;;  %v1439_v0 = vadd.f32 %v1438_v29, %v15233_v45 }
 0x23d   : > { %v12605_v63 = vpop.eup %12604  ;;  %12618 = vrcp.f32 %v1800_v11  ;;  %v1707_v59 = vadd.f32 1.0, %v12603_v1  ;;  %v1442_v5 = vpop.f32.mrb[14].mxu1 }
 0x23e   : > { %v15286_v32 = vpop.f32.mrb[30].mxu0  ;;  %v1848_v54 = vmul.f32 %v12605_v63, %v1564_v37  ;;  %12620 = vpow2.f32 %v9357_v51  ;;  %v1443_v10 = vadd.f32 %v1442_v5, %v15230_v18  ;;  %v1444_v6 = vpop.f32.mrb[15].mxu1 }
 0x23f   : > { %v15291_v15 = vpop.f32.mrb[31].mxu0  ;;  %12622 = vrcp.f32 %v1707_v59  ;;  %v1445_v43 = vadd.f32 %v1444_v6, %v15233_v45 }
 0x240   : > { %v12607_v11 = vpop.eup %12606  ;;  %v1864_v27 = vadd.f32 %v1848_v54, %v1562_v53  ;;  %12624 = vrcp.f32 %v1801_v57  ;;  %v9358_v1 = vmul.f32 -1.442695, %v1443_v10  ;;  %v9373_v57 = vmul.f32 -1.442695, %v1439_v0 }
 0x241   : > { %v12609_v4 = vpop.eup %12608  ;;  %12626 = vrcp.f32 %v1802_v8  ;;  %v1708_v31 = vadd.f32 1.0, %v12607_v11  ;;  %v1448_v37 = vpop.f32.mrb[16].mxu1  ;;  %v1576_v54 = vadd.f32 %v15250_v44, %v15273_v24  ;;  %v9374_v44 = vmul.f32 -1.442695, %v1445_v43 }
 0x242   : > { %v15296_v51 = vpop.f32.mrb[32].mxu0  ;;  %v12611_v63 = vpop.eup %12610  ;;  %12628 = vtanh.f32 %v1864_v27  ;;  %v1849_v59 = vmul.f32 %v12609_v4, %v1570_v39 }
 0x243   : > { %v1450_v29 = vpop.f32.mrb[17].mxu1  ;;  %v15300_v5 = vpop.f32.mrb[33].mxu0  ;;  %12630 = vpow2.f32 %v9372_v41  ;;  %v1803_v11 = vadd.f32 1.0, %v12611_v63  ;;  %v1574_v41 = vadd.f32 %v15247_v49, %v15278_v17 }
 0x244   : > { %v12613_v53 = vpop.eup %12612  ;;  %v1865_v8 = vadd.f32 %v1849_v59, %v1568_v58  ;;  %12632 = vrcp.f32 %v1708_v31  ;;  %v1449_v31 = vadd.f32 %v1448_v37, %v15230_v18  ;;  %v1580_v37 = vadd.f32 %v15253_v26, %v15278_v17 }
 0x245   : > { %v12615_v10 = vpop.eup %12614  ;;  %v1709_v27 = vadd.f32 1.0, %v12613_v53  ;;  %12634 = vpow2.f32 %v9358_v1  ;;  %v1454_v14 = vpop.f32.mrb[18].mxu1  ;;  %v1582_v1 = vadd.f32 %v15256_v2, %v15273_v24 }
 0x246   : > { %v15305_v28 = vpop.f32.mrb[34].mxu0  ;;  %v12617_v39 = vpop.eup %12616  ;;  %12636 = vtanh.f32 %v1865_v8  ;;  %v1850_v0 = vmul.f32 %v12615_v10, %v1576_v54  ;;  %v1455_v49 = vadd.f32 %v1454_v14, %v15230_v18 }
 0x247   : > { %v1456_v6 = vpop.f32.mrb[19].mxu1  ;;  %v15309_v4 = vpop.f32.mrb[35].mxu0  ;;  %12638 = vpow2.f32 %v9373_v57  ;;  %v1804_v8 = vadd.f32 1.0, %v12617_v39 }
 0x248   : > { %v12619_v58 = vpop.eup %12618  ;;  %v1866_v59 = vadd.f32 %v1850_v0, %v1574_v41  ;;  %12640 = vrcp.f32 %v1709_v27  ;;  %v9360_v26 = vmul.f32 -1.442695, %v1455_v49 }
 0x249   : > { %v12621_v63 = vpop.eup %12620  ;;  %12642 = vrcp.f32 %v1803_v11  ;;  %v1460_v54 = vpop.f32.mrb[20].mxu1  ;;  %v9359_v11 = vmul.f32 -1.442695, %v1449_v31 }
 0x24a   : > { %v12623_v53 = vpop.eup %12622  ;;  %v1710_v12 = vadd.f32 1.0, %v12621_v63  ;;  %v15315_v10 = vpop.f32.mrb[36].mxu0  ;;  %12644 = vtanh.f32 %v1866_v59  ;;  %v1461_v14 = vadd.f32 %v1460_v54, %v15230_v18  ;;  %v1588_v63 = vadd.f32 %v15262_v20, %v15273_v24 }
 0x24b   : > { %v12625_v61 = vpop.eup %12624  ;;  %v1851_v57 = vmul.f32 %v12623_v53, %v1582_v1  ;;  %v15319_v43 = vpop.f32.mrb[21].mxu1  ;;  %12646 = vpow2.f32 %v9374_v44  ;;  %v1451_v44 = vadd.f32 %v1450_v29, %v15233_v45  ;;  %v1594_v20 = vadd.f32 %v15270_v9, %v15273_v24 }
 0x24c   : > { %v15321_v41 = vpop.f32.mrb[37].mxu0  ;;  %v15323_v2 = vpop.eup %12626  ;;  %12648 = vrcp.f32 %v1710_v12  ;;  %v9361_v36 = vmul.f32 -1.442695, %v1461_v14  ;;  %v1457_v9 = vadd.f32 %v1456_v6, %v15233_v45 }
 0x24d   : > { %v12629_v27 = vpop.eup %12628  ;;  %v1867_v39 = vadd.f32 %v1851_v57, %v1580_v37  ;;  %12650 = vrcp.f32 %v1804_v8  ;;  %v1466_v59 = vpop.f32.mrb[22].mxu1  ;;  %v1586_v8 = vadd.f32 %v15259_v19, %v15278_v17 }
 0x24e   : > { %v12631_v0 = vpop.eup %12630  ;;  %v15328_v1 = vpop.f32.mrb[38].mxu0  ;;  %v1896_v53 = vsub.f32 %v15004_v50, %v12629_v27  ;;  %v1467_v46 = vadd.f32 %v1466_v59, %v15230_v18 }
 0x24f   : > { %v12633_v60 = vpop.eup %12632  ;;  %12652 = vtanh.f32 %v1867_v39  ;;  %v15332_v31 = vpop.f32.mrb[23].mxu1  ;;  %v1805_v57 = vadd.f32 1.0, %v12631_v0 }
 0x250   : > { %v15334_v12 = vpop.f32.mrb[39].mxu0  ;;  %v12635_v54 = vpop.eup %12634  ;;  %v1852_v37 = vmul.f32 %v12633_v60, %v1588_v63  ;;  %12654 = vpow2.f32 %v9359_v11  ;;  %v1912_v39 = vmul.f32 %v12619_v58, %v1896_v53  ;;  %v9375_v63 = vmul.f32 -1.442695, %v1451_v44 }
 0x251   : > { %v12637_v49 = vpop.eup %12636  ;;  %v1711_v50 = vadd.f32 1.0, %v12635_v54  ;;  %12656 = vpow2.f32 %v9360_v26  ;;  %v1472_v22 = vpop.f32.mrb[24].mxu1  ;;  %v1592_v26 = vadd.f32 %v15266_v42, %v15278_v17  ;;  %v1600_v44 = vadd.f32 %v15281_v35, %v15273_v24 }
 0x252   : > { %v12639_v47 = vpop.eup %12638  ;;  %v1868_v29 = vadd.f32 %v1852_v37, %v1586_v8  ;;  %v15341_v33 = vpop.f32.mrb[40].mxu0  ;;  %v1897_v19 = vsub.f32 %v15032_v40, %v12637_v49  ;;  %v15349_v58 = vadd.f32 %v12629_v27, %v1912_v39  ;;  %v9362_v8 = vmul.f32 -1.442695, %v1467_v46 }
 0x253   : > { %v12641_v60 = vpop.eup %12640  ;;  %12658 = vrcp.f32 %v1711_v50  ;;  %v15345_v11 = vpop.f32.mrb[25].mxu1  ;;  %v1806_v40 = vadd.f32 1.0, %v12639_v47  ;;  %v1598_v47 = vadd.f32 %v15275_v16, %v15278_v17  ;;  %v9376_v35 = vmul.f32 -1.442695, %v1457_v9 }
 0x254   : > { %v15347_v0 = vpop.f32.mrb[41].mxu0  ;;  %v15351_v14 = vpop.eup %12642  ;;  %12660 = vtanh.f32 %v1868_v29  ;;  %v1853_v59 = vmul.f32 %v12641_v60, %v1594_v20  ;;  %10455 = vmatprep.mubr.f32.mxu1 %v15349_v58  ;;  %2560 = vmatprep.mubr.f32.mxu0 %v15349_v58  ;;  %v1913_v6 = vmul.f32 %v12625_v61, %v1897_v19 }
 0x255   : > { %v12645_v53 = vpop.eup %12644  ;;  %12662 = vrcp.f32 %v1805_v57  ;;  %v1478_v37 = vpop.f32.mrb[26].mxu1 }
 0x256   : > { %v12647_v27 = vpop.eup %12646  ;;  %v1869_v54 = vadd.f32 %v1853_v59, %v1592_v26  ;;  %12664 = vpow2.f32 %v9361_v36  ;;  %v15359_v50 = vpop.f32.mrb[42].mxu0  ;;  %v1898_v42 = vsub.f32 %v15040_v55, %v12645_v53  ;;  %v15368_v61 = vadd.f32 %v12637_v49, %v1913_v6 }
 0x257   : > { %v12649_v20 = vpop.eup %12648  ;;  %12666 = vpow2.f32 %v9375_v63  ;;  %v15364_v57 = vpop.f32.mrb[27].mxu1  ;;  %v1463_v36 = vadd.f32 %v15319_v43, %v15233_v45  ;;  %v1473_v55 = vadd.f32 %v1472_v22, %v15230_v18  ;;  %v1807_v9 = vadd.f32 1.0, %v12647_v27 }
 0x258   : > { %v15366_v39 = vpop.f32.mrb[43].mxu0  ;;  %v15370_v29 = vpop.eup %12650  ;;  %12668 = vtanh.f32 %v1869_v54  ;;  %v1854_v46 = vmul.f32 %v12649_v20, %v1600_v44  ;;  %10456 = vmatmul.mubr.f32.vlgmr.msra.gmra.mrb[32].mxu1 %v15368_v61  ;;  %v1914_v16 = vmul.f32 %v15323_v2, %v1898_v42  ;;  %v1469_v22 = vadd.f32 %v15332_v31, %v15233_v45 }
 0x259   : > { %v12653_v19 = vpop.eup %12652  ;;  %12670 = vrcp.f32 %v1806_v40  ;;  %11310 = vmatpush1.bf16.msra.mxu1 %v14420_v21  ;;  %v1484_v49 = vpop.f32.mrb[28].mxu1  ;;  %v1606_v6 = vadd.f32 %v15291_v15, %v15273_v24  ;;  %v9377_v27 = vmul.f32 -1.442695, %v1463_v36  ;;  %v9363_v54 = vmul.f32 -1.442695, %v1473_v55 }
 0x25a   : > { %v12655_v60 = vpop.eup %12654  ;;  %v1870_v63 = vadd.f32 %v1854_v46, %v1598_v47  ;;  %12672 = vpow2.f32 %v9362_v8  ;;  %v15378_v26 = vpop.f32.mrb[44].mxu0  ;;  %v1899_v59 = vsub.f32 %v15050_v7, %v12653_v19  ;;  %11312 = vmatprep.subr.bf16.mxu1 %v14431_v25  ;;  %v1479_v42 = vadd.f32 %v1478_v37, %v15230_v18 }
 0x25b   : > { %v1712_v43 = vadd.f32 1.0, %v12655_v60  ;;  %12674 = vpow2.f32 %v9376_v35  ;;  %v15384_v40 = vpop.f32.mrb[29].mxu1  ;;  %v15386_v2 = vpop.f32.mrb[45].mxu0  ;;  %v15391_v20 = vadd.f32 %v12645_v53, %v1914_v16  ;;  %v1604_v47 = vadd.f32 %v15286_v32, %v15278_v17 }
 0x25c   : > { %v12657_v44 = vpop.eup %12656  ;;  %12676 = vtanh.f32 %v1870_v63  ;;  %v1915_v15 = vmul.f32 %v15351_v14, %v1899_v59  ;;  %v9378_v55 = vmul.f32 -1.442695, %v1469_v22  ;;  %v1475_v14 = vadd.f32 %v15345_v11, %v15233_v45 }
 0x25d   : > { %v12659_v8 = vpop.eup %12658  ;;  %12678 = vrcp.f32 %v1712_v43  ;;  %v1713_v7 = vadd.f32 1.0, %v12657_v44  ;;  %11314 = vmatpush1.bf16.msra.mxu1 %v14457_v34  ;;  %v1490_v46 = vpop.f32.mrb[30].mxu1  ;;  %10458 = vmatprep.mubr.f32.mxu1 %v15391_v20  ;;  %v9364_v59 = vmul.f32 -1.442695, %v1479_v42  ;;  %v1485_v44 = vadd.f32 %v1484_v49, %v15230_v18 }
 0x25e   : > { %v12661_v31 = vpop.eup %12660  ;;  %12680 = vrcp.f32 %v1807_v9  ;;  %v1855_v35 = vmul.f32 %v12659_v8, %v1606_v6  ;;  %v15396_v60 = vpop.f32.mrb[46].mxu0  ;;  %11316 = vmatprep.subr.bf16.mxu1 %v14468_v38  ;;  %v15409_v6 = vadd.f32 %v12653_v19, %v1915_v15  ;;  %v15421_v19 = vld [vmem:[%s19859_s5] ss:$0 sm:$0xff] }
 0x25f   : > { %v12663_v36 = vpop.eup %12662  ;;  %12682 = vrcp.f32 %v1713_v7  ;;  %v15400_v53 = vpop.f32.mrb[31].mxu1  ;;  %v1900_v32 = vsub.f32 %v15059_v56, %v12661_v31 }
 0x260   : > { %v15402_v37 = vpop.f32.mrb[47].mxu0  ;;  %v12665_v16 = vpop.eup %12664  ;;  %v1871_v63 = vadd.f32 %v1855_v35, %v1604_v47  ;;  %12684 = vpow2.f32 %v9363_v54  ;;  %20278 = vst [vmem:[#allocation85_spill] sm:$0xff] %v15409_v6  ;;  %v1610_v54 = vadd.f32 %v15296_v51, %v15278_v17  ;;  %10459 = vmatmul.mubr.f32.gmra.mrb[34].mxu1 %v15409_v6 }
 0x261   : > { %v12667_v9 = vpop.eup %12666  ;;  %v1714_v43 = vadd.f32 1.0, %v12665_v16  ;;  %12686 = vpow2.f32 %v9377_v27  ;;  %11318 = vmatpush1.bf16.msra.mxu1 %v14496_v48  ;;  %v10493_v8 = vpop.f32.mrb[48].mxu0  ;;  %v1916_v56 = vmul.f32 %v15370_v29, %v1900_v32  ;;  %v1612_v32 = vadd.f32 %v15300_v5, %v15273_v24 }
 0x262   : > { %v12669_v22 = vpop.eup %12668  ;;  %12688 = vtanh.f32 %v1871_v63  ;;  %v2240_v27 = vpop.f32.mrb[49].mxu0  ;;  %11320 = vmatprep.subr.bf16.mxu1 %v14508_v52  ;;  %v15424_v29 = vadd.f32 %v15421_v19, %v10493_v8  ;;  %v1808_v35 = vadd.f32 1.0, %v12667_v9  ;;  %v9379_v16 = vmul.f32 -1.442695, %v1475_v14 }
 0x263   : > { %v12671_v7 = vpop.eup %12670  ;;  %12690 = vpow2.f32 %v9378_v55  ;;  %v1901_v11 = vsub.f32 %v15067_v13, %v12669_v22  ;;  %v15427_v51 = vadd.f32 %v15421_v19, %v2240_v27  ;;  %v15429_v49 = vadd.f32 %v12661_v31, %v1916_v56  ;;  %v20279_v56 = vld [vmem:[#allocation27_spill] sm:$0xff]  ;;  %v20281_v27 = vld [vmem:[#allocation78_spill] sm:$0xff] }
 0x264   : > { %v12673_v42 = vpop.eup %12672  ;;  %12692 = vrcp.f32 %v1714_v43  ;;  %v9365_v63 = vmul.f32 -1.442695, %v1485_v44  ;;  %v1491_v9 = vadd.f32 %v1490_v46, %v15230_v18 }
 0x265   : > { %v12675_v47 = vpop.eup %12674  ;;  %v1715_v13 = vadd.f32 1.0, %v12673_v42  ;;  %12694 = vpow2.f32 %v9364_v59  ;;  %v1917_v15 = vmul.f32 %v12663_v36, %v1901_v11  ;;  %v19994_v43 = vmax.f32 %v15427_v51, 0.0  ;;  %10461 = vmatprep.mubr.f32.mxu1 %v15429_v49  ;;  %11322 = vmatpush1.bf16.msra.mxu1 %v14536_v62  ;;  %v10496_v8 = vpop.f32.mrb[50].mxu0 }
 0x266   : > { %v12677_v55 = vpop.eup %12676  ;;  %11324 = vmatprep.subr.bf16.mxu1 %v20279_v56  ;;  %v2250_v59 = vpop.f32.mrb[51].mxu0  ;;  %v1618_v11 = vadd.f32 %v15309_v4, %v15273_v24  ;;  %v20283_v56 = vld [vmem:[#allocation31_spill] sm:$0xff] }
 0x267   : > { %v12679_v31 = vpop.eup %12678  ;;  %12696 = vrcp.f32 %v1715_v13  ;;  %v15438_v36 = vadd.f32 %v12669_v22, %v1917_v15  ;;  %v1902_v5 = vsub.f32 %v20281_v27, %v12677_v55  ;;  %2561 = vmatmul.mubr.f32.vlgmr.msra.gmra.mrb[64].mxu0 %v19994_v43  ;;  %v15446_v42 = vadd.f32 %v15421_v19, %v2250_v59  ;;  %v20282_v43 = vld [vmem:[#allocation30_spill] sm:$0xff] }
 0x268   : > { %v12681_v14 = vpop.eup %12680  ;;  %v1856_v44 = vmul.f32 %v12679_v31, %v1612_v32  ;;  %12698 = vrcp.f32 %v1808_v35  ;;  %v1616_v22 = vadd.f32 %v15305_v28, %v15278_v17  ;;  %v1481_v15 = vadd.f32 %v15364_v57, %v15233_v45  ;;  %2566 = vmatprep.mubr.f32.mxu0 %v15368_v61  ;;  %11470 = vmatpush3.bf16.msra.mxu0 %v14363_v3 }
 0x269   : > { %20280 = vst [vmem:[#allocation86_spill] sm:$0xff] %v15438_v36  ;;  %v12683_v13 = vpop.eup %12682  ;;  %10462 = vmatmul.mubr.f32.gmra.mrb[36].mxu1 %v15438_v36  ;;  %v1918_v4 = vmul.f32 %v12671_v7, %v1902_v5  ;;  %v1809_v27 = vadd.f32 1.0, %v12675_v47  ;;  %12700 = vpow2.f32 %v9365_v63  ;;  %v15456_v46 = vpop.f32.mrb[52].mxu0  ;;  %v9366_v57 = vmul.f32 -1.442695, %v1491_v9 }
 0x26a   : > { %v12685_v32 = vpop.eup %12684  ;;  %v1872_v31 = vadd.f32 %v1856_v44, %v1610_v54  ;;  %v1857_v59 = vmul.f32 %v12683_v13, %v1618_v11  ;;  %11326 = vmatpush1.bf16.msra.mxu1 %v20282_v43  ;;  %12702 = vpow2.f32 %v9379_v16  ;;  %v2260_v7 = vpop.f32.mrb[53].mxu0  ;;  %v20284_v54 = vld [vmem:[#allocation12_spill] sm:$0xff]  ;;  %v15464_v5 = vadd.f32 %v15421_v19, %v10496_v8  ;;  %v13871_v13 = vld [vmem:[%s14999_s22 + $0x38] sm:$0xff]  ;;  %v20288_v16 = vld [vmem:[#allocation14_spill] sm:$0xff] }
 0x26b   : > { %v12687_v28 = vpop.eup %12686  ;;  %v1716_v35 = vadd.f32 1.0, %v12685_v32  ;;  %11328 = vmatprep.subr.bf16.mxu1 %v20283_v56  ;;  %v15460_v62 = vadd.f32 %v12677_v55, %v1918_v4  ;;  %11472 = vmatprep.subr.bf16.mxu0 %v20284_v54  ;;  %v20285_v44 = vmax.f32 %v15424_v29, 0.0  ;;  %v1624_v11 = vadd.f32 %v15321_v41, %v15273_v24  ;;  %v20286_v41 = vld [vmem:[#allocation34_spill] sm:$0xff] }
 0x26c   : > { %v12689_v47 = vpop.eup %12688  ;;  %12704 = vtanh.f32 %v1872_v31  ;;  %v1873_v63 = vadd.f32 %v1857_v59, %v1616_v22  ;;  %v9380_v55 = vmul.f32 -1.442695, %v1481_v15  ;;  %v1622_v8 = vadd.f32 %v15315_v10, %v15278_v17  ;;  %11474 = vmatpush3.bf16.msra.mxu0 %v20284_v54 }
 0x26d   : > { %2567 = vmatmul.mubr.f32.gmra.mrb[66].mxu0 %v20285_v44  ;;  %v12691_v9 = vpop.eup %12690  ;;  %12706 = vrcp.f32 %v1716_v35  ;;  %10464 = vmatprep.mubr.f32.mxu1 %v15460_v62  ;;  %v1903_v22 = vsub.f32 %v13871_v13, %v12689_v47  ;;  %v1630_v32 = vadd.f32 %v15334_v12, %v15273_v24  ;;  %v1487_v31 = vadd.f32 %v15384_v40, %v15233_v45  ;;  %v15481_v15 = vpop.f32.mrb[54].mxu0 }
 0x26e   : > { %2572 = vmatprep.mubr.f32.mxu0 %v15391_v20  ;;  %v12693_v4 = vpop.eup %12692  ;;  %12708 = vtanh.f32 %v1873_v63  ;;  %11330 = vmatpush1.bf16.msra.mxu1 %v20286_v41  ;;  %v1810_v35 = vadd.f32 1.0, %v12687_v28  ;;  %v20287_v63 = vld [vmem:[#allocation35_spill] sm:$0xff]  ;;  %v2270_v10 = vpop.f32.mrb[55].mxu0  ;;  %v20289_v40 = vmax.f32 %v15446_v42, 0.0  ;;  %v15489_v41 = vadd.f32 %v15421_v19, %v2260_v7 }
 0x26f   : > { %v12695_v59 = vpop.eup %12694  ;;  %12710 = vrcp.f32 %v1809_v27  ;;  %v1858_v44 = vmul.f32 %v12693_v4, %v1624_v11  ;;  %11332 = vmatprep.subr.bf16.mxu1 %v20287_v63  ;;  %v1919_v13 = vmul.f32 %v12681_v14, %v1903_v22  ;;  %11476 = vmatprep.subr.bf16.mxu0 %v20288_v16  ;;  %v19997_v56 = vmax.f32 %v15464_v5, 0.0  ;;  %v20291_v22 = vld [vmem:[#allocation38_spill] sm:$0xff] }
 0x270   : > { %v1717_v12 = vadd.f32 1.0, %v12695_v59  ;;  %12712 = vpow2.f32 %v9366_v57  ;;  %v1811_v28 = vadd.f32 1.0, %v12691_v9  ;;  %v1628_v14 = vadd.f32 %v15328_v1, %v15278_v17  ;;  %11478 = vmatpush3.bf16.msra.mxu0 %v20288_v16  ;;  %v20292_v9 = vld [vmem:[#allocation39_spill] sm:$0xff] }
 0x271   : > { %2573 = vmatmul.mubr.f32.gmra.mrb[68].mxu0 %v20289_v40  ;;  %v12697_v43 = vpop.eup %12696  ;;  %v1874_v27 = vadd.f32 %v1858_v44, %v1622_v8  ;;  %12714 = vpow2.f32 %v9380_v55  ;;  %v15492_v11 = vadd.f32 %v12689_v47, %v1919_v13  ;;  %v15498_v4 = vpop.f32.mrb[56].mxu0  ;;  %v9381_v8 = vmul.f32 -1.442695, %v1487_v31 }
 0x272   : > { %2578 = vmatprep.mubr.f32.mxu0 %v15409_v6  ;;  %v1859_v57 = vmul.f32 %v12697_v43, %v1630_v32  ;;  %12716 = vrcp.f32 %v1717_v12  ;;  %11334 = vmatpush1.bf16.msra.mxu1 %v20291_v22  ;;  %v12699_v7 = vpop.eup %12698  ;;  %v1493_v47 = vadd.f32 %v15400_v53, %v15233_v45  ;;  %v15505_v55 = vpop.f32.mrb[57].mxu0  ;;  %v15509_v32 = vadd.f32 %v15421_v19, %v15456_v46  ;;  %v20293_v53 = vld [vmem:[#allocation15_spill] sm:$0xff]  ;;  %v20294_v46 = vld [vmem:[#allocation42_spill] sm:$0xff] }
 0x273   : > { %20290 = vst [vmem:[#allocation78_spill] sm:$0xff] %v15492_v11  ;;  %12718 = vtanh.f32 %v1874_v27  ;;  %10465 = vmatmul.mubr.f32.gmra.mrb[38].mxu1 %v15492_v11  ;;  %11336 = vmatprep.subr.bf16.mxu1 %v20292_v9  ;;  %v12701_v1 = vpop.eup %12700  ;;  %v1634_v27 = vadd.f32 %v15341_v33, %v15278_v17 }
 0x274   : > { %12720 = vrcp.f32 %v1810_v35  ;;  %v1875_v43 = vadd.f32 %v1859_v57, %v1628_v14  ;;  %11544 = vmatprep.subr.bf16.mxu0 %v20293_v53  ;;  %v12703_v59 = vpop.eup %12702  ;;  %v1718_v44 = vadd.f32 1.0, %v12701_v1  ;;  %v1636_v35 = vadd.f32 %v15347_v0, %v15273_v24  ;;  %v20295_v1 = vld [vmem:[#allocation43_spill] sm:$0xff] }
 0x275   : > { %2579 = vmatmul.mubr.f32.gmra.mrb[70].mxu0 %v19997_v56  ;;  %12722 = vrcp.f32 %v1811_v28  ;;  %v15519_v12 = vpop.f32.mrb[58].mxu0  ;;  %v9382_v14 = vmul.f32 -1.442695, %v1493_v47  ;;  %v13872_v28 = vld [vmem:[%s14999_s22 + $0x40] sm:$0xff]  ;;  %v20296_v0 = vmax.f32 %v15489_v41, 0.0  ;;  %v13873_v47 = vld [vmem:[%s14999_s22 + $0x48] sm:$0xff] }
 0x276   : > { %2584 = vmatprep.mubr.f32.mxu0 %v15429_v49  ;;  %v12705_v13 = vpop.eup %12704  ;;  %12724 = vtanh.f32 %v1875_v43  ;;  %11338 = vmatpush1.bf16.msra.mxu1 %v20294_v46  ;;  %v15525_v56 = vpop.f32.mrb[59].mxu0  ;;  %v15530_v46 = vadd.f32 %v15421_v19, %v2270_v10 }
 0x277   : > { %v12707_v40 = vpop.eup %12706  ;;  %12726 = vpow2.f32 %v9381_v8  ;;  %v1904_v57 = vsub.f32 %v13872_v28, %v12705_v13  ;;  %11340 = vmatprep.subr.bf16.mxu1 %v20295_v1  ;;  %v1812_v1 = vadd.f32 1.0, %v12703_v59 }
 0x278   : > { %v12709_v43 = vpop.eup %12708  ;;  %v1860_v31 = vmul.f32 %v12707_v40, %v1636_v35  ;;  %12728 = vrcp.f32 %v1718_v44  ;;  %v1642_v44 = vadd.f32 %v15366_v39, %v15273_v24  ;;  %v20297_v35 = vld [vmem:[#allocation46_spill] sm:$0xff]  ;;  %v15547_v39 = vadd.f32 %v15421_v19, %v15481_v15 }
 0x279   : > { %2585 = vmatmul.mubr.f32.gmra.mrb[72].mxu0 %v20296_v0  ;;  %v12711_v33 = vpop.eup %12710  ;;  %v1920_v8 = vmul.f32 %v12699_v7, %v1904_v57  ;;  %v1905_v22 = vsub.f32 %v13873_v47, %v12709_v43  ;;  %v15538_v40 = vpop.f32.mrb[60].mxu0  ;;  %12730 = vpow2.f32 %v9382_v14  ;;  %v20298_v57 = vld [vmem:[#allocation47_spill] sm:$0xff]  ;;  %v13874_v15 = vld [vmem:[%s14999_s22 + $0x50] sm:$0xff] }
 0x27a   : > { %2590 = vmatprep.mubr.f32.mxu0 %v15438_v36  ;;  %v12713_v28 = vpop.eup %12712  ;;  %v1876_v63 = vadd.f32 %v1860_v31, %v1634_v27  ;;  %11342 = vmatpush1.bf16.msra.mxu1 %v20297_v35  ;;  %v15543_v47 = vpop.f32.mrb[61].mxu0  ;;  %v20299_v31 = vmax.f32 %v15509_v32, 0.0  ;;  %v20306_v35 = vld [vmem:[#allocation55_spill] sm:$0xff] }
 0x27b   : > { %v12715_v10 = vpop.eup %12714  ;;  %v1719_v0 = vadd.f32 1.0, %v12713_v28  ;;  %v15540_v9 = vadd.f32 %v12705_v13, %v1920_v8  ;;  %v1921_v7 = vmul.f32 %v12711_v33, %v1905_v22  ;;  %11344 = vmatprep.subr.bf16.mxu1 %v20298_v57  ;;  %v1640_v22 = vadd.f32 %v15359_v50, %v15278_v17  ;;  %v20301_v28 = vld [vmem:[#allocation50_spill] sm:$0xff] }
 0x27c   : > { %v12717_v59 = vpop.eup %12716  ;;  %12732 = vtanh.f32 %v1876_v63  ;;  %v1813_v57 = vadd.f32 1.0, %v12715_v10  ;;  %v1648_v10 = vadd.f32 %v15386_v2, %v15273_v24  ;;  %v15586_v2 = vadd.f32 %v15421_v19, %v15498_v4 }
 0x27d   : > { %2591 = vmatmul.mubr.f32.gmra.mrb[74].mxu0 %v20299_v31  ;;  %v12719_v14 = vpop.eup %12718  ;;  %v1861_v13 = vmul.f32 %v12717_v59, %v1642_v44  ;;  %12734 = vrcp.f32 %v1719_v0  ;;  %10467 = vmatprep.mubr.f32.mxu1 %v15540_v9  ;;  %v15555_v33 = vadd.f32 %v12709_v43, %v1921_v7  ;;  %v15560_v31 = vpop.f32.mrb[62].mxu0  ;;  %v20302_v44 = vld [vmem:[#allocation51_spill] sm:$0xff]  ;;  %v15570_v59 = vadd.f32 %v15421_v19, %v15505_v55 }
 0x27e   : > { %2596 = vmatprep.mubr.f32.mxu0 %v15460_v62  ;;  %v12721_v63 = vpop.eup %12720  ;;  %12736 = vrcp.f32 %v1812_v1  ;;  %v1906_v8 = vsub.f32 %v13874_v15, %v12719_v14  ;;  %11346 = vmatpush1.bf16.msra.mxu1 %v20301_v28  ;;  %v15564_v43 = vpop.f32.mrb[63].mxu0  ;;  %v20303_v1 = vmax.f32 %v15530_v46, 0.0  ;;  %v1646_v55 = vadd.f32 %v15378_v26, %v15278_v17 }
 0x27f   : > { %20300 = vst [vmem:[#allocation12_spill] sm:$0xff] %v15555_v33  ;;  %v12723_v27 = vpop.eup %12722  ;;  %v1877_v50 = vadd.f32 %v1861_v13, %v1640_v22  ;;  %10468 = vmatmul.mubr.f32.gmra.mrb[40].mxu1 %v15555_v33  ;;  %11348 = vmatprep.subr.bf16.mxu1 %v20302_v44  ;;  %v13875_v22 = vld [vmem:[%s14999_s22 + $0x58] sm:$0xff] }
 0x280   : > { %v12725_v0 = vpop.eup %12724  ;;  %v1922_v7 = vmul.f32 %v12721_v63, %v1906_v8  ;;  %v20305_v8 = vld [vmem:[#allocation54_spill] sm:$0xff] }
 0x281   : > { %2597 = vmatmul.mubr.f32.gmra.mrb[76].mxu0 %v20303_v1  ;;  %v12727_v28 = vpop.eup %12726  ;;  %12738 = vtanh.f32 %v1877_v50  ;;  %v1907_v13 = vsub.f32 %v13875_v22, %v12725_v0  ;;  %v20310_v50 = vld [vmem:[#allocation59_spill] sm:$0xff] }
 0x282   : > { %2602 = vmatprep.mubr.f32.mxu0 %v15492_v11  ;;  %v12729_v44 = vpop.eup %12728  ;;  %v15577_v63 = vadd.f32 %v12719_v14, %v1922_v7  ;;  %11350 = vmatpush1.bf16.msra.mxu1 %v20305_v8  ;;  %12740 = vrcp.f32 %v1813_v57  ;;  %v20307_v14 = vmax.f32 %v15547_v39, 0.0  ;;  %v1814_v7 = vadd.f32 1.0, %v12727_v28 }
 0x283   : > { %v1862_v1 = vmul.f32 %v12729_v44, %v1648_v10  ;;  %v1923_v15 = vmul.f32 %v12723_v27, %v1907_v13  ;;  %11352 = vmatprep.subr.bf16.mxu1 %v20306_v35  ;;  %v12731_v57 = vpop.eup %12730  ;;  %v1654_v44 = vadd.f32 %v15402_v37, %v15273_v24  ;;  %v20309_v10 = vld [vmem:[#allocation58_spill] sm:$0xff]  ;;  %v13876_v13 = vld [vmem:[%s14999_s22 + $0x60] sm:$0xff]  ;;  %v15606_v37 = vadd.f32 %v15421_v19, %v15525_v56 }
 0x284   : > { %20304 = vst [vmem:[#allocation87_spill] sm:$0xff] %v15577_v63  ;;  %10470 = vmatprep.mubr.f32.mxu1 %v15577_v63  ;;  %v15617_v56 = vadd.f32 %v15421_v19, %v15519_v12  ;;  %v15632_v12 = vadd.f32 %v15421_v19, %v15543_v47  ;;  %v20319_v47 = vld [vmem:[#allocation72_spill] sm:$0xff] }
 0x285   : > { %2603 = vmatmul.mubr.f32.gmra.mrb[78].mxu0 %v20307_v14  ;;  %v1878_v22 = vadd.f32 %v1862_v1, %v1646_v55  ;;  %v15591_v26 = vadd.f32 %v12725_v0, %v1923_v15  ;;  %v1652_v0 = vadd.f32 %v15396_v60, %v15278_v17  ;;  %v20311_v55 = vmax.f32 %v15570_v59, 0.0 }
 0x286   : > { %2608 = vmatprep.mubr.f32.mxu0 %v15540_v9  ;;  %v12733_v27 = vpop.eup %12732  ;;  %11354 = vmatpush1.bf16.msra.mxu1 %v20309_v10  ;;  %v19999_v1 = vmax.f32 %v15586_v2, 0.0  ;;  %v20312_v10 = vld [vmem:[#allocation62_spill] sm:$0xff] }
 0x287   : > { %20308 = vst [vmem:[#allocation88_spill] sm:$0xff] %v15591_v26  ;;  %v12735_v4 = vpop.eup %12734  ;;  %12742 = vtanh.f32 %v1878_v22  ;;  %10471 = vmatmul.mubr.f32.gmra.mrb[42].mxu1 %v15591_v26  ;;  %v1908_v14 = vsub.f32 %v13876_v13, %v12733_v27  ;;  %11356 = vmatprep.subr.bf16.mxu1 %v20310_v50  ;;  %v1815_v13 = vadd.f32 1.0, %v12731_v57  ;;  %v19998_v57 = vmax.f32 %v15606_v37, 0.0 }
 0x288   : > { %v12737_v28 = vpop.eup %12736  ;;  %v1863_v15 = vmul.f32 %v12735_v4, %v1654_v44  ;;  %12744 = vrcp.f32 %v1814_v7  ;;  %v20314_v44 = vld [vmem:[#allocation63_spill] sm:$0xff]  ;;  %v13877_v4 = vld [vmem:[%s14999_s22 + $0x68] sm:$0xff] }
 0x289   : > { %2609 = vmatmul.mubr.f32.gmra.mrb[80].mxu0 %v20311_v55  ;;  %v1924_v22 = vmul.f32 %v12737_v28, %v1908_v14  ;;  %v20316_v14 = vld [vmem:[#allocation67_spill] sm:$0xff] }
 0x28a   : > { %2614 = vmatprep.mubr.f32.mxu0 %v15555_v33  ;;  %v1879_v50 = vadd.f32 %v1863_v15, %v1652_v0  ;;  %11358 = vmatpush1.bf16.msra.mxu1 %v20312_v10  ;;  %v20000_v0 = vmax.f32 %v15617_v56, 0.0 }
 0x28b   : > { %v12739_v35 = vpop.eup %12738  ;;  %v15611_v60 = vadd.f32 %v12733_v27, %v1924_v22  ;;  %11360 = vmatprep.subr.bf16.mxu1 %v20314_v44  ;;  %v13878_v22 = vld [vmem:[%s14999_s22 + $0x70] sm:$0xff] }
 0x28c   : > { %12746 = vtanh.f32 %v1879_v50  ;;  %v1909_v55 = vsub.f32 %v13877_v4, %v12739_v35  ;;  %v12741_v7 = vpop.eup %12740  ;;  %v20315_v50 = vld [vmem:[#allocation66_spill] sm:$0xff] }
 0x28d   : > { %20313 = vst [vmem:[#allocation89_spill] sm:$0xff] %v15611_v60  ;;  %2615 = vmatmul.mubr.f32.gmra.mrb[82].mxu0 %v19999_v1  ;;  %10473 = vmatprep.mubr.f32.mxu1 %v15611_v60  ;;  %12748 = vrcp.f32 %v1815_v13 }
 0x28e   : > { %2620 = vmatprep.mubr.f32.mxu0 %v15577_v63  ;;  %v1925_v27 = vmul.f32 %v12741_v7, %v1909_v55  ;;  %11362 = vmatpush1.bf16.msra.mxu1 %v20315_v50  ;;  %v15641_v7 = vadd.f32 %v15421_v19, %v15538_v40  ;;  %v15657_v40 = vadd.f32 %v15421_v19, %v15564_v43 }
 0x28f   : > { %11364 = vmatprep.subr.bf16.mxu1 %v20316_v14 }
 0x290   : > { %v15626_v28 = vadd.f32 %v12739_v35, %v1925_v27  ;;  %v20318_v35 = vld [vmem:[#allocation70_spill] sm:$0xff]  ;;  %v20004_v27 = vmax.f32 %v15632_v12, 0.0  ;;  %v20002_v43 = vmax.f32 %v15657_v40, 0.0 }
 0x291   : > { %2621 = vmatmul.mubr.f32.gmra.mrb[84].mxu0 %v19998_v57  ;;  %v12743_v15 = vpop.eup %12742 }
 0x292   : > { %20317 = vst [vmem:[#allocation90_spill] sm:$0xff] %v15626_v28  ;;  %2626 = vmatprep.mubr.f32.mxu0 %v15591_v26  ;;  %10474 = vmatmul.mubr.f32.gmra.mrb[44].mxu1 %v15626_v28  ;;  %v1910_v13 = vsub.f32 %v13878_v22, %v12743_v15  ;;  %v12745_v4 = vpop.eup %12744  ;;  %v13879_v22 = vld [vmem:[%s14999_s22 + $0x78] sm:$0xff]  ;;  %s9128_s22 = scalar_lea.sflag [#allocation5], %s14361_s15 }
 0x293   : > { %11366 = vmatpush1.bf16.msra.mxu1 %v20318_v35  ;;  %v20321_v35 = vld [vmem:[#allocation74_spill] sm:$0xff] }
 0x294   : > { %v1926_v55 = vmul.f32 %v12745_v4, %v1910_v13  ;;  %11368 = vmatprep.subr.bf16.mxu1 %v20319_v47  ;;  %v20003_v4 = vmax.f32 %v15641_v7, 0.0 }
 0x295   : > { %2627 = vmatmul.mubr.f32.gmra.mrb[86].mxu0 %v20000_v0 }
 0x296   : > { %2632 = vmatprep.mubr.f32.mxu0 %v15611_v60  ;;  %v12747_v57 = vpop.eup %12746  ;;  %v15648_v1 = vadd.f32 %v12743_v15, %v1926_v55  ;;  %v20322_v15 = vld [vmem:[#allocation76_spill] sm:$0xff] }
 0x297   : > { %v1911_v14 = vsub.f32 %v13879_v22, %v12747_v57  ;;  %11370 = vmatpush1.bf16.msra.mxu1 %v20321_v35  ;;  %v12749_v13 = vpop.eup %12748  ;;  %v15666_v22 = vadd.f32 %v15421_v19, %v15560_v31  ;;  %v20324_v19 = vmax.f32 %v15427_v51, 0.0  ;;  %v9464_v31 = vld [vmem:[%s14386_s12 + $0x100] sm:$0xff]  ;;  %v9465_v51 = vld [vmem:[%s14386_s12 + $0x108] sm:$0xff] }
 0x298   : > { %20320 = vst [vmem:[#allocation91_spill] sm:$0xff] %v15648_v1  ;;  %10476 = vmatprep.mubr.f32.mxu1 %v15648_v1  ;;  %11436 = vmatprep.subr.bf16.mxu1 %v20322_v15 }
 0x299   : > { %2633 = vmatmul.mubr.f32.gmra.mrb[88].mxu0 %v20004_v27  ;;  %v1927_v0 = vmul.f32 %v12749_v13, %v1911_v14  ;;  %v20325_v14 = vld [vmem:[#allocation77_spill] sm:$0xff]  ;;  %v9466_v13 = vld [vmem:[%s14386_s12 + $0x110] sm:$0xff] }
 0x29a   : > { %2638 = vmatprep.mubr.f32.mxu0 %v15626_v28  ;;  %v20336_v27 = vld [vmem:[#allocation25_spill] sm:$0xff] }
 0x29b   : > { %v15662_v55 = vadd.f32 %v12747_v57, %v1927_v0  ;;  %v20001_v57 = vmax.f32 %v15666_v22, 0.0  ;;  %v20326_v0 = vmax.f32 %v15424_v29, 0.0  ;;  %v9467_v29 = vld [vmem:[%s14386_s12 + $0x118] sm:$0xff] }
 0x29d   : > { %20323 = vst [vmem:[#allocation92_spill] sm:$0xff] %v15662_v55  ;;  %2639 = vmatmul.mubr.f32.gmra.mrb[90].mxu0 %v20003_v4  ;;  %10477 = vmatmul.mubr.f32.gmra.mrb[46].mxu1 %v15662_v55  ;;  %v20335_v4 = vld [vmem:[#allocation24_spill] sm:$0xff] }
 0x29e   : > { %2644 = vmatprep.mubr.f32.mxu0 %v15648_v1  ;;  %2399 = vmatprep.mubr.f32.mxu1 %v15349_v58 }
 0x2a1   : > { %2645 = vmatmul.mubr.f32.gmra.mrb[92].mxu0 %v20002_v43  ;;  %2400 = vmatmul.mubr.f32.vlgmr.msra.gmra.mrb[48].mxu1 %v20324_v19  ;;  %v20327_v19 = vmax.f32 %v15446_v42, 0.0  ;;  %v20330_v42 = vmax.f32 %v15464_v5, 0.0  ;;  %v20332_v43 = vld [vmem:[#allocation21_spill] sm:$0xff]  ;;  %v20334_v5 = vmax.f32 %v15489_v41, 0.0  ;;  %v20338_v41 = vmax.f32 %v15509_v32, 0.0 }
 0x2a2   : > { %2650 = vmatprep.mubr.f32.mxu0 %v15662_v55  ;;  %2405 = vmatprep.mubr.f32.mxu1 %v15368_v61  ;;  %v20342_v32 = vmax.f32 %v15530_v46, 0.0  ;;  %v20346_v46 = vmax.f32 %v15547_v39, 0.0  ;;  %v9479_v39 = vld [vmem:[%s14386_s12 + $0x178] sm:$0xff] }
 0x2a3   : > { %11438 = vmatpush3.bf16.msra.mxu1 %v20322_v15 }
 0x2a4   : > { %11440 = vmatprep.subr.bf16.mxu1 %v20325_v14 }
 0x2a5   : > { %2651 = vmatmul.mubr.f32.gmra.mrb[94].mxu0 %v20001_v57  ;;  %2406 = vmatmul.mubr.f32.gmra.mrb[50].mxu1 %v20326_v0  ;;  %v20328_v0 = vld [vmem:[#allocation17_spill] sm:$0xff]  ;;  %v20329_v57 = vld [vmem:[#allocation80_spill] sm:$0xff] }
 0x2a6   : > { %10583 = vmatprep.mubr.msk.f32.mxu0 %vm1103_vm0, %v9464_v31  ;;  %2411 = vmatprep.mubr.f32.mxu1 %v15391_v20  ;;  %v9468_v31 = vld [vmem:[%s14386_s12 + $0x120] sm:$0xff] }
 0x2a7   : > { %11442 = vmatpush3.bf16.msra.mxu1 %v20325_v14 }
 0x2a8   : > { %11444 = vmatprep.subr.bf16.mxu1 %v15156_v23 }
 0x2a9   : > { %10584 = vmatmul.mubr.msk.f32.vlgmr.msra.gmra.mrb[96].mxu0 %vm1103_vm0, %v9465_v51  ;;  %2412 = vmatmul.mubr.f32.gmra.mrb[52].mxu1 %v20327_v19  ;;  %v9469_v51 = vld [vmem:[%s14386_s12 + $0x128] sm:$0xff]  ;;  %v20331_v19 = vld [vmem:[#allocation20_spill] sm:$0xff] }
 0x2aa   : > { %10586 = vmatprep.mubr.msk.f32.mxu0 %vm1103_vm0, %v9466_v13  ;;  %2417 = vmatprep.mubr.f32.mxu1 %v15409_v6  ;;  %v9470_v13 = vld [vmem:[%s14386_s12 + $0x130] sm:$0xff] }
 0x2ab   : > { %11546 = vmatpush1.bf16.msra.mxu0 %v14445_v30  ;;  %11446 = vmatpush3.bf16.msra.mxu1 %v15156_v23 }
 0x2ac   : > { %11548 = vmatprep.subr.bf16.mxu0 %v20328_v0  ;;  %11448 = vmatprep.subr.bf16.mxu1 %v20329_v57 }
 0x2ad   : > { %10587 = vmatmul.mubr.msk.f32.gmra.mrb[98].mxu0 %vm1103_vm0, %v9467_v29  ;;  %2418 = vmatmul.mubr.f32.gmra.mrb[54].mxu1 %v20330_v42  ;;  %v20333_v29 = vld [vmem:[#allocation81_spill] sm:$0xff]  ;;  %v9472_v42 = vld [vmem:[%s14386_s12 + $0x140] sm:$0xff] }
 0x2ae   : > { %10589 = vmatprep.mubr.msk.f32.mxu0 %vm1103_vm0, %v9468_v31  ;;  %2423 = vmatprep.mubr.f32.mxu1 %v15429_v49  ;;  %v9471_v31 = vld [vmem:[%s14386_s12 + $0x138] sm:$0xff] }
 0x2af   : > { %11550 = vmatpush1.bf16.msra.mxu0 %v20331_v19  ;;  %11450 = vmatpush3.bf16.msra.mxu1 %v20329_v57 }
 0x2b0   : > { %11552 = vmatprep.subr.bf16.mxu0 %v20332_v43  ;;  %11452 = vmatprep.subr.bf16.mxu1 %v20333_v29 }
 0x2b1   : > { %10590 = vmatmul.mubr.msk.f32.gmra.mrb[100].mxu0 %vm1103_vm0, %v9469_v51  ;;  %2424 = vmatmul.mubr.f32.gmra.mrb[56].mxu1 %v20334_v5  ;;  %v20337_v51 = vld [vmem:[#allocation82_spill] sm:$0xff] }
 0x2b2   : > { %10592 = vmatprep.mubr.msk.f32.mxu0 %vm1103_vm0, %v9470_v13  ;;  %2429 = vmatprep.mubr.f32.mxu1 %v15438_v36  ;;  %v9473_v13 = vld [vmem:[%s14386_s12 + $0x148] sm:$0xff]  ;;  %v9474_v5 = vld [vmem:[%s14386_s12 + $0x150] sm:$0xff] }
 0x2b3   : > { %11554 = vmatpush1.bf16.msra.mxu0 %v20335_v4  ;;  %11454 = vmatpush3.bf16.msra.mxu1 %v20333_v29  ;;  %v20339_v4 = vld [vmem:[#allocation28_spill] sm:$0xff] }
 0x2b4   : > { %11556 = vmatprep.subr.bf16.mxu0 %v20336_v27  ;;  %11456 = vmatprep.subr.bf16.mxu1 %v20337_v51  ;;  %v20340_v27 = vld [vmem:[#allocation29_spill] sm:$0xff] }
 0x2b5   : > { %10593 = vmatmul.mubr.msk.f32.gmra.mrb[102].mxu0 %vm1103_vm0, %v9471_v31  ;;  %2430 = vmatmul.mubr.f32.gmra.mrb[58].mxu1 %v20338_v41  ;;  %v20341_v31 = vld [vmem:[#allocation83_spill] sm:$0xff]  ;;  %v9476_v41 = vld [vmem:[%s14386_s12 + $0x160] sm:$0xff] }
 0x2b6   : > { %10595 = vmatprep.mubr.msk.f32.mxu0 %vm1103_vm0, %v9472_v42  ;;  %2435 = vmatprep.mubr.f32.mxu1 %v15460_v62  ;;  %v9475_v42 = vld [vmem:[%s14386_s12 + $0x158] sm:$0xff] }
 0x2b7   : > { %11558 = vmatpush1.bf16.msra.mxu0 %v20339_v4  ;;  %11458 = vmatpush3.bf16.msra.mxu1 %v20337_v51  ;;  %v20343_v4 = vld [vmem:[#allocation32_spill] sm:$0xff] }
 0x2b8   : > { %11560 = vmatprep.subr.bf16.mxu0 %v20340_v27  ;;  %11460 = vmatprep.subr.bf16.mxu1 %v20341_v31  ;;  %v20344_v27 = vld [vmem:[#allocation33_spill] sm:$0xff]  ;;  %v20347_v51 = vld [vmem:[#allocation36_spill] sm:$0xff] }
 0x2b9   : > { %10596 = vmatmul.mubr.msk.f32.gmra.mrb[104].mxu0 %vm1103_vm0, %v9473_v13  ;;  %2436 = vmatmul.mubr.f32.gmra.mrb[60].mxu1 %v20342_v32  ;;  %v20345_v13 = vld [vmem:[#allocation84_spill] sm:$0xff]  ;;  %v9478_v32 = vld [vmem:[%s14386_s12 + $0x170] sm:$0xff] }
 0x2ba   : > { %10598 = vmatprep.mubr.msk.f32.mxu0 %vm1103_vm0, %v9474_v5  ;;  %2441 = vmatprep.mubr.f32.mxu1 %v15492_v11  ;;  %v9477_v5 = vld [vmem:[%s14386_s12 + $0x168] sm:$0xff] }
 0x2bb   : > { %11562 = vmatpush1.bf16.msra.mxu0 %v20343_v4  ;;  %11462 = vmatpush3.bf16.msra.mxu1 %v20341_v31  ;;  %v20348_v4 = vld [vmem:[#allocation37_spill] sm:$0xff]  ;;  %v20350_v31 = vmax.f32 %v15570_v59, 0.0 }
 0x2bc   : > { %11564 = vmatprep.subr.bf16.mxu0 %v20344_v27  ;;  %11464 = vmatprep.subr.bf16.mxu1 %v20345_v13  ;;  %v20355_v59 = vld [vmem:[#allocation45_spill] sm:$0xff] }
 0x2bd   : > { %10599 = vmatmul.mubr.msk.f32.gmra.mrb[106].mxu0 %vm1103_vm0, %v9475_v42  ;;  %2442 = vmatmul.mubr.f32.gmra.mrb[62].mxu1 %v20346_v46  ;;  %v20349_v42 = vld [vmem:[#allocation13_spill] sm:$0xff] }
 0x2be   : > { %10601 = vmatprep.mubr.msk.f32.mxu0 %vm1103_vm0, %v9476_v41  ;;  %2447 = vmatprep.mubr.f32.mxu1 %v15540_v9  ;;  %v20351_v41 = vld [vmem:[#allocation40_spill] sm:$0xff]  ;;  %v20352_v46 = vld [vmem:[#allocation41_spill] sm:$0xff] }
 0x2bf   : > { %11566 = vmatpush1.bf16.msra.mxu0 %v20347_v51  ;;  %11466 = vmatpush3.bf16.msra.mxu1 %v20345_v13  ;;  %v20353_v13 = vmax.f32 %v15586_v2, 0.0  ;;  %v20360_v2 = vld [vmem:[#allocation52_spill] sm:$0xff] }
 0x2c0   : > { %11568 = vmatprep.subr.bf16.mxu0 %v20348_v4  ;;  %11480 = vmatprep.subr.bf16.mxu1 %v20349_v42  ;;  %v20358_v42 = vld [vmem:[#allocation49_spill] sm:$0xff] }
 0x2c1   : > { %10602 = vmatmul.mubr.msk.f32.gmra.mrb[108].mxu0 %vm1103_vm0, %v9477_v5  ;;  %2448 = vmatmul.mubr.f32.gmra.mrb[64].mxu1 %v20350_v31  ;;  %v20354_v5 = vld [vmem:[#allocation44_spill] sm:$0xff]  ;;  %v20356_v31 = vmax.f32 %v15606_v37, 0.0 }
 0x2c2   : > { %10604 = vmatprep.mubr.msk.f32.mxu0 %vm1103_vm0, %v9478_v32  ;;  %2453 = vmatprep.mubr.f32.mxu1 %v15555_v33  ;;  %v20357_v32 = vld [vmem:[#allocation48_spill] sm:$0xff] }
 0x2c3   : > { %11570 = vmatpush1.bf16.msra.mxu0 %v20351_v41  ;;  %v20363_v37 = vld [vmem:[#allocation56_spill] sm:$0xff] }
 0x2c4   : > { %11572 = vmatprep.subr.bf16.mxu0 %v20352_v46 }
 0x2c5   : > { %10605 = vmatmul.mubr.msk.f32.gmra.mrb[110].mxu0 %vm1103_vm0, %v9479_v39  ;;  %2454 = vmatmul.mubr.f32.gmra.mrb[66].mxu1 %v20353_v13  ;;  %v20359_v39 = vmax.f32 %v15617_v56, 0.0  ;;  %v20361_v13 = vld [vmem:[#allocation53_spill] sm:$0xff]  ;;  %v20366_v56 = vld [vmem:[#allocation60_spill] sm:$0xff] }
 0x2c6   : > { %2459 = vmatprep.mubr.f32.mxu1 %v15577_v63 }
 0x2c7   : > { %11574 = vmatpush1.bf16.msra.mxu0 %v20354_v5 }
 0x2c8   : > { %11576 = vmatprep.subr.bf16.mxu0 %v20355_v59  ;;  %v20362_v59 = vmax.f32 %v15632_v12, 0.0  ;;  %v20369_v12 = vld [vmem:[#allocation64_spill] sm:$0xff] }
 0x2c9   : > { %2460 = vmatmul.mubr.f32.gmra.mrb[68].mxu1 %v20356_v31  ;;  %v20364_v31 = vld [vmem:[#allocation57_spill] sm:$0xff] }
 0x2ca   : > { %2465 = vmatprep.mubr.f32.mxu1 %v15591_v26 }
 0x2cb   : > { %11578 = vmatpush1.bf16.msra.mxu0 %v20357_v32 }
 0x2cc   : > { %11580 = vmatprep.subr.bf16.mxu0 %v20358_v42  ;;  %v20365_v42 = vmax.f32 %v15641_v7, 0.0  ;;  %v20372_v7 = vld [vmem:[#allocation68_spill] sm:$0xff] }
 0x2cd   : > { %2466 = vmatmul.mubr.f32.gmra.mrb[70].mxu1 %v20359_v39  ;;  %v20367_v39 = vld [vmem:[#allocation61_spill] sm:$0xff] }
 0x2ce   : > { %2471 = vmatprep.mubr.f32.mxu1 %v15611_v60 }
 0x2cf   : > { %11582 = vmatpush1.bf16.msra.mxu0 %v20360_v2 }
 0x2d0   : > { %11584 = vmatprep.subr.bf16.mxu0 %v20361_v13  ;;  %v20368_v13 = vmax.f32 %v15657_v40, 0.0  ;;  %v20376_v40 = vld [vmem:[#allocation75_spill] sm:$0xff] }
 0x2d1   : > { %2472 = vmatmul.mubr.f32.gmra.mrb[72].mxu1 %v20362_v59  ;;  %v20370_v59 = vld [vmem:[#allocation65_spill] sm:$0xff] }
 0x2d2   : > { %2477 = vmatprep.mubr.f32.mxu1 %v15626_v28 }
 0x2d3   : > { %11586 = vmatpush1.bf16.msra.mxu0 %v20363_v37 }
 0x2d4   : > { %11588 = vmatprep.subr.bf16.mxu0 %v20364_v31  ;;  %v20371_v31 = vmax.f32 %v15666_v22, 0.0 }
 0x2d5   : > { %2478 = vmatmul.mubr.f32.gmra.mrb[74].mxu1 %v20365_v42  ;;  %v20373_v42 = vld [vmem:[#allocation69_spill] sm:$0xff] }
 0x2d6   : > { %2483 = vmatprep.mubr.f32.mxu1 %v15648_v1 }
 0x2d7   : > { %11590 = vmatpush1.bf16.msra.mxu0 %v20366_v56  ;;  %v20374_v56 = vld [vmem:[#allocation71_spill] sm:$0xff] }
 0x2d8   : > { %11592 = vmatprep.subr.bf16.mxu0 %v20367_v39  ;;  %v20375_v39 = vld [vmem:[#allocation73_spill] sm:$0xff] }
 0x2d9   : > { %2484 = vmatmul.mubr.f32.gmra.mrb[76].mxu1 %v20368_v13  ;;  %v15810_v13 = vld [vmem:[%s19859_s5 + $0x2] ss:$0 sm:$0xff] }
 0x2da   : > { %2489 = vmatprep.mubr.f32.mxu1 %v15662_v55 }
 0x2db   : > { %11594 = vmatpush1.bf16.msra.mxu0 %v20369_v12 }
 0x2dc   : > { %11596 = vmatprep.subr.bf16.mxu0 %v20370_v59 }
 0x2dd   : > { %2490 = vmatmul.mubr.f32.gmra.mrb[78].mxu1 %v20371_v31 }
 0x2df   : > { %11598 = vmatpush1.bf16.msra.mxu0 %v20372_v7 }
 0x2e0   : > { %11600 = vmatprep.subr.bf16.mxu0 %v20373_v42 }
 0x2e3   : > { %11602 = vmatpush1.bf16.msra.mxu0 %v20374_v56 }
 0x2e4   : > { %11604 = vmatprep.subr.bf16.mxu0 %v20375_v39 }
 0x2e7   : > { %11606 = vmatpush1.bf16.msra.mxu0 %v20376_v40 }
 0x2e8   : > { %11640 = vmatprep.subr.bf16.mxu0 %v14363_v3 }
 0x32b   : > { %v10457_v59 = vpop.f32.mrb[32].mxu1 }
 0x32c   : > { %v2020_v22 = vadd.f32 %v10457_v59, %v15810_v13  ;;  %v2014_v31 = vpop.f32.mrb[33].mxu1 }
 0x32d   : > { %v2015_v7 = vadd.f32 %v15810_v13, %v2014_v31 }
 0x32e   : > { %2094 = vst [vmem:[%s15816_s23 + $0x8] sm:$0xff] %v2020_v22 }
 0x32f   : > { %2093 = vst [vmem:[%s15816_s23] sm:$0xff] %v2015_v7 }
 0x333   : > { %v10460_v40 = vpop.f32.mrb[34].mxu1 }
 0x334   : > { %v2030_v39 = vadd.f32 %v10460_v40, %v15810_v13  ;;  %v2024_v56 = vpop.f32.mrb[35].mxu1 }
 0x335   : > { %v2025_v59 = vadd.f32 %v15810_v13, %v2024_v56 }
 0x336   : > { %2096 = vst [vmem:[%s15816_s23 + $0x18] sm:$0xff] %v2030_v39 }
 0x337   : > { %2095 = vst [vmem:[%s15816_s23 + $0x10] sm:$0xff] %v2025_v59 }
 0x33a   : > { %v15824_v31 = vpop.f32.mrb[64].mxu0 }
 0x33b   : > { %v15826_v12 = vpop.f32.mrb[65].mxu0 }
 0x33c   : > { %v10463_v42 = vpop.f32.mrb[36].mxu1 }
 0x33d   : > { %v2040_v37 = vadd.f32 %v10463_v42, %v15810_v13  ;;  %v2034_v22 = vpop.f32.mrb[37].mxu1 }
 0x33e   : > { %v2035_v7 = vadd.f32 %v15810_v13, %v2034_v22 }
 0x33f   : > { %2098 = vst [vmem:[%s15816_s23 + $0x28] sm:$0xff] %v2040_v37 }
 0x340   : > { %v15831_v2 = vpop.f32.mrb[66].mxu0  ;;  %2097 = vst [vmem:[%s15816_s23 + $0x20] sm:$0xff] %v2035_v7 }
 0x341   : > { %v15834_v40 = vpop.f32.mrb[67].mxu0 }
 0x344   : > { %v15836_v56 = vpop.f32.mrb[68].mxu0 }
 0x345   : > { %v15838_v39 = vpop.f32.mrb[69].mxu0 }
 0x346   : > { %v10466_v59 = vpop.f32.mrb[38].mxu1 }
 0x347   : > { %v2050_v32 = vadd.f32 %v10466_v59, %v15810_v13  ;;  %v2044_v5 = vpop.f32.mrb[39].mxu1 }
 0x348   : > { %v15841_v42 = vpop.f32.mrb[70].mxu0  ;;  %v2045_v22 = vadd.f32 %v15810_v13, %v2044_v5 }
 0x349   : > { %v15844_v37 = vpop.f32.mrb[71].mxu0  ;;  %2100 = vst [vmem:[%s15816_s23 + $0x38] sm:$0xff] %v2050_v32 }
 0x34a   : > { %2099 = vst [vmem:[%s15816_s23 + $0x30] sm:$0xff] %v2045_v22 }
 0x34c   : > { %v15848_v7 = vpop.f32.mrb[72].mxu0 }
 0x34d   : > { %v15850_v46 = vpop.f32.mrb[73].mxu0 }
 0x350   : > { %v15852_v41 = vpop.f32.mrb[74].mxu0 }
 0x351   : > { %v15854_v4 = vpop.f32.mrb[75].mxu0 }
 0x352   : > { %v10469_v59 = vpop.f32.mrb[40].mxu1 }
 0x353   : > { %v2060_v51 = vadd.f32 %v10469_v59, %v15810_v13  ;;  %v2054_v27 = vpop.f32.mrb[41].mxu1 }
 0x354   : > { %v15857_v29 = vpop.f32.mrb[76].mxu0  ;;  %v2055_v5 = vadd.f32 %v15810_v13, %v2054_v27 }
 0x355   : > { %v15860_v32 = vpop.f32.mrb[77].mxu0  ;;  %2102 = vst [vmem:[%s15816_s23 + $0x48] sm:$0xff] %v2060_v51 }
 0x356   : > { %2101 = vst [vmem:[%s15816_s23 + $0x40] sm:$0xff] %v2055_v5 }
 0x358   : > { %v15864_v22 = vpop.f32.mrb[78].mxu0 }
 0x359   : > { %v15866_v57 = vpop.f32.mrb[79].mxu0 }
 0x35a   : > { %v10472_v43 = vpop.f32.mrb[42].mxu1 }
 0x35b   : > { %v2070_v19 = vadd.f32 %v10472_v43, %v15810_v13  ;;  %v2064_v23 = vpop.f32.mrb[43].mxu1 }
 0x35c   : > { %v15869_v59 = vpop.f32.mrb[80].mxu0  ;;  %v2065_v0 = vadd.f32 %v15810_v13, %v2064_v23 }
 0x35d   : > { %v15872_v30 = vpop.f32.mrb[81].mxu0  ;;  %2104 = vst [vmem:[%s15816_s23 + $0x58] sm:$0xff] %v2070_v19 }
 0x35e   : > { %2103 = vst [vmem:[%s15816_s23 + $0x50] sm:$0xff] %v2065_v0 }
 0x360   : > { %v15876_v27 = vpop.f32.mrb[82].mxu0 }
 0x361   : > { %v15878_v51 = vpop.f32.mrb[83].mxu0 }
 0x364   : > { %v15880_v5 = vpop.f32.mrb[84].mxu0 }
 0x365   : > { %v15882_v14 = vpop.f32.mrb[85].mxu0  ;;  %v10475_v43 = vpop.f32.mrb[44].mxu1 }
 0x366   : > { %v2080_v15 = vadd.f32 %v10475_v43, %v15810_v13  ;;  %v2074_v35 = vpop.f32.mrb[45].mxu1 }
 0x367   : > { %v2075_v23 = vadd.f32 %v15810_v13, %v2074_v35 }
 0x368   : > { %v15886_v47 = vpop.f32.mrb[86].mxu0  ;;  %2106 = vst [vmem:[%s15816_s23 + $0x68] sm:$0xff] %v2080_v15 }
 0x369   : > { %v15889_v0 = vpop.f32.mrb[87].mxu0  ;;  %2105 = vst [vmem:[%s15816_s23 + $0x60] sm:$0xff] %v2075_v23 }
 0x36c   : > { %v15892_v19 = vpop.f32.mrb[88].mxu0 }
 0x36d   : > { %v15894_v50 = vpop.f32.mrb[89].mxu0 }
 0x370   : > { %v15896_v44 = vpop.f32.mrb[90].mxu0  ;;  %v10478_v10 = vpop.f32.mrb[46].mxu1 }
 0x371   : > { %20378 = vst [vmem:[#allocation93_spill] sm:$0xff] %v15896_v44  ;;  %v15898_v8 = vpop.f32.mrb[91].mxu0  ;;  %v2090_v43 = vadd.f32 %v10478_v10, %v15810_v13  ;;  %v2084_v55 = vpop.f32.mrb[47].mxu1 }
 0x372   : > { %v2085_v35 = vadd.f32 %v15810_v13, %v2084_v55 }
 0x373   : > { %2108 = vst [vmem:[%s15816_s23 + $0x78] sm:$0xff] %v2090_v43 }
 0x374   : > { %v15903_v1 = vpop.f32.mrb[92].mxu0  ;;  %2107 = vst [vmem:[%s15816_s23 + $0x70] sm:$0xff] %v2085_v35  ;;  %v2401_v15 = vpop.f32.mrb[48].mxu1 }
 0x375   : > { %20379 = vst [vmem:[#allocation94_spill] sm:$0xff] %v15903_v1  ;;  %v15906_v23 = vpop.f32.mrb[93].mxu0  ;;  %v2402_v28 = vadd.f32 %v2401_v15, %v15230_v18  ;;  %v2403_v60 = vpop.f32.mrb[49].mxu1 }
 0x376   : > { %20380 = vst [vmem:[#allocation95_spill] sm:$0xff] %v15906_v23  ;;  %v2404_v13 = vadd.f32 %v2403_v60, %v15233_v45 }
 0x377   : > { %v9416_v26 = vmul.f32 -1.442695, %v2402_v28 }
 0x378   : > { %v15909_v63 = vpop.f32.mrb[94].mxu0  ;;  %v2407_v53 = vpop.f32.mrb[50].mxu1  ;;  %v9432_v11 = vmul.f32 -1.442695, %v2404_v13 }
 0x379   : > { %20381 = vst [vmem:[#allocation96_spill] sm:$0xff] %v15909_v63  ;;  %v15911_v33 = vpop.f32.mrb[95].mxu0  ;;  %12750 = vpow2.f32 %v9416_v26  ;;  %v2408_v10 = vadd.f32 %v2407_v53, %v15230_v18  ;;  %v2409_v55 = vpop.f32.mrb[51].mxu1 }
 0x37a   : > { %20382 = vst [vmem:[#allocation97_spill] sm:$0xff] %v15911_v33  ;;  %v2410_v23 = vadd.f32 %v2409_v55, %v15233_v45 }
 0x37b   : > { %v9417_v43 = vmul.f32 -1.442695, %v2408_v10 }
 0x37c   : > { %v15915_v35 = vpop.f32.mrb[96].mxu0  ;;  %v2413_v1 = vpop.f32.mrb[52].mxu1  ;;  %v9433_v52 = vmul.f32 -1.442695, %v2410_v23 }
 0x37d   : > { %v15918_v15 = vpop.f32.mrb[97].mxu0  ;;  %12752 = vpow2.f32 %v9417_v43  ;;  %v2414_v28 = vadd.f32 %v2413_v1, %v15230_v18  ;;  %v2415_v63 = vpop.f32.mrb[53].mxu1 }
 0x37e   : > { %v2416_v26 = vadd.f32 %v2415_v63, %v15233_v45 }
 0x37f   : > { %v9418_v33 = vmul.f32 -1.442695, %v2414_v28 }
 0x380   : > { %v15922_v53 = vpop.f32.mrb[98].mxu0  ;;  %v2419_v60 = vpop.f32.mrb[54].mxu1  ;;  %v9434_v43 = vmul.f32 -1.442695, %v2416_v26 }
 0x381   : > { %20383 = vst [vmem:[#allocation98_spill] sm:$0xff] %v15922_v53  ;;  %v15924_v10 = vpop.f32.mrb[99].mxu0  ;;  %12754 = vpow2.f32 %v9418_v33  ;;  %v2420_v55 = vadd.f32 %v2419_v60, %v15230_v18  ;;  %v2421_v36 = vpop.f32.mrb[55].mxu1 }
 0x382   : > { %12756 = vpow2.f32 %v9432_v11  ;;  %v2422_v60 = vadd.f32 %v2421_v36, %v15233_v45 }
 0x383   : > { %v12751_v48 = vpop.eup %12750  ;;  %v9419_v16 = vmul.f32 -1.442695, %v2420_v55  ;;  %12758 = vpow2.f32 %v9433_v52 }
 0x384   : > { %v15927_v1 = vpop.f32.mrb[100].mxu0  ;;  %v2705_v13 = vadd.f32 1.0, %v12751_v48  ;;  %v2425_v28 = vpop.f32.mrb[56].mxu1 }
 0x385   : > { %20384 = vst [vmem:[#allocation99_spill] sm:$0xff] %v15927_v1  ;;  %v15929_v63 = vpop.f32.mrb[101].mxu0  ;;  %12760 = vpow2.f32 %v9419_v16  ;;  %v2426_v23 = vadd.f32 %v2425_v28, %v15230_v18  ;;  %v2427_v6 = vpop.f32.mrb[57].mxu1 }
 0x386   : > { %20385 = vst [vmem:[#allocation100_spill] sm:$0xff] %v15929_v63  ;;  %12762 = vrcp.f32 %v2705_v13  ;;  %v2428_v55 = vadd.f32 %v2427_v6, %v15233_v45  ;;  %v9435_v13 = vmul.f32 -1.442695, %v2422_v60 }
 0x387   : > { %v12753_v33 = vpop.eup %12752  ;;  %12764 = vpow2.f32 %v9434_v43  ;;  %v9420_v44 = vmul.f32 -1.442695, %v2426_v23 }
 0x388   : > { %v15933_v11 = vpop.f32.mrb[102].mxu0  ;;  %v2706_v26 = vadd.f32 1.0, %v12753_v33  ;;  %v2431_v48 = vpop.f32.mrb[58].mxu1  ;;  %v9436_v23 = vmul.f32 -1.442695, %v2428_v55  ;;  %v2563_v55 = vadd.f32 %v15824_v31, %v15278_v17  ;;  %v2571_v31 = vadd.f32 %v15834_v40, %v15273_v24 }
 0x389   : > { %20386 = vst [vmem:[#allocation101_spill] sm:$0xff] %v15933_v11  ;;  %v15936_v52 = vpop.f32.mrb[103].mxu0  ;;  %12766 = vpow2.f32 %v9420_v44  ;;  %v2432_v16 = vadd.f32 %v2431_v48, %v15230_v18  ;;  %v2433_v1 = vpop.f32.mrb[59].mxu1 }
 0x38a   : > { %20387 = vst [vmem:[#allocation102_spill] sm:$0xff] %v15936_v52  ;;  %12768 = vrcp.f32 %v2706_v26  ;;  %v2565_v26 = vadd.f32 %v15826_v12, %v15273_v24 }
 0x38b   : > { %v12755_v28 = vpop.eup %12754  ;;  %v9421_v63 = vmul.f32 -1.442695, %v2432_v16 }
 0x38c   : > { %v15939_v43 = vpop.f32.mrb[104].mxu0  ;;  %v2707_v36 = vadd.f32 1.0, %v12755_v28  ;;  %v2437_v38 = vpop.f32.mrb[60].mxu1 }
 0x38d   : > { %20388 = vst [vmem:[#allocation103_spill] sm:$0xff] %v15939_v43  ;;  %v15941_v11 = vpop.f32.mrb[105].mxu0  ;;  %v12757_v33 = vpop.eup %12756  ;;  %12770 = vpow2.f32 %v9421_v63  ;;  %v2438_v6 = vadd.f32 %v2437_v38, %v15230_v18 }
 0x38e   : > { %20389 = vst [vmem:[#allocation104_spill] sm:$0xff] %v15941_v11  ;;  %v2439_v52 = vpop.f32.mrb[61].mxu1  ;;  %v12759_v44 = vpop.eup %12758  ;;  %12772 = vrcp.f32 %v2707_v36  ;;  %v2801_v43 = vadd.f32 1.0, %v12757_v33 }
 0x38f   : > { %v12761_v48 = vpop.eup %12760  ;;  %12774 = vpow2.f32 %v9435_v13  ;;  %v9422_v60 = vmul.f32 -1.442695, %v2438_v6  ;;  %v2802_v34 = vadd.f32 1.0, %v12759_v44  ;;  %v2434_v6 = vadd.f32 %v2433_v1, %v15233_v45 }
 0x390   : > { %v15946_v16 = vpop.f32.mrb[106].mxu0  ;;  %v12763_v28 = vpop.eup %12762  ;;  %v2708_v11 = vadd.f32 1.0, %v12761_v48  ;;  %12776 = vpow2.f32 %v9436_v23 }
 0x391   : > { %20390 = vst [vmem:[#allocation105_spill] sm:$0xff] %v15946_v16  ;;  %v2443_v63 = vpop.f32.mrb[62].mxu1  ;;  %v15950_v38 = vpop.f32.mrb[107].mxu0  ;;  %v2849_v36 = vmul.f32 %v12763_v28, %v2565_v26  ;;  %12778 = vpow2.f32 %v9422_v60 }
 0x392   : > { %20391 = vst [vmem:[#allocation106_spill] sm:$0xff] %v15950_v38  ;;  %v12765_v53 = vpop.eup %12764  ;;  %v2444_v12 = vadd.f32 %v2443_v63, %v15230_v18  ;;  %v2445_v13 = vpop.f32.mrb[63].mxu1  ;;  %12780 = vrcp.f32 %v2708_v11  ;;  %v2569_v11 = vadd.f32 %v15831_v2, %v15278_v17 }
 0x393   : > { %v12767_v16 = vpop.eup %12766  ;;  %v15956_v48 = vadd.f32 %v2849_v36, %v2563_v55  ;;  %12782 = vrcp.f32 %v2801_v43  ;;  %v2803_v26 = vadd.f32 1.0, %v12765_v53  ;;  %v9437_v55 = vmul.f32 -1.442695, %v2434_v6 }
 0x394   : > { %v9423_v33 = vmul.f32 -1.442695, %v2444_v12  ;;  %v15958_v23 = vpop.f32.mrb[108].mxu0  ;;  %v12769_v38 = vpop.eup %12768  ;;  %v2709_v44 = vadd.f32 1.0, %v12767_v16  ;;  %12784 = vrcp.f32 %v2802_v34  ;;  %v2440_v36 = vadd.f32 %v2439_v52, %v15233_v45 }
 0x395   : > { %20392 = vst [vmem:[#allocation107_spill] sm:$0xff] %v15958_v23  ;;  %v2449_v60 = vpop.f32.mrb[64].mxu1  ;;  %v15960_v28 = vpop.f32.mrb[109].mxu0  ;;  %v2850_v1 = vmul.f32 %v12769_v38, %v2571_v31  ;;  %v2577_v53 = vadd.f32 %v15838_v39, %v15273_v24  ;;  %v2575_v52 = vadd.f32 %v15836_v56, %v15278_v17 }
 0x396   : > { %20393 = vst [vmem:[#allocation108_spill] sm:$0xff] %v15960_v28  ;;  %v2450_v63 = vadd.f32 %v2449_v60, %v15230_v18  ;;  %v2451_v40 = vpop.f32.mrb[65].mxu1  ;;  %12786 = vrcp.f32 %v2709_v44  ;;  %v2446_v44 = vadd.f32 %v2445_v13, %v15233_v45  ;;  %v2581_v13 = vadd.f32 %v15841_v42, %v15278_v17 }
 0x397   : > { %v12771_v12 = vpop.eup %12770  ;;  %v2866_v23 = vadd.f32 %v2850_v1, %v2569_v11  ;;  %12788 = vpow2.f32 %v9423_v33  ;;  %v9438_v33 = vmul.f32 -1.442695, %v2440_v36 }
 0x398   : > { %v15968_v43 = vpop.f32.mrb[110].mxu0  ;;  %v12773_v16 = vpop.eup %12772  ;;  %12790 = vrcp.f32 %v2803_v26  ;;  %v2710_v2 = vadd.f32 1.0, %v12771_v12  ;;  %v9424_v38 = vmul.f32 -1.442695, %v2450_v63  ;;  %v2583_v63 = vadd.f32 %v15844_v37, %v15273_v24 }
 0x399   : > { %20394 = vst [vmem:[#allocation109_spill] sm:$0xff] %v15968_v43  ;;  %v2455_v34 = vpop.f32.mrb[66].mxu1  ;;  %v15970_v31 = vpop.f32.mrb[111].mxu0  ;;  %12792 = vtanh.f32 %v2866_v23  ;;  %v2851_v6 = vmul.f32 %v12773_v16, %v2577_v53  ;;  %v2452_v37 = vadd.f32 %v2451_v40, %v15233_v45 }
 0x39a   : > { %20395 = vst [vmem:[#allocation110_spill] sm:$0xff] %v15970_v31  ;;  %v12775_v60 = vpop.eup %12774  ;;  %v2457_v11 = vpop.f32.mrb[67].mxu1  ;;  %12794 = vpow2.f32 %v9437_v55  ;;  %v2456_v1 = vadd.f32 %v2455_v34, %v15230_v18  ;;  %v9439_v55 = vmul.f32 -1.442695, %v2446_v44  ;;  %v2589_v34 = vadd.f32 %v15850_v46, %v15273_v24 }
 0x39b   : > { %v12777_v39 = vpop.eup %12776  ;;  %v2867_v12 = vadd.f32 %v2851_v6, %v2575_v52  ;;  %12796 = vrcp.f32 %v2710_v2  ;;  %v2804_v23 = vadd.f32 1.0, %v12775_v60  ;;  %v2587_v46 = vadd.f32 %v15848_v7, %v15278_v17 }
 0x39c   : > { %v12779_v26 = vpop.eup %12778  ;;  %12798 = vpow2.f32 %v9424_v38  ;;  %v2461_v56 = vpop.f32.mrb[68].mxu1  ;;  %v9425_v2 = vmul.f32 -1.442695, %v2456_v1  ;;  %v2805_v52 = vadd.f32 1.0, %v12777_v39  ;;  %v9440_v39 = vmul.f32 -1.442695, %v2452_v37 }
 0x39d   : > { %v12781_v43 = vpop.eup %12780  ;;  %v2711_v31 = vadd.f32 1.0, %v12779_v26  ;;  %12800 = vtanh.f32 %v2867_v12  ;;  %v2463_v36 = vpop.f32.mrb[69].mxu1  ;;  %v2462_v38 = vadd.f32 %v2461_v56, %v15230_v18  ;;  %v2593_v37 = vadd.f32 %v15852_v41, %v15278_v17 }
 0x39e   : > { %v2852_v53 = vmul.f32 %v12781_v43, %v2583_v63  ;;  %v15980_v16 = vpop.eup %12782  ;;  %12802 = vpow2.f32 %v9438_v33  ;;  %v2458_v43 = vadd.f32 %v2457_v11, %v15233_v45  ;;  %v2464_v11 = vadd.f32 %v2463_v36, %v15233_v45 }
 0x39f   : > { %v12785_v60 = vpop.eup %12784  ;;  %12804 = vrcp.f32 %v2711_v31 }
 0x3a0   : > { %v15986_v6 = vadd.f32 %v2852_v53, %v2581_v13  ;;  %v12787_v42 = vpop.eup %12786  ;;  %12806 = vrcp.f32 %v2804_v23  ;;  %v2467_v44 = vpop.f32.mrb[70].mxu1  ;;  %v9426_v23 = vmul.f32 -1.442695, %v2462_v38  ;;  %v2595_v53 = vadd.f32 %v15854_v4, %v15273_v24 }
 0x3a1   : > { %v12789_v26 = vpop.eup %12788  ;;  %v2853_v33 = vmul.f32 %v12787_v42, %v2589_v34  ;;  %12808 = vpow2.f32 %v9439_v55  ;;  %v2469_v40 = vpop.f32.mrb[71].mxu1  ;;  %v2468_v31 = vadd.f32 %v2467_v44, %v15230_v18  ;;  %v9441_v7 = vmul.f32 -1.442695, %v2458_v43 }
 0x3a2   : > { %v12791_v1 = vpop.eup %12790  ;;  %v2712_v12 = vadd.f32 1.0, %v12789_v26  ;;  %12810 = vpow2.f32 %v9425_v2  ;;  %v2601_v4 = vadd.f32 %v15860_v32, %v15273_v24 }
 0x3a3   : > { %v12793_v63 = vpop.eup %12792  ;;  %v2869_v56 = vadd.f32 %v2853_v33, %v2587_v46  ;;  %12812 = vrcp.f32 %v2805_v52  ;;  %v9427_v36 = vmul.f32 -1.442695, %v2468_v31 }
 0x3a4   : > { %v12795_v13 = vpop.eup %12794  ;;  %12814 = vrcp.f32 %v2712_v12  ;;  %v2473_v55 = vpop.f32.mrb[72].mxu1  ;;  %v2898_v34 = vsub.f32 %v15368_v61, %v12793_v63  ;;  %v9442_v61 = vmul.f32 -1.442695, %v2464_v11 }
 0x3a5   : > { %v12797_v42 = vpop.eup %12796  ;;  %12816 = vtanh.f32 %v2869_v56  ;;  %v2474_v2 = vadd.f32 %v2473_v55, %v15230_v18  ;;  %v2475_v52 = vpop.f32.mrb[73].mxu1 }
 0x3a6   : > { %v12799_v38 = vpop.eup %12798  ;;  %v2854_v44 = vmul.f32 %v12797_v42, %v2595_v53  ;;  %12818 = vpow2.f32 %v9440_v39  ;;  %v2914_v26 = vmul.f32 %v12785_v60, %v2898_v34  ;;  %v2806_v53 = vadd.f32 1.0, %v12795_v13 }
 0x3a7   : > { %v12801_v46 = vpop.eup %12800  ;;  %v2713_v43 = vadd.f32 1.0, %v12799_v38  ;;  %12820 = vpow2.f32 %v9426_v23  ;;  %v9428_v12 = vmul.f32 -1.442695, %v2474_v2  ;;  %v2470_v60 = vadd.f32 %v2469_v40, %v15233_v45 }
 0x3a8   : > { %v12803_v33 = vpop.eup %12802  ;;  %12822 = vpow2.f32 %v9441_v7  ;;  %v2479_v56 = vpop.f32.mrb[74].mxu1  ;;  %v16001_v41 = vadd.f32 %v12793_v63, %v2914_v26  ;;  %v2899_v55 = vsub.f32 %v15391_v20, %v12801_v46  ;;  %v16007_v31 = vadd.f32 %v2854_v44, %v2593_v37 }
 0x3a9   : > { %v12805_v28 = vpop.eup %12804  ;;  %12824 = vrcp.f32 %v2713_v43  ;;  %v16005_v39 = vpop.f32.mrb[75].mxu1  ;;  %v2599_v23 = vadd.f32 %v15857_v29, %v15278_v17  ;;  %v2807_v34 = vadd.f32 1.0, %v12803_v33  ;;  %v2480_v20 = vadd.f32 %v2479_v56, %v15230_v18 }
 0x3aa   : > { %v16009_v32 = vpop.eup %12806  ;;  %v2855_v11 = vmul.f32 %v12805_v28, %v2601_v4  ;;  %12826 = vpow2.f32 %v9427_v36  ;;  %v2915_v63 = vmul.f32 %v12791_v1, %v2899_v55  ;;  %v2607_v40 = vadd.f32 %v15866_v57, %v15273_v24 }
 0x3ab   : > { %v12809_v7 = vpop.eup %12808  ;;  %12828 = vpow2.f32 %v9442_v61  ;;  %v9443_v44 = vmul.f32 -1.442695, %v2470_v60  ;;  %v2476_v36 = vadd.f32 %v2475_v52, %v15233_v45  ;;  %v2605_v4 = vadd.f32 %v15864_v22, %v15278_v17 }
 0x3ac   : > { %v12811_v13 = vpop.eup %12810  ;;  %v2871_v42 = vadd.f32 %v2855_v11, %v2599_v23  ;;  %12830 = vpow2.f32 %v9428_v12  ;;  %v2485_v37 = vpop.f32.mrb[76].mxu1  ;;  %v16018_v28 = vadd.f32 %v12801_v46, %v2915_v63  ;;  %v9429_v43 = vmul.f32 -1.442695, %v2480_v20 }
 0x3ad   : > { %v12813_v2 = vpop.eup %12812  ;;  %12832 = vrcp.f32 %v2806_v53  ;;  %v2714_v38 = vadd.f32 1.0, %v12811_v13  ;;  %v16016_v29 = vpop.f32.mrb[77].mxu1  ;;  %v2808_v55 = vadd.f32 1.0, %v12809_v7  ;;  %v2613_v46 = vadd.f32 %v15872_v30, %v15273_v24 }
 0x3ae   : > { %v12815_v1 = vpop.eup %12814  ;;  %12834 = vtanh.f32 %v2871_v42  ;;  %v9444_v23 = vmul.f32 -1.442695, %v2476_v36  ;;  %v2486_v30 = vadd.f32 %v2485_v37, %v15230_v18  ;;  %v2482_v36 = vadd.f32 %v16005_v39, %v15233_v45 }
 0x3af   : > { %v12817_v26 = vpop.eup %12816  ;;  %12836 = vrcp.f32 %v2807_v34  ;;  %v2856_v57 = vmul.f32 %v12815_v1, %v2607_v40 }
 0x3b0   : > { %v12819_v61 = vpop.eup %12818  ;;  %12838 = vrcp.f32 %v2714_v38  ;;  %v2491_v33 = vpop.f32.mrb[78].mxu1  ;;  %v2901_v12 = vsub.f32 %v15429_v49, %v12817_v26  ;;  %v2611_v49 = vadd.f32 %v15869_v59, %v15278_v17  ;;  %v9445_v39 = vmul.f32 -1.442695, %v2482_v36 }
 0x3b1   : > { %v12821_v56 = vpop.eup %12820  ;;  %12840 = vpow2.f32 %v9443_v44  ;;  %v16026_v53 = vpop.f32.mrb[79].mxu1  ;;  %v16028_v52 = vadd.f32 %v2856_v57, %v2605_v4  ;;  %v2809_v42 = vadd.f32 1.0, %v12819_v61  ;;  %v2619_v57 = vadd.f32 %v15878_v51, %v15273_v24  ;;  %v16051_v51 = vld [vmem:[%s19859_s5] ss:$0 sm:$0xff] }
 0x3b2   : > { %v12823_v60 = vpop.eup %12822  ;;  %v2715_v22 = vadd.f32 1.0, %v12821_v56  ;;  %12842 = vtanh.f32 %v15956_v48  ;;  %v2917_v11 = vmul.f32 %v12813_v2, %v2901_v12  ;;  %v2492_v48 = vadd.f32 %v2491_v33, %v15230_v18 }
 0x3b3   : > { %v12825_v63 = vpop.eup %12824  ;;  %12844 = vpow2.f32 %v9429_v43  ;;  %v2810_v59 = vadd.f32 1.0, %v12823_v60  ;;  %v2617_v12 = vadd.f32 %v15876_v27, %v15278_v17 }
 0x3b4   : > { %v12827_v7 = vpop.eup %12826  ;;  %v2857_v34 = vmul.f32 %v12825_v63, %v2613_v46  ;;  %12846 = vrcp.f32 %v2715_v22  ;;  %v16034_v20 = vadd.f32 %v12817_v26, %v2917_v11  ;;  %v9430_v26 = vmul.f32 -1.442695, %v2486_v30 }
 0x3b5   : > { %v12829_v13 = vpop.eup %12828  ;;  %12848 = vrcp.f32 %v2808_v55  ;;  %v2716_v40 = vadd.f32 1.0, %v12827_v7  ;;  %v9431_v56 = vmul.f32 -1.442695, %v2492_v48 }
 0x3b6   : > { %v12831_v38 = vpop.eup %12830  ;;  %v2873_v44 = vadd.f32 %v2857_v34, %v2611_v49  ;;  %12850 = vpow2.f32 %v9444_v23  ;;  %v2811_v43 = vadd.f32 1.0, %v12829_v13  ;;  %v2625_v23 = vadd.f32 %v15882_v14, %v15273_v24 }
 0x3b7   : > { %v16037_v2 = vpop.eup %12832  ;;  %12852 = vrcp.f32 %v2716_v40  ;;  %v2717_v1 = vadd.f32 1.0, %v12831_v38  ;;  %v2623_v14 = vadd.f32 %v15880_v5, %v15278_v17  ;;  %v16064_v34 = vadd.f32 %v16051_v51, %v15915_v35 }
 0x3b8   : > { %v12835_v37 = vpop.eup %12834  ;;  %12854 = vtanh.f32 %v2873_v44  ;;  %v2631_v38 = vadd.f32 %v15889_v0, %v15273_v24  ;;  %v2488_v5 = vadd.f32 %v16016_v29, %v15233_v45  ;;  %v2494_v0 = vadd.f32 %v16026_v53, %v15233_v45 }
 0x3b9   : > { %v12837_v4 = vpop.eup %12836  ;;  %12856 = vrcp.f32 %v2809_v42  ;;  %v2903_v61 = vsub.f32 %v15460_v62, %v12835_v37  ;;  %v16055_v62 = vadd.f32 %v16051_v51, %v15918_v15  ;;  %v2637_v29 = vadd.f32 %v15894_v50, %v15273_v24 }
 0x3ba   : > { %v12839_v33 = vpop.eup %12838  ;;  %12858 = vrcp.f32 %v2717_v1  ;;  %v9446_v50 = vmul.f32 -1.442695, %v2488_v5 }
 0x3bb   : > { %v12841_v55 = vpop.eup %12840  ;;  %v2858_v46 = vmul.f32 %v12839_v33, %v2619_v57  ;;  %12860 = vrcp.f32 %v2810_v59  ;;  %v2919_v60 = vmul.f32 %v12837_v4, %v2903_v61  ;;  %v20042_v44 = vmax.f32 %v16055_v62, 0.0 }
 0x3bc   : > { %v12843_v22 = vpop.eup %12842  ;;  %12862 = vpow2.f32 %v9430_v26  ;;  %v2812_v42 = vadd.f32 1.0, %v12841_v55  ;;  %v2635_v57 = vadd.f32 %v15892_v19, %v15278_v17 }
 0x3bd   : > { %v12845_v27 = vpop.eup %12844  ;;  %12864 = vrcp.f32 %v2811_v43  ;;  %v2897_v11 = vsub.f32 %v15349_v58, %v12843_v22  ;;  %v16058_v63 = vadd.f32 %v12835_v37, %v2919_v60  ;;  %v2874_v49 = vadd.f32 %v2858_v46, %v2617_v12  ;;  %v20396_v60 = vld [vmem:[#allocation18_spill] sm:$0xff] }
 0x3be   : > { %v12847_v7 = vpop.eup %12846  ;;  %v2718_v30 = vadd.f32 1.0, %v12845_v27  ;;  %12866 = vpow2.f32 %v9431_v56 }
 0x3bf   : > { %v16066_v15 = vpop.eup %12848  ;;  %v2859_v13 = vmul.f32 %v12847_v7, %v2625_v23  ;;  %v2913_v40 = vmul.f32 %v15980_v16, %v2897_v11  ;;  %12868 = vpow2.f32 %v9445_v39  ;;  %v2629_v16 = vadd.f32 %v15886_v47, %v15278_v17  ;;  %v20397_v11 = vld [vmem:[#allocation98_spill] sm:$0xff]  ;;  %v20398_v7 = vld [vmem:[#allocation19_spill] sm:$0xff] }
 0x3c0   : > { %v12851_v58 = vpop.eup %12850  ;;  %12870 = vrcp.f32 %v2718_v30  ;;  %v2643_v39 = vadd.f32 %v15898_v8, %v15273_v24  ;;  %v20399_v30 = vld [vmem:[#allocation93_spill] sm:$0xff] }
 0x3c1   : > { %v12853_v35 = vpop.eup %12852  ;;  %v16074_v48 = vadd.f32 %v12843_v22, %v2913_v40  ;;  %12872 = vtanh.f32 %v15986_v6  ;;  %v2875_v59 = vadd.f32 %v2859_v13, %v2623_v14  ;;  %v20041_v6 = vmax.f32 %v16064_v34, 0.0  ;;  %v20400_v40 = vld [vmem:[#allocation85_spill] sm:$0xff] }
 0x3c2   : > { %v12855_v1 = vpop.eup %12854  ;;  %v2860_v36 = vmul.f32 %v12853_v35, %v2631_v38  ;;  %12874 = vtanh.f32 %v16007_v31  ;;  %v16093_v31 = vadd.f32 %v16051_v51, %v15924_v10  ;;  %v9447_v10 = vmul.f32 -1.442695, %v2494_v0  ;;  %v20401_v38 = vld [vmem:[#allocation14_spill] sm:$0xff] }
 0x3c3   : > { %v12857_v37 = vpop.eup %12856  ;;  %12876 = vrcp.f32 %v2812_v42  ;;  %10547 = vmatprep.mubr.f32.mxu1 %v16074_v48  ;;  %3558 = vmatprep.mubr.f32.mxu0 %v16074_v48  ;;  %v2905_v26 = vsub.f32 %v15540_v9, %v12855_v1  ;;  %v2813_v27 = vadd.f32 1.0, %v12851_v58  ;;  %v2641_v13 = vadd.f32 %v20399_v30, %v15278_v17  ;;  %v20414_v30 = vld [vmem:[#allocation87_spill] sm:$0xff] }
 0x3c4   : > { %v12859_v47 = vpop.eup %12858  ;;  %3559 = vmatmul.mubr.f32.vlgmr.msra.gmra.mrb[112].mxu0 %v20042_v44  ;;  %10548 = vmatmul.mubr.f32.vlgmr.msra.gmra.mrb[80].mxu1 %v16001_v41  ;;  %12878 = vtanh.f32 %v16028_v52  ;;  %v2876_v53 = vadd.f32 %v2860_v36, %v2629_v16  ;;  %v20039_v55 = vmax.f32 %v16093_v31, 0.0 }
 0x3c5   : > { %v16096_v4 = vpop.eup %12860  ;;  %v2861_v9 = vmul.f32 %v12859_v47, %v2637_v29  ;;  %11482 = vmatpush1.bf16.msra.mxu1 %v14420_v21  ;;  %3564 = vmatprep.mubr.f32.mxu0 %v16001_v41  ;;  %v2921_v43 = vmul.f32 %v12857_v37, %v2905_v26  ;;  %12880 = vtanh.f32 %v2874_v49  ;;  %v16119_v49 = vadd.f32 %v16051_v51, %v20397_v11  ;;  %v20404_v29 = vld [vmem:[#allocation23_spill] sm:$0xff] }
 0x3c6   : > { %v12863_v61 = vpop.eup %12862  ;;  %11484 = vmatprep.subr.bf16.mxu1 %v14431_v25  ;;  %10550 = vmatprep.mubr.f32.mxu1 %v16018_v28  ;;  %12882 = vtanh.f32 %v2875_v59  ;;  %v20402_v59 = vld [vmem:[#allocation22_spill] sm:$0xff] }
 0x3c7   : > { %v16104_v52 = vpop.eup %12864  ;;  %v2719_v33 = vadd.f32 1.0, %v12863_v61  ;;  %v16106_v12 = vadd.f32 %v12855_v1, %v2921_v43  ;;  %12884 = vtanh.f32 %v2876_v53  ;;  %v2877_v19 = vadd.f32 %v2861_v9, %v2635_v57  ;;  %11642 = vmatpush3.bf16.msra.mxu0 %v14363_v3  ;;  %v20403_v1 = vld [vmem:[#allocation86_spill] sm:$0xff] }
 0x3c8   : > { %v12867_v56 = vpop.eup %12866  ;;  %3565 = vmatmul.mubr.f32.gmra.mrb[114].mxu0 %v20041_v6  ;;  %12886 = vpow2.f32 %v9446_v50  ;;  %11644 = vmatprep.subr.bf16.mxu0 %v20284_v54  ;;  %v20038_v26 = vmax.f32 %v16119_v49, 0.0  ;;  %v20405_v50 = vld [vmem:[#allocation100_spill] sm:$0xff]  ;;  %v20406_v9 = vld [vmem:[#allocation78_spill] sm:$0xff] }
 0x3c9   : > { %v12869_v46 = vpop.eup %12868  ;;  %12888 = vrcp.f32 %v2719_v33  ;;  %11486 = vmatpush1.bf16.msra.mxu1 %v20396_v60  ;;  %3570 = vmatprep.mubr.f32.mxu0 %v16018_v28  ;;  %v2720_v22 = vadd.f32 1.0, %v12867_v56  ;;  %v16136_v53 = vadd.f32 %v16051_v51, %v20405_v50  ;;  %v20408_v33 = vld [vmem:[#allocation95_spill] sm:$0xff] }
 0x3ca   : > { %v12871_v23 = vpop.eup %12870  ;;  %12890 = vpow2.f32 %v9447_v10  ;;  %11488 = vmatprep.subr.bf16.mxu1 %v20398_v7  ;;  %v2814_v35 = vadd.f32 1.0, %v12869_v46  ;;  %v20407_v10 = vld [vmem:[#allocation94_spill] sm:$0xff]  ;;  %v20410_v46 = vld [vmem:[#allocation12_spill] sm:$0xff] }
 0x3cb   : > { %v12873_v14 = vpop.eup %12872  ;;  %v2862_v8 = vmul.f32 %v12871_v23, %v2643_v39  ;;  %12892 = vrcp.f32 %v2720_v22  ;;  %11646 = vmatpush3.bf16.msra.mxu0 %v20284_v54  ;;  %v20411_v22 = vld [vmem:[#allocation15_spill] sm:$0xff] }
 0x3cc   : > { %v12875_v42 = vpop.eup %12874  ;;  %3571 = vmatmul.mubr.f32.gmra.mrb[116].mxu0 %v20039_v55  ;;  %v2900_v58 = vsub.f32 %v20400_v40, %v12873_v14  ;;  %11648 = vmatprep.subr.bf16.mxu0 %v20401_v38  ;;  %12894 = vtanh.f32 %v2877_v19  ;;  %v2649_v19 = vadd.f32 %v20408_v33, %v15273_v24  ;;  %v20415_v40 = vld [vmem:[#allocation97_spill] sm:$0xff] }
 0x3cd   : > { %v12877_v5 = vpop.eup %12876  ;;  %11490 = vmatpush1.bf16.msra.mxu1 %v20402_v59  ;;  %v2902_v16 = vsub.f32 %v20403_v1, %v12875_v42  ;;  %v2878_v36 = vadd.f32 %v2862_v8, %v2641_v13  ;;  %12896 = vrcp.f32 %v2813_v27  ;;  %v20416_v1 = vld [vmem:[#allocation88_spill] sm:$0xff] }
 0x3ce   : > { %v12879_v0 = vpop.eup %12878  ;;  %v2916_v37 = vmul.f32 %v16009_v32, %v2900_v58  ;;  %11492 = vmatprep.subr.bf16.mxu1 %v20404_v29  ;;  %v2647_v32 = vadd.f32 %v20407_v10, %v15278_v17  ;;  %v2655_v58 = vadd.f32 %v20415_v40, %v15273_v24  ;;  %v20422_v40 = vld [vmem:[#allocation30_spill] sm:$0xff] }
 0x3cf   : > { %v12881_v47 = vpop.eup %12880  ;;  %v2918_v57 = vmul.f32 %v16037_v2, %v2902_v16  ;;  %v2904_v43 = vsub.f32 %v20406_v9, %v12879_v0  ;;  %12898 = vtanh.f32 %v2878_v36  ;;  %11650 = vmatpush3.bf16.msra.mxu0 %v20401_v38  ;;  %v20412_v2 = vld [vmem:[#allocation26_spill] sm:$0xff]  ;;  %v20417_v36 = vld [vmem:[#allocation99_spill] sm:$0xff] }
 0x3d0   : > { %v12883_v61 = vpop.eup %12882  ;;  %v16145_v56 = vadd.f32 %v12873_v14, %v2916_v37  ;;  %v2906_v39 = vsub.f32 %v20410_v46, %v12881_v47  ;;  %11716 = vmatprep.subr.bf16.mxu0 %v20411_v22  ;;  %12900 = vrcp.f32 %v2814_v35  ;;  %v20419_v9 = vld [vmem:[#allocation27_spill] sm:$0xff]  ;;  %v20421_v46 = vld [vmem:[#allocation96_spill] sm:$0xff] }
 0x3d1   : > { %v12885_v23 = vpop.eup %12884  ;;  %11494 = vmatpush1.bf16.msra.mxu1 %v20412_v2  ;;  %v16150_v27 = vadd.f32 %v12875_v42, %v2918_v57  ;;  %v2920_v11 = vmul.f32 %v16066_v15, %v2904_v43  ;;  %v2907_v13 = vsub.f32 %v20414_v30, %v12883_v61  ;;  %v16162_v42 = vadd.f32 %v16051_v51, %v20417_v36  ;;  %v20429_v36 = vld [vmem:[#allocation35_spill] sm:$0xff] }
 0x3d2   : > { %20409 = vst [vmem:[#allocation98_spill] sm:$0xff] %v16145_v56  ;;  %v12887_v8 = vpop.eup %12886  ;;  %10551 = vmatmul.mubr.f32.gmra.mrb[82].mxu1 %v16145_v56  ;;  %3576 = vmatprep.mubr.f32.mxu0 %v16145_v56  ;;  %v2922_v14 = vmul.f32 %v16096_v4, %v2906_v39  ;;  %v2908_v35 = vsub.f32 %v20416_v1, %v12885_v23  ;;  %v20037_v15 = vmax.f32 %v16136_v53, 0.0  ;;  %v20427_v1 = vld [vmem:[#allocation89_spill] sm:$0xff] }
 0x3d3   : > { %20413 = vst [vmem:[#allocation93_spill] sm:$0xff] %v16150_v27  ;;  %v12889_v16 = vpop.eup %12888  ;;  %3577 = vmatmul.mubr.f32.gmra.mrb[118].mxu0 %v20038_v26  ;;  %10553 = vmatprep.mubr.f32.mxu1 %v16034_v20  ;;  %v16168_v37 = vadd.f32 %v12879_v0, %v2920_v11  ;;  %v2923_v50 = vmul.f32 %v16104_v52, %v2907_v13  ;;  %v2815_v30 = vadd.f32 1.0, %v12887_v8  ;;  %v20424_v52 = vld [vmem:[#allocation31_spill] sm:$0xff]  ;;  %v20036_v8 = vmax.f32 %v16162_v42, 0.0 }
 0x3d4   : > { %v12891_v57 = vpop.eup %12890  ;;  %v2863_v4 = vmul.f32 %v12889_v16, %v2649_v19  ;;  %3582 = vmatprep.mubr.f32.mxu0 %v16034_v20  ;;  %11496 = vmatprep.subr.bf16.mxu1 %v20419_v9  ;;  %v16173_v43 = vadd.f32 %v12881_v47, %v2922_v14  ;;  %v2924_v10 = vmul.f32 %v12877_v5, %v2908_v35  ;;  %v20426_v5 = vld [vmem:[#allocation102_spill] sm:$0xff] }
 0x3d5   : > { %20418 = vst [vmem:[#allocation85_spill] sm:$0xff] %v16168_v37  ;;  %v12893_v33 = vpop.eup %12892  ;;  %v2653_v39 = vadd.f32 %v20421_v46, %v15278_v17  ;;  %11498 = vmatpush1.bf16.msra.mxu1 %v20422_v40  ;;  %v16178_v0 = vadd.f32 %v12883_v61, %v2923_v50  ;;  %v16188_v14 = vadd.f32 %v16051_v51, %v20426_v5  ;;  %v20428_v16 = vld [vmem:[#allocation34_spill] sm:$0xff]  ;;  %v20434_v5 = vld [vmem:[#allocation39_spill] sm:$0xff] }
 0x3d6   : > { %20420 = vst [vmem:[#allocation86_spill] sm:$0xff] %v16173_v43  ;;  %v2864_v11 = vmul.f32 %v12893_v33, %v2655_v58  ;;  %10554 = vmatmul.mubr.f32.gmra.mrb[84].mxu1 %v16150_v27  ;;  %11500 = vmatprep.subr.bf16.mxu1 %v20424_v52  ;;  %v16182_v19 = vadd.f32 %v12885_v23, %v2924_v10  ;;  %v12895_v47 = vpop.eup %12894  ;;  %v2816_v58 = vadd.f32 1.0, %v12891_v57  ;;  %v20431_v57 = vld [vmem:[#allocation101_spill] sm:$0xff] }
 0x3d7   : > { %20423 = vst [vmem:[#allocation100_spill] sm:$0xff] %v16178_v0  ;;  %v2879_v13 = vadd.f32 %v2863_v4, %v2647_v32  ;;  %3583 = vmatmul.mubr.f32.gmra.mrb[120].mxu0 %v20037_v15  ;;  %10556 = vmatprep.mubr.f32.mxu1 %v16058_v63  ;;  %v12897_v61 = vpop.eup %12896  ;;  %v2909_v23 = vsub.f32 %v20427_v1, %v12895_v47  ;;  %v20430_v4 = vld [vmem:[#allocation90_spill] sm:$0xff]  ;;  %v20436_v1 = vld [vmem:[#allocation104_spill] sm:$0xff] }
 0x3d8   : > { %20425 = vst [vmem:[#allocation78_spill] sm:$0xff] %v16182_v19  ;;  %3588 = vmatprep.mubr.f32.mxu0 %v16150_v27  ;;  %v2880_v32 = vadd.f32 %v2864_v11, %v2653_v39  ;;  %v16200_v46 = vadd.f32 %v16051_v51, %v20431_v57  ;;  %v20035_v39 = vmax.f32 %v16188_v14, 0.0  ;;  %v20440_v57 = vld [vmem:[#allocation91_spill] sm:$0xff]  ;;  %v20442_v15 = vld [vmem:[#allocation92_spill] sm:$0xff] }
 0x3d9   : > { %12902 = vtanh.f32 %v2879_v13  ;;  %v12899_v35 = vpop.eup %12898  ;;  %11502 = vmatpush1.bf16.msra.mxu1 %v20428_v16  ;;  %v2925_v50 = vmul.f32 %v12897_v61, %v2909_v23  ;;  %v20433_v13 = vld [vmem:[#allocation38_spill] sm:$0xff]  ;;  %v16218_v23 = vadd.f32 %v16051_v51, %v20436_v1 }
 0x3da   : > { %12904 = vrcp.f32 %v2815_v30  ;;  %11504 = vmatprep.subr.bf16.mxu1 %v20429_v36  ;;  %10557 = vmatmul.mubr.f32.gmra.mrb[86].mxu1 %v16168_v37  ;;  %v2910_v10 = vsub.f32 %v20430_v4, %v12899_v35  ;;  %v12901_v33 = vpop.eup %12900  ;;  %v20439_v4 = vld [vmem:[#allocation103_spill] sm:$0xff] }
 0x3db   : > { %12906 = vtanh.f32 %v2880_v32  ;;  %3589 = vmatmul.mubr.f32.gmra.mrb[122].mxu0 %v20036_v8  ;;  %10559 = vmatprep.mubr.f32.mxu1 %v16106_v12  ;;  %v16207_v30 = vadd.f32 %v12895_v47, %v2925_v50  ;;  %v20437_v47 = vld [vmem:[#allocation42_spill] sm:$0xff]  ;;  %v20438_v50 = vld [vmem:[#allocation43_spill] sm:$0xff] }
 0x3dc   : > { %12908 = vrcp.f32 %v2816_v58  ;;  %3594 = vmatprep.mubr.f32.mxu0 %v16058_v63  ;;  %v2926_v11 = vmul.f32 %v12901_v33, %v2910_v10  ;;  %v20040_v58 = vmax.f32 %v16200_v46, 0.0  ;;  %v16228_v10 = vadd.f32 %v16051_v51, %v20439_v4  ;;  %v20443_v4 = vld [vmem:[#allocation47_spill] sm:$0xff] }
 0x3dd   : > { %20432 = vst [vmem:[#allocation94_spill] sm:$0xff] %v16207_v30  ;;  %11506 = vmatpush1.bf16.msra.mxu1 %v20433_v13  ;;  %v20043_v33 = vmax.f32 %v16218_v23, 0.0 }
 0x3de   : > { %11508 = vmatprep.subr.bf16.mxu1 %v20434_v5  ;;  %10560 = vmatmul.mubr.f32.gmra.mrb[88].mxu1 %v16173_v43  ;;  %v16212_v61 = vadd.f32 %v12899_v35, %v2926_v11 }
 0x3df   : > { %3595 = vmatmul.mubr.f32.gmra.mrb[124].mxu0 %v20035_v39  ;;  %10562 = vmatprep.mubr.f32.mxu1 %v16178_v0  ;;  %v20441_v39 = vld [vmem:[#allocation46_spill] sm:$0xff] }
 0x3e0   : > { %20435 = vst [vmem:[#allocation95_spill] sm:$0xff] %v16212_v61  ;;  %3600 = vmatprep.mubr.f32.mxu0 %v16168_v37 }
 0x3e1   : > { %11510 = vmatpush1.bf16.msra.mxu1 %v20437_v47 }
 0x3e2   : > { %11512 = vmatprep.subr.bf16.mxu1 %v20438_v50  ;;  %10563 = vmatmul.mubr.f32.gmra.mrb[90].mxu1 %v16182_v19 }
 0x3e3   : > { %v12903_v32 = vpop.eup %12902  ;;  %3601 = vmatmul.mubr.f32.gmra.mrb[126].mxu0 %v20040_v58  ;;  %10565 = vmatprep.mubr.f32.mxu1 %v16207_v30  ;;  %v20444_v58 = vld [vmem:[#allocation106_spill] sm:$0xff] }
 0x3e4   : > { %v12905_v35 = vpop.eup %12904  ;;  %v2911_v11 = vsub.f32 %v20440_v57, %v12903_v32  ;;  %3606 = vmatprep.mubr.f32.mxu0 %v16106_v12  ;;  %v16244_v6 = vadd.f32 %v16051_v51, %v20444_v58  ;;  %v20044_v57 = vmax.f32 %v16228_v10, 0.0 }
 0x3e5   : > { %v12907_v1 = vpop.eup %12906  ;;  %11514 = vmatpush1.bf16.msra.mxu1 %v20441_v39 }
 0x3e6   : > { %v2927_v8 = vmul.f32 %v12905_v35, %v2911_v11  ;;  %v2912_v26 = vsub.f32 %v20442_v15, %v12907_v1  ;;  %v12909_v55 = vpop.eup %12908  ;;  %11516 = vmatprep.subr.bf16.mxu1 %v20443_v4  ;;  %10566 = vmatmul.mubr.f32.gmra.mrb[92].mxu1 %v16212_v61  ;;  %v20446_v15 = vld [vmem:[#allocation50_spill] sm:$0xff]  ;;  %v20448_v11 = vld [vmem:[#allocation51_spill] sm:$0xff] }
 0x3e7   : > { %3607 = vmatmul.mubr.f32.gmra.mrb[128].mxu0 %v20043_v33  ;;  %v20449_v33 = vld [vmem:[#allocation105_spill] sm:$0xff] }
 0x3e8   : > { %v16247_v44 = vadd.f32 %v12903_v32, %v2927_v8  ;;  %v2928_v39 = vmul.f32 %v12909_v55, %v2912_v26  ;;  %3612 = vmatprep.mubr.f32.mxu0 %v16173_v43  ;;  %v16257_v4 = vadd.f32 %v16051_v51, %v20449_v33  ;;  %v20045_v8 = vmax.f32 %v16244_v6, 0.0  ;;  %v20450_v55 = vld [vmem:[#allocation54_spill] sm:$0xff]  ;;  %v20451_v26 = vld [vmem:[#allocation55_spill] sm:$0xff] }
 0x3e9   : > { %11518 = vmatpush1.bf16.msra.mxu1 %v20446_v15  ;;  %v20453_v33 = vld [vmem:[#allocation58_spill] sm:$0xff]  ;;  %v20461_v15 = vld [vmem:[#allocation109_spill] sm:$0xff] }
 0x3ea   : > { %20445 = vst [vmem:[#allocation12_spill] sm:$0xff] %v16247_v44  ;;  %10568 = vmatprep.mubr.f32.mxu1 %v16247_v44  ;;  %v16252_v35 = vadd.f32 %v12907_v1, %v2928_v39  ;;  %11520 = vmatprep.subr.bf16.mxu1 %v20448_v11  ;;  %v20452_v39 = vld [vmem:[#allocation108_spill] sm:$0xff]  ;;  %v20046_v32 = vmax.f32 %v16257_v4, 0.0  ;;  %v20454_v1 = vld [vmem:[#allocation59_spill] sm:$0xff] }
 0x3eb   : > { %3613 = vmatmul.mubr.f32.gmra.mrb[130].mxu0 %v20044_v57  ;;  %v16271_v58 = vadd.f32 %v16051_v51, %v20452_v39  ;;  %v20455_v57 = vld [vmem:[#allocation107_spill] sm:$0xff]  ;;  %v20456_v39 = vld [vmem:[#allocation62_spill] sm:$0xff] }
 0x3ec   : > { %20447 = vst [vmem:[#allocation87_spill] sm:$0xff] %v16252_v35  ;;  %10569 = vmatmul.mubr.f32.gmra.mrb[94].mxu1 %v16252_v35  ;;  %3618 = vmatprep.mubr.f32.mxu0 %v16178_v0  ;;  %v20460_v11 = vld [vmem:[#allocation67_spill] sm:$0xff] }
 0x3ed   : > { %3397 = vmatprep.mubr.f32.mxu1 %v16074_v48  ;;  %11522 = vmatpush1.bf16.msra.mxu1 %v20450_v55  ;;  %v16279_v55 = vadd.f32 %v16051_v51, %v20455_v57 }
 0x3ee   : > { %11524 = vmatprep.subr.bf16.mxu1 %v20451_v26  ;;  %v20457_v26 = vld [vmem:[#allocation63_spill] sm:$0xff] }
 0x3ef   : > { %3619 = vmatmul.mubr.f32.gmra.mrb[132].mxu0 %v20045_v8  ;;  %v20047_v8 = vmax.f32 %v16271_v58, 0.0  ;;  %v20048_v57 = vmax.f32 %v16279_v55, 0.0 }
 0x3f0   : > { %3624 = vmatprep.mubr.f32.mxu0 %v16182_v19 }
 0x3f1   : > { %11526 = vmatpush1.bf16.msra.mxu1 %v20453_v33  ;;  %v20458_v33 = vld [vmem:[#allocation110_spill] sm:$0xff] }
 0x3f2   : > { %11528 = vmatprep.subr.bf16.mxu1 %v20454_v1  ;;  %v16291_v1 = vadd.f32 %v16051_v51, %v20458_v33 }
 0x3f3   : > { %3625 = vmatmul.mubr.f32.gmra.mrb[134].mxu0 %v20046_v32  ;;  %v20459_v32 = vld [vmem:[#allocation66_spill] sm:$0xff] }
 0x3f4   : > { %3630 = vmatprep.mubr.f32.mxu0 %v16207_v30  ;;  %v20049_v33 = vmax.f32 %v16291_v1, 0.0 }
 0x3f5   : > { %11530 = vmatpush1.bf16.msra.mxu1 %v20456_v39  ;;  %v20463_v39 = vld [vmem:[#allocation72_spill] sm:$0xff] }
 0x3f6   : > { %11532 = vmatprep.subr.bf16.mxu1 %v20457_v26  ;;  %v16299_v26 = vadd.f32 %v16051_v51, %v20461_v15  ;;  %v20464_v51 = vld [vmem:[#allocation74_spill] sm:$0xff]  ;;  %v9544_v15 = vld [vmem:[%s14386_s12 + $0x180] sm:$0xff] }
 0x3f7   : > { %3631 = vmatmul.mubr.f32.gmra.mrb[136].mxu0 %v20047_v8  ;;  %v20462_v8 = vld [vmem:[#allocation70_spill] sm:$0xff] }
 0x3f8   : > { %3636 = vmatprep.mubr.f32.mxu0 %v16212_v61 }
 0x3f9   : > { %11534 = vmatpush1.bf16.msra.mxu1 %v20459_v32  ;;  %v20468_v32 = vmax.f32 %v16064_v34, 0.0  ;;  %v20472_v34 = vmax.f32 %v16093_v31, 0.0  ;;  %v20476_v31 = vmax.f32 %v16119_v49, 0.0  ;;  %v20480_v49 = vmax.f32 %v16136_v53, 0.0 }
 0x3fa   : > { %11536 = vmatprep.subr.bf16.mxu1 %v20460_v11  ;;  %v20050_v11 = vmax.f32 %v16299_v26, 0.0  ;;  %v20484_v53 = vmax.f32 %v16162_v42, 0.0  ;;  %v20488_v42 = vmax.f32 %v16188_v14, 0.0  ;;  %v9559_v14 = vld [vmem:[%s14386_s12 + $0x1f8] sm:$0xff] }
 0x3fb   : > { %3637 = vmatmul.mubr.f32.gmra.mrb[138].mxu0 %v20048_v57  ;;  %v20465_v57 = vld [vmem:[#allocation76_spill] sm:$0xff] }
 0x3fc   : > { %3642 = vmatprep.mubr.f32.mxu0 %v16247_v44 }
 0x3fd   : > { %11538 = vmatpush1.bf16.msra.mxu1 %v20462_v8  ;;  %v20466_v8 = vmax.f32 %v16055_v62, 0.0  ;;  %v9547_v62 = vld [vmem:[%s14386_s12 + $0x198] sm:$0xff] }
 0x3fe   : > { %11540 = vmatprep.subr.bf16.mxu1 %v20463_v39  ;;  %v9546_v39 = vld [vmem:[%s14386_s12 + $0x190] sm:$0xff] }
 0x3ff   : > { %3643 = vmatmul.mubr.f32.gmra.mrb[140].mxu0 %v20049_v33  ;;  %v9545_v33 = vld [vmem:[%s14386_s12 + $0x188] sm:$0xff] }
 0x400   : > { %3648 = vmatprep.mubr.f32.mxu0 %v16252_v35 }
 0x401   : > { %11542 = vmatpush1.bf16.msra.mxu1 %v20464_v51  ;;  %v20467_v51 = vld [vmem:[#allocation77_spill] sm:$0xff] }
 0x402   : > { %11608 = vmatprep.subr.bf16.mxu1 %v20465_v57 }
 0x403   : > { %3649 = vmatmul.mubr.f32.gmra.mrb[142].mxu0 %v20050_v11  ;;  %v20470_v11 = vld [vmem:[#allocation17_spill] sm:$0xff] }
 0x404   : > { %3398 = vmatmul.mubr.f32.vlgmr.msra.gmra.mrb[96].mxu1 %v20466_v8  ;;  %10675 = vmatprep.mubr.msk.f32.mxu0 %vm1103_vm0, %v9544_v15  ;;  %v9548_v8 = vld [vmem:[%s14386_s12 + $0x1a0] sm:$0xff] }
 0x405   : > { %3403 = vmatprep.mubr.f32.mxu1 %v16001_v41  ;;  %11610 = vmatpush3.bf16.msra.mxu1 %v20465_v57  ;;  %v20469_v15 = vld [vmem:[#allocation16_spill] sm:$0xff]  ;;  %v20471_v57 = vld [vmem:[#allocation79_spill] sm:$0xff] }
 0x406   : > { %11612 = vmatprep.subr.bf16.mxu1 %v20467_v51 }
 0x407   : > { %10676 = vmatmul.mubr.msk.f32.vlgmr.msra.gmra.mrb[144].mxu0 %vm1103_vm0, %v9545_v33  ;;  %v20473_v33 = vld [vmem:[#allocation20_spill] sm:$0xff] }
 0x408   : > { %3404 = vmatmul.mubr.f32.gmra.mrb[98].mxu1 %v20468_v32  ;;  %10678 = vmatprep.mubr.msk.f32.mxu0 %vm1103_vm0, %v9546_v39  ;;  %v9549_v32 = vld [vmem:[%s14386_s12 + $0x1a8] sm:$0xff]  ;;  %v9550_v39 = vld [vmem:[%s14386_s12 + $0x1b0] sm:$0xff] }
 0x409   : > { %3409 = vmatprep.mubr.f32.mxu1 %v16018_v28  ;;  %11718 = vmatpush1.bf16.msra.mxu0 %v20469_v15 }
 0x40a   : > { %11720 = vmatprep.subr.bf16.mxu0 %v20470_v11  ;;  %11614 = vmatpush3.bf16.msra.mxu1 %v20467_v51  ;;  %v20474_v11 = vld [vmem:[#allocation21_spill] sm:$0xff] }
 0x40b   : > { %10679 = vmatmul.mubr.msk.f32.gmra.mrb[146].mxu0 %vm1103_vm0, %v9547_v62  ;;  %11616 = vmatprep.subr.bf16.mxu1 %v20471_v57  ;;  %v20475_v62 = vld [vmem:[#allocation80_spill] sm:$0xff] }
 0x40c   : > { %3410 = vmatmul.mubr.f32.gmra.mrb[100].mxu1 %v20472_v34  ;;  %10681 = vmatprep.mubr.msk.f32.mxu0 %vm1103_vm0, %v9548_v8  ;;  %v9551_v8 = vld [vmem:[%s14386_s12 + $0x1b8] sm:$0xff]  ;;  %v9552_v34 = vld [vmem:[%s14386_s12 + $0x1c0] sm:$0xff] }
 0x40d   : > { %3415 = vmatprep.mubr.f32.mxu1 %v16145_v56  ;;  %11722 = vmatpush1.bf16.msra.mxu0 %v20473_v33  ;;  %v20477_v33 = vld [vmem:[#allocation24_spill] sm:$0xff] }
 0x40e   : > { %11724 = vmatprep.subr.bf16.mxu0 %v20474_v11  ;;  %11618 = vmatpush3.bf16.msra.mxu1 %v20471_v57  ;;  %v20478_v11 = vld [vmem:[#allocation25_spill] sm:$0xff] }
 0x40f   : > { %10682 = vmatmul.mubr.msk.f32.gmra.mrb[148].mxu0 %vm1103_vm0, %v9549_v32  ;;  %11620 = vmatprep.subr.bf16.mxu1 %v20475_v62  ;;  %v20479_v32 = vld [vmem:[#allocation81_spill] sm:$0xff] }
 0x410   : > { %3416 = vmatmul.mubr.f32.gmra.mrb[102].mxu1 %v20476_v31  ;;  %10684 = vmatprep.mubr.msk.f32.mxu0 %vm1103_vm0, %v9550_v39  ;;  %v9553_v39 = vld [vmem:[%s14386_s12 + $0x1c8] sm:$0xff]  ;;  %v9554_v31 = vld [vmem:[%s14386_s12 + $0x1d0] sm:$0xff] }
 0x411   : > { %3421 = vmatprep.mubr.f32.mxu1 %v16034_v20  ;;  %11726 = vmatpush1.bf16.msra.mxu0 %v20477_v33  ;;  %v20481_v33 = vld [vmem:[#allocation28_spill] sm:$0xff] }
 0x412   : > { %11728 = vmatprep.subr.bf16.mxu0 %v20478_v11  ;;  %11622 = vmatpush3.bf16.msra.mxu1 %v20475_v62  ;;  %v20482_v11 = vld [vmem:[#allocation29_spill] sm:$0xff] }
 0x413   : > { %10685 = vmatmul.mubr.msk.f32.gmra.mrb[150].mxu0 %vm1103_vm0, %v9551_v8  ;;  %11624 = vmatprep.subr.bf16.mxu1 %v20479_v32  ;;  %v20483_v8 = vld [vmem:[#allocation82_spill] sm:$0xff] }
 0x414   : > { %3422 = vmatmul.mubr.f32.gmra.mrb[104].mxu1 %v20480_v49  ;;  %10687 = vmatprep.mubr.msk.f32.mxu0 %vm1103_vm0, %v9552_v34  ;;  %v9555_v34 = vld [vmem:[%s14386_s12 + $0x1d8] sm:$0xff]  ;;  %v9556_v49 = vld [vmem:[%s14386_s12 + $0x1e0] sm:$0xff] }
 0x415   : > { %3427 = vmatprep.mubr.f32.mxu1 %v16150_v27  ;;  %11730 = vmatpush1.bf16.msra.mxu0 %v20481_v33  ;;  %v20485_v33 = vld [vmem:[#allocation32_spill] sm:$0xff] }
 0x416   : > { %11732 = vmatprep.subr.bf16.mxu0 %v20482_v11  ;;  %11626 = vmatpush3.bf16.msra.mxu1 %v20479_v32  ;;  %v20486_v11 = vld [vmem:[#allocation33_spill] sm:$0xff]  ;;  %v20489_v32 = vld [vmem:[#allocation36_spill] sm:$0xff] }
 0x417   : > { %10688 = vmatmul.mubr.msk.f32.gmra.mrb[152].mxu0 %vm1103_vm0, %v9553_v39  ;;  %11628 = vmatprep.subr.bf16.mxu1 %v20483_v8  ;;  %v20487_v39 = vld [vmem:[#allocation83_spill] sm:$0xff] }
 0x418   : > { %3428 = vmatmul.mubr.f32.gmra.mrb[106].mxu1 %v20484_v53  ;;  %10690 = vmatprep.mubr.msk.f32.mxu0 %vm1103_vm0, %v9554_v31  ;;  %v9557_v31 = vld [vmem:[%s14386_s12 + $0x1e8] sm:$0xff]  ;;  %v9558_v53 = vld [vmem:[%s14386_s12 + $0x1f0] sm:$0xff] }
 0x419   : > { %3433 = vmatprep.mubr.f32.mxu1 %v16058_v63  ;;  %11734 = vmatpush1.bf16.msra.mxu0 %v20485_v33  ;;  %v20490_v33 = vld [vmem:[#allocation37_spill] sm:$0xff] }
 0x41a   : > { %11736 = vmatprep.subr.bf16.mxu0 %v20486_v11  ;;  %11630 = vmatpush3.bf16.msra.mxu1 %v20483_v8  ;;  %v20492_v11 = vmax.f32 %v16200_v46, 0.0  ;;  %v20497_v46 = vld [vmem:[#allocation44_spill] sm:$0xff] }
 0x41b   : > { %10691 = vmatmul.mubr.msk.f32.gmra.mrb[154].mxu0 %vm1103_vm0, %v9555_v34  ;;  %11632 = vmatprep.subr.bf16.mxu1 %v20487_v39  ;;  %v20491_v34 = vld [vmem:[#allocation84_spill] sm:$0xff] }
 0x41c   : > { %3434 = vmatmul.mubr.f32.gmra.mrb[108].mxu1 %v20488_v42  ;;  %10693 = vmatprep.mubr.msk.f32.mxu0 %vm1103_vm0, %v9556_v49  ;;  %v20493_v49 = vld [vmem:[#allocation40_spill] sm:$0xff]  ;;  %v20494_v42 = vld [vmem:[#allocation41_spill] sm:$0xff] }
 0x41d   : > { %3439 = vmatprep.mubr.f32.mxu1 %v16168_v37  ;;  %11738 = vmatpush1.bf16.msra.mxu0 %v20489_v32 }
 0x41e   : > { %11740 = vmatprep.subr.bf16.mxu0 %v20490_v33  ;;  %11634 = vmatpush3.bf16.msra.mxu1 %v20487_v39  ;;  %v20495_v33 = vld [vmem:[#allocation13_spill] sm:$0xff] }
 0x41f   : > { %10694 = vmatmul.mubr.msk.f32.gmra.mrb[156].mxu0 %vm1103_vm0, %v9557_v31  ;;  %11636 = vmatprep.subr.bf16.mxu1 %v20491_v34  ;;  %v20496_v31 = vmax.f32 %v16218_v23, 0.0  ;;  %v20503_v23 = vld [vmem:[#allocation52_spill] sm:$0xff] }
 0x420   : > { %3440 = vmatmul.mubr.f32.gmra.mrb[110].mxu1 %v20492_v11  ;;  %10696 = vmatprep.mubr.msk.f32.mxu0 %vm1103_vm0, %v9558_v53  ;;  %v20498_v11 = vld [vmem:[#allocation45_spill] sm:$0xff]  ;;  %v20499_v53 = vmax.f32 %v16228_v10, 0.0  ;;  %v20506_v10 = vld [vmem:[#allocation56_spill] sm:$0xff] }
 0x421   : > { %3445 = vmatprep.mubr.f32.mxu1 %v16106_v12  ;;  %11742 = vmatpush1.bf16.msra.mxu0 %v20493_v49  ;;  %v20501_v49 = vld [vmem:[#allocation49_spill] sm:$0xff] }
 0x422   : > { %11744 = vmatprep.subr.bf16.mxu0 %v20494_v42  ;;  %11638 = vmatpush3.bf16.msra.mxu1 %v20491_v34  ;;  %v20500_v42 = vld [vmem:[#allocation48_spill] sm:$0xff] }
 0x423   : > { %10697 = vmatmul.mubr.msk.f32.gmra.mrb[158].mxu0 %vm1103_vm0, %v9559_v14  ;;  %11652 = vmatprep.subr.bf16.mxu1 %v20495_v33  ;;  %v20502_v14 = vmax.f32 %v16244_v6, 0.0  ;;  %v20509_v6 = vld [vmem:[#allocation60_spill] sm:$0xff] }
 0x424   : > { %3446 = vmatmul.mubr.f32.gmra.mrb[112].mxu1 %v20496_v31  ;;  %v20504_v31 = vld [vmem:[#allocation53_spill] sm:$0xff] }
 0x425   : > { %3451 = vmatprep.mubr.f32.mxu1 %v16173_v43  ;;  %11746 = vmatpush1.bf16.msra.mxu0 %v20497_v46 }
 0x426   : > { %11748 = vmatprep.subr.bf16.mxu0 %v20498_v11  ;;  %v20505_v11 = vmax.f32 %v16257_v4, 0.0  ;;  %v20512_v4 = vld [vmem:[#allocation64_spill] sm:$0xff] }
 0x428   : > { %3452 = vmatmul.mubr.f32.gmra.mrb[114].mxu1 %v20499_v53  ;;  %v20507_v53 = vld [vmem:[#allocation57_spill] sm:$0xff] }
 0x429   : > { %3457 = vmatprep.mubr.f32.mxu1 %v16178_v0  ;;  %11750 = vmatpush1.bf16.msra.mxu0 %v20500_v42 }
 0x42a   : > { %11752 = vmatprep.subr.bf16.mxu0 %v20501_v49  ;;  %v20508_v49 = vmax.f32 %v16271_v58, 0.0  ;;  %v20515_v58 = vld [vmem:[#allocation68_spill] sm:$0xff] }
 0x42c   : > { %3458 = vmatmul.mubr.f32.gmra.mrb[116].mxu1 %v20502_v14  ;;  %v20510_v14 = vld [vmem:[#allocation61_spill] sm:$0xff] }
 0x42d   : > { %3463 = vmatprep.mubr.f32.mxu1 %v16182_v19  ;;  %11754 = vmatpush1.bf16.msra.mxu0 %v20503_v23 }
 0x42e   : > { %11756 = vmatprep.subr.bf16.mxu0 %v20504_v31  ;;  %v20511_v31 = vmax.f32 %v16279_v55, 0.0  ;;  %v20517_v55 = vmax.f32 %v16299_v26, 0.0 }
 0x430   : > { %3464 = vmatmul.mubr.f32.gmra.mrb[118].mxu1 %v20505_v11  ;;  %v20513_v11 = vld [vmem:[#allocation65_spill] sm:$0xff] }
 0x431   : > { %3469 = vmatprep.mubr.f32.mxu1 %v16207_v30  ;;  %11758 = vmatpush1.bf16.msra.mxu0 %v20506_v10 }
 0x432   : > { %11760 = vmatprep.subr.bf16.mxu0 %v20507_v53  ;;  %v20514_v53 = vmax.f32 %v16291_v1, 0.0 }
 0x434   : > { %3470 = vmatmul.mubr.f32.gmra.mrb[120].mxu1 %v20508_v49  ;;  %v20516_v49 = vld [vmem:[#allocation69_spill] sm:$0xff] }
 0x435   : > { %3475 = vmatprep.mubr.f32.mxu1 %v16212_v61  ;;  %11762 = vmatpush1.bf16.msra.mxu0 %v20509_v6 }
 0x436   : > { %11764 = vmatprep.subr.bf16.mxu0 %v20510_v14  ;;  %v20519_v14 = vld [vmem:[#allocation73_spill] sm:$0xff] }
 0x438   : > { %3476 = vmatmul.mubr.f32.gmra.mrb[122].mxu1 %v20511_v31  ;;  %v20518_v31 = vld [vmem:[#allocation71_spill] sm:$0xff] }
 0x439   : > { %3481 = vmatprep.mubr.f32.mxu1 %v16247_v44  ;;  %11766 = vmatpush1.bf16.msra.mxu0 %v20512_v4  ;;  %v20520_v4 = vld [vmem:[#allocation75_spill] sm:$0xff] }
 0x43a   : > { %11768 = vmatprep.subr.bf16.mxu0 %v20513_v11 }
 0x43c   : > { %3482 = vmatmul.mubr.f32.gmra.mrb[124].mxu1 %v20514_v53 }
 0x43d   : > { %3487 = vmatprep.mubr.f32.mxu1 %v16252_v35  ;;  %11770 = vmatpush1.bf16.msra.mxu0 %v20515_v58  ;;  %v16447_v58 = vld [vmem:[%s19859_s5 + $0x2] ss:$0 sm:$0xff] }
 0x43e   : > { %11772 = vmatprep.subr.bf16.mxu0 %v20516_v49 }
 0x440   : > { %3488 = vmatmul.mubr.f32.gmra.mrb[126].mxu1 %v20517_v55 }
 0x441   : > { %11774 = vmatpush1.bf16.msra.mxu0 %v20518_v31 }
 0x442   : > { %11776 = vmatprep.subr.bf16.mxu0 %v20519_v14 }
 0x445   : > { %11778 = vmatpush1.bf16.msra.mxu0 %v20520_v4 }
 0x446   : > { %11812 = vmatprep.subr.bf16.mxu0 %v14363_v3 }
 0x497   : > { %v10549_v1 = vpop.f32.mrb[80].mxu1  ;;  %v16442_v53 = vpop.f32.mrb[112].mxu0 }
 0x498   : > { %v3017_v49 = vadd.f32 %v16447_v58, %v10549_v1  ;;  %v3011_v26 = vpop.f32.mrb[81].mxu1  ;;  %v16450_v55 = vpop.f32.mrb[113].mxu0 }
 0x499   : > { %v3012_v14 = vadd.f32 %v16447_v58, %v3011_v26 }
 0x49a   : > { %9449 = vst [vmem:[%s15816_s23 + $0x88] sm:$0xff] %v3017_v49 }
 0x49b   : > { %9448 = vst [vmem:[%s15816_s23 + $0x80] sm:$0xff] %v3012_v14  ;;  %v16455_v4 = vpop.f32.mrb[114].mxu0 }
 0x49c   : > { %v16457_v31 = vpop.f32.mrb[115].mxu0 }
 0x49f   : > { %v16459_v11 = vpop.f32.mrb[116].mxu0 }
 0x4a0   : > { %v16461_v6 = vpop.f32.mrb[117].mxu0 }
 0x4a5   : > { %v10552_v1 = vpop.f32.mrb[82].mxu1 }
 0x4a6   : > { %v3027_v10 = vadd.f32 %v16447_v58, %v10552_v1  ;;  %v3021_v23 = vpop.f32.mrb[83].mxu1  ;;  %v16464_v42 = vpop.f32.mrb[118].mxu0 }
 0x4a7   : > { %v3022_v26 = vadd.f32 %v16447_v58, %v3021_v23  ;;  %v16467_v49 = vpop.f32.mrb[119].mxu0 }
 0x4a8   : > { %9451 = vst [vmem:[%s15816_s23 + $0x98] sm:$0xff] %v3027_v10 }
 0x4a9   : > { %9450 = vst [vmem:[%s15816_s23 + $0x90] sm:$0xff] %v3022_v26  ;;  %v10555_v14 = vpop.f32.mrb[84].mxu1 }
 0x4aa   : > { %v3037_v46 = vadd.f32 %v16447_v58, %v10555_v14  ;;  %v3031_v33 = vpop.f32.mrb[85].mxu1  ;;  %v16472_v34 = vpop.f32.mrb[120].mxu0 }
 0x4ab   : > { %v3032_v32 = vadd.f32 %v16447_v58, %v3031_v33  ;;  %v16475_v1 = vpop.f32.mrb[121].mxu0 }
 0x4ac   : > { %9453 = vst [vmem:[%s15816_s23 + $0xa8] sm:$0xff] %v3037_v46 }
 0x4ad   : > { %9452 = vst [vmem:[%s15816_s23 + $0xa0] sm:$0xff] %v3032_v32  ;;  %v10558_v23 = vpop.f32.mrb[86].mxu1 }
 0x4ae   : > { %v3047_v10 = vadd.f32 %v16447_v58, %v10558_v23  ;;  %v3041_v39 = vpop.f32.mrb[87].mxu1  ;;  %v16480_v26 = vpop.f32.mrb[122].mxu0 }
 0x4af   : > { %v3042_v8 = vadd.f32 %v16447_v58, %v3041_v39  ;;  %v16483_v14 = vpop.f32.mrb[123].mxu0 }
 0x4b0   : > { %9455 = vst [vmem:[%s15816_s23 + $0xb8] sm:$0xff] %v3047_v10 }
 0x4b1   : > { %9454 = vst [vmem:[%s15816_s23 + $0xb0] sm:$0xff] %v3042_v8  ;;  %v10561_v33 = vpop.f32.mrb[88].mxu1 }
 0x4b2   : > { %v3057_v46 = vadd.f32 %v16447_v58, %v10561_v33  ;;  %v3051_v62 = vpop.f32.mrb[89].mxu1  ;;  %v16488_v32 = vpop.f32.mrb[124].mxu0 }
 0x4b3   : > { %v3052_v57 = vadd.f32 %v16447_v58, %v3051_v62  ;;  %v16491_v23 = vpop.f32.mrb[125].mxu0 }
 0x4b4   : > { %9457 = vst [vmem:[%s15816_s23 + $0xc8] sm:$0xff] %v3057_v46 }
 0x4b5   : > { %9456 = vst [vmem:[%s15816_s23 + $0xc0] sm:$0xff] %v3052_v57  ;;  %v10564_v39 = vpop.f32.mrb[90].mxu1 }
 0x4b6   : > { %v3067_v10 = vadd.f32 %v16447_v58, %v10564_v39  ;;  %v3061_v15 = vpop.f32.mrb[91].mxu1  ;;  %v16496_v8 = vpop.f32.mrb[126].mxu0 }
 0x4b7   : > { %v3062_v51 = vadd.f32 %v16447_v58, %v3061_v15  ;;  %v16499_v33 = vpop.f32.mrb[127].mxu0 }
 0x4b8   : > { %9459 = vst [vmem:[%s15816_s23 + $0xd8] sm:$0xff] %v3067_v10 }
 0x4b9   : > { %9458 = vst [vmem:[%s15816_s23 + $0xd0] sm:$0xff] %v3062_v51  ;;  %v10567_v62 = vpop.f32.mrb[92].mxu1 }
 0x4ba   : > { %v3077_v46 = vadd.f32 %v16447_v58, %v10567_v62  ;;  %v3071_v35 = vpop.f32.mrb[93].mxu1  ;;  %v16504_v57 = vpop.f32.mrb[128].mxu0 }
 0x4bb   : > { %v3072_v44 = vadd.f32 %v16447_v58, %v3071_v35  ;;  %v16507_v39 = vpop.f32.mrb[129].mxu0 }
 0x4bc   : > { %9461 = vst [vmem:[%s15816_s23 + $0xe8] sm:$0xff] %v3077_v46 }
 0x4bd   : > { %9460 = vst [vmem:[%s15816_s23 + $0xe0] sm:$0xff] %v3072_v44 }
 0x4be   : > { %v16511_v15 = vpop.f32.mrb[130].mxu0 }
 0x4bf   : > { %v10570_v50 = vpop.f32.mrb[94].mxu1  ;;  %v16514_v51 = vpop.f32.mrb[131].mxu0 }
 0x4c0   : > { %v3087_v10 = vadd.f32 %v16447_v58, %v10570_v50  ;;  %v3081_v47 = vpop.f32.mrb[95].mxu1 }
 0x4c1   : > { %v3082_v5 = vadd.f32 %v16447_v58, %v3081_v47 }
 0x4c2   : > { %9463 = vst [vmem:[%s15816_s23 + $0xf8] sm:$0xff] %v3087_v10  ;;  %v16519_v62 = vpop.f32.mrb[132].mxu0 }
 0x4c3   : > { %9462 = vst [vmem:[%s15816_s23 + $0xf0] sm:$0xff] %v3082_v5  ;;  %v16521_v13 = vpop.f32.mrb[133].mxu0 }
 0x4c6   : > { %v16523_v35 = vpop.f32.mrb[134].mxu0 }
 0x4c7   : > { %v16525_v46 = vpop.f32.mrb[135].mxu0 }
 0x4ca   : > { %v16527_v44 = vpop.f32.mrb[136].mxu0 }
 0x4cb   : > { %v16529_v61 = vpop.f32.mrb[137].mxu0 }
 0x4ce   : > { %v16531_v50 = vpop.f32.mrb[138].mxu0 }
 0x4cf   : > { %20521 = vst [vmem:[#allocation97_spill] sm:$0xff] %v16531_v50  ;;  %v16533_v36 = vpop.f32.mrb[139].mxu0 }
 0x4d2   : > { %v16535_v16 = vpop.f32.mrb[140].mxu0 }
 0x4d3   : > { %20522 = vst [vmem:[#allocation88_spill] sm:$0xff] %v16535_v16  ;;  %v16537_v47 = vpop.f32.mrb[141].mxu0 }
 0x4d4   : > { %20523 = vst [vmem:[#allocation99_spill] sm:$0xff] %v16537_v47 }
 0x4d6   : > { %v16539_v5 = vpop.f32.mrb[142].mxu0 }
 0x4d7   : > { %20524 = vst [vmem:[#allocation96_spill] sm:$0xff] %v16539_v5  ;;  %v3399_v58 = vpop.f32.mrb[96].mxu1  ;;  %v16541_v10 = vpop.f32.mrb[143].mxu0 }
 0x4d8   : > { %20525 = vst [vmem:[#allocation102_spill] sm:$0xff] %v16541_v10  ;;  %v3400_v30 = vadd.f32 %v3399_v58, %v15230_v18  ;;  %v3401_v52 = vpop.f32.mrb[97].mxu1 }
 0x4d9   : > { %v3402_v43 = vadd.f32 %v3401_v52, %v15233_v45 }
 0x4da   : > { %v9496_v40 = vmul.f32 -1.442695, %v3400_v30  ;;  %v16544_v9 = vpop.f32.mrb[144].mxu0 }
 0x4db   : > { %v3405_v19 = vpop.f32.mrb[98].mxu1  ;;  %v16546_v0 = vpop.f32.mrb[145].mxu0  ;;  %v9512_v29 = vmul.f32 -1.442695, %v3402_v43 }
 0x4dc   : > { %12910 = vpow2.f32 %v9496_v40  ;;  %v3406_v2 = vadd.f32 %v3405_v19, %v15230_v18  ;;  %v3407_v22 = vpop.f32.mrb[99].mxu1 }
 0x4dd   : > { %v3408_v10 = vadd.f32 %v3407_v22, %v15233_v45 }
 0x4de   : > { %v9497_v47 = vmul.f32 -1.442695, %v3406_v2  ;;  %v16550_v5 = vpop.f32.mrb[146].mxu0 }
 0x4df   : > { %20526 = vst [vmem:[#allocation89_spill] sm:$0xff] %v16550_v5  ;;  %v3411_v16 = vpop.f32.mrb[100].mxu1  ;;  %v16553_v58 = vpop.f32.mrb[147].mxu0  ;;  %v9513_v59 = vmul.f32 -1.442695, %v3408_v10 }
 0x4e0   : > { %12912 = vpow2.f32 %v9497_v47  ;;  %v3412_v30 = vadd.f32 %v3411_v16, %v15230_v18  ;;  %v3413_v37 = vpop.f32.mrb[101].mxu1 }
 0x4e1   : > { %v3414_v40 = vadd.f32 %v3413_v37, %v15233_v45 }
 0x4e2   : > { %v9498_v27 = vmul.f32 -1.442695, %v3412_v30  ;;  %v16557_v19 = vpop.f32.mrb[148].mxu0 }
 0x4e3   : > { %20527 = vst [vmem:[#allocation90_spill] sm:$0xff] %v16557_v19  ;;  %v3417_v52 = vpop.f32.mrb[102].mxu1  ;;  %v16559_v2 = vpop.f32.mrb[149].mxu0  ;;  %v9514_v47 = vmul.f32 -1.442695, %v3414_v40 }
 0x4e4   : > { %20528 = vst [vmem:[#allocation101_spill] sm:$0xff] %v16559_v2  ;;  %12914 = vpow2.f32 %v9498_v27  ;;  %v3418_v22 = vadd.f32 %v3417_v52, %v15230_v18  ;;  %v3419_v38 = vpop.f32.mrb[103].mxu1 }
 0x4e5   : > { %12916 = vpow2.f32 %v9512_v29  ;;  %v3420_v52 = vadd.f32 %v3419_v38, %v15233_v45 }
 0x4e6   : > { %v12911_v56 = vpop.eup %12910  ;;  %v9499_v50 = vmul.f32 -1.442695, %v3418_v22  ;;  %v16562_v16 = vpop.f32.mrb[150].mxu0  ;;  %12918 = vpow2.f32 %v9513_v59 }
 0x4e7   : > { %20529 = vst [vmem:[#allocation104_spill] sm:$0xff] %v16562_v16  ;;  %v3703_v43 = vadd.f32 1.0, %v12911_v56  ;;  %v3423_v30 = vpop.f32.mrb[104].mxu1  ;;  %v16564_v37 = vpop.f32.mrb[151].mxu0 }
 0x4e8   : > { %20530 = vst [vmem:[#allocation103_spill] sm:$0xff] %v16564_v37  ;;  %12920 = vpow2.f32 %v9499_v50  ;;  %v3424_v10 = vadd.f32 %v3423_v30, %v15230_v18  ;;  %v3425_v19 = vpop.f32.mrb[105].mxu1 }
 0x4e9   : > { %12922 = vrcp.f32 %v3703_v43  ;;  %v3426_v22 = vadd.f32 %v3425_v19, %v15233_v45  ;;  %v9515_v43 = vmul.f32 -1.442695, %v3420_v52 }
 0x4ea   : > { %v12913_v27 = vpop.eup %12912  ;;  %12924 = vpow2.f32 %v9514_v47  ;;  %v9500_v2 = vmul.f32 -1.442695, %v3424_v10  ;;  %v16568_v29 = vpop.f32.mrb[152].mxu0 }
 0x4eb   : > { %20531 = vst [vmem:[#allocation91_spill] sm:$0xff] %v16568_v29  ;;  %v3704_v40 = vadd.f32 1.0, %v12913_v27  ;;  %v3429_v56 = vpop.f32.mrb[106].mxu1  ;;  %v16571_v59 = vpop.f32.mrb[153].mxu0  ;;  %v9516_v10 = vmul.f32 -1.442695, %v3426_v22  ;;  %v3561_v22 = vadd.f32 %v16442_v53, %v15278_v17  ;;  %v3569_v53 = vadd.f32 %v16457_v31, %v15273_v24 }
 0x4ec   : > { %20532 = vst [vmem:[#allocation92_spill] sm:$0xff] %v16571_v59  ;;  %12926 = vpow2.f32 %v9500_v2  ;;  %v3430_v50 = vadd.f32 %v3429_v56, %v15230_v18  ;;  %v3431_v16 = vpop.f32.mrb[107].mxu1 }
 0x4ed   : > { %12928 = vrcp.f32 %v3704_v40  ;;  %v3563_v40 = vadd.f32 %v16450_v55, %v15273_v24 }
 0x4ee   : > { %v12915_v30 = vpop.eup %12914  ;;  %v9501_v37 = vmul.f32 -1.442695, %v3430_v50  ;;  %v16574_v47 = vpop.f32.mrb[154].mxu0 }
 0x4ef   : > { %20533 = vst [vmem:[#allocation106_spill] sm:$0xff] %v16574_v47  ;;  %v3705_v38 = vadd.f32 1.0, %v12915_v30  ;;  %v3435_v7 = vpop.f32.mrb[108].mxu1  ;;  %v16576_v29 = vpop.f32.mrb[155].mxu0 }
 0x4f0   : > { %20534 = vst [vmem:[#allocation105_spill] sm:$0xff] %v16576_v29  ;;  %v12917_v27 = vpop.eup %12916  ;;  %12930 = vpow2.f32 %v9501_v37  ;;  %v3436_v19 = vadd.f32 %v3435_v7, %v15230_v18  ;;  %v3437_v59 = vpop.f32.mrb[109].mxu1 }
 0x4f1   : > { %v12919_v2 = vpop.eup %12918  ;;  %12932 = vrcp.f32 %v3705_v38  ;;  %v3799_v47 = vadd.f32 1.0, %v12917_v27 }
 0x4f2   : > { %v12921_v56 = vpop.eup %12920  ;;  %12934 = vpow2.f32 %v9515_v43  ;;  %v9502_v52 = vmul.f32 -1.442695, %v3436_v19  ;;  %v16581_v50 = vpop.f32.mrb[156].mxu0  ;;  %v3800_v60 = vadd.f32 1.0, %v12919_v2  ;;  %v3432_v19 = vadd.f32 %v3431_v16, %v15233_v45 }
 0x4f3   : > { %20535 = vst [vmem:[#allocation108_spill] sm:$0xff] %v16581_v50  ;;  %v12923_v30 = vpop.eup %12922  ;;  %v3706_v29 = vadd.f32 1.0, %v12921_v56  ;;  %12936 = vpow2.f32 %v9516_v10  ;;  %v3441_v37 = vpop.f32.mrb[110].mxu1 }
 0x4f4   : > { %v16585_v7 = vpop.f32.mrb[157].mxu0  ;;  %v12925_v5 = vpop.eup %12924  ;;  %v3847_v38 = vmul.f32 %v12923_v30, %v3563_v40  ;;  %12938 = vpow2.f32 %v9502_v52  ;;  %v3442_v55 = vadd.f32 %v3441_v37, %v15230_v18 }
 0x4f5   : > { %20536 = vst [vmem:[#allocation107_spill] sm:$0xff] %v16585_v7  ;;  %v3443_v43 = vpop.f32.mrb[111].mxu1  ;;  %12940 = vrcp.f32 %v3706_v29  ;;  %v3801_v40 = vadd.f32 1.0, %v12925_v5  ;;  %v3567_v29 = vadd.f32 %v16455_v4, %v15278_v17  ;;  %v3575_v5 = vadd.f32 %v16461_v6, %v15273_v24 }
 0x4f6   : > { %v12927_v50 = vpop.eup %12926  ;;  %v9503_v27 = vmul.f32 -1.442695, %v3442_v55  ;;  %v16591_v56 = vadd.f32 %v3847_v38, %v3561_v22  ;;  %v16593_v10 = vpop.f32.mrb[158].mxu0  ;;  %12942 = vrcp.f32 %v3799_v47  ;;  %v9517_v22 = vmul.f32 -1.442695, %v3432_v19 }
 0x4f7   : > { %20537 = vst [vmem:[#allocation110_spill] sm:$0xff] %v16593_v10  ;;  %v12929_v7 = vpop.eup %12928  ;;  %v3707_v2 = vadd.f32 1.0, %v12927_v50  ;;  %v3447_v52 = vpop.f32.mrb[112].mxu1  ;;  %12944 = vrcp.f32 %v3800_v60  ;;  %v3438_v38 = vadd.f32 %v3437_v59, %v15233_v45  ;;  %v3573_v60 = vadd.f32 %v16459_v11, %v15278_v17 }
 0x4f8   : > { %v16595_v30 = vpop.f32.mrb[159].mxu0  ;;  %v3848_v16 = vmul.f32 %v12929_v7, %v3569_v53  ;;  %v3448_v37 = vadd.f32 %v3447_v52, %v15230_v18  ;;  %v3449_v31 = vpop.f32.mrb[113].mxu1  ;;  %v3444_v19 = vadd.f32 %v3443_v43, %v15233_v45  ;;  %v3579_v43 = vadd.f32 %v16464_v42, %v15278_v17 }
 0x4f9   : > { %20538 = vst [vmem:[#allocation109_spill] sm:$0xff] %v16595_v30  ;;  %12946 = vrcp.f32 %v3707_v2  ;;  %v9518_v52 = vmul.f32 -1.442695, %v3438_v38 }
 0x4fa   : > { %v12931_v55 = vpop.eup %12930  ;;  %v3864_v10 = vadd.f32 %v3848_v16, %v3567_v29  ;;  %12948 = vpow2.f32 %v9503_v27  ;;  %v9504_v30 = vmul.f32 -1.442695, %v3448_v37 }
 0x4fb   : > { %v12933_v47 = vpop.eup %12932  ;;  %12950 = vrcp.f32 %v3801_v40  ;;  %v3708_v50 = vadd.f32 1.0, %v12931_v55  ;;  %v3453_v4 = vpop.f32.mrb[114].mxu1  ;;  %v3581_v40 = vadd.f32 %v16467_v49, %v15273_v24  ;;  %v3450_v49 = vadd.f32 %v3449_v31, %v15233_v45 }
 0x4fc   : > { %v12935_v7 = vpop.eup %12934  ;;  %12952 = vtanh.f32 %v3864_v10  ;;  %v3849_v53 = vmul.f32 %v12933_v47, %v3575_v5  ;;  %v3455_v59 = vpop.f32.mrb[115].mxu1  ;;  %v3454_v6 = vadd.f32 %v3453_v4, %v15230_v18  ;;  %v3587_v47 = vadd.f32 %v16475_v1, %v15273_v24 }
 0x4fd   : > { %v12937_v2 = vpop.eup %12936  ;;  %12954 = vpow2.f32 %v9517_v22  ;;  %v3802_v10 = vadd.f32 1.0, %v12935_v7  ;;  %v9519_v22 = vmul.f32 -1.442695, %v3444_v19  ;;  %v3585_v1 = vadd.f32 %v16472_v34, %v15278_v17 }
 0x4fe   : > { %v12939_v27 = vpop.eup %12938  ;;  %v3865_v29 = vadd.f32 %v3849_v53, %v3573_v60  ;;  %12956 = vrcp.f32 %v3708_v50  ;;  %v9505_v50 = vmul.f32 -1.442695, %v3454_v6  ;;  %v3803_v7 = vadd.f32 1.0, %v12937_v2 }
 0x4ff   : > { %v12941_v16 = vpop.eup %12940  ;;  %v3709_v37 = vadd.f32 1.0, %v12939_v27  ;;  %12958 = vpow2.f32 %v9504_v30  ;;  %v3459_v11 = vpop.f32.mrb[116].mxu1  ;;  %v3456_v53 = vadd.f32 %v3455_v59, %v15233_v45  ;;  %v9520_v2 = vmul.f32 -1.442695, %v3450_v49 }
 0x500   : > { %12960 = vtanh.f32 %v3865_v29  ;;  %v3850_v55 = vmul.f32 %v12941_v16, %v3581_v40  ;;  %v3461_v38 = vpop.f32.mrb[117].mxu1  ;;  %v16611_v5 = vpop.eup %12942  ;;  %v3460_v30 = vadd.f32 %v3459_v11, %v15230_v18  ;;  %v3591_v49 = vadd.f32 %v16480_v26, %v15278_v17 }
 0x501   : > { %12962 = vpow2.f32 %v9518_v52  ;;  %v12945_v4 = vpop.eup %12944  ;;  %v3462_v59 = vadd.f32 %v3461_v38, %v15233_v45  ;;  %v9521_v34 = vmul.f32 -1.442695, %v3456_v53 }
 0x502   : > { %12964 = vrcp.f32 %v3709_v37  ;;  %v16617_v60 = vadd.f32 %v3850_v55, %v3579_v43  ;;  %v3593_v43 = vadd.f32 %v16483_v14, %v15273_v24  ;;  %v3599_v14 = vadd.f32 %v16491_v23, %v15273_v24 }
 0x503   : > { %v12947_v42 = vpop.eup %12946  ;;  %12966 = vrcp.f32 %v3802_v10  ;;  %v3465_v19 = vpop.f32.mrb[118].mxu1  ;;  %v9506_v10 = vmul.f32 -1.442695, %v3460_v30 }
 0x504   : > { %v12949_v27 = vpop.eup %12948  ;;  %v3851_v52 = vmul.f32 %v12947_v42, %v3587_v47  ;;  %12968 = vpow2.f32 %v9519_v22  ;;  %v3467_v31 = vpop.f32.mrb[119].mxu1  ;;  %v3466_v40 = vadd.f32 %v3465_v19, %v15230_v18 }
 0x505   : > { %v12951_v6 = vpop.eup %12950  ;;  %v3710_v29 = vadd.f32 1.0, %v12949_v27  ;;  %12970 = vpow2.f32 %v9505_v50 }
 0x506   : > { %v12953_v16 = vpop.eup %12952  ;;  %v3867_v37 = vadd.f32 %v3851_v52, %v3585_v1  ;;  %12972 = vrcp.f32 %v3803_v7  ;;  %v9507_v38 = vmul.f32 -1.442695, %v3466_v40 }
 0x507   : > { %v12955_v11 = vpop.eup %12954  ;;  %12974 = vrcp.f32 %v3710_v29  ;;  %v3471_v55 = vpop.f32.mrb[120].mxu1  ;;  %v3896_v22 = vsub.f32 %v16001_v41, %v12953_v16  ;;  %v9522_v41 = vmul.f32 -1.442695, %v3462_v59 }
 0x508   : > { %v12957_v47 = vpop.eup %12956  ;;  %12976 = vtanh.f32 %v3867_v37  ;;  %v3472_v50 = vadd.f32 %v3471_v55, %v15230_v18  ;;  %v3473_v7 = vpop.f32.mrb[121].mxu1 }
 0x509   : > { %v12959_v30 = vpop.eup %12958  ;;  %v3852_v42 = vmul.f32 %v12957_v47, %v3593_v43  ;;  %12978 = vpow2.f32 %v9520_v2  ;;  %v3912_v19 = vmul.f32 %v12945_v4, %v3896_v22  ;;  %v3804_v43 = vadd.f32 1.0, %v12955_v11 }
 0x50a   : > { %v12961_v27 = vpop.eup %12960  ;;  %v3711_v53 = vadd.f32 1.0, %v12959_v30  ;;  %12980 = vpow2.f32 %v9506_v10  ;;  %v9508_v52 = vmul.f32 -1.442695, %v3472_v50  ;;  %v3468_v4 = vadd.f32 %v3467_v31, %v15233_v45 }
 0x50b   : > { %v12963_v1 = vpop.eup %12962  ;;  %12982 = vpow2.f32 %v9521_v34  ;;  %v3477_v29 = vpop.f32.mrb[122].mxu1  ;;  %v16632_v26 = vadd.f32 %v12953_v16, %v3912_v19  ;;  %v3897_v37 = vsub.f32 %v16018_v28, %v12961_v27  ;;  %v16638_v40 = vadd.f32 %v3852_v42, %v3591_v49 }
 0x50c   : > { %v12965_v55 = vpop.eup %12964  ;;  %12984 = vrcp.f32 %v3711_v53  ;;  %v16636_v2 = vpop.f32.mrb[123].mxu1  ;;  %v3597_v10 = vadd.f32 %v16488_v32, %v15278_v17  ;;  %v3805_v22 = vadd.f32 1.0, %v12963_v1  ;;  %v3478_v28 = vadd.f32 %v3477_v29, %v15230_v18 }
 0x50d   : > { %v16640_v23 = vpop.eup %12966  ;;  %v3853_v59 = vmul.f32 %v12965_v55, %v3599_v14  ;;  %12986 = vpow2.f32 %v9507_v38  ;;  %v3913_v16 = vmul.f32 %v12951_v6, %v3897_v37  ;;  %v3605_v31 = vadd.f32 %v16499_v33, %v15273_v24 }
 0x50e   : > { %v12969_v34 = vpop.eup %12968  ;;  %12988 = vpow2.f32 %v9522_v41  ;;  %v9523_v42 = vmul.f32 -1.442695, %v3468_v4  ;;  %v3474_v19 = vadd.f32 %v3473_v7, %v15233_v45  ;;  %v3603_v53 = vadd.f32 %v16496_v8, %v15278_v17 }
 0x50f   : > { %v12971_v11 = vpop.eup %12970  ;;  %v3869_v47 = vadd.f32 %v3853_v59, %v3597_v10  ;;  %12990 = vpow2.f32 %v9508_v52  ;;  %v3483_v49 = vpop.f32.mrb[124].mxu1  ;;  %v16649_v38 = vadd.f32 %v12961_v27, %v3913_v16  ;;  %v9509_v41 = vmul.f32 -1.442695, %v3478_v28 }
 0x510   : > { %v12973_v50 = vpop.eup %12972  ;;  %12992 = vrcp.f32 %v3804_v43  ;;  %v3712_v30 = vadd.f32 1.0, %v12971_v11  ;;  %v16647_v32 = vpop.f32.mrb[125].mxu1  ;;  %v3806_v55 = vadd.f32 1.0, %v12969_v34  ;;  %v3611_v27 = vadd.f32 %v16507_v39, %v15273_v24 }
 0x511   : > { %v12975_v6 = vpop.eup %12974  ;;  %12994 = vtanh.f32 %v3869_v47  ;;  %v9524_v10 = vmul.f32 -1.442695, %v3474_v19  ;;  %v3484_v39 = vadd.f32 %v3483_v49, %v15230_v18  ;;  %v3480_v19 = vadd.f32 %v16636_v2, %v15233_v45 }
 0x512   : > { %v12977_v14 = vpop.eup %12976  ;;  %12996 = vrcp.f32 %v3805_v22  ;;  %v3854_v33 = vmul.f32 %v12975_v6, %v3605_v31 }
 0x513   : > { %v12979_v1 = vpop.eup %12978  ;;  %12998 = vrcp.f32 %v3712_v30  ;;  %v3489_v52 = vpop.f32.mrb[126].mxu1  ;;  %v3899_v29 = vsub.f32 %v16034_v20, %v12977_v14  ;;  %v3609_v20 = vadd.f32 %v16504_v57, %v15278_v17  ;;  %v9525_v2 = vmul.f32 -1.442695, %v3480_v19 }
 0x514   : > { %v12981_v37 = vpop.eup %12980  ;;  %13000 = vpow2.f32 %v9523_v42  ;;  %v16657_v43 = vpop.f32.mrb[127].mxu1  ;;  %v16659_v7 = vadd.f32 %v3854_v33, %v3603_v53  ;;  %v3807_v47 = vadd.f32 1.0, %v12979_v1  ;;  %v3617_v33 = vadd.f32 %v16514_v51, %v15273_v24  ;;  %v16682_v51 = vld [vmem:[%s19859_s5] ss:$0 sm:$0xff] }
 0x515   : > { %v12983_v4 = vpop.eup %12982  ;;  %v3713_v8 = vadd.f32 1.0, %v12981_v37  ;;  %13002 = vtanh.f32 %v16591_v56  ;;  %v3915_v59 = vmul.f32 %v12973_v50, %v3899_v29  ;;  %v3490_v56 = vadd.f32 %v3489_v52, %v15230_v18 }
 0x516   : > { %v12985_v16 = vpop.eup %12984  ;;  %13004 = vpow2.f32 %v9509_v41  ;;  %v3808_v57 = vadd.f32 1.0, %v12983_v4  ;;  %v3615_v29 = vadd.f32 %v16511_v15, %v15278_v17 }
 0x517   : > { %v12987_v34 = vpop.eup %12986  ;;  %v3855_v22 = vmul.f32 %v12985_v16, %v3611_v27  ;;  %13006 = vrcp.f32 %v3713_v8  ;;  %v16665_v28 = vadd.f32 %v12977_v14, %v3915_v59  ;;  %v9510_v14 = vmul.f32 -1.442695, %v3484_v39 }
 0x518   : > { %v12989_v11 = vpop.eup %12988  ;;  %13008 = vrcp.f32 %v3806_v55  ;;  %v3714_v31 = vadd.f32 1.0, %v12987_v34  ;;  %v9511_v37 = vmul.f32 -1.442695, %v3490_v56 }
 0x519   : > { %v12991_v30 = vpop.eup %12990  ;;  %v3871_v42 = vadd.f32 %v3855_v22, %v3609_v20  ;;  %13010 = vpow2.f32 %v9524_v10  ;;  %v3809_v41 = vadd.f32 1.0, %v12989_v11  ;;  %v3623_v10 = vadd.f32 %v16521_v13, %v15273_v24 }
 0x51a   : > { %v16668_v50 = vpop.eup %12992  ;;  %13012 = vrcp.f32 %v3714_v31  ;;  %v3715_v6 = vadd.f32 1.0, %v12991_v30  ;;  %v3621_v13 = vadd.f32 %v16519_v62, %v15278_v17  ;;  %v16695_v22 = vadd.f32 %v16682_v51, %v16544_v9 }
 0x51b   : > { %v12995_v49 = vpop.eup %12994  ;;  %13014 = vtanh.f32 %v3871_v42  ;;  %v3629_v30 = vadd.f32 %v16525_v46, %v15273_v24  ;;  %v3486_v9 = vadd.f32 %v16647_v32, %v15233_v45  ;;  %v3492_v46 = vadd.f32 %v16657_v43, %v15233_v45 }
 0x51c   : > { %v12997_v53 = vpop.eup %12996  ;;  %13016 = vrcp.f32 %v3807_v47  ;;  %v3901_v1 = vsub.f32 %v16058_v63, %v12995_v49  ;;  %v16686_v63 = vadd.f32 %v16682_v51, %v16546_v0  ;;  %v3635_v32 = vadd.f32 %v16529_v61, %v15273_v24 }
 0x51d   : > { %v12999_v52 = vpop.eup %12998  ;;  %13018 = vrcp.f32 %v3715_v6  ;;  %v9526_v61 = vmul.f32 -1.442695, %v3486_v9 }
 0x51e   : > { %v13001_v55 = vpop.eup %13000  ;;  %v3856_v27 = vmul.f32 %v12999_v52, %v3617_v33  ;;  %13020 = vrcp.f32 %v3808_v57  ;;  %v3917_v4 = vmul.f32 %v12997_v53, %v3901_v1  ;;  %v20077_v42 = vmax.f32 %v16686_v63, 0.0 }
 0x51f   : > { %v13003_v8 = vpop.eup %13002  ;;  %13022 = vpow2.f32 %v9510_v14  ;;  %v3810_v47 = vadd.f32 1.0, %v13001_v55  ;;  %v20075_v14 = vmax.f32 %v16695_v22, 0.0  ;;  %v3633_v33 = vadd.f32 %v16527_v44, %v15278_v17 }
 0x520   : > { %v13005_v15 = vpop.eup %13004  ;;  %13024 = vrcp.f32 %v3809_v41  ;;  %v3895_v59 = vsub.f32 %v16074_v48, %v13003_v8  ;;  %v16689_v16 = vadd.f32 %v12995_v49, %v3917_v4  ;;  %v3872_v20 = vadd.f32 %v3856_v27, %v3615_v29  ;;  %v20541_v4 = vld [vmem:[#allocation18_spill] sm:$0xff] }
 0x521   : > { %v13007_v34 = vpop.eup %13006  ;;  %v3716_v39 = vadd.f32 1.0, %v13005_v15  ;;  %13026 = vpow2.f32 %v9511_v37 }
 0x522   : > { %20539 = vst [vmem:[#allocation111_spill] sm:$0xff] %v16689_v16  ;;  %v16697_v0 = vpop.eup %13008  ;;  %v3857_v11 = vmul.f32 %v13007_v34, %v3623_v10  ;;  %v3911_v31 = vmul.f32 %v16611_v5, %v3895_v59  ;;  %13028 = vpow2.f32 %v9525_v2  ;;  %v3627_v5 = vadd.f32 %v16523_v35, %v15278_v17  ;;  %v20542_v59 = vld [vmem:[#allocation89_spill] sm:$0xff]  ;;  %v20543_v34 = vld [vmem:[#allocation19_spill] sm:$0xff] }
 0x523   : > { %v13011_v48 = vpop.eup %13010  ;;  %13030 = vrcp.f32 %v3716_v39  ;;  %v3641_v2 = vadd.f32 %v16533_v36, %v15273_v24  ;;  %v20544_v39 = vld [vmem:[#allocation97_spill] sm:$0xff] }
 0x524   : > { %v13013_v62 = vpop.eup %13012  ;;  %v16705_v56 = vadd.f32 %v13003_v8, %v3911_v31  ;;  %13032 = vtanh.f32 %v16617_v60  ;;  %v3873_v57 = vadd.f32 %v3857_v11, %v3621_v13  ;;  %v3811_v15 = vadd.f32 1.0, %v13011_v48  ;;  %v20545_v31 = vld [vmem:[#allocation98_spill] sm:$0xff] }
 0x525   : > { %v13015_v6 = vpop.eup %13014  ;;  %v3858_v19 = vmul.f32 %v13013_v62, %v3629_v30  ;;  %13034 = vtanh.f32 %v16638_v40  ;;  %v16724_v40 = vadd.f32 %v16682_v51, %v16553_v58  ;;  %v9527_v58 = vmul.f32 -1.442695, %v3492_v46  ;;  %v20546_v30 = vld [vmem:[#allocation14_spill] sm:$0xff] }
 0x526   : > { %v13017_v49 = vpop.eup %13016  ;;  %13036 = vrcp.f32 %v3810_v47  ;;  %10639 = vmatprep.mubr.f32.mxu1 %v16705_v56  ;;  %4556 = vmatprep.mubr.f32.mxu0 %v16705_v56  ;;  %v3903_v60 = vsub.f32 %v16106_v12, %v13015_v6  ;;  %v3639_v11 = vadd.f32 %v20544_v39, %v15278_v17  ;;  %v20557_v39 = vld [vmem:[#allocation100_spill] sm:$0xff] }
 0x527   : > { %v13019_v35 = vpop.eup %13018  ;;  %4557 = vmatmul.mubr.f32.vlgmr.msra.gmra.mrb[160].mxu0 %v20077_v42  ;;  %10640 = vmatmul.mubr.f32.vlgmr.msra.gmra.mrb[128].mxu1 %v16632_v26  ;;  %13038 = vtanh.f32 %v16659_v7  ;;  %v3874_v43 = vadd.f32 %v3858_v19, %v3627_v5  ;;  %v20074_v55 = vmax.f32 %v16724_v40, 0.0 }
 0x528   : > { %v16727_v53 = vpop.eup %13020  ;;  %v3859_v12 = vmul.f32 %v13019_v35, %v3635_v32  ;;  %11654 = vmatpush1.bf16.msra.mxu1 %v14420_v21  ;;  %4562 = vmatprep.mubr.f32.mxu0 %v16632_v26  ;;  %v3919_v41 = vmul.f32 %v13017_v49, %v3903_v60  ;;  %13040 = vtanh.f32 %v3872_v20  ;;  %v16750_v20 = vadd.f32 %v16682_v51, %v20542_v59  ;;  %v20549_v60 = vld [vmem:[#allocation23_spill] sm:$0xff] }
 0x529   : > { %v13023_v1 = vpop.eup %13022  ;;  %11656 = vmatprep.subr.bf16.mxu1 %v14431_v25  ;;  %10642 = vmatprep.mubr.f32.mxu1 %v16649_v38  ;;  %13042 = vtanh.f32 %v3873_v57  ;;  %v20547_v57 = vld [vmem:[#allocation22_spill] sm:$0xff] }
 0x52a   : > { %v16735_v7 = vpop.eup %13024  ;;  %v3717_v52 = vadd.f32 1.0, %v13023_v1  ;;  %v16737_v29 = vadd.f32 %v13015_v6, %v3919_v41  ;;  %13044 = vtanh.f32 %v3874_v43  ;;  %v3875_v44 = vadd.f32 %v3859_v12, %v3633_v33  ;;  %11814 = vmatpush3.bf16.msra.mxu0 %v14363_v3  ;;  %v20548_v6 = vld [vmem:[#allocation93_spill] sm:$0xff] }
 0x52b   : > { %v13027_v37 = vpop.eup %13026  ;;  %4563 = vmatmul.mubr.f32.gmra.mrb[162].mxu0 %v20075_v14  ;;  %13046 = vpow2.f32 %v9526_v61  ;;  %11816 = vmatprep.subr.bf16.mxu0 %v20284_v54  ;;  %v20073_v49 = vmax.f32 %v16750_v20, 0.0  ;;  %v20550_v61 = vld [vmem:[#allocation101_spill] sm:$0xff]  ;;  %v20592_v14 = vld [vmem:[#allocation106_spill] sm:$0xff] }
 0x52c   : > { %20540 = vst [vmem:[#allocation112_spill] sm:$0xff] %v16737_v29  ;;  %v13029_v27 = vpop.eup %13028  ;;  %13048 = vrcp.f32 %v3717_v52  ;;  %11658 = vmatpush1.bf16.msra.mxu1 %v20541_v4  ;;  %4568 = vmatprep.mubr.f32.mxu0 %v16649_v38  ;;  %v3718_v8 = vadd.f32 1.0, %v13027_v37  ;;  %v16767_v43 = vadd.f32 %v16682_v51, %v20550_v61  ;;  %v20551_v12 = vld [vmem:[#allocation85_spill] sm:$0xff] }
 0x52d   : > { %v13031_v10 = vpop.eup %13030  ;;  %13050 = vpow2.f32 %v9527_v58  ;;  %11660 = vmatprep.subr.bf16.mxu1 %v20543_v34  ;;  %v3812_v62 = vadd.f32 1.0, %v13029_v27  ;;  %v20552_v58 = vld [vmem:[#allocation88_spill] sm:$0xff]  ;;  %v20554_v27 = vld [vmem:[#allocation86_spill] sm:$0xff] }
 0x52e   : > { %v13033_v13 = vpop.eup %13032  ;;  %v3860_v36 = vmul.f32 %v13031_v10, %v3641_v2  ;;  %13052 = vrcp.f32 %v3718_v8  ;;  %11818 = vmatpush3.bf16.msra.mxu0 %v20284_v54  ;;  %v3645_v52 = vadd.f32 %v20552_v58, %v15278_v17  ;;  %v20555_v8 = vld [vmem:[#allocation15_spill] sm:$0xff] }
 0x52f   : > { %v13035_v47 = vpop.eup %13034  ;;  %4569 = vmatmul.mubr.f32.gmra.mrb[164].mxu0 %v20074_v55  ;;  %v3898_v48 = vsub.f32 %v20545_v31, %v13033_v13  ;;  %11820 = vmatprep.subr.bf16.mxu0 %v20546_v30  ;;  %13054 = vtanh.f32 %v3875_v44  ;;  %v20558_v31 = vld [vmem:[#allocation102_spill] sm:$0xff] }
 0x530   : > { %v13037_v9 = vpop.eup %13036  ;;  %11662 = vmatpush1.bf16.msra.mxu1 %v20547_v57  ;;  %v3900_v5 = vsub.f32 %v20548_v6, %v13035_v47  ;;  %v3876_v19 = vadd.f32 %v3860_v36, %v3639_v11  ;;  %13056 = vrcp.f32 %v3811_v15  ;;  %v20559_v6 = vld [vmem:[#allocation78_spill] sm:$0xff] }
 0x531   : > { %v13039_v46 = vpop.eup %13038  ;;  %v3914_v32 = vmul.f32 %v16640_v23, %v3898_v48  ;;  %11664 = vmatprep.subr.bf16.mxu1 %v20549_v60  ;;  %v20553_v23 = vld [vmem:[#allocation99_spill] sm:$0xff]  ;;  %v3653_v48 = vadd.f32 %v20558_v31, %v15273_v24  ;;  %v20565_v31 = vld [vmem:[#allocation30_spill] sm:$0xff] }
 0x532   : > { %v13041_v35 = vpop.eup %13040  ;;  %v3916_v33 = vmul.f32 %v16668_v50, %v3900_v5  ;;  %v3902_v41 = vsub.f32 %v20551_v12, %v13039_v46  ;;  %13058 = vtanh.f32 %v3876_v19  ;;  %11822 = vmatpush3.bf16.msra.mxu0 %v20546_v30  ;;  %v3647_v44 = vadd.f32 %v20553_v23, %v15273_v24  ;;  %v20556_v50 = vld [vmem:[#allocation26_spill] sm:$0xff]  ;;  %v20562_v12 = vld [vmem:[#allocation27_spill] sm:$0xff] }
 0x533   : > { %v13043_v1 = vpop.eup %13042  ;;  %v16776_v37 = vadd.f32 %v13033_v13, %v3914_v32  ;;  %v3904_v2 = vsub.f32 %v20554_v27, %v13041_v35  ;;  %11888 = vmatprep.subr.bf16.mxu0 %v20555_v8  ;;  %13060 = vrcp.f32 %v3812_v62  ;;  %v20560_v19 = vld [vmem:[#allocation90_spill] sm:$0xff]  ;;  %v20564_v27 = vld [vmem:[#allocation96_spill] sm:$0xff] }
 0x534   : > { %v13045_v10 = vpop.eup %13044  ;;  %11666 = vmatpush1.bf16.msra.mxu1 %v20556_v50  ;;  %v16781_v15 = vadd.f32 %v13035_v47, %v3916_v33  ;;  %v3918_v59 = vmul.f32 %v16697_v0, %v3902_v41  ;;  %v3905_v11 = vsub.f32 %v20557_v39, %v13043_v1  ;;  %v16793_v47 = vadd.f32 %v16682_v51, %v20560_v19  ;;  %v20572_v19 = vld [vmem:[#allocation35_spill] sm:$0xff] }
 0x535   : > { %v13047_v36 = vpop.eup %13046  ;;  %10643 = vmatmul.mubr.f32.gmra.mrb[130].mxu1 %v16776_v37  ;;  %4574 = vmatprep.mubr.f32.mxu0 %v16776_v37  ;;  %v3920_v13 = vmul.f32 %v16727_v53, %v3904_v2  ;;  %v3906_v62 = vsub.f32 %v20559_v6, %v13045_v10  ;;  %v20072_v0 = vmax.f32 %v16767_v43, 0.0  ;;  %v3651_v2 = vadd.f32 %v20564_v27, %v15278_v17  ;;  %v20574_v27 = vld [vmem:[#allocation104_spill] sm:$0xff] }
 0x536   : > { %v13049_v5 = vpop.eup %13048  ;;  %4575 = vmatmul.mubr.f32.gmra.mrb[166].mxu0 %v20073_v49  ;;  %10645 = vmatprep.mubr.f32.mxu1 %v16665_v28  ;;  %v16799_v32 = vadd.f32 %v13039_v46, %v3918_v59  ;;  %v3921_v61 = vmul.f32 %v16735_v7, %v3905_v11  ;;  %v3813_v39 = vadd.f32 1.0, %v13047_v36 }
 0x537   : > { %v13051_v33 = vpop.eup %13050  ;;  %v3861_v53 = vmul.f32 %v13049_v5, %v3647_v44  ;;  %4580 = vmatprep.mubr.f32.mxu0 %v16665_v28  ;;  %11668 = vmatprep.subr.bf16.mxu1 %v20562_v12  ;;  %v16804_v41 = vadd.f32 %v13041_v35, %v3920_v13  ;;  %v3922_v58 = vmul.f32 %v13037_v9, %v3906_v62  ;;  %v20567_v44 = vld [vmem:[#allocation31_spill] sm:$0xff]  ;;  %v20071_v9 = vmax.f32 %v16793_v47, 0.0  ;;  %v20571_v5 = vld [vmem:[#allocation34_spill] sm:$0xff] }
 0x538   : > { %20561 = vst [vmem:[#allocation18_spill] sm:$0xff] %v16799_v32  ;;  %v13053_v23 = vpop.eup %13052  ;;  %11670 = vmatpush1.bf16.msra.mxu1 %v20565_v31  ;;  %v16809_v46 = vadd.f32 %v13043_v1, %v3921_v61  ;;  %v20569_v13 = vld [vmem:[#allocation103_spill] sm:$0xff] }
 0x539   : > { %20563 = vst [vmem:[#allocation89_spill] sm:$0xff] %v16804_v41  ;;  %v3877_v59 = vadd.f32 %v3861_v53, %v3645_v52  ;;  %v3862_v7 = vmul.f32 %v13053_v23, %v3653_v48  ;;  %10646 = vmatmul.mubr.f32.gmra.mrb[132].mxu1 %v16781_v15  ;;  %11672 = vmatprep.subr.bf16.mxu1 %v20567_v44  ;;  %v13055_v35 = vpop.eup %13054  ;;  %v3814_v48 = vadd.f32 1.0, %v13051_v33  ;;  %v20573_v53 = vld [vmem:[#allocation95_spill] sm:$0xff] }
 0x53a   : > { %20566 = vst [vmem:[#allocation19_spill] sm:$0xff] %v16809_v46  ;;  %v16813_v11 = vadd.f32 %v13045_v10, %v3922_v58  ;;  %4581 = vmatmul.mubr.f32.gmra.mrb[168].mxu0 %v20072_v0  ;;  %v16820_v36 = vadd.f32 %v16682_v51, %v20569_v13  ;;  %10648 = vmatprep.mubr.f32.mxu1 %v16689_v16  ;;  %v13057_v1 = vpop.eup %13056  ;;  %v20570_v10 = vld [vmem:[#allocation94_spill] sm:$0xff]  ;;  %v20577_v13 = vld [vmem:[#allocation39_spill] sm:$0xff] }
 0x53b   : > { %13062 = vtanh.f32 %v3877_v59  ;;  %v3878_v52 = vadd.f32 %v3862_v7, %v3651_v2  ;;  %4586 = vmatprep.mubr.f32.mxu0 %v16781_v15  ;;  %v3907_v6 = vsub.f32 %v20570_v10, %v13055_v35  ;;  %v16831_v33 = vadd.f32 %v16682_v51, %v20574_v27  ;;  %v20576_v7 = vld [vmem:[#allocation38_spill] sm:$0xff]  ;;  %v20579_v10 = vld [vmem:[#allocation92_spill] sm:$0xff]  ;;  %v20585_v0 = vld [vmem:[#allocation87_spill] sm:$0xff] }
 0x53c   : > { %20568 = vst [vmem:[#allocation97_spill] sm:$0xff] %v16813_v11  ;;  %v13059_v62 = vpop.eup %13058  ;;  %13064 = vrcp.f32 %v3813_v39  ;;  %11674 = vmatpush1.bf16.msra.mxu1 %v20571_v5  ;;  %v20070_v2 = vmax.f32 %v16820_v36, 0.0  ;;  %v20583_v27 = vld [vmem:[#allocation12_spill] sm:$0xff] }
 0x53d   : > { %13066 = vtanh.f32 %v3878_v52  ;;  %11676 = vmatprep.subr.bf16.mxu1 %v20572_v19  ;;  %10649 = vmatmul.mubr.f32.gmra.mrb[134].mxu1 %v16799_v32  ;;  %v3923_v61 = vmul.f32 %v13057_v1, %v3907_v6  ;;  %v3908_v58 = vsub.f32 %v20573_v53, %v13059_v62  ;;  %v13061_v23 = vpop.eup %13060  ;;  %v20076_v52 = vmax.f32 %v16831_v33, 0.0  ;;  %v20582_v53 = vld [vmem:[#allocation91_spill] sm:$0xff] }
 0x53e   : > { %4587 = vmatmul.mubr.f32.gmra.mrb[170].mxu0 %v20071_v9  ;;  %10651 = vmatprep.mubr.f32.mxu1 %v16737_v29  ;;  %13068 = vrcp.f32 %v3814_v48  ;;  %v16850_v48 = vadd.f32 %v16682_v51, %v20579_v10 }
 0x53f   : > { %4592 = vmatprep.mubr.f32.mxu0 %v16689_v16  ;;  %v16838_v39 = vadd.f32 %v13055_v35, %v3923_v61  ;;  %v3924_v59 = vmul.f32 %v13061_v23, %v3908_v58  ;;  %v20580_v35 = vld [vmem:[#allocation42_spill] sm:$0xff]  ;;  %v20581_v61 = vld [vmem:[#allocation43_spill] sm:$0xff]  ;;  %v16859_v58 = vadd.f32 %v16682_v51, %v20582_v53 }
 0x540   : > { %11678 = vmatpush1.bf16.msra.mxu1 %v20576_v7  ;;  %v20078_v23 = vmax.f32 %v16850_v48, 0.0  ;;  %v20586_v53 = vld [vmem:[#allocation47_spill] sm:$0xff] }
 0x541   : > { %20575 = vst [vmem:[#allocation98_spill] sm:$0xff] %v16838_v39  ;;  %11680 = vmatprep.subr.bf16.mxu1 %v20577_v13  ;;  %10652 = vmatmul.mubr.f32.gmra.mrb[136].mxu1 %v16804_v41  ;;  %v16843_v1 = vadd.f32 %v13059_v62, %v3924_v59 }
 0x542   : > { %4593 = vmatmul.mubr.f32.gmra.mrb[172].mxu0 %v20070_v2  ;;  %10654 = vmatprep.mubr.f32.mxu1 %v16809_v46  ;;  %v20584_v2 = vld [vmem:[#allocation46_spill] sm:$0xff] }
 0x543   : > { %20578 = vst [vmem:[#allocation14_spill] sm:$0xff] %v16843_v1  ;;  %4598 = vmatprep.mubr.f32.mxu0 %v16799_v32 }
 0x544   : > { %11682 = vmatpush1.bf16.msra.mxu1 %v20580_v35 }
 0x545   : > { %v13063_v6 = vpop.eup %13062  ;;  %11684 = vmatprep.subr.bf16.mxu1 %v20581_v61  ;;  %10655 = vmatmul.mubr.f32.gmra.mrb[138].mxu1 %v16813_v11 }
 0x546   : > { %v13065_v62 = vpop.eup %13064  ;;  %4599 = vmatmul.mubr.f32.gmra.mrb[174].mxu0 %v20076_v52  ;;  %10657 = vmatprep.mubr.f32.mxu1 %v16838_v39  ;;  %v3909_v59 = vsub.f32 %v20583_v27, %v13063_v6  ;;  %v20587_v52 = vld [vmem:[#allocation105_spill] sm:$0xff] }
 0x547   : > { %v13067_v10 = vpop.eup %13066  ;;  %4604 = vmatprep.mubr.f32.mxu0 %v16737_v29  ;;  %v16876_v27 = vadd.f32 %v16682_v51, %v20587_v52 }
 0x548   : > { %11686 = vmatpush1.bf16.msra.mxu1 %v20584_v2  ;;  %v3925_v9 = vmul.f32 %v13065_v62, %v3909_v59  ;;  %v3910_v49 = vsub.f32 %v20585_v0, %v13067_v10  ;;  %v13069_v55 = vpop.eup %13068  ;;  %v20589_v0 = vld [vmem:[#allocation50_spill] sm:$0xff]  ;;  %v20591_v59 = vld [vmem:[#allocation51_spill] sm:$0xff] }
 0x549   : > { %11688 = vmatprep.subr.bf16.mxu1 %v20586_v53  ;;  %10658 = vmatmul.mubr.f32.gmra.mrb[140].mxu1 %v16843_v1  ;;  %v20079_v52 = vmax.f32 %v16876_v27, 0.0  ;;  %v20605_v53 = vld [vmem:[#allocation110_spill] sm:$0xff] }
 0x54a   : > { %4605 = vmatmul.mubr.f32.gmra.mrb[176].mxu0 %v20078_v23  ;;  %v16878_v42 = vadd.f32 %v13063_v6, %v3925_v9  ;;  %v3926_v2 = vmul.f32 %v13069_v55, %v3910_v49  ;;  %v16888_v23 = vadd.f32 %v16682_v51, %v20592_v14  ;;  %v20593_v9 = vmax.f32 %v16859_v58, 0.0  ;;  %v20594_v55 = vld [vmem:[#allocation54_spill] sm:$0xff]  ;;  %v20595_v49 = vld [vmem:[#allocation55_spill] sm:$0xff] }
 0x54b   : > { %4610 = vmatprep.mubr.f32.mxu0 %v16804_v41  ;;  %v20596_v14 = vld [vmem:[#allocation107_spill] sm:$0xff] }
 0x54c   : > { %20588 = vst [vmem:[#allocation22_spill] sm:$0xff] %v16878_v42  ;;  %11690 = vmatpush1.bf16.msra.mxu1 %v20589_v0  ;;  %10660 = vmatprep.mubr.f32.mxu1 %v16878_v42  ;;  %v16883_v62 = vadd.f32 %v13067_v10, %v3926_v2  ;;  %v20080_v2 = vmax.f32 %v16888_v23, 0.0  ;;  %v16903_v6 = vadd.f32 %v16682_v51, %v20596_v14  ;;  %v20597_v10 = vld [vmem:[#allocation58_spill] sm:$0xff]  ;;  %v20601_v14 = vld [vmem:[#allocation63_spill] sm:$0xff] }
 0x54d   : > { %11692 = vmatprep.subr.bf16.mxu1 %v20591_v59  ;;  %v20599_v59 = vld [vmem:[#allocation108_spill] sm:$0xff] }
 0x54e   : > { %20590 = vst [vmem:[#allocation93_spill] sm:$0xff] %v16883_v62  ;;  %4611 = vmatmul.mubr.f32.gmra.mrb[178].mxu0 %v20593_v9  ;;  %10661 = vmatmul.mubr.f32.gmra.mrb[142].mxu1 %v16883_v62  ;;  %v20598_v9 = vld [vmem:[#allocation59_spill] sm:$0xff] }
 0x54f   : > { %4616 = vmatprep.mubr.f32.mxu0 %v16809_v46  ;;  %4395 = vmatprep.mubr.f32.mxu1 %v16705_v56 }
 0x550   : > { %11694 = vmatpush1.bf16.msra.mxu1 %v20594_v55  ;;  %v16910_v55 = vadd.f32 %v16682_v51, %v20599_v59 }
 0x551   : > { %11696 = vmatprep.subr.bf16.mxu1 %v20595_v49  ;;  %v20081_v49 = vmax.f32 %v16903_v6, 0.0 }
 0x552   : > { %4617 = vmatmul.mubr.f32.gmra.mrb[180].mxu0 %v20079_v52  ;;  %v20600_v52 = vld [vmem:[#allocation62_spill] sm:$0xff] }
 0x553   : > { %4622 = vmatprep.mubr.f32.mxu0 %v16813_v11 }
 0x554   : > { %11698 = vmatpush1.bf16.msra.mxu1 %v20597_v10  ;;  %v20603_v10 = vld [vmem:[#allocation66_spill] sm:$0xff] }
 0x555   : > { %11700 = vmatprep.subr.bf16.mxu1 %v20598_v9  ;;  %v20602_v9 = vld [vmem:[#allocation109_spill] sm:$0xff] }
 0x556   : > { %4623 = vmatmul.mubr.f32.gmra.mrb[182].mxu0 %v20080_v2  ;;  %v16923_v59 = vadd.f32 %v16682_v51, %v20602_v9  ;;  %v20604_v2 = vld [vmem:[#allocation67_spill] sm:$0xff]  ;;  %v20607_v9 = vld [vmem:[#allocation70_spill] sm:$0xff] }
 0x557   : > { %4628 = vmatprep.mubr.f32.mxu0 %v16838_v39 }
 0x558   : > { %11702 = vmatpush1.bf16.msra.mxu1 %v20600_v52  ;;  %v20082_v0 = vmax.f32 %v16923_v59, 0.0  ;;  %v20606_v52 = vmax.f32 %v16910_v55, 0.0 }
 0x559   : > { %11704 = vmatprep.subr.bf16.mxu1 %v20601_v14  ;;  %v16930_v14 = vadd.f32 %v16682_v51, %v20605_v53  ;;  %v20609_v51 = vld [vmem:[#allocation74_spill] sm:$0xff]  ;;  %v9624_v53 = vld [vmem:[%s14386_s12 + $0x200] sm:$0xff] }
 0x55a   : > { %4629 = vmatmul.mubr.f32.gmra.mrb[184].mxu0 %v20081_v49  ;;  %v20608_v49 = vld [vmem:[#allocation72_spill] sm:$0xff] }
 0x55b   : > { %4634 = vmatprep.mubr.f32.mxu0 %v16843_v1 }
 0x55c   : > { %11706 = vmatpush1.bf16.msra.mxu1 %v20603_v10  ;;  %v20083_v10 = vmax.f32 %v16930_v14, 0.0 }
 0x55d   : > { %11708 = vmatprep.subr.bf16.mxu1 %v20604_v2  ;;  %v20610_v2 = vld [vmem:[#allocation76_spill] sm:$0xff] }
 0x55e   : > { %4635 = vmatmul.mubr.f32.gmra.mrb[186].mxu0 %v20606_v52  ;;  %v20611_v52 = vmax.f32 %v16686_v63, 0.0  ;;  %v9627_v63 = vld [vmem:[%s14386_s12 + $0x218] sm:$0xff] }
 0x55f   : > { %4640 = vmatprep.mubr.f32.mxu0 %v16878_v42 }
 0x560   : > { %11710 = vmatpush1.bf16.msra.mxu1 %v20607_v9  ;;  %v20613_v9 = vmax.f32 %v16695_v22, 0.0  ;;  %v20617_v22 = vmax.f32 %v16724_v40, 0.0  ;;  %v20621_v40 = vmax.f32 %v16750_v20, 0.0  ;;  %v20625_v20 = vmax.f32 %v16767_v43, 0.0 }
 0x561   : > { %11712 = vmatprep.subr.bf16.mxu1 %v20608_v49  ;;  %v9625_v49 = vld [vmem:[%s14386_s12 + $0x208] sm:$0xff]  ;;  %v20629_v43 = vmax.f32 %v16793_v47, 0.0  ;;  %v20633_v47 = vmax.f32 %v16820_v36, 0.0  ;;  %v9639_v36 = vld [vmem:[%s14386_s12 + $0x278] sm:$0xff] }
 0x562   : > { %4641 = vmatmul.mubr.f32.gmra.mrb[188].mxu0 %v20082_v0  ;;  %v9626_v0 = vld [vmem:[%s14386_s12 + $0x210] sm:$0xff] }
 0x563   : > { %4646 = vmatprep.mubr.f32.mxu0 %v16883_v62 }
 0x564   : > { %11714 = vmatpush1.bf16.msra.mxu1 %v20609_v51  ;;  %v20612_v51 = vld [vmem:[#allocation77_spill] sm:$0xff] }
 0x565   : > { %11780 = vmatprep.subr.bf16.mxu1 %v20610_v2 }
 0x566   : > { %4647 = vmatmul.mubr.f32.gmra.mrb[190].mxu0 %v20083_v10  ;;  %v20615_v10 = vld [vmem:[#allocation17_spill] sm:$0xff] }
 0x567   : > { %4396 = vmatmul.mubr.f32.vlgmr.msra.gmra.mrb[144].mxu1 %v20611_v52  ;;  %10767 = vmatprep.mubr.msk.f32.mxu0 %vm1103_vm0, %v9624_v53  ;;  %v9628_v53 = vld [vmem:[%s14386_s12 + $0x220] sm:$0xff] }
 0x568   : > { %4401 = vmatprep.mubr.f32.mxu1 %v16632_v26  ;;  %11782 = vmatpush3.bf16.msra.mxu1 %v20610_v2  ;;  %v20614_v52 = vld [vmem:[#allocation16_spill] sm:$0xff]  ;;  %v20616_v2 = vld [vmem:[#allocation79_spill] sm:$0xff] }
 0x569   : > { %11784 = vmatprep.subr.bf16.mxu1 %v20612_v51 }
 0x56a   : > { %10768 = vmatmul.mubr.msk.f32.vlgmr.msra.gmra.mrb[192].mxu0 %vm1103_vm0, %v9625_v49  ;;  %v9630_v49 = vld [vmem:[%s14386_s12 + $0x230] sm:$0xff] }
 0x56b   : > { %4402 = vmatmul.mubr.f32.gmra.mrb[146].mxu1 %v20613_v9  ;;  %10770 = vmatprep.mubr.msk.f32.mxu0 %vm1103_vm0, %v9626_v0  ;;  %v9629_v0 = vld [vmem:[%s14386_s12 + $0x228] sm:$0xff]  ;;  %v20618_v9 = vld [vmem:[#allocation20_spill] sm:$0xff] }
 0x56c   : > { %4407 = vmatprep.mubr.f32.mxu1 %v16649_v38  ;;  %11890 = vmatpush1.bf16.msra.mxu0 %v20614_v52 }
 0x56d   : > { %11892 = vmatprep.subr.bf16.mxu0 %v20615_v10  ;;  %11786 = vmatpush3.bf16.msra.mxu1 %v20612_v51  ;;  %v20619_v10 = vld [vmem:[#allocation21_spill] sm:$0xff] }
 0x56e   : > { %10771 = vmatmul.mubr.msk.f32.gmra.mrb[194].mxu0 %vm1103_vm0, %v9627_v63  ;;  %11788 = vmatprep.subr.bf16.mxu1 %v20616_v2  ;;  %v20620_v63 = vld [vmem:[#allocation80_spill] sm:$0xff] }
 0x56f   : > { %4408 = vmatmul.mubr.f32.gmra.mrb[148].mxu1 %v20617_v22  ;;  %10773 = vmatprep.mubr.msk.f32.mxu0 %vm1103_vm0, %v9628_v53  ;;  %v9631_v53 = vld [vmem:[%s14386_s12 + $0x238] sm:$0xff]  ;;  %v9632_v22 = vld [vmem:[%s14386_s12 + $0x240] sm:$0xff] }
 0x570   : > { %4413 = vmatprep.mubr.f32.mxu1 %v16776_v37  ;;  %11894 = vmatpush1.bf16.msra.mxu0 %v20618_v9  ;;  %v20622_v9 = vld [vmem:[#allocation24_spill] sm:$0xff] }
 0x571   : > { %11896 = vmatprep.subr.bf16.mxu0 %v20619_v10  ;;  %11790 = vmatpush3.bf16.msra.mxu1 %v20616_v2  ;;  %v20623_v10 = vld [vmem:[#allocation25_spill] sm:$0xff] }
 0x572   : > { %10774 = vmatmul.mubr.msk.f32.gmra.mrb[196].mxu0 %vm1103_vm0, %v9629_v0  ;;  %11792 = vmatprep.subr.bf16.mxu1 %v20620_v63  ;;  %v20624_v0 = vld [vmem:[#allocation81_spill] sm:$0xff] }
 0x573   : > { %4414 = vmatmul.mubr.f32.gmra.mrb[150].mxu1 %v20621_v40  ;;  %10776 = vmatprep.mubr.msk.f32.mxu0 %vm1103_vm0, %v9630_v49  ;;  %v9633_v49 = vld [vmem:[%s14386_s12 + $0x248] sm:$0xff]  ;;  %v9634_v40 = vld [vmem:[%s14386_s12 + $0x250] sm:$0xff] }
 0x574   : > { %4419 = vmatprep.mubr.f32.mxu1 %v16665_v28  ;;  %11898 = vmatpush1.bf16.msra.mxu0 %v20622_v9  ;;  %v20626_v9 = vld [vmem:[#allocation28_spill] sm:$0xff] }
 0x575   : > { %11900 = vmatprep.subr.bf16.mxu0 %v20623_v10  ;;  %11794 = vmatpush3.bf16.msra.mxu1 %v20620_v63  ;;  %v20627_v10 = vld [vmem:[#allocation29_spill] sm:$0xff] }
 0x576   : > { %10777 = vmatmul.mubr.msk.f32.gmra.mrb[198].mxu0 %vm1103_vm0, %v9631_v53  ;;  %11796 = vmatprep.subr.bf16.mxu1 %v20624_v0  ;;  %v20628_v53 = vld [vmem:[#allocation82_spill] sm:$0xff] }
 0x577   : > { %4420 = vmatmul.mubr.f32.gmra.mrb[152].mxu1 %v20625_v20  ;;  %10779 = vmatprep.mubr.msk.f32.mxu0 %vm1103_vm0, %v9632_v22  ;;  %v9635_v22 = vld [vmem:[%s14386_s12 + $0x258] sm:$0xff]  ;;  %v9636_v20 = vld [vmem:[%s14386_s12 + $0x260] sm:$0xff] }
 0x578   : > { %4425 = vmatprep.mubr.f32.mxu1 %v16781_v15  ;;  %11902 = vmatpush1.bf16.msra.mxu0 %v20626_v9  ;;  %v20630_v9 = vld [vmem:[#allocation32_spill] sm:$0xff] }
 0x579   : > { %11904 = vmatprep.subr.bf16.mxu0 %v20627_v10  ;;  %11798 = vmatpush3.bf16.msra.mxu1 %v20624_v0  ;;  %v20631_v10 = vld [vmem:[#allocation33_spill] sm:$0xff]  ;;  %v20634_v0 = vld [vmem:[#allocation36_spill] sm:$0xff] }
 0x57a   : > { %10780 = vmatmul.mubr.msk.f32.gmra.mrb[200].mxu0 %vm1103_vm0, %v9633_v49  ;;  %11800 = vmatprep.subr.bf16.mxu1 %v20628_v53  ;;  %v20632_v49 = vld [vmem:[#allocation83_spill] sm:$0xff] }
 0x57b   : > { %4426 = vmatmul.mubr.f32.gmra.mrb[154].mxu1 %v20629_v43  ;;  %10782 = vmatprep.mubr.msk.f32.mxu0 %vm1103_vm0, %v9634_v40  ;;  %v9637_v40 = vld [vmem:[%s14386_s12 + $0x268] sm:$0xff]  ;;  %v9638_v43 = vld [vmem:[%s14386_s12 + $0x270] sm:$0xff] }
 0x57c   : > { %4431 = vmatprep.mubr.f32.mxu1 %v16689_v16  ;;  %11906 = vmatpush1.bf16.msra.mxu0 %v20630_v9  ;;  %v20635_v9 = vld [vmem:[#allocation37_spill] sm:$0xff] }
 0x57d   : > { %11908 = vmatprep.subr.bf16.mxu0 %v20631_v10  ;;  %11802 = vmatpush3.bf16.msra.mxu1 %v20628_v53  ;;  %v20637_v10 = vmax.f32 %v16831_v33, 0.0  ;;  %v20642_v33 = vld [vmem:[#allocation44_spill] sm:$0xff] }
 0x57e   : > { %10783 = vmatmul.mubr.msk.f32.gmra.mrb[202].mxu0 %vm1103_vm0, %v9635_v22  ;;  %11804 = vmatprep.subr.bf16.mxu1 %v20632_v49  ;;  %v20636_v22 = vld [vmem:[#allocation84_spill] sm:$0xff] }
 0x57f   : > { %4432 = vmatmul.mubr.f32.gmra.mrb[156].mxu1 %v20633_v47  ;;  %10785 = vmatprep.mubr.msk.f32.mxu0 %vm1103_vm0, %v9636_v20  ;;  %v20638_v20 = vld [vmem:[#allocation40_spill] sm:$0xff]  ;;  %v20639_v47 = vld [vmem:[#allocation41_spill] sm:$0xff] }
 0x580   : > { %4437 = vmatprep.mubr.f32.mxu1 %v16799_v32  ;;  %11910 = vmatpush1.bf16.msra.mxu0 %v20634_v0 }
 0x581   : > { %11912 = vmatprep.subr.bf16.mxu0 %v20635_v9  ;;  %11806 = vmatpush3.bf16.msra.mxu1 %v20632_v49  ;;  %v20640_v9 = vld [vmem:[#allocation13_spill] sm:$0xff] }
 0x582   : > { %10786 = vmatmul.mubr.msk.f32.gmra.mrb[204].mxu0 %vm1103_vm0, %v9637_v40  ;;  %11808 = vmatprep.subr.bf16.mxu1 %v20636_v22  ;;  %v20641_v40 = vmax.f32 %v16850_v48, 0.0  ;;  %v20648_v48 = vld [vmem:[#allocation52_spill] sm:$0xff] }
 0x583   : > { %4438 = vmatmul.mubr.f32.gmra.mrb[158].mxu1 %v20637_v10  ;;  %10788 = vmatprep.mubr.msk.f32.mxu0 %vm1103_vm0, %v9638_v43  ;;  %v20643_v10 = vld [vmem:[#allocation45_spill] sm:$0xff]  ;;  %v20644_v43 = vmax.f32 %v16859_v58, 0.0  ;;  %v20651_v58 = vld [vmem:[#allocation56_spill] sm:$0xff] }
 0x584   : > { %4443 = vmatprep.mubr.f32.mxu1 %v16737_v29  ;;  %11914 = vmatpush1.bf16.msra.mxu0 %v20638_v20 }
 0x585   : > { %11916 = vmatprep.subr.bf16.mxu0 %v20639_v47  ;;  %11810 = vmatpush3.bf16.msra.mxu1 %v20636_v22  ;;  %v20645_v47 = vld [vmem:[#allocation48_spill] sm:$0xff]  ;;  %v20646_v22 = vld [vmem:[#allocation49_spill] sm:$0xff] }
 0x586   : > { %10789 = vmatmul.mubr.msk.f32.gmra.mrb[206].mxu0 %vm1103_vm0, %v9639_v36  ;;  %11824 = vmatprep.subr.bf16.mxu1 %v20640_v9  ;;  %v20647_v36 = vmax.f32 %v16876_v27, 0.0  ;;  %v20654_v27 = vld [vmem:[#allocation60_spill] sm:$0xff] }
 0x587   : > { %4444 = vmatmul.mubr.f32.gmra.mrb[160].mxu1 %v20641_v40  ;;  %v20649_v40 = vld [vmem:[#allocation53_spill] sm:$0xff] }
 0x588   : > { %4449 = vmatprep.mubr.f32.mxu1 %v16804_v41  ;;  %11918 = vmatpush1.bf16.msra.mxu0 %v20642_v33 }
 0x589   : > { %11920 = vmatprep.subr.bf16.mxu0 %v20643_v10  ;;  %v20650_v10 = vmax.f32 %v16888_v23, 0.0  ;;  %v20657_v23 = vld [vmem:[#allocation64_spill] sm:$0xff] }
 0x58b   : > { %4450 = vmatmul.mubr.f32.gmra.mrb[162].mxu1 %v20644_v43  ;;  %v20652_v43 = vld [vmem:[#allocation57_spill] sm:$0xff] }
 0x58c   : > { %4455 = vmatprep.mubr.f32.mxu1 %v16809_v46  ;;  %11922 = vmatpush1.bf16.msra.mxu0 %v20645_v47 }
 0x58d   : > { %11924 = vmatprep.subr.bf16.mxu0 %v20646_v22  ;;  %v20653_v22 = vmax.f32 %v16903_v6, 0.0  ;;  %v20660_v6 = vld [vmem:[#allocation68_spill] sm:$0xff] }
 0x58f   : > { %4456 = vmatmul.mubr.f32.gmra.mrb[164].mxu1 %v20647_v36  ;;  %v20655_v36 = vld [vmem:[#allocation61_spill] sm:$0xff] }
 0x590   : > { %4461 = vmatprep.mubr.f32.mxu1 %v16813_v11  ;;  %11926 = vmatpush1.bf16.msra.mxu0 %v20648_v48 }
 0x591   : > { %11928 = vmatprep.subr.bf16.mxu0 %v20649_v40  ;;  %v20656_v40 = vmax.f32 %v16910_v55, 0.0  ;;  %v20662_v55 = vmax.f32 %v16930_v14, 0.0 }
 0x593   : > { %4462 = vmatmul.mubr.f32.gmra.mrb[166].mxu1 %v20650_v10  ;;  %v20658_v10 = vld [vmem:[#allocation65_spill] sm:$0xff] }
 0x594   : > { %4467 = vmatprep.mubr.f32.mxu1 %v16838_v39  ;;  %11930 = vmatpush1.bf16.msra.mxu0 %v20651_v58 }
 0x595   : > { %11932 = vmatprep.subr.bf16.mxu0 %v20652_v43  ;;  %v20659_v43 = vmax.f32 %v16923_v59, 0.0 }
 0x597   : > { %4468 = vmatmul.mubr.f32.gmra.mrb[168].mxu1 %v20653_v22  ;;  %v20661_v22 = vld [vmem:[#allocation69_spill] sm:$0xff] }
 0x598   : > { %4473 = vmatprep.mubr.f32.mxu1 %v16843_v1  ;;  %11934 = vmatpush1.bf16.msra.mxu0 %v20654_v27 }
 0x599   : > { %11936 = vmatprep.subr.bf16.mxu0 %v20655_v36  ;;  %v20664_v36 = vld [vmem:[#allocation73_spill] sm:$0xff] }
 0x59b   : > { %4474 = vmatmul.mubr.f32.gmra.mrb[170].mxu1 %v20656_v40  ;;  %v20663_v40 = vld [vmem:[#allocation71_spill] sm:$0xff] }
 0x59c   : > { %4479 = vmatprep.mubr.f32.mxu1 %v16878_v42  ;;  %11938 = vmatpush1.bf16.msra.mxu0 %v20657_v23  ;;  %v20665_v23 = vld [vmem:[#allocation75_spill] sm:$0xff] }
 0x59d   : > { %11940 = vmatprep.subr.bf16.mxu0 %v20658_v10 }
 0x59f   : > { %4480 = vmatmul.mubr.f32.gmra.mrb[172].mxu1 %v20659_v43 }
 0x5a0   : > { %4485 = vmatprep.mubr.f32.mxu1 %v16883_v62  ;;  %11942 = vmatpush1.bf16.msra.mxu0 %v20660_v6  ;;  %v17078_v6 = vld [vmem:[%s19859_s5 + $0x2] ss:$0 sm:$0xff] }
 0x5a1   : > { %11944 = vmatprep.subr.bf16.mxu0 %v20661_v22 }
 0x5a3   : > { %4486 = vmatmul.mubr.f32.gmra.mrb[174].mxu1 %v20662_v55 }
 0x5a4   : > { %11946 = vmatpush1.bf16.msra.mxu0 %v20663_v40 }
 0x5a5   : > { %11948 = vmatprep.subr.bf16.mxu0 %v20664_v36 }
 0x5a8   : > { %11950 = vmatpush1.bf16.msra.mxu0 %v20665_v23 }
 0x5a9   : > { %11984 = vmatprep.subr.bf16.mxu0 %v14363_v3 }
 0x5fa   : > { %v10641_v59 = vpop.f32.mrb[128].mxu1  ;;  %v17073_v43 = vpop.f32.mrb[160].mxu0 }
 0x5fb   : > { %v4015_v22 = vadd.f32 %v17078_v6, %v10641_v59  ;;  %v4009_v14 = vpop.f32.mrb[129].mxu1  ;;  %v17081_v55 = vpop.f32.mrb[161].mxu0 }
 0x5fc   : > { %v4010_v36 = vadd.f32 %v17078_v6, %v4009_v14 }
 0x5fd   : > { %9529 = vst [vmem:[%s15816_s23 + $0x108] sm:$0xff] %v4015_v22 }
 0x5fe   : > { %9528 = vst [vmem:[%s15816_s23 + $0x100] sm:$0xff] %v4010_v36  ;;  %v17086_v23 = vpop.f32.mrb[162].mxu0 }
 0x5ff   : > { %v17088_v40 = vpop.f32.mrb[163].mxu0 }
 0x602   : > { %v17090_v10 = vpop.f32.mrb[164].mxu0 }
 0x603   : > { %v17092_v27 = vpop.f32.mrb[165].mxu0 }
 0x608   : > { %v10644_v59 = vpop.f32.mrb[130].mxu1 }
 0x609   : > { %v4025_v58 = vadd.f32 %v17078_v6, %v10644_v59  ;;  %v4019_v48 = vpop.f32.mrb[131].mxu1  ;;  %v17095_v47 = vpop.f32.mrb[166].mxu0 }
 0x60a   : > { %v4020_v14 = vadd.f32 %v17078_v6, %v4019_v48  ;;  %v17098_v22 = vpop.f32.mrb[167].mxu0 }
 0x60b   : > { %9531 = vst [vmem:[%s15816_s23 + $0x118] sm:$0xff] %v4025_v58 }
 0x60c   : > { %9530 = vst [vmem:[%s15816_s23 + $0x110] sm:$0xff] %v4020_v14  ;;  %v10647_v36 = vpop.f32.mrb[132].mxu1 }
 0x60d   : > { %v4035_v9 = vadd.f32 %v17078_v6, %v10647_v36  ;;  %v4029_v33 = vpop.f32.mrb[133].mxu1  ;;  %v17103_v20 = vpop.f32.mrb[168].mxu0 }
 0x60e   : > { %v4030_v49 = vadd.f32 %v17078_v6, %v4029_v33  ;;  %v17106_v59 = vpop.f32.mrb[169].mxu0 }
 0x60f   : > { %9533 = vst [vmem:[%s15816_s23 + $0x128] sm:$0xff] %v4035_v9 }
 0x610   : > { %9532 = vst [vmem:[%s15816_s23 + $0x120] sm:$0xff] %v4030_v49  ;;  %v10650_v48 = vpop.f32.mrb[134].mxu1 }
 0x611   : > { %v4045_v58 = vadd.f32 %v17078_v6, %v10650_v48  ;;  %v4039_v0 = vpop.f32.mrb[135].mxu1  ;;  %v17111_v14 = vpop.f32.mrb[170].mxu0 }
 0x612   : > { %v4040_v53 = vadd.f32 %v17078_v6, %v4039_v0  ;;  %v17114_v36 = vpop.f32.mrb[171].mxu0 }
 0x613   : > { %9535 = vst [vmem:[%s15816_s23 + $0x138] sm:$0xff] %v4045_v58 }
 0x614   : > { %9534 = vst [vmem:[%s15816_s23 + $0x130] sm:$0xff] %v4040_v53  ;;  %v10653_v33 = vpop.f32.mrb[136].mxu1 }
 0x615   : > { %v4055_v9 = vadd.f32 %v17078_v6, %v10653_v33  ;;  %v4049_v63 = vpop.f32.mrb[137].mxu1  ;;  %v17119_v49 = vpop.f32.mrb[172].mxu0 }
 0x616   : > { %v4050_v2 = vadd.f32 %v17078_v6, %v4049_v63  ;;  %v17122_v48 = vpop.f32.mrb[173].mxu0 }
 0x617   : > { %9537 = vst [vmem:[%s15816_s23 + $0x148] sm:$0xff] %v4055_v9 }
 0x618   : > { %9536 = vst [vmem:[%s15816_s23 + $0x140] sm:$0xff] %v4050_v2  ;;  %v10656_v0 = vpop.f32.mrb[138].mxu1 }
 0x619   : > { %v4065_v58 = vadd.f32 %v17078_v6, %v10656_v0  ;;  %v4059_v51 = vpop.f32.mrb[139].mxu1  ;;  %v17127_v53 = vpop.f32.mrb[174].mxu0 }
 0x61a   : > { %v4060_v52 = vadd.f32 %v17078_v6, %v4059_v51  ;;  %v17130_v33 = vpop.f32.mrb[175].mxu0 }
 0x61b   : > { %9539 = vst [vmem:[%s15816_s23 + $0x158] sm:$0xff] %v4065_v58 }
 0x61c   : > { %9538 = vst [vmem:[%s15816_s23 + $0x150] sm:$0xff] %v4060_v52  ;;  %v10659_v63 = vpop.f32.mrb[140].mxu1 }
 0x61d   : > { %v4075_v9 = vadd.f32 %v17078_v6, %v10659_v63  ;;  %v4069_v62 = vpop.f32.mrb[141].mxu1  ;;  %v17135_v2 = vpop.f32.mrb[176].mxu0 }
 0x61e   : > { %20666 = vst [vmem:[#allocation23_spill] sm:$0xff] %v17135_v2  ;;  %v4070_v42 = vadd.f32 %v17078_v6, %v4069_v62  ;;  %v17138_v0 = vpop.f32.mrb[177].mxu0 }
 0x61f   : > { %9541 = vst [vmem:[%s15816_s23 + $0x168] sm:$0xff] %v4075_v9 }
 0x620   : > { %9540 = vst [vmem:[%s15816_s23 + $0x160] sm:$0xff] %v4070_v42 }
 0x621   : > { %v10662_v1 = vpop.f32.mrb[142].mxu1  ;;  %v17142_v51 = vpop.f32.mrb[178].mxu0 }
 0x622   : > { %20667 = vst [vmem:[#allocation101_spill] sm:$0xff] %v17142_v51  ;;  %v4085_v58 = vadd.f32 %v17078_v6, %v10662_v1  ;;  %v4079_v39 = vpop.f32.mrb[143].mxu1  ;;  %v17145_v52 = vpop.f32.mrb[179].mxu0 }
 0x623   : > { %20668 = vst [vmem:[#allocation85_spill] sm:$0xff] %v17145_v52  ;;  %v4080_v11 = vadd.f32 %v17078_v6, %v4079_v39 }
 0x624   : > { %9543 = vst [vmem:[%s15816_s23 + $0x178] sm:$0xff] %v4085_v58 }
 0x625   : > { %9542 = vst [vmem:[%s15816_s23 + $0x170] sm:$0xff] %v4080_v11  ;;  %v17150_v63 = vpop.f32.mrb[180].mxu0 }
 0x626   : > { %20669 = vst [vmem:[#allocation88_spill] sm:$0xff] %v17150_v63  ;;  %v17152_v46 = vpop.f32.mrb[181].mxu0 }
 0x627   : > { %20670 = vst [vmem:[#allocation99_spill] sm:$0xff] %v17152_v46 }
 0x629   : > { %v17154_v62 = vpop.f32.mrb[182].mxu0 }
 0x62a   : > { %20671 = vst [vmem:[#allocation86_spill] sm:$0xff] %v17154_v62  ;;  %v17156_v9 = vpop.f32.mrb[183].mxu0 }
 0x62b   : > { %20672 = vst [vmem:[#allocation15_spill] sm:$0xff] %v17156_v9 }
 0x62d   : > { %v17158_v42 = vpop.f32.mrb[184].mxu0 }
 0x62e   : > { %20673 = vst [vmem:[#allocation100_spill] sm:$0xff] %v17158_v42  ;;  %v17160_v41 = vpop.f32.mrb[185].mxu0 }
 0x62f   : > { %20674 = vst [vmem:[#allocation102_spill] sm:$0xff] %v17160_v41 }
 0x631   : > { %v17162_v1 = vpop.f32.mrb[186].mxu0 }
 0x632   : > { %20675 = vst [vmem:[#allocation78_spill] sm:$0xff] %v17162_v1  ;;  %v17164_v61 = vpop.f32.mrb[187].mxu0 }
 0x633   : > { %20676 = vst [vmem:[#allocation90_spill] sm:$0xff] %v17164_v61 }
 0x635   : > { %v17166_v29 = vpop.f32.mrb[188].mxu0 }
 0x636   : > { %20677 = vst [vmem:[#allocation96_spill] sm:$0xff] %v17166_v29  ;;  %v17168_v39 = vpop.f32.mrb[189].mxu0 }
 0x637   : > { %20678 = vst [vmem:[#allocation103_spill] sm:$0xff] %v17168_v39 }
 0x639   : > { %v17170_v11 = vpop.f32.mrb[190].mxu0 }
 0x63a   : > { %20679 = vst [vmem:[#allocation94_spill] sm:$0xff] %v17170_v11  ;;  %v4397_v6 = vpop.f32.mrb[144].mxu1  ;;  %v17172_v58 = vpop.f32.mrb[191].mxu0 }
 0x63b   : > { %20680 = vst [vmem:[#allocation95_spill] sm:$0xff] %v17172_v58  ;;  %v4398_v35 = vadd.f32 %v4397_v6, %v15230_v18  ;;  %v4399_v13 = vpop.f32.mrb[145].mxu1 }
 0x63c   : > { %v4400_v39 = vadd.f32 %v4399_v13, %v15233_v45 }
 0x63d   : > { %v9576_v7 = vmul.f32 -1.442695, %v4398_v35  ;;  %v17175_v42 = vpop.f32.mrb[192].mxu0 }
 0x63e   : > { %v4403_v41 = vpop.f32.mrb[146].mxu1  ;;  %v17177_v62 = vpop.f32.mrb[193].mxu0  ;;  %v9592_v9 = vmul.f32 -1.442695, %v4400_v39 }
 0x63f   : > { %13070 = vpow2.f32 %v9576_v7  ;;  %v4404_v1 = vadd.f32 %v4403_v41, %v15230_v18  ;;  %v4405_v29 = vpop.f32.mrb[147].mxu1 }
 0x640   : > { %v4406_v11 = vadd.f32 %v4405_v29, %v15233_v45 }
 0x641   : > { %v9577_v61 = vmul.f32 -1.442695, %v4404_v1  ;;  %v17182_v19 = vpop.f32.mrb[194].mxu0 }
 0x642   : > { %v4409_v58 = vpop.f32.mrb[148].mxu1  ;;  %v17184_v6 = vpop.f32.mrb[195].mxu0  ;;  %v9593_v63 = vmul.f32 -1.442695, %v4406_v11 }
 0x643   : > { %13072 = vpow2.f32 %v9577_v61  ;;  %v4410_v35 = vadd.f32 %v4409_v58, %v15230_v18  ;;  %v4411_v5 = vpop.f32.mrb[149].mxu1 }
 0x644   : > { %v4412_v61 = vadd.f32 %v4411_v5, %v15233_v45 }
 0x645   : > { %v9578_v7 = vmul.f32 -1.442695, %v4410_v35  ;;  %v17187_v32 = vpop.f32.mrb[196].mxu0 }
 0x646   : > { %v4415_v41 = vpop.f32.mrb[150].mxu1  ;;  %v17189_v46 = vpop.f32.mrb[197].mxu0 }
 0x647   : > { %13074 = vpow2.f32 %v9578_v7  ;;  %v4416_v29 = vadd.f32 %v4415_v41, %v15230_v18  ;;  %v4417_v13 = vpop.f32.mrb[151].mxu1  ;;  %v9594_v41 = vmul.f32 -1.442695, %v4412_v61 }
 0x648   : > { %13076 = vpow2.f32 %v9592_v9  ;;  %v4418_v9 = vadd.f32 %v4417_v13, %v15233_v45 }
 0x649   : > { %v13071_v1 = vpop.eup %13070  ;;  %13078 = vpow2.f32 %v9593_v63  ;;  %v9579_v44 = vmul.f32 -1.442695, %v4416_v29  ;;  %v17193_v58 = vpop.f32.mrb[198].mxu0 }
 0x64a   : > { %20681 = vst [vmem:[#allocation104_spill] sm:$0xff] %v17193_v58  ;;  %v4701_v39 = vadd.f32 1.0, %v13071_v1  ;;  %v4421_v11 = vpop.f32.mrb[152].mxu1  ;;  %v17195_v35 = vpop.f32.mrb[199].mxu0 }
 0x64b   : > { %20682 = vst [vmem:[#allocation92_spill] sm:$0xff] %v17195_v35  ;;  %13080 = vpow2.f32 %v9579_v44  ;;  %v4422_v31 = vadd.f32 %v4421_v11, %v15230_v18  ;;  %v4423_v51 = vpop.f32.mrb[153].mxu1 }
 0x64c   : > { %13082 = vrcp.f32 %v4701_v39  ;;  %v4424_v29 = vadd.f32 %v4423_v51, %v15233_v45  ;;  %v9595_v39 = vmul.f32 -1.442695, %v4418_v9 }
 0x64d   : > { %v13073_v7 = vpop.eup %13072  ;;  %v9580_v52 = vmul.f32 -1.442695, %v4422_v31  ;;  %v17199_v63 = vpop.f32.mrb[200].mxu0 }
 0x64e   : > { %20683 = vst [vmem:[#allocation91_spill] sm:$0xff] %v17199_v63  ;;  %v4702_v5 = vadd.f32 1.0, %v13073_v7  ;;  %v4427_v58 = vpop.f32.mrb[154].mxu1  ;;  %v17202_v1 = vpop.f32.mrb[201].mxu0  ;;  %v9596_v63 = vmul.f32 -1.442695, %v4424_v29 }
 0x64f   : > { %20684 = vst [vmem:[#allocation12_spill] sm:$0xff] %v17202_v1  ;;  %13084 = vpow2.f32 %v9580_v52  ;;  %v4428_v44 = vadd.f32 %v4427_v58, %v15230_v18  ;;  %v4429_v2 = vpop.f32.mrb[155].mxu1 }
 0x650   : > { %13086 = vrcp.f32 %v4702_v5  ;;  %v4430_v58 = vadd.f32 %v4429_v2, %v15233_v45 }
 0x651   : > { %v13075_v11 = vpop.eup %13074  ;;  %13088 = vpow2.f32 %v9594_v41  ;;  %v9581_v61 = vmul.f32 -1.442695, %v4428_v44  ;;  %v17205_v16 = vpop.f32.mrb[202].mxu0  ;;  %v4561_v41 = vadd.f32 %v17081_v55, %v15273_v24 }
 0x652   : > { %20685 = vst [vmem:[#allocation87_spill] sm:$0xff] %v17205_v16  ;;  %v13077_v31 = vpop.eup %13076  ;;  %v4703_v13 = vadd.f32 1.0, %v13075_v11  ;;  %v4433_v7 = vpop.f32.mrb[156].mxu1 }
 0x653   : > { %v17207_v12 = vpop.f32.mrb[203].mxu0  ;;  %v13079_v51 = vpop.eup %13078  ;;  %13090 = vpow2.f32 %v9581_v61  ;;  %v4434_v52 = vadd.f32 %v4433_v7, %v15230_v18  ;;  %v4797_v9 = vadd.f32 1.0, %v13077_v31 }
 0x654   : > { %20686 = vst [vmem:[#allocation105_spill] sm:$0xff] %v17207_v12  ;;  %v4435_v1 = vpop.f32.mrb[157].mxu1  ;;  %13092 = vrcp.f32 %v4703_v13  ;;  %v4798_v16 = vadd.f32 1.0, %v13079_v51  ;;  %v4559_v13 = vadd.f32 %v17073_v43, %v15278_v17  ;;  %v4567_v51 = vadd.f32 %v17088_v40, %v15273_v24 }
 0x655   : > { %v13081_v5 = vpop.eup %13080  ;;  %13094 = vpow2.f32 %v9595_v39  ;;  %v9582_v44 = vmul.f32 -1.442695, %v4434_v52  ;;  %v17213_v11 = vpop.f32.mrb[204].mxu0  ;;  %v9597_v39 = vmul.f32 -1.442695, %v4430_v58  ;;  %v4436_v31 = vadd.f32 %v4435_v1, %v15233_v45 }
 0x656   : > { %20687 = vst [vmem:[#allocation106_spill] sm:$0xff] %v17213_v11  ;;  %v13083_v29 = vpop.eup %13082  ;;  %v4704_v12 = vadd.f32 1.0, %v13081_v5  ;;  %13096 = vpow2.f32 %v9596_v63  ;;  %v4439_v61 = vpop.f32.mrb[158].mxu1 }
 0x657   : > { %v17215_v35 = vpop.f32.mrb[205].mxu0  ;;  %v4845_v2 = vmul.f32 %v13083_v29, %v4561_v41  ;;  %13098 = vpow2.f32 %v9582_v44  ;;  %v4440_v7 = vadd.f32 %v4439_v61, %v15230_v18  ;;  %v4441_v55 = vpop.f32.mrb[159].mxu1  ;;  %v9598_v40 = vmul.f32 -1.442695, %v4436_v31 }
 0x658   : > { %20688 = vst [vmem:[#allocation107_spill] sm:$0xff] %v17215_v35  ;;  %13100 = vrcp.f32 %v4704_v12  ;;  %v4565_v12 = vadd.f32 %v17086_v23, %v15278_v17  ;;  %v4571_v23 = vadd.f32 %v17090_v10, %v15278_v17 }
 0x659   : > { %v13085_v52 = vpop.eup %13084  ;;  %v4861_v63 = vadd.f32 %v4845_v2, %v4559_v13  ;;  %13102 = vrcp.f32 %v4797_v9  ;;  %v17223_v5 = vpop.f32.mrb[206].mxu0  ;;  %v9583_v41 = vmul.f32 -1.442695, %v4440_v7  ;;  %v4442_v9 = vadd.f32 %v4441_v55, %v15233_v45 }
 0x65a   : > { %20689 = vst [vmem:[#allocation108_spill] sm:$0xff] %v17223_v5  ;;  %v13087_v11 = vpop.eup %13086  ;;  %13104 = vrcp.f32 %v4798_v16  ;;  %v4705_v43 = vadd.f32 1.0, %v13085_v52  ;;  %v4445_v44 = vpop.f32.mrb[160].mxu1  ;;  %v4573_v16 = vadd.f32 %v17092_v27, %v15273_v24 }
 0x65b   : > { %v17225_v29 = vpop.f32.mrb[207].mxu0  ;;  %v13089_v61 = vpop.eup %13088  ;;  %13106 = vtanh.f32 %v4861_v63  ;;  %v4846_v1 = vmul.f32 %v13087_v11, %v4567_v51  ;;  %v9599_v31 = vmul.f32 -1.442695, %v4442_v9  ;;  %v4446_v51 = vadd.f32 %v4445_v44, %v15230_v18 }
 0x65c   : > { %20690 = vst [vmem:[#allocation109_spill] sm:$0xff] %v17225_v29  ;;  %v4447_v58 = vpop.f32.mrb[161].mxu1  ;;  %13108 = vpow2.f32 %v9597_v39  ;;  %v4799_v52 = vadd.f32 1.0, %v13089_v61  ;;  %v4583_v44 = vadd.f32 %v17103_v20, %v15278_v17 }
 0x65d   : > { %v13091_v13 = vpop.eup %13090  ;;  %v4862_v2 = vadd.f32 %v4846_v1, %v4565_v12  ;;  %13110 = vrcp.f32 %v4705_v43  ;;  %v4577_v43 = vadd.f32 %v17095_v47, %v15278_v17  ;;  %v4585_v47 = vadd.f32 %v17106_v59, %v15273_v24 }
 0x65e   : > { %v13093_v7 = vpop.eup %13092  ;;  %v4706_v5 = vadd.f32 1.0, %v13091_v13  ;;  %13112 = vpow2.f32 %v9583_v41  ;;  %v4451_v29 = vpop.f32.mrb[162].mxu1  ;;  %v4579_v41 = vadd.f32 %v17098_v22, %v15273_v24 }
 0x65f   : > { %v13095_v35 = vpop.eup %13094  ;;  %13114 = vtanh.f32 %v4862_v2  ;;  %v4847_v11 = vmul.f32 %v13093_v7, %v4573_v16  ;;  %v17234_v39 = vpop.f32.mrb[163].mxu1  ;;  %v4452_v1 = vadd.f32 %v4451_v29, %v15230_v18  ;;  %v17253_v29 = vld [vmem:[%s19859_s5] ss:$0 sm:$0xff] }
 0x660   : > { %v13097_v55 = vpop.eup %13096  ;;  %13116 = vpow2.f32 %v9598_v40  ;;  %v4800_v10 = vadd.f32 1.0, %v13095_v35  ;;  %v9584_v35 = vmul.f32 -1.442695, %v4446_v51  ;;  %v17257_v16 = vadd.f32 %v17253_v29, %v17177_v62 }
 0x661   : > { %v13099_v27 = vpop.eup %13098  ;;  %v4863_v63 = vadd.f32 %v4847_v11, %v4571_v23  ;;  %13118 = vrcp.f32 %v4706_v5  ;;  %v4589_v5 = vadd.f32 %v17111_v14, %v15278_v17  ;;  %v4801_v59 = vadd.f32 1.0, %v13097_v55 }
 0x662   : > { %v13101_v61 = vpop.eup %13100  ;;  %13120 = vrcp.f32 %v4799_v52  ;;  %v4707_v12 = vadd.f32 1.0, %v13099_v27  ;;  %v4457_v13 = vpop.f32.mrb[164].mxu1  ;;  %v4591_v14 = vadd.f32 %v17114_v36, %v15273_v24  ;;  %v9585_v11 = vmul.f32 -1.442695, %v4452_v1 }
 0x663   : > { %v13103_v40 = vpop.eup %13102  ;;  %13122 = vtanh.f32 %v4863_v63  ;;  %v4848_v9 = vmul.f32 %v13101_v61, %v4579_v41  ;;  %v17246_v2 = vpop.f32.mrb[165].mxu1  ;;  %v4458_v52 = vadd.f32 %v4457_v13, %v15230_v18  ;;  %v17265_v62 = vadd.f32 %v17119_v49, %v15278_v17 }
 0x664   : > { %v13105_v22 = vpop.eup %13104  ;;  %13124 = vpow2.f32 %v9599_v31  ;;  %v4448_v55 = vadd.f32 %v4447_v58, %v15233_v45  ;;  %v20109_v61 = vmax.f32 %v17257_v16, 0.0 }
 0x665   : > { %v13107_v20 = vpop.eup %13106  ;;  %v4864_v7 = vadd.f32 %v4848_v9, %v4577_v43  ;;  %13126 = vrcp.f32 %v4707_v12  ;;  %v17272_v43 = vadd.f32 %v17253_v29, %v17175_v42  ;;  %v9586_v49 = vmul.f32 -1.442695, %v4458_v52 }
 0x666   : > { %v13109_v23 = vpop.eup %13108  ;;  %13128 = vrcp.f32 %v4800_v10  ;;  %v4463_v31 = vpop.f32.mrb[166].mxu1  ;;  %v4893_v51 = vsub.f32 %v16705_v56, %v13107_v20 }
 0x667   : > { %v13111_v27 = vpop.eup %13110  ;;  %13130 = vtanh.f32 %v4864_v7  ;;  %v17268_v63 = vpop.f32.mrb[167].mxu1  ;;  %v4802_v12 = vadd.f32 1.0, %v13109_v23  ;;  %v4464_v58 = vadd.f32 %v4463_v31, %v15230_v18 }
 0x668   : > { %v13113_v41 = vpop.eup %13112  ;;  %v4849_v36 = vmul.f32 %v13111_v27, %v4585_v47  ;;  %13132 = vpow2.f32 %v9584_v35  ;;  %v4909_v56 = vmul.f32 %v13103_v40, %v4893_v51  ;;  %v9600_v47 = vmul.f32 -1.442695, %v4448_v55 }
 0x669   : > { %v13115_v10 = vpop.eup %13114  ;;  %13134 = vrcp.f32 %v4801_v59  ;;  %v4708_v1 = vadd.f32 1.0, %v13113_v41  ;;  %v4454_v35 = vadd.f32 %v17234_v39, %v15233_v45 }
 0x66a   : > { %v13117_v13 = vpop.eup %13116  ;;  %v4865_v9 = vadd.f32 %v4849_v36, %v4583_v44  ;;  %13136 = vpow2.f32 %v9585_v11  ;;  %v4469_v7 = vpop.f32.mrb[168].mxu1  ;;  %v17276_v50 = vadd.f32 %v13107_v20, %v4909_v56  ;;  %v4894_v59 = vsub.f32 %v16632_v26, %v13115_v10 }
 0x66b   : > { %v13119_v42 = vpop.eup %13118  ;;  %13138 = vrcp.f32 %v4708_v1  ;;  %v17280_v40 = vpop.f32.mrb[169].mxu1  ;;  %v4597_v44 = vadd.f32 %v17122_v48, %v15273_v24  ;;  %v20108_v11 = vmax.f32 %v17272_v43, 0.0  ;;  %v4803_v31 = vadd.f32 1.0, %v13117_v13 }
 0x66c   : > { %v13121_v23 = vpop.eup %13120  ;;  %13140 = vtanh.f32 %v4865_v9  ;;  %v4850_v52 = vmul.f32 %v13119_v42, %v4591_v14  ;;  %10731 = vmatprep.mubr.f32.mxu1 %v17276_v50  ;;  %5554 = vmatprep.mubr.f32.mxu0 %v17276_v50  ;;  %v4910_v39 = vmul.f32 %v13105_v22, %v4894_v59  ;;  %v17292_v26 = vadd.f32 %v17253_v29, %v17184_v6 }
 0x66d   : > { %v13123_v20 = vpop.eup %13122  ;;  %13142 = vrcp.f32 %v4802_v12  ;;  %5555 = vmatmul.mubr.f32.vlgmr.msra.gmra.mrb[208].mxu0 %v20109_v61  ;;  %v9587_v48 = vmul.f32 -1.442695, %v4464_v58  ;;  %v9601_v36 = vmul.f32 -1.442695, %v4454_v35  ;;  %v4460_v56 = vadd.f32 %v17246_v2, %v15233_v45 }
 0x66e   : > { %v13125_v14 = vpop.eup %13124  ;;  %v4866_v51 = vadd.f32 %v4850_v52, %v4589_v5  ;;  %13144 = vpow2.f32 %v9586_v49  ;;  %v4475_v27 = vpop.f32.mrb[170].mxu1  ;;  %v4895_v55 = vsub.f32 %v16649_v38, %v13123_v20  ;;  %11986 = vmatpush3.bf16.msra.mxu0 %v14363_v3  ;;  %v17300_v12 = vadd.f32 %v13115_v10, %v4910_v39 }
 0x66f   : > { %v13127_v41 = vpop.eup %13126  ;;  %13146 = vpow2.f32 %v9600_v47  ;;  %v17298_v22 = vpop.f32.mrb[171].mxu1  ;;  %11988 = vmatprep.subr.bf16.mxu0 %v20284_v54  ;;  %v4470_v1 = vadd.f32 %v4469_v7, %v15230_v18  ;;  %v4601_v13 = vadd.f32 %v17127_v53, %v15278_v17  ;;  %v17310_v2 = vadd.f32 %v17253_v29, %v17182_v19 }
 0x670   : > { %v13129_v6 = vpop.eup %13128  ;;  %13148 = vtanh.f32 %v4866_v51  ;;  %v4851_v5 = vmul.f32 %v13127_v41, %v4597_v44  ;;  %v4911_v38 = vmul.f32 %v13121_v23, %v4895_v55  ;;  %10732 = vmatmul.mubr.f32.vlgmr.msra.gmra.mrb[176].mxu1 %v17300_v12  ;;  %5560 = vmatprep.mubr.f32.mxu0 %v17300_v12  ;;  %v20105_v10 = vmax.f32 %v17292_v26, 0.0 }
 0x671   : > { %v13131_v49 = vpop.eup %13130  ;;  %13150 = vrcp.f32 %v4803_v31  ;;  %v4804_v7 = vadd.f32 1.0, %v13125_v14  ;;  %11826 = vmatpush1.bf16.msra.mxu1 %v14420_v21  ;;  %5561 = vmatmul.mubr.f32.gmra.mrb[210].mxu0 %v20108_v11  ;;  %v4466_v19 = vadd.f32 %v17268_v63, %v15233_v45  ;;  %v4603_v52 = vadd.f32 %v17130_v33, %v15273_v24 }
 0x672   : > { %v13133_v9 = vpop.eup %13132  ;;  %v4867_v58 = vadd.f32 %v4851_v5, %v17265_v62  ;;  %13152 = vpow2.f32 %v9587_v48  ;;  %v4481_v42 = vpop.f32.mrb[172].mxu1  ;;  %v17317_v53 = vadd.f32 %v13123_v20, %v4911_v38  ;;  %11828 = vmatprep.subr.bf16.mxu1 %v14431_v25  ;;  %v4896_v62 = vsub.f32 %v16776_v37, %v13131_v49  ;;  %11990 = vmatpush3.bf16.msra.mxu0 %v20284_v54 }
 0x673   : > { %v13135_v47 = vpop.eup %13134  ;;  %v4709_v35 = vadd.f32 1.0, %v13133_v9  ;;  %13154 = vpow2.f32 %v9601_v36  ;;  %v17322_v59 = vpop.f32.mrb[173].mxu1  ;;  %v9602_v44 = vmul.f32 -1.442695, %v4460_v56  ;;  %v9588_v20 = vmul.f32 -1.442695, %v4470_v1  ;;  %11992 = vmatprep.subr.bf16.mxu0 %v20546_v30 }
 0x674   : > { %v13137_v23 = vpop.eup %13136  ;;  %13156 = vtanh.f32 %v4867_v58  ;;  %10734 = vmatprep.mubr.f32.mxu1 %v17317_v53  ;;  %5566 = vmatprep.mubr.f32.mxu0 %v17317_v53  ;;  %v4476_v39 = vadd.f32 %v4475_v27, %v15230_v18  ;;  %v4912_v14 = vmul.f32 %v13129_v6, %v4896_v62  ;;  %v20104_v48 = vmax.f32 %v17310_v2, 0.0 }
 0x675   : > { %v13139_v63 = vpop.eup %13138  ;;  %13158 = vrcp.f32 %v4709_v35  ;;  %v4710_v31 = vadd.f32 1.0, %v13137_v23  ;;  %11830 = vmatpush1.bf16.msra.mxu1 %v20541_v4  ;;  %5567 = vmatmul.mubr.f32.gmra.mrb[212].mxu0 %v20105_v10  ;;  %v17338_v55 = vadd.f32 %v17253_v29, %v17189_v46  ;;  %v9603_v27 = vmul.f32 -1.442695, %v4466_v19 }
 0x676   : > { %v13141_v37 = vpop.eup %13140  ;;  %v4852_v51 = vmul.f32 %v13139_v63, %v4603_v52  ;;  %13160 = vrcp.f32 %v4804_v7  ;;  %v4487_v33 = vpop.f32.mrb[174].mxu1  ;;  %11832 = vmatprep.subr.bf16.mxu1 %v20543_v34  ;;  %v17343_v56 = vadd.f32 %v13131_v49, %v4912_v14  ;;  %11994 = vmatpush3.bf16.msra.mxu0 %v20546_v30  ;;  %v9589_v9 = vmul.f32 -1.442695, %v4476_v39  ;;  %v20691_v39 = vld [vmem:[#allocation26_spill] sm:$0xff] }
 0x677   : > { %v13143_v41 = vpop.eup %13142  ;;  %13162 = vrcp.f32 %v4710_v31  ;;  %v17340_v36 = vpop.f32.mrb[175].mxu1  ;;  %v4897_v6 = vsub.f32 %v16665_v28, %v13141_v37  ;;  %12060 = vmatprep.subr.bf16.mxu0 %v20555_v8  ;;  %v4482_v28 = vadd.f32 %v4481_v42, %v15230_v18  ;;  %v20103_v7 = vmax.f32 %v17338_v55, 0.0 }
 0x678   : > { %v13145_v5 = vpop.eup %13144  ;;  %v4868_v1 = vadd.f32 %v4852_v51, %v4601_v13  ;;  %13164 = vpow2.f32 %v9588_v20  ;;  %10735 = vmatmul.mubr.f32.gmra.mrb[178].mxu1 %v17343_v56  ;;  %5572 = vmatprep.mubr.f32.mxu0 %v17343_v56  ;;  %v17354_v13 = vadd.f32 %v17253_v29, %v17187_v32 }
 0x679   : > { %v13147_v46 = vpop.eup %13146  ;;  %v4711_v38 = vadd.f32 1.0, %v13145_v5  ;;  %13166 = vpow2.f32 %v9602_v44  ;;  %v4913_v58 = vmul.f32 %v13135_v47, %v4897_v6  ;;  %11834 = vmatpush1.bf16.msra.mxu1 %v20547_v57  ;;  %5573 = vmatmul.mubr.f32.gmra.mrb[214].mxu0 %v20104_v48  ;;  %v4472_v47 = vadd.f32 %v17280_v40, %v15233_v45 }
 0x67a   : > { %v13149_v49 = vpop.eup %13148  ;;  %13168 = vtanh.f32 %v4868_v1  ;;  %11836 = vmatprep.subr.bf16.mxu1 %v20549_v60  ;;  %v4805_v23 = vadd.f32 1.0, %v13147_v46  ;;  %v4609_v40 = vadd.f32 %v17138_v0, %v15273_v24  ;;  %v9590_v63 = vmul.f32 -1.442695, %v4482_v28  ;;  %v20694_v0 = vld [vmem:[#allocation111_spill] sm:$0xff] }
 0x67b   : > { %v13151_v35 = vpop.eup %13150  ;;  %13170 = vpow2.f32 %v9603_v27  ;;  %v17362_v19 = vadd.f32 %v13141_v37, %v4913_v58  ;;  %v4898_v42 = vsub.f32 %v16781_v15, %v13149_v49  ;;  %v20102_v31 = vmax.f32 %v17354_v13, 0.0  ;;  %v20692_v15 = vld [vmem:[#allocation92_spill] sm:$0xff]  ;;  %v20695_v1 = vld [vmem:[#allocation23_spill] sm:$0xff] }
 0x67c   : > { %v13153_v62 = vpop.eup %13152  ;;  %13172 = vrcp.f32 %v4711_v38  ;;  %v17375_v14 = vadd.f32 %v17253_v29, %v20692_v15  ;;  %v9604_v51 = vmul.f32 -1.442695, %v4472_v47  ;;  %v4607_v46 = vadd.f32 %v20695_v1, %v15278_v17 }
 0x67d   : > { %v13155_v32 = vpop.eup %13154  ;;  %v4712_v52 = vadd.f32 1.0, %v13153_v62  ;;  %13174 = vpow2.f32 %v9589_v9  ;;  %10737 = vmatprep.mubr.f32.mxu1 %v17362_v19  ;;  %5578 = vmatprep.mubr.f32.mxu0 %v17362_v19  ;;  %v4914_v44 = vmul.f32 %v13143_v41, %v4898_v42  ;;  %v20693_v41 = vld [vmem:[#allocation27_spill] sm:$0xff]  ;;  %v20696_v9 = vld [vmem:[#allocation85_spill] sm:$0xff]  ;;  %v4488_v28 = vadd.f32 %v4487_v33, %v15230_v18 }
 0x67e   : > { %v13157_v20 = vpop.eup %13156  ;;  %11838 = vmatpush1.bf16.msra.mxu1 %v20691_v39  ;;  %5579 = vmatmul.mubr.f32.gmra.mrb[216].mxu0 %v20103_v7  ;;  %v4615_v58 = vadd.f32 %v20696_v9, %v15273_v24  ;;  %v20697_v62 = vld [vmem:[#allocation101_spill] sm:$0xff]  ;;  %v20106_v33 = vmax.f32 %v17375_v14, 0.0 }
 0x67f   : > { %v13159_v37 = vpop.eup %13158  ;;  %13176 = vrcp.f32 %v4712_v52  ;;  %11840 = vmatprep.subr.bf16.mxu1 %v20693_v41  ;;  %v17378_v27 = vadd.f32 %v13149_v49, %v4914_v44  ;;  %v4899_v6 = vsub.f32 %v20694_v0, %v13157_v20  ;;  %v4613_v47 = vadd.f32 %v20697_v62, %v15278_v17 }
 0x680   : > { %v13161_v5 = vpop.eup %13160  ;;  %v4853_v38 = vmul.f32 %v13159_v37, %v4609_v40  ;;  %13178 = vrcp.f32 %v4805_v23  ;;  %v4478_v49 = vadd.f32 %v17298_v22, %v15233_v45  ;;  %v20698_v37 = vld [vmem:[#allocation30_spill] sm:$0xff]  ;;  %v4806_v0 = vadd.f32 1.0, %v13155_v32  ;;  %v20699_v22 = vld [vmem:[#allocation31_spill] sm:$0xff] }
 0x681   : > { %v13163_v42 = vpop.eup %13162  ;;  %10738 = vmatmul.mubr.f32.gmra.mrb[180].mxu1 %v17378_v27  ;;  %5584 = vmatprep.mubr.f32.mxu0 %v17378_v27  ;;  %v4915_v52 = vmul.f32 %v13151_v35, %v4899_v6  ;;  %13180 = vpow2.f32 %v9590_v63  ;;  %v20701_v63 = vld [vmem:[#allocation104_spill] sm:$0xff] }
 0x682   : > { %v13165_v44 = vpop.eup %13164  ;;  %v4869_v40 = vadd.f32 %v4853_v38, %v4607_v46  ;;  %v4854_v15 = vmul.f32 %v13163_v42, %v4615_v58  ;;  %11842 = vmatpush1.bf16.msra.mxu1 %v20698_v37  ;;  %5585 = vmatmul.mubr.f32.gmra.mrb[218].mxu0 %v20102_v31  ;;  %13182 = vpow2.f32 %v9604_v51  ;;  %v9591_v46 = vmul.f32 -1.442695, %v4488_v28  ;;  %v20702_v42 = vld [vmem:[#allocation99_spill] sm:$0xff] }
 0x683   : > { %v13167_v23 = vpop.eup %13166  ;;  %v4713_v1 = vadd.f32 1.0, %v13165_v44  ;;  %11844 = vmatprep.subr.bf16.mxu1 %v20699_v22  ;;  %v17397_v9 = vadd.f32 %v13157_v20, %v4915_v52  ;;  %v17401_v38 = vadd.f32 %v17253_v29, %v20701_v63  ;;  %v4621_v62 = vadd.f32 %v20702_v42, %v15273_v24  ;;  %v20703_v20 = vld [vmem:[#allocation18_spill] sm:$0xff]  ;;  %v20705_v44 = vld [vmem:[#allocation15_spill] sm:$0xff] }
 0x684   : > { %v13169_v35 = vpop.eup %13168  ;;  %13184 = vtanh.f32 %v4869_v40  ;;  %v4870_v6 = vadd.f32 %v4854_v15, %v4613_v47  ;;  %v9605_v32 = vmul.f32 -1.442695, %v4478_v49  ;;  %v20704_v47 = vld [vmem:[#allocation88_spill] sm:$0xff]  ;;  %v4627_v40 = vadd.f32 %v20705_v44, %v15273_v24  ;;  %v20706_v15 = vld [vmem:[#allocation34_spill] sm:$0xff]  ;;  %v20707_v42 = vld [vmem:[#allocation35_spill] sm:$0xff] }
 0x685   : > { %20700 = vst [vmem:[#allocation110_spill] sm:$0xff] %v17397_v9  ;;  %v13171_v58 = vpop.eup %13170  ;;  %13186 = vrcp.f32 %v4713_v1  ;;  %10740 = vmatprep.mubr.f32.mxu1 %v17397_v9  ;;  %5590 = vmatprep.mubr.f32.mxu0 %v17397_v9  ;;  %v4900_v51 = vsub.f32 %v20703_v20, %v13169_v35  ;;  %v4619_v28 = vadd.f32 %v20704_v47, %v15278_v17  ;;  %v4807_v31 = vadd.f32 1.0, %v13167_v23 }
 0x686   : > { %v13173_v52 = vpop.eup %13172  ;;  %13188 = vtanh.f32 %v4870_v6  ;;  %11846 = vmatpush1.bf16.msra.mxu1 %v20706_v15  ;;  %5591 = vmatmul.mubr.f32.gmra.mrb[220].mxu0 %v20106_v33  ;;  %v4484_v63 = vadd.f32 %v17322_v59, %v15233_v45  ;;  %v20107_v6 = vmax.f32 %v17401_v38, 0.0  ;;  %v4808_v48 = vadd.f32 1.0, %v13171_v58  ;;  %v20710_v59 = vld [vmem:[#allocation38_spill] sm:$0xff]  ;;  %v20711_v58 = vld [vmem:[#allocation39_spill] sm:$0xff] }
 0x687   : > { %v13175_v49 = vpop.eup %13174  ;;  %13190 = vrcp.f32 %v4806_v0  ;;  %v4855_v1 = vmul.f32 %v13173_v52, %v4621_v62  ;;  %11848 = vmatprep.subr.bf16.mxu1 %v20707_v42  ;;  %v4916_v20 = vmul.f32 %v13161_v5, %v4900_v51  ;;  %v20709_v0 = vld [vmem:[#allocation86_spill] sm:$0xff]  ;;  %v4490_v23 = vadd.f32 %v17340_v36, %v15233_v45  ;;  %v20713_v36 = vld [vmem:[#allocation12_spill] sm:$0xff] }
 0x688   : > { %v4714_v47 = vadd.f32 1.0, %v13175_v49  ;;  %13192 = vpow2.f32 %v9591_v46  ;;  %v4625_v62 = vadd.f32 %v20709_v0, %v15278_v17  ;;  %v9606_v5 = vmul.f32 -1.442695, %v4484_v63  ;;  %v20717_v0 = vld [vmem:[#allocation100_spill] sm:$0xff] }
 0x689   : > { %v13177_v44 = vpop.eup %13176  ;;  %v4871_v7 = vadd.f32 %v4855_v1, %v4619_v28  ;;  %13194 = vpow2.f32 %v9605_v32  ;;  %v17419_v10 = vadd.f32 %v13169_v35, %v4916_v20  ;;  %v20712_v28 = vld [vmem:[#allocation102_spill] sm:$0xff]  ;;  %v17435_v49 = vadd.f32 %v17253_v29, %v20713_v36  ;;  %v20715_v20 = vld [vmem:[#allocation112_spill] sm:$0xff] }
 0x68a   : > { %v4856_v52 = vmul.f32 %v13177_v44, %v4627_v40  ;;  %13196 = vrcp.f32 %v4714_v47  ;;  %11850 = vmatpush1.bf16.msra.mxu1 %v20710_v59  ;;  %v13179_v33 = vpop.eup %13178  ;;  %v4633_v40 = vadd.f32 %v20712_v28, %v15273_v24  ;;  %v20714_v1 = vld [vmem:[#allocation42_spill] sm:$0xff]  ;;  %v9607_v63 = vmul.f32 -1.442695, %v4490_v23  ;;  %v20716_v44 = vld [vmem:[#allocation43_spill] sm:$0xff] }
 0x68b   : > { %20708 = vst [vmem:[#allocation92_spill] sm:$0xff] %v17419_v10  ;;  %13198 = vtanh.f32 %v4871_v7  ;;  %10741 = vmatmul.mubr.f32.gmra.mrb[182].mxu1 %v17419_v10  ;;  %5596 = vmatprep.mubr.f32.mxu0 %v17419_v10  ;;  %v13181_v46 = vpop.eup %13180  ;;  %v20747_v59 = vld [vmem:[#allocation62_spill] sm:$0xff] }
 0x68c   : > { %13200 = vrcp.f32 %v4807_v31  ;;  %v4872_v35 = vadd.f32 %v4856_v52, %v4625_v62  ;;  %11852 = vmatprep.subr.bf16.mxu1 %v20711_v58  ;;  %5597 = vmatmul.mubr.f32.gmra.mrb[222].mxu0 %v20107_v6  ;;  %v13183_v32 = vpop.eup %13182  ;;  %v4715_v51 = vadd.f32 1.0, %v13181_v46  ;;  %v4631_v62 = vadd.f32 %v20717_v0, %v15278_v17  ;;  %v20719_v6 = vld [vmem:[#allocation89_spill] sm:$0xff]  ;;  %v20721_v58 = vld [vmem:[#allocation46_spill] sm:$0xff] }
 0x68d   : > { %13202 = vrcp.f32 %v4808_v48  ;;  %v4809_v23 = vadd.f32 1.0, %v13183_v32  ;;  %v20724_v32 = vld [vmem:[#allocation78_spill] sm:$0xff] }
 0x68e   : > { %v13185_v7 = vpop.eup %13184  ;;  %13204 = vtanh.f32 %v4872_v35  ;;  %11854 = vmatpush1.bf16.msra.mxu1 %v20714_v1  ;;  %v20718_v35 = vld [vmem:[#allocation90_spill] sm:$0xff]  ;;  %v20720_v1 = vld [vmem:[#allocation91_spill] sm:$0xff] }
 0x68f   : > { %v13187_v31 = vpop.eup %13186  ;;  %13206 = vpow2.f32 %v9606_v5  ;;  %v4901_v47 = vsub.f32 %v20715_v20, %v13185_v7  ;;  %11856 = vmatprep.subr.bf16.mxu1 %v20716_v44  ;;  %v4639_v28 = vadd.f32 %v20718_v35, %v15273_v24  ;;  %v17447_v20 = vadd.f32 %v17253_v29, %v20720_v1 }
 0x690   : > { %v13189_v48 = vpop.eup %13188  ;;  %v4857_v52 = vmul.f32 %v13187_v31, %v4633_v40  ;;  %13208 = vrcp.f32 %v4715_v51  ;;  %v20110_v44 = vmax.f32 %v17435_v49, 0.0 }
 0x691   : > { %v13191_v46 = vpop.eup %13190  ;;  %v4917_v36 = vmul.f32 %v13179_v33, %v4901_v47  ;;  %v4902_v11 = vsub.f32 %v20719_v6, %v13189_v48  ;;  %13210 = vpow2.f32 %v9607_v63  ;;  %v20723_v33 = vld [vmem:[#allocation47_spill] sm:$0xff] }
 0x692   : > { %v13193_v61 = vpop.eup %13192  ;;  %v4873_v5 = vadd.f32 %v4857_v52, %v4631_v62  ;;  %11858 = vmatpush1.bf16.msra.mxu1 %v20721_v58  ;;  %v4637_v62 = vadd.f32 %v20724_v32, %v15278_v17  ;;  %v20730_v32 = vld [vmem:[#allocation103_spill] sm:$0xff] }
 0x693   : > { %v13195_v40 = vpop.eup %13194  ;;  %v4716_v51 = vadd.f32 1.0, %v13193_v61  ;;  %v17451_v31 = vadd.f32 %v13185_v7, %v4917_v36  ;;  %v4918_v0 = vmul.f32 %v13191_v46, %v4902_v11  ;;  %11860 = vmatprep.subr.bf16.mxu1 %v20723_v33  ;;  %v20726_v7 = vld [vmem:[#allocation105_spill] sm:$0xff]  ;;  %v20727_v46 = vld [vmem:[#allocation19_spill] sm:$0xff] }
 0x694   : > { %v13197_v6 = vpop.eup %13196  ;;  %13212 = vtanh.f32 %v4873_v5  ;;  %v17465_v63 = vadd.f32 %v17253_v29, %v20726_v7  ;;  %v4645_v7 = vadd.f32 %v20730_v32, %v15273_v24  ;;  %v20737_v33 = vld [vmem:[#allocation55_spill] sm:$0xff] }
 0x695   : > { %20722 = vst [vmem:[#allocation111_spill] sm:$0xff] %v17451_v31  ;;  %v13199_v47 = vpop.eup %13198  ;;  %v4858_v1 = vmul.f32 %v13197_v6, %v4639_v28  ;;  %13214 = vrcp.f32 %v4716_v51  ;;  %10743 = vmatprep.mubr.f32.mxu1 %v17451_v31  ;;  %5602 = vmatprep.mubr.f32.mxu0 %v17451_v31  ;;  %v17458_v52 = vadd.f32 %v13189_v48, %v4918_v0  ;;  %v20728_v28 = vld [vmem:[#allocation50_spill] sm:$0xff]  ;;  %v4810_v51 = vadd.f32 1.0, %v13195_v40  ;;  %v20729_v0 = vld [vmem:[#allocation51_spill] sm:$0xff] }
 0x696   : > { %v13201_v61 = vpop.eup %13200  ;;  %13216 = vrcp.f32 %v4809_v23  ;;  %5603 = vmatmul.mubr.f32.gmra.mrb[224].mxu0 %v20110_v44  ;;  %v4903_v35 = vsub.f32 %v20727_v46, %v13199_v47  ;;  %11862 = vmatpush1.bf16.msra.mxu1 %v20728_v28  ;;  %v20731_v44 = vld [vmem:[#allocation97_spill] sm:$0xff]  ;;  %v20732_v28 = vld [vmem:[#allocation87_spill] sm:$0xff] }
 0x697   : > { %20725 = vst [vmem:[#allocation23_spill] sm:$0xff] %v17458_v52  ;;  %v13203_v36 = vpop.eup %13202  ;;  %v4874_v5 = vadd.f32 %v4858_v1, %v4637_v62  ;;  %10744 = vmatmul.mubr.f32.gmra.mrb[184].mxu1 %v17458_v52  ;;  %5608 = vmatprep.mubr.f32.mxu0 %v17458_v52  ;;  %v17477_v62 = vadd.f32 %v17253_v29, %v20732_v28  ;;  %v20733_v1 = vmax.f32 %v17447_v20, 0.0 }
 0x698   : > { %v13205_v48 = vpop.eup %13204  ;;  %v4919_v23 = vmul.f32 %v13201_v61, %v4903_v35  ;;  %11864 = vmatprep.subr.bf16.mxu1 %v20729_v0  ;;  %v20735_v35 = vld [vmem:[#allocation54_spill] sm:$0xff]  ;;  %v20736_v0 = vld [vmem:[#allocation96_spill] sm:$0xff] }
 0x699   : > { %v13207_v6 = vpop.eup %13206  ;;  %13218 = vtanh.f32 %v4874_v5  ;;  %v4904_v46 = vsub.f32 %v20731_v44, %v13205_v48  ;;  %v4643_v32 = vadd.f32 %v20736_v0, %v15278_v17 }
 0x69a   : > { %v13209_v11 = vpop.eup %13208  ;;  %5609 = vmatmul.mubr.f32.gmra.mrb[226].mxu0 %v20733_v1  ;;  %v17482_v61 = vadd.f32 %v13199_v47, %v4919_v23  ;;  %11866 = vmatpush1.bf16.msra.mxu1 %v20735_v35  ;;  %13220 = vrcp.f32 %v4810_v51  ;;  %v4811_v58 = vadd.f32 1.0, %v13207_v6  ;;  %v20739_v23 = vld [vmem:[#allocation95_spill] sm:$0xff] }
 0x69b   : > { %v4859_v5 = vmul.f32 %v13209_v11, %v4645_v7  ;;  %v4920_v44 = vmul.f32 %v13203_v36, %v4904_v46  ;;  %11868 = vmatprep.subr.bf16.mxu1 %v20737_v33  ;;  %v13211_v28 = vpop.eup %13210  ;;  %v4651_v35 = vadd.f32 %v20739_v23, %v15273_v24  ;;  %v20740_v11 = vmax.f32 %v17465_v63, 0.0  ;;  %v20741_v36 = vld [vmem:[#allocation107_spill] sm:$0xff]  ;;  %v20742_v7 = vld [vmem:[#allocation58_spill] sm:$0xff] }
 0x69c   : > { %20734 = vst [vmem:[#allocation85_spill] sm:$0xff] %v17482_v61  ;;  %10746 = vmatprep.mubr.f32.mxu1 %v17482_v61  ;;  %5614 = vmatprep.mubr.f32.mxu0 %v17482_v61  ;;  %v17499_v51 = vadd.f32 %v17253_v29, %v20741_v36  ;;  %v4812_v33 = vadd.f32 1.0, %v13211_v28 }
 0x69d   : > { %v4875_v40 = vadd.f32 %v4859_v5, %v4643_v32  ;;  %v17490_v1 = vadd.f32 %v13205_v48, %v4920_v44  ;;  %v20743_v48 = vld [vmem:[#allocation98_spill] sm:$0xff] }
 0x69e   : > { %v13213_v47 = vpop.eup %13212  ;;  %5615 = vmatmul.mubr.f32.gmra.mrb[228].mxu0 %v20740_v11  ;;  %11870 = vmatpush1.bf16.msra.mxu1 %v20742_v7  ;;  %v20744_v5 = vld [vmem:[#allocation94_spill] sm:$0xff]  ;;  %v20745_v11 = vld [vmem:[#allocation59_spill] sm:$0xff]  ;;  %v20111_v7 = vmax.f32 %v17499_v51, 0.0 }
 0x69f   : > { %20738 = vst [vmem:[#allocation101_spill] sm:$0xff] %v17490_v1  ;;  %v13215_v46 = vpop.eup %13214  ;;  %13222 = vtanh.f32 %v4875_v40  ;;  %10747 = vmatmul.mubr.f32.gmra.mrb[186].mxu1 %v17490_v1  ;;  %5620 = vmatprep.mubr.f32.mxu0 %v17490_v1  ;;  %v4905_v6 = vsub.f32 %v20743_v48, %v13213_v47  ;;  %v4649_v44 = vadd.f32 %v20744_v5, %v15278_v17  ;;  %v20746_v40 = vmax.f32 %v17477_v62, 0.0  ;;  %v20748_v48 = vld [vmem:[#allocation106_spill] sm:$0xff] }
 0x6a0   : > { %v13217_v32 = vpop.eup %13216  ;;  %v4860_v23 = vmul.f32 %v13215_v46, %v4651_v35  ;;  %11872 = vmatprep.subr.bf16.mxu1 %v20745_v11  ;;  %13224 = vrcp.f32 %v4811_v58  ;;  %v17514_v15 = vadd.f32 %v17253_v29, %v20748_v48  ;;  %v20750_v35 = vld [vmem:[#allocation63_spill] sm:$0xff]  ;;  %v20751_v58 = vld [vmem:[#allocation14_spill] sm:$0xff] }
 0x6a1   : > { %v4921_v36 = vmul.f32 %v13217_v32, %v4905_v6  ;;  %v20752_v32 = vld [vmem:[#allocation66_spill] sm:$0xff] }
 0x6a2   : > { %v4876_v0 = vadd.f32 %v4860_v23, %v4649_v44  ;;  %5621 = vmatmul.mubr.f32.gmra.mrb[230].mxu0 %v20746_v40  ;;  %11874 = vmatpush1.bf16.msra.mxu1 %v20747_v59  ;;  %v20753_v44 = vld [vmem:[#allocation67_spill] sm:$0xff]  ;;  %v20762_v59 = vld [vmem:[#allocation74_spill] sm:$0xff] }
 0x6a3   : > { %v13219_v42 = vpop.eup %13218  ;;  %v17516_v5 = vadd.f32 %v13213_v47, %v4921_v36  ;;  %11876 = vmatprep.subr.bf16.mxu1 %v20750_v35  ;;  %v20112_v47 = vmax.f32 %v17514_v15, 0.0  ;;  %v20755_v36 = vld [vmem:[#allocation109_spill] sm:$0xff] }
 0x6a4   : > { %13226 = vtanh.f32 %v4876_v0  ;;  %v4906_v46 = vsub.f32 %v20751_v58, %v13219_v42  ;;  %v13221_v28 = vpop.eup %13220  ;;  %v17531_v40 = vadd.f32 %v17253_v29, %v20755_v36 }
 0x6a5   : > { %20749 = vst [vmem:[#allocation104_spill] sm:$0xff] %v17516_v5  ;;  %10749 = vmatprep.mubr.f32.mxu1 %v17516_v5  ;;  %5626 = vmatprep.mubr.f32.mxu0 %v17516_v5  ;;  %13228 = vrcp.f32 %v4812_v33  ;;  %v20756_v33 = vld [vmem:[#allocation22_spill] sm:$0xff] }
 0x6a6   : > { %5627 = vmatmul.mubr.f32.gmra.mrb[232].mxu0 %v20111_v7  ;;  %v4922_v6 = vmul.f32 %v13221_v28, %v4906_v46  ;;  %11878 = vmatpush1.bf16.msra.mxu1 %v20752_v32  ;;  %v20757_v46 = vld [vmem:[#allocation70_spill] sm:$0xff]  ;;  %v20759_v7 = vld [vmem:[#allocation108_spill] sm:$0xff] }
 0x6a7   : > { %11880 = vmatprep.subr.bf16.mxu1 %v20753_v44  ;;  %v17543_v44 = vadd.f32 %v17253_v29, %v20759_v7 }
 0x6a8   : > { %v17527_v23 = vadd.f32 %v13219_v42, %v4922_v6  ;;  %v20758_v42 = vld [vmem:[#allocation72_spill] sm:$0xff]  ;;  %v20114_v6 = vmax.f32 %v17531_v40, 0.0 }
 0x6a9   : > { %v13223_v0 = vpop.eup %13222  ;;  %v20113_v29 = vmax.f32 %v17543_v44, 0.0 }
 0x6aa   : > { %20754 = vst [vmem:[#allocation99_spill] sm:$0xff] %v17527_v23  ;;  %10750 = vmatmul.mubr.f32.gmra.mrb[188].mxu1 %v17527_v23  ;;  %5632 = vmatprep.mubr.f32.mxu0 %v17527_v23  ;;  %v4907_v48 = vsub.f32 %v20756_v33, %v13223_v0  ;;  %v13225_v58 = vpop.eup %13224  ;;  %v20761_v33 = vld [vmem:[#allocation93_spill] sm:$0xff] }
 0x6ab   : > { %5633 = vmatmul.mubr.f32.gmra.mrb[234].mxu0 %v20112_v47  ;;  %11882 = vmatpush1.bf16.msra.mxu1 %v20757_v46 }
 0x6ac   : > { %v4923_v28 = vmul.f32 %v13225_v58, %v4907_v48  ;;  %11884 = vmatprep.subr.bf16.mxu1 %v20758_v42  ;;  %v20763_v58 = vld [vmem:[#allocation76_spill] sm:$0xff] }
 0x6ae   : > { %v13227_v36 = vpop.eup %13226  ;;  %v17545_v32 = vadd.f32 %v13223_v0, %v4923_v28  ;;  %v9704_v0 = vld [vmem:[%s14386_s12 + $0x280] sm:$0xff]  ;;  %v20765_v28 = vmax.f32 %v17257_v16, 0.0  ;;  %v20769_v16 = vld [vmem:[#allocation17_spill] sm:$0xff] }
 0x6af   : > { %v4908_v35 = vsub.f32 %v20761_v33, %v13227_v36  ;;  %11886 = vmatpush1.bf16.msra.mxu1 %v20762_v59  ;;  %v13229_v47 = vpop.eup %13228  ;;  %v9708_v33 = vld [vmem:[%s14386_s12 + $0x2a0] sm:$0xff] }
 0x6b0   : > { %20760 = vst [vmem:[#allocation18_spill] sm:$0xff] %v17545_v32  ;;  %10752 = vmatprep.mubr.f32.mxu1 %v17545_v32  ;;  %5638 = vmatprep.mubr.f32.mxu0 %v17545_v32 }
 0x6b1   : > { %5639 = vmatmul.mubr.f32.gmra.mrb[236].mxu0 %v20114_v6  ;;  %v4924_v48 = vmul.f32 %v13229_v47, %v4908_v35  ;;  %11952 = vmatprep.subr.bf16.mxu1 %v20763_v58  ;;  %v9705_v35 = vld [vmem:[%s14386_s12 + $0x288] sm:$0xff]  ;;  %v9706_v47 = vld [vmem:[%s14386_s12 + $0x290] sm:$0xff]  ;;  %v20771_v6 = vld [vmem:[#allocation79_spill] sm:$0xff] }
 0x6b3   : > { %v17555_v7 = vadd.f32 %v13227_v36, %v4924_v48  ;;  %v9707_v36 = vld [vmem:[%s14386_s12 + $0x298] sm:$0xff]  ;;  %v20766_v48 = vld [vmem:[#allocation16_spill] sm:$0xff] }
 0x6b5   : > { %20764 = vst [vmem:[#allocation88_spill] sm:$0xff] %v17555_v7  ;;  %10753 = vmatmul.mubr.f32.gmra.mrb[190].mxu1 %v17555_v7  ;;  %5644 = vmatprep.mubr.f32.mxu0 %v17555_v7 }
 0x6b6   : > { %5393 = vmatprep.mubr.f32.mxu1 %v17276_v50  ;;  %5645 = vmatmul.mubr.f32.gmra.mrb[238].mxu0 %v20113_v29  ;;  %v20768_v29 = vmax.f32 %v17272_v43, 0.0  ;;  %v20772_v43 = vmax.f32 %v17292_v26, 0.0  ;;  %v20776_v26 = vmax.f32 %v17310_v2, 0.0  ;;  %v20780_v2 = vmax.f32 %v17338_v55, 0.0 }
 0x6b7   : > { %10859 = vmatprep.mubr.msk.f32.mxu0 %vm1103_vm0, %v9704_v0  ;;  %v20767_v0 = vld [vmem:[#allocation77_spill] sm:$0xff]  ;;  %v20784_v55 = vmax.f32 %v17354_v13, 0.0  ;;  %v20788_v13 = vmax.f32 %v17375_v14, 0.0 }
 0x6b8   : > { %v20793_v14 = vld [vmem:[#allocation41_spill] sm:$0xff] }
 0x6b9   : > { %5394 = vmatmul.mubr.f32.vlgmr.msra.gmra.mrb[192].mxu1 %v20765_v28  ;;  %v20770_v28 = vld [vmem:[#allocation20_spill] sm:$0xff] }
 0x6ba   : > { %5399 = vmatprep.mubr.f32.mxu1 %v17300_v12  ;;  %10860 = vmatmul.mubr.msk.f32.vlgmr.msra.gmra.mrb[240].mxu0 %vm1103_vm0, %v9705_v35  ;;  %v9709_v35 = vld [vmem:[%s14386_s12 + $0x2a8] sm:$0xff] }
 0x6bb   : > { %10862 = vmatprep.mubr.msk.f32.mxu0 %vm1103_vm0, %v9706_v47  ;;  %11954 = vmatpush3.bf16.msra.mxu1 %v20763_v58  ;;  %v9710_v47 = vld [vmem:[%s14386_s12 + $0x2b0] sm:$0xff] }
 0x6bc   : > { %12062 = vmatpush1.bf16.msra.mxu0 %v20766_v48  ;;  %11956 = vmatprep.subr.bf16.mxu1 %v20767_v0 }
 0x6bd   : > { %5400 = vmatmul.mubr.f32.gmra.mrb[194].mxu1 %v20768_v29  ;;  %12064 = vmatprep.subr.bf16.mxu0 %v20769_v16  ;;  %v20773_v29 = vld [vmem:[#allocation21_spill] sm:$0xff]  ;;  %v20775_v16 = vld [vmem:[#allocation80_spill] sm:$0xff] }
 0x6be   : > { %5405 = vmatprep.mubr.f32.mxu1 %v17317_v53  ;;  %10863 = vmatmul.mubr.msk.f32.gmra.mrb[242].mxu0 %vm1103_vm0, %v9707_v36  ;;  %v9711_v36 = vld [vmem:[%s14386_s12 + $0x2b8] sm:$0xff] }
 0x6bf   : > { %10865 = vmatprep.mubr.msk.f32.mxu0 %vm1103_vm0, %v9708_v33  ;;  %11958 = vmatpush3.bf16.msra.mxu1 %v20767_v0  ;;  %v9712_v33 = vld [vmem:[%s14386_s12 + $0x2c0] sm:$0xff] }
 0x6c0   : > { %12066 = vmatpush1.bf16.msra.mxu0 %v20770_v28  ;;  %11960 = vmatprep.subr.bf16.mxu1 %v20771_v6  ;;  %v20774_v28 = vld [vmem:[#allocation24_spill] sm:$0xff] }
 0x6c1   : > { %5406 = vmatmul.mubr.f32.gmra.mrb[196].mxu1 %v20772_v43  ;;  %12068 = vmatprep.subr.bf16.mxu0 %v20773_v29  ;;  %v20777_v43 = vld [vmem:[#allocation25_spill] sm:$0xff] }
 0x6c2   : > { %5411 = vmatprep.mubr.f32.mxu1 %v17343_v56  ;;  %10866 = vmatmul.mubr.msk.f32.gmra.mrb[244].mxu0 %vm1103_vm0, %v9709_v35  ;;  %v9713_v35 = vld [vmem:[%s14386_s12 + $0x2c8] sm:$0xff] }
 0x6c3   : > { %10868 = vmatprep.mubr.msk.f32.mxu0 %vm1103_vm0, %v9710_v47  ;;  %11962 = vmatpush3.bf16.msra.mxu1 %v20771_v6  ;;  %v9714_v47 = vld [vmem:[%s14386_s12 + $0x2d0] sm:$0xff]  ;;  %v20779_v29 = vld [vmem:[#allocation81_spill] sm:$0xff] }
 0x6c4   : > { %12070 = vmatpush1.bf16.msra.mxu0 %v20774_v28  ;;  %11964 = vmatprep.subr.bf16.mxu1 %v20775_v16  ;;  %v20778_v28 = vld [vmem:[#allocation28_spill] sm:$0xff] }
 0x6c5   : > { %5412 = vmatmul.mubr.f32.gmra.mrb[198].mxu1 %v20776_v26  ;;  %12072 = vmatprep.subr.bf16.mxu0 %v20777_v43  ;;  %v20781_v26 = vld [vmem:[#allocation29_spill] sm:$0xff]  ;;  %v20783_v43 = vld [vmem:[#allocation82_spill] sm:$0xff] }
 0x6c6   : > { %5417 = vmatprep.mubr.f32.mxu1 %v17362_v19  ;;  %10869 = vmatmul.mubr.msk.f32.gmra.mrb[246].mxu0 %vm1103_vm0, %v9711_v36  ;;  %v9715_v36 = vld [vmem:[%s14386_s12 + $0x2d8] sm:$0xff] }
 0x6c7   : > { %10871 = vmatprep.mubr.msk.f32.mxu0 %vm1103_vm0, %v9712_v33  ;;  %11966 = vmatpush3.bf16.msra.mxu1 %v20775_v16  ;;  %v9716_v33 = vld [vmem:[%s14386_s12 + $0x2e0] sm:$0xff] }
 0x6c8   : > { %12074 = vmatpush1.bf16.msra.mxu0 %v20778_v28  ;;  %11968 = vmatprep.subr.bf16.mxu1 %v20779_v29  ;;  %v20782_v28 = vld [vmem:[#allocation32_spill] sm:$0xff] }
 0x6c9   : > { %5418 = vmatmul.mubr.f32.gmra.mrb[200].mxu1 %v20780_v2  ;;  %12076 = vmatprep.subr.bf16.mxu0 %v20781_v26  ;;  %v20785_v2 = vld [vmem:[#allocation33_spill] sm:$0xff]  ;;  %v20786_v26 = vld [vmem:[#allocation36_spill] sm:$0xff] }
 0x6ca   : > { %5423 = vmatprep.mubr.f32.mxu1 %v17378_v27  ;;  %10872 = vmatmul.mubr.msk.f32.gmra.mrb[248].mxu0 %vm1103_vm0, %v9713_v35  ;;  %v9717_v35 = vld [vmem:[%s14386_s12 + $0x2e8] sm:$0xff] }
 0x6cb   : > { %10874 = vmatprep.mubr.msk.f32.mxu0 %vm1103_vm0, %v9714_v47  ;;  %11970 = vmatpush3.bf16.msra.mxu1 %v20779_v29  ;;  %v9718_v47 = vld [vmem:[%s14386_s12 + $0x2f0] sm:$0xff] }
 0x6cc   : > { %12078 = vmatpush1.bf16.msra.mxu0 %v20782_v28  ;;  %11972 = vmatprep.subr.bf16.mxu1 %v20783_v43  ;;  %v20787_v28 = vld [vmem:[#allocation83_spill] sm:$0xff] }
 0x6cd   : > { %5424 = vmatmul.mubr.f32.gmra.mrb[202].mxu1 %v20784_v55  ;;  %12080 = vmatprep.subr.bf16.mxu0 %v20785_v2  ;;  %v20789_v55 = vld [vmem:[#allocation37_spill] sm:$0xff]  ;;  %v20791_v2 = vld [vmem:[#allocation84_spill] sm:$0xff] }
 0x6ce   : > { %5429 = vmatprep.mubr.f32.mxu1 %v17397_v9  ;;  %10875 = vmatmul.mubr.msk.f32.gmra.mrb[250].mxu0 %vm1103_vm0, %v9715_v36  ;;  %v9719_v36 = vld [vmem:[%s14386_s12 + $0x2f8] sm:$0xff] }
 0x6cf   : > { %10877 = vmatprep.mubr.msk.f32.mxu0 %vm1103_vm0, %v9716_v33  ;;  %11974 = vmatpush3.bf16.msra.mxu1 %v20783_v43  ;;  %v20790_v33 = vld [vmem:[#allocation40_spill] sm:$0xff] }
 0x6d0   : > { %12082 = vmatpush1.bf16.msra.mxu0 %v20786_v26  ;;  %11976 = vmatprep.subr.bf16.mxu1 %v20787_v28  ;;  %v20792_v26 = vmax.f32 %v17401_v38, 0.0  ;;  %v20798_v38 = vld [vmem:[#allocation48_spill] sm:$0xff] }
 0x6d1   : > { %5430 = vmatmul.mubr.f32.gmra.mrb[204].mxu1 %v20788_v13  ;;  %12084 = vmatprep.subr.bf16.mxu0 %v20789_v55  ;;  %v20796_v13 = vmax.f32 %v17435_v49, 0.0  ;;  %v20803_v49 = vld [vmem:[#allocation53_spill] sm:$0xff] }
 0x6d2   : > { %5435 = vmatprep.mubr.f32.mxu1 %v17419_v10  ;;  %10878 = vmatmul.mubr.msk.f32.gmra.mrb[252].mxu0 %vm1103_vm0, %v9717_v35  ;;  %v20794_v35 = vld [vmem:[#allocation44_spill] sm:$0xff] }
 0x6d3   : > { %10880 = vmatprep.mubr.msk.f32.mxu0 %vm1103_vm0, %v9718_v47  ;;  %11978 = vmatpush3.bf16.msra.mxu1 %v20787_v28  ;;  %v20795_v47 = vld [vmem:[#allocation13_spill] sm:$0xff] }
 0x6d4   : > { %12086 = vmatpush1.bf16.msra.mxu0 %v20790_v33  ;;  %11980 = vmatprep.subr.bf16.mxu1 %v20791_v2  ;;  %v20797_v33 = vld [vmem:[#allocation45_spill] sm:$0xff] }
 0x6d5   : > { %5436 = vmatmul.mubr.f32.gmra.mrb[206].mxu1 %v20792_v26  ;;  %12088 = vmatprep.subr.bf16.mxu0 %v20793_v14  ;;  %v20799_v26 = vmax.f32 %v17447_v20, 0.0  ;;  %v20800_v14 = vld [vmem:[#allocation49_spill] sm:$0xff] }
 0x6d6   : > { %5441 = vmatprep.mubr.f32.mxu1 %v17451_v31  ;;  %10881 = vmatmul.mubr.msk.f32.gmra.mrb[254].mxu0 %vm1103_vm0, %v9719_v36  ;;  %v20801_v36 = vld [vmem:[#allocation52_spill] sm:$0xff]  ;;  %v20806_v20 = vld [vmem:[#allocation57_spill] sm:$0xff] }
 0x6d7   : > { %11982 = vmatpush3.bf16.msra.mxu1 %v20791_v2 }
 0x6d8   : > { %12090 = vmatpush1.bf16.msra.mxu0 %v20794_v35  ;;  %11996 = vmatprep.subr.bf16.mxu1 %v20795_v47  ;;  %v20802_v47 = vmax.f32 %v17465_v63, 0.0  ;;  %v20809_v63 = vld [vmem:[#allocation61_spill] sm:$0xff] }
 0x6d9   : > { %5442 = vmatmul.mubr.f32.gmra.mrb[208].mxu1 %v20796_v13  ;;  %12092 = vmatprep.subr.bf16.mxu0 %v20797_v33  ;;  %v20804_v13 = vld [vmem:[#allocation56_spill] sm:$0xff] }
 0x6da   : > { %5447 = vmatprep.mubr.f32.mxu1 %v17458_v52 }
 0x6dc   : > { %12094 = vmatpush1.bf16.msra.mxu0 %v20798_v38  ;;  %v20805_v38 = vmax.f32 %v17477_v62, 0.0  ;;  %v20812_v62 = vld [vmem:[#allocation65_spill] sm:$0xff] }
 0x6dd   : > { %5448 = vmatmul.mubr.f32.gmra.mrb[210].mxu1 %v20799_v26  ;;  %12096 = vmatprep.subr.bf16.mxu0 %v20800_v14  ;;  %v20807_v26 = vld [vmem:[#allocation60_spill] sm:$0xff] }
 0x6de   : > { %5453 = vmatprep.mubr.f32.mxu1 %v17482_v61 }
 0x6e0   : > { %12098 = vmatpush1.bf16.msra.mxu0 %v20801_v36  ;;  %v20808_v36 = vmax.f32 %v17499_v51, 0.0  ;;  %v20815_v51 = vld [vmem:[#allocation69_spill] sm:$0xff] }
 0x6e1   : > { %5454 = vmatmul.mubr.f32.gmra.mrb[212].mxu1 %v20802_v47  ;;  %12100 = vmatprep.subr.bf16.mxu0 %v20803_v49  ;;  %v20810_v47 = vld [vmem:[#allocation64_spill] sm:$0xff] }
 0x6e2   : > { %5459 = vmatprep.mubr.f32.mxu1 %v17490_v1 }
 0x6e4   : > { %12102 = vmatpush1.bf16.msra.mxu0 %v20804_v13  ;;  %v20811_v13 = vmax.f32 %v17514_v15, 0.0  ;;  %v20817_v15 = vmax.f32 %v17543_v44, 0.0 }
 0x6e5   : > { %5460 = vmatmul.mubr.f32.gmra.mrb[214].mxu1 %v20805_v38  ;;  %12104 = vmatprep.subr.bf16.mxu0 %v20806_v20  ;;  %v20813_v38 = vld [vmem:[#allocation68_spill] sm:$0xff] }
 0x6e6   : > { %5465 = vmatprep.mubr.f32.mxu1 %v17516_v5 }
 0x6e8   : > { %12106 = vmatpush1.bf16.msra.mxu0 %v20807_v26  ;;  %v20814_v26 = vmax.f32 %v17531_v40, 0.0 }
 0x6e9   : > { %5466 = vmatmul.mubr.f32.gmra.mrb[216].mxu1 %v20808_v36  ;;  %12108 = vmatprep.subr.bf16.mxu0 %v20809_v63  ;;  %v20816_v36 = vld [vmem:[#allocation71_spill] sm:$0xff] }
 0x6ea   : > { %5471 = vmatprep.mubr.f32.mxu1 %v17527_v23 }
 0x6ec   : > { %12110 = vmatpush1.bf16.msra.mxu0 %v20810_v47 }
 0x6ed   : > { %5472 = vmatmul.mubr.f32.gmra.mrb[218].mxu1 %v20811_v13  ;;  %12112 = vmatprep.subr.bf16.mxu0 %v20812_v62  ;;  %v20818_v13 = vld [vmem:[#allocation73_spill] sm:$0xff]  ;;  %v20819_v62 = vld [vmem:[#allocation75_spill] sm:$0xff] }
 0x6ee   : > { %5477 = vmatprep.mubr.f32.mxu1 %v17545_v32 }
 0x6f0   : > { %12114 = vmatpush1.bf16.msra.mxu0 %v20813_v38 }
 0x6f1   : > { %5478 = vmatmul.mubr.f32.gmra.mrb[220].mxu1 %v20814_v26  ;;  %12116 = vmatprep.subr.bf16.mxu0 %v20815_v51  ;;  %v17696_v51 = vld [vmem:[%s19859_s5 + $0x2] ss:$0 sm:$0xff] }
 0x6f2   : > { %5483 = vmatprep.mubr.f32.mxu1 %v17555_v7 }
 0x6f4   : > { %12118 = vmatpush1.bf16.msra.mxu0 %v20816_v36 }
 0x6f5   : > { %5484 = vmatmul.mubr.f32.gmra.mrb[222].mxu1 %v20817_v15  ;;  %12120 = vmatprep.subr.bf16.mxu0 %v20818_v13 }
 0x6f8   : > { %12122 = vmatpush1.bf16.msra.mxu0 %v20819_v62 }
 0x6f9   : > { %12156 = vmatprep.subr.bf16.mxu0 %v14363_v3 }
 0x740   : > { %v17689_v38 = vpop.f32.mrb[208].mxu0 }
 0x741   : > { %v17691_v40 = vpop.f32.mrb[209].mxu0 }
 0x743   : > { %v10733_v26 = vpop.f32.mrb[176].mxu1 }
 0x744   : > { %v5013_v44 = vadd.f32 %v17696_v51, %v10733_v26  ;;  %v5007_v15 = vpop.f32.mrb[177].mxu1  ;;  %v17699_v13 = vpop.f32.mrb[210].mxu0 }
 0x745   : > { %v5008_v62 = vadd.f32 %v17696_v51, %v5007_v15  ;;  %v17702_v36 = vpop.f32.mrb[211].mxu0 }
 0x746   : > { %9609 = vst [vmem:[%s15816_s23 + $0x188] sm:$0xff] %v5013_v44 }
 0x747   : > { %9608 = vst [vmem:[%s15816_s23 + $0x180] sm:$0xff] %v5008_v62 }
 0x748   : > { %v17706_v47 = vpop.f32.mrb[212].mxu0 }
 0x749   : > { %v17708_v63 = vpop.f32.mrb[213].mxu0 }
 0x74b   : > { %v10736_v20 = vpop.f32.mrb[178].mxu1 }
 0x74c   : > { %v5023_v49 = vadd.f32 %v17696_v51, %v10736_v20  ;;  %v5017_v26 = vpop.f32.mrb[179].mxu1  ;;  %v17711_v14 = vpop.f32.mrb[214].mxu0 }
 0x74d   : > { %v5018_v33 = vadd.f32 %v17696_v51, %v5017_v26  ;;  %v17714_v35 = vpop.f32.mrb[215].mxu0 }
 0x74e   : > { %9611 = vst [vmem:[%s15816_s23 + $0x198] sm:$0xff] %v5023_v49 }
 0x74f   : > { %9610 = vst [vmem:[%s15816_s23 + $0x190] sm:$0xff] %v5018_v33 }
 0x751   : > { %v17718_v44 = vpop.f32.mrb[216].mxu0 }
 0x752   : > { %v17720_v62 = vpop.f32.mrb[217].mxu0 }
 0x754   : > { %v10739_v15 = vpop.f32.mrb[180].mxu1 }
 0x755   : > { %v5033_v2 = vadd.f32 %v17696_v51, %v10739_v15  ;;  %v5027_v20 = vpop.f32.mrb[181].mxu1  ;;  %v17723_v55 = vpop.f32.mrb[218].mxu0 }
 0x756   : > { %v5028_v28 = vadd.f32 %v17696_v51, %v5027_v20  ;;  %v17726_v43 = vpop.f32.mrb[219].mxu0 }
 0x757   : > { %9613 = vst [vmem:[%s15816_s23 + $0x1a8] sm:$0xff] %v5033_v2 }
 0x758   : > { %9612 = vst [vmem:[%s15816_s23 + $0x1a0] sm:$0xff] %v5028_v28 }
 0x759   : > { %v17730_v49 = vpop.f32.mrb[220].mxu0 }
 0x75a   : > { %v17732_v33 = vpop.f32.mrb[221].mxu0 }
 0x75e   : > { %v10742_v26 = vpop.f32.mrb[182].mxu1 }
 0x75f   : > { %v5043_v29 = vadd.f32 %v17696_v51, %v10742_v26  ;;  %v5037_v15 = vpop.f32.mrb[183].mxu1  ;;  %v17735_v16 = vpop.f32.mrb[222].mxu0 }
 0x760   : > { %v5038_v6 = vadd.f32 %v17696_v51, %v5037_v15  ;;  %v17738_v0 = vpop.f32.mrb[223].mxu0 }
 0x761   : > { %9615 = vst [vmem:[%s15816_s23 + $0x1b8] sm:$0xff] %v5043_v29 }
 0x762   : > { %9614 = vst [vmem:[%s15816_s23 + $0x1b0] sm:$0xff] %v5038_v6 }
 0x769   : > { %v17742_v2 = vpop.f32.mrb[224].mxu0 }
 0x76a   : > { %20820 = vst [vmem:[#allocation15_spill] sm:$0xff] %v17742_v2  ;;  %v10745_v28 = vpop.f32.mrb[184].mxu1  ;;  %v17744_v20 = vpop.f32.mrb[225].mxu0 }
 0x76b   : > { %v5053_v48 = vadd.f32 %v17696_v51, %v10745_v28  ;;  %v5047_v58 = vpop.f32.mrb[185].mxu1 }
 0x76c   : > { %v5048_v26 = vadd.f32 %v17696_v51, %v5047_v58 }
 0x76d   : > { %9617 = vst [vmem:[%s15816_s23 + $0x1c8] sm:$0xff] %v5053_v48  ;;  %v17749_v59 = vpop.f32.mrb[226].mxu0 }
 0x76e   : > { %20821 = vst [vmem:[#allocation86_spill] sm:$0xff] %v17749_v59  ;;  %9616 = vst [vmem:[%s15816_s23 + $0x1c0] sm:$0xff] %v5048_v26  ;;  %v17752_v15 = vpop.f32.mrb[227].mxu0 }
 0x76f   : > { %20822 = vst [vmem:[#allocation102_spill] sm:$0xff] %v17752_v15 }
 0x771   : > { %v17754_v29 = vpop.f32.mrb[228].mxu0 }
 0x772   : > { %20823 = vst [vmem:[#allocation12_spill] sm:$0xff] %v17754_v29  ;;  %v10748_v6 = vpop.f32.mrb[186].mxu1  ;;  %v17756_v7 = vpop.f32.mrb[229].mxu0 }
 0x773   : > { %20824 = vst [vmem:[#allocation112_spill] sm:$0xff] %v17756_v7  ;;  %v5063_v42 = vadd.f32 %v17696_v51, %v10748_v6  ;;  %v5057_v46 = vpop.f32.mrb[187].mxu1 }
 0x774   : > { %v5058_v28 = vadd.f32 %v17696_v51, %v5057_v46 }
 0x775   : > { %9619 = vst [vmem:[%s15816_s23 + $0x1d8] sm:$0xff] %v5063_v42  ;;  %v17761_v58 = vpop.f32.mrb[230].mxu0 }
 0x776   : > { %20825 = vst [vmem:[#allocation100_spill] sm:$0xff] %v17761_v58  ;;  %9618 = vst [vmem:[%s15816_s23 + $0x1d0] sm:$0xff] %v5058_v28  ;;  %v17764_v48 = vpop.f32.mrb[231].mxu0 }
 0x777   : > { %20826 = vst [vmem:[#allocation90_spill] sm:$0xff] %v17764_v48 }
 0x779   : > { %v17766_v26 = vpop.f32.mrb[232].mxu0 }
 0x77a   : > { %20827 = vst [vmem:[#allocation89_spill] sm:$0xff] %v17766_v26  ;;  %v17768_v32 = vpop.f32.mrb[233].mxu0 }
 0x77b   : > { %20828 = vst [vmem:[#allocation91_spill] sm:$0xff] %v17768_v32 }
 0x77d   : > { %v10751_v23 = vpop.f32.mrb[188].mxu1 }
 0x77e   : > { %v5073_v11 = vadd.f32 %v17696_v51, %v10751_v23  ;;  %v5067_v6 = vpop.f32.mrb[189].mxu1  ;;  %v17771_v5 = vpop.f32.mrb[234].mxu0 }
 0x77f   : > { %20829 = vst [vmem:[#allocation78_spill] sm:$0xff] %v17771_v5  ;;  %v5068_v46 = vadd.f32 %v17696_v51, %v5067_v6  ;;  %v17774_v42 = vpop.f32.mrb[235].mxu0 }
 0x780   : > { %20830 = vst [vmem:[#allocation105_spill] sm:$0xff] %v17774_v42  ;;  %9621 = vst [vmem:[%s15816_s23 + $0x1e8] sm:$0xff] %v5073_v11 }
 0x781   : > { %9620 = vst [vmem:[%s15816_s23 + $0x1e0] sm:$0xff] %v5068_v46 }
 0x784   : > { %v17778_v28 = vpop.f32.mrb[236].mxu0 }
 0x785   : > { %20831 = vst [vmem:[#allocation19_spill] sm:$0xff] %v17778_v28  ;;  %v17780_v1 = vpop.f32.mrb[237].mxu0 }
 0x786   : > { %20832 = vst [vmem:[#allocation103_spill] sm:$0xff] %v17780_v1 }
 0x788   : > { %v10754_v61 = vpop.f32.mrb[190].mxu1 }
 0x789   : > { %v5083_v52 = vadd.f32 %v17696_v51, %v10754_v61  ;;  %v5077_v26 = vpop.f32.mrb[191].mxu1  ;;  %v17783_v31 = vpop.f32.mrb[238].mxu0 }
 0x78a   : > { %20833 = vst [vmem:[#allocation97_spill] sm:$0xff] %v17783_v31  ;;  %v5078_v23 = vadd.f32 %v17696_v51, %v5077_v26  ;;  %v17786_v32 = vpop.f32.mrb[239].mxu0 }
 0x78b   : > { %20834 = vst [vmem:[#allocation87_spill] sm:$0xff] %v17786_v32  ;;  %9623 = vst [vmem:[%s15816_s23 + $0x1f8] sm:$0xff] %v5083_v52 }
 0x78c   : > { %9622 = vst [vmem:[%s15816_s23 + $0x1f0] sm:$0xff] %v5078_v23  ;;  %v5395_v6 = vpop.f32.mrb[192].mxu1 }
 0x78d   : > { %v5396_v11 = vadd.f32 %v5395_v6, %v15230_v18  ;;  %v5397_v46 = vpop.f32.mrb[193].mxu1  ;;  %v17791_v5 = vpop.f32.mrb[240].mxu0 }
 0x78e   : > { %v17793_v28 = vpop.f32.mrb[241].mxu0  ;;  %v5398_v51 = vadd.f32 %v5397_v46, %v15233_v45 }
 0x78f   : > { %v9656_v1 = vmul.f32 -1.442695, %v5396_v11 }
 0x790   : > { %v5401_v42 = vpop.f32.mrb[194].mxu1 }
 0x791   : > { %13230 = vpow2.f32 %v9656_v1  ;;  %v5402_v61 = vadd.f32 %v5401_v42, %v15230_v18  ;;  %v5403_v31 = vpop.f32.mrb[195].mxu1  ;;  %v17796_v58 = vpop.f32.mrb[242].mxu0  ;;  %v9672_v1 = vmul.f32 -1.442695, %v5398_v51 }
 0x792   : > { %v17799_v52 = vpop.f32.mrb[243].mxu0  ;;  %v5404_v23 = vadd.f32 %v5403_v31, %v15233_v45 }
 0x793   : > { %v9657_v26 = vmul.f32 -1.442695, %v5402_v61 }
 0x794   : > { %v5407_v6 = vpop.f32.mrb[196].mxu1  ;;  %v9673_v42 = vmul.f32 -1.442695, %v5404_v23 }
 0x795   : > { %13232 = vpow2.f32 %v9657_v26  ;;  %v5408_v32 = vadd.f32 %v5407_v6, %v15230_v18  ;;  %v5409_v48 = vpop.f32.mrb[197].mxu1  ;;  %v17803_v11 = vpop.f32.mrb[244].mxu0 }
 0x796   : > { %v17805_v29 = vpop.f32.mrb[245].mxu0  ;;  %v5410_v6 = vadd.f32 %v5409_v48, %v15233_v45 }
 0x797   : > { %v9658_v10 = vmul.f32 -1.442695, %v5408_v32 }
 0x798   : > { %v5413_v7 = vpop.f32.mrb[198].mxu1 }
 0x799   : > { %13234 = vpow2.f32 %v9658_v10  ;;  %v5414_v46 = vadd.f32 %v5413_v7, %v15230_v18  ;;  %v5415_v22 = vpop.f32.mrb[199].mxu1  ;;  %v17808_v61 = vpop.f32.mrb[246].mxu0 }
 0x79a   : > { %20835 = vst [vmem:[#allocation96_spill] sm:$0xff] %v17808_v61  ;;  %13236 = vpow2.f32 %v9672_v1  ;;  %v17810_v31 = vpop.f32.mrb[247].mxu0  ;;  %v9674_v1 = vmul.f32 -1.442695, %v5410_v6  ;;  %v5416_v15 = vadd.f32 %v5415_v22, %v15233_v45 }
 0x79b   : > { %20836 = vst [vmem:[#allocation95_spill] sm:$0xff] %v17810_v31  ;;  %v13231_v26 = vpop.eup %13230  ;;  %13238 = vpow2.f32 %v9673_v42  ;;  %v9659_v37 = vmul.f32 -1.442695, %v5414_v46 }
 0x79c   : > { %v5699_v51 = vadd.f32 1.0, %v13231_v26  ;;  %v5419_v59 = vpop.f32.mrb[200].mxu1 }
 0x79d   : > { %13240 = vpow2.f32 %v9659_v37  ;;  %v5420_v32 = vadd.f32 %v5419_v59, %v15230_v18  ;;  %v5421_v23 = vpop.f32.mrb[201].mxu1  ;;  %v17814_v10 = vpop.f32.mrb[248].mxu0 }
 0x79e   : > { %20837 = vst [vmem:[#allocation107_spill] sm:$0xff] %v17814_v10  ;;  %13242 = vrcp.f32 %v5699_v51  ;;  %v17816_v7 = vpop.f32.mrb[249].mxu0  ;;  %v5422_v48 = vadd.f32 %v5421_v23, %v15233_v45 }
 0x79f   : > { %20838 = vst [vmem:[#allocation98_spill] sm:$0xff] %v17816_v7  ;;  %v13233_v61 = vpop.eup %13232  ;;  %v9660_v2 = vmul.f32 -1.442695, %v5420_v32  ;;  %v9675_v7 = vmul.f32 -1.442695, %v5416_v15  ;;  %v5559_v15 = vadd.f32 %v17691_v40, %v15273_v24 }
 0x7a0   : > { %v5700_v42 = vadd.f32 1.0, %v13233_v61  ;;  %v5425_v46 = vpop.f32.mrb[202].mxu1  ;;  %v9676_v32 = vmul.f32 -1.442695, %v5422_v48 }
 0x7a1   : > { %13244 = vpow2.f32 %v9660_v2  ;;  %v5426_v37 = vadd.f32 %v5425_v46, %v15230_v18  ;;  %v5427_v26 = vpop.f32.mrb[203].mxu1  ;;  %v17821_v59 = vpop.f32.mrb[250].mxu0 }
 0x7a2   : > { %20839 = vst [vmem:[#allocation94_spill] sm:$0xff] %v17821_v59  ;;  %13246 = vrcp.f32 %v5700_v42  ;;  %v17823_v10 = vpop.f32.mrb[251].mxu0  ;;  %v5428_v42 = vadd.f32 %v5427_v26, %v15233_v45 }
 0x7a3   : > { %20840 = vst [vmem:[#allocation106_spill] sm:$0xff] %v17823_v10  ;;  %v13235_v51 = vpop.eup %13234  ;;  %13248 = vpow2.f32 %v9674_v1  ;;  %v9661_v6 = vmul.f32 -1.442695, %v5426_v37 }
 0x7a4   : > { %v13237_v9 = vpop.eup %13236  ;;  %v5701_v22 = vadd.f32 1.0, %v13235_v51  ;;  %v5431_v61 = vpop.f32.mrb[204].mxu1  ;;  %v9677_v40 = vmul.f32 -1.442695, %v5428_v42 }
 0x7a5   : > { %v13239_v41 = vpop.eup %13238  ;;  %13250 = vpow2.f32 %v9661_v6  ;;  %v5432_v2 = vadd.f32 %v5431_v61, %v15230_v18  ;;  %v5433_v23 = vpop.f32.mrb[205].mxu1  ;;  %v5795_v1 = vadd.f32 1.0, %v13237_v9 }
 0x7a6   : > { %v17826_v46 = vpop.f32.mrb[252].mxu0  ;;  %13252 = vrcp.f32 %v5701_v22  ;;  %v5796_v51 = vadd.f32 1.0, %v13239_v41  ;;  %v5434_v9 = vadd.f32 %v5433_v23, %v15233_v45 }
 0x7a7   : > { %20841 = vst [vmem:[#allocation14_spill] sm:$0xff] %v17826_v46  ;;  %v17829_v59 = vpop.f32.mrb[253].mxu0  ;;  %v13241_v10 = vpop.eup %13240  ;;  %13254 = vpow2.f32 %v9675_v7  ;;  %v9662_v48 = vmul.f32 -1.442695, %v5432_v2  ;;  %v5557_v46 = vadd.f32 %v17689_v38, %v15278_v17 }
 0x7a8   : > { %20842 = vst [vmem:[#allocation109_spill] sm:$0xff] %v17829_v59  ;;  %v13243_v37 = vpop.eup %13242  ;;  %v5702_v6 = vadd.f32 1.0, %v13241_v10  ;;  %13256 = vpow2.f32 %v9676_v32  ;;  %v5437_v61 = vpop.f32.mrb[206].mxu1  ;;  %v5565_v10 = vadd.f32 %v17702_v36, %v15273_v24 }
 0x7a9   : > { %v5843_v22 = vmul.f32 %v13243_v37, %v5559_v15  ;;  %13258 = vpow2.f32 %v9662_v48  ;;  %v5438_v26 = vadd.f32 %v5437_v61, %v15230_v18  ;;  %v5439_v59 = vpop.f32.mrb[207].mxu1  ;;  %v17836_v31 = vpop.f32.mrb[254].mxu0  ;;  %v9678_v61 = vmul.f32 -1.442695, %v5434_v9 }
 0x7aa   : > { %20843 = vst [vmem:[#allocation22_spill] sm:$0xff] %v17836_v31  ;;  %13260 = vrcp.f32 %v5702_v6  ;;  %v17839_v7 = vpop.f32.mrb[255].mxu0  ;;  %v5563_v6 = vadd.f32 %v17699_v13, %v15278_v17  ;;  %v5440_v31 = vadd.f32 %v5439_v59, %v15233_v45  ;;  %v5569_v13 = vadd.f32 %v17706_v47, %v15278_v17 }
 0x7ab   : > { %20844 = vst [vmem:[#allocation108_spill] sm:$0xff] %v17839_v7  ;;  %v13245_v41 = vpop.eup %13244  ;;  %v5859_v32 = vadd.f32 %v5843_v22, %v5557_v46  ;;  %13262 = vrcp.f32 %v5795_v1  ;;  %v9663_v15 = vmul.f32 -1.442695, %v5438_v26  ;;  %v5571_v46 = vadd.f32 %v17708_v63, %v15273_v24 }
 0x7ac   : > { %v13247_v38 = vpop.eup %13246  ;;  %13264 = vrcp.f32 %v5796_v51  ;;  %v5703_v2 = vadd.f32 1.0, %v13245_v41  ;;  %v5443_v48 = vpop.f32.mrb[208].mxu1 }
 0x7ad   : > { %v13249_v37 = vpop.eup %13248  ;;  %13266 = vtanh.f32 %v5859_v32  ;;  %v5844_v42 = vmul.f32 %v13247_v38, %v5565_v10  ;;  %v5445_v23 = vpop.f32.mrb[209].mxu1  ;;  %v9679_v10 = vmul.f32 -1.442695, %v5440_v31  ;;  %v5444_v32 = vadd.f32 %v5443_v48, %v15230_v18 }
 0x7ae   : > { %13268 = vpow2.f32 %v9677_v40  ;;  %v5797_v51 = vadd.f32 1.0, %v13249_v37  ;;  %v5581_v48 = vadd.f32 %v17718_v44, %v15278_v17 }
 0x7af   : > { %v13251_v7 = vpop.eup %13250  ;;  %v5860_v36 = vadd.f32 %v5844_v42, %v5563_v6  ;;  %13270 = vrcp.f32 %v5703_v2  ;;  %v5577_v2 = vadd.f32 %v17714_v35, %v15273_v24 }
 0x7b0   : > { %v13253_v1 = vpop.eup %13252  ;;  %v5704_v22 = vadd.f32 1.0, %v13251_v7  ;;  %13272 = vpow2.f32 %v9663_v15  ;;  %v5449_v26 = vpop.f32.mrb[210].mxu1  ;;  %v5575_v7 = vadd.f32 %v17711_v14, %v15278_v17  ;;  %v5583_v14 = vadd.f32 %v17720_v62, %v15273_v24 }
 0x7b1   : > { %v13255_v41 = vpop.eup %13254  ;;  %13274 = vtanh.f32 %v5860_v36  ;;  %v5845_v40 = vmul.f32 %v13253_v1, %v5571_v46  ;;  %v17850_v9 = vpop.f32.mrb[211].mxu1  ;;  %v5450_v6 = vadd.f32 %v5449_v26, %v15230_v18  ;;  %v5587_v46 = vadd.f32 %v17723_v55, %v15278_v17 }
 0x7b2   : > { %v13257_v59 = vpop.eup %13256  ;;  %13276 = vpow2.f32 %v9678_v61  ;;  %v5798_v47 = vadd.f32 1.0, %v13255_v41  ;;  %v9664_v1 = vmul.f32 -1.442695, %v5444_v32  ;;  %v5589_v55 = vadd.f32 %v17726_v43, %v15273_v24 }
 0x7b3   : > { %v13259_v63 = vpop.eup %13258  ;;  %v5861_v38 = vadd.f32 %v5845_v40, %v5569_v13  ;;  %13278 = vrcp.f32 %v5704_v22  ;;  %v5799_v62 = vadd.f32 1.0, %v13257_v59  ;;  %v9665_v40 = vmul.f32 -1.442695, %v5450_v6 }
 0x7b4   : > { %v13261_v15 = vpop.eup %13260  ;;  %13280 = vrcp.f32 %v5797_v51  ;;  %v5705_v37 = vadd.f32 1.0, %v13259_v63  ;;  %v5455_v42 = vpop.f32.mrb[212].mxu1  ;;  %v17869_v51 = vld [vmem:[%s19859_s5] ss:$0 sm:$0xff]  ;;  %v5446_v59 = vadd.f32 %v5445_v23, %v15233_v45 }
 0x7b5   : > { %v13263_v61 = vpop.eup %13262  ;;  %13282 = vtanh.f32 %v5861_v38  ;;  %v5846_v31 = vmul.f32 %v13261_v15, %v5577_v2  ;;  %v17862_v36 = vpop.f32.mrb[213].mxu1  ;;  %v17873_v22 = vadd.f32 %v17869_v51, %v17793_v28  ;;  %v5456_v41 = vadd.f32 %v5455_v42, %v15230_v18 }
 0x7b6   : > { %v13265_v35 = vpop.eup %13264  ;;  %13284 = vpow2.f32 %v9679_v10  ;;  %v17881_v28 = vadd.f32 %v17730_v49, %v15278_v17 }
 0x7b7   : > { %v13267_v44 = vpop.eup %13266  ;;  %v5862_v26 = vadd.f32 %v5846_v31, %v5575_v7  ;;  %13286 = vrcp.f32 %v5705_v37  ;;  %v17888_v7 = vadd.f32 %v17869_v51, %v17791_v5  ;;  %v20140_v15 = vmax.f32 %v17873_v22, 0.0 }
 0x7b8   : > { %v13269_v13 = vpop.eup %13268  ;;  %13288 = vrcp.f32 %v5798_v47  ;;  %v5461_v10 = vpop.f32.mrb[214].mxu1  ;;  %v5891_v32 = vsub.f32 %v17276_v50, %v13267_v44  ;;  %v9666_v49 = vmul.f32 -1.442695, %v5456_v41 }
 0x7b9   : > { %v13271_v63 = vpop.eup %13270  ;;  %13290 = vtanh.f32 %v5862_v26  ;;  %v17884_v38 = vpop.f32.mrb[215].mxu1  ;;  %v5800_v37 = vadd.f32 1.0, %v13269_v13  ;;  %v5462_v23 = vadd.f32 %v5461_v10, %v15230_v18 }
 0x7ba   : > { %v13273_v2 = vpop.eup %13272  ;;  %v5847_v43 = vmul.f32 %v13271_v63, %v5583_v14  ;;  %13292 = vpow2.f32 %v9664_v1  ;;  %v5907_v50 = vmul.f32 %v13263_v61, %v5891_v32  ;;  %v9680_v14 = vmul.f32 -1.442695, %v5446_v59 }
 0x7bb   : > { %v13275_v47 = vpop.eup %13274  ;;  %13294 = vrcp.f32 %v5799_v62  ;;  %v5706_v6 = vadd.f32 1.0, %v13273_v2  ;;  %v5452_v1 = vadd.f32 %v17850_v9, %v15233_v45 }
 0x7bc   : > { %v13277_v42 = vpop.eup %13276  ;;  %v5863_v31 = vadd.f32 %v5847_v43, %v5581_v48  ;;  %13296 = vpow2.f32 %v9665_v40  ;;  %v5467_v26 = vpop.f32.mrb[216].mxu1  ;;  %v17892_v39 = vadd.f32 %v13267_v44, %v5907_v50  ;;  %v5892_v62 = vsub.f32 %v17300_v12, %v13275_v47 }
 0x7bd   : > { %v13279_v5 = vpop.eup %13278  ;;  %13298 = vrcp.f32 %v5706_v6  ;;  %v17896_v61 = vpop.f32.mrb[217].mxu1  ;;  %v5595_v48 = vadd.f32 %v17732_v33, %v15273_v24  ;;  %v20139_v40 = vmax.f32 %v17888_v7, 0.0  ;;  %v5801_v10 = vadd.f32 1.0, %v13277_v42 }
 0x7be   : > { %v13281_v13 = vpop.eup %13280  ;;  %13300 = vtanh.f32 %v5863_v31  ;;  %v5848_v41 = vmul.f32 %v13279_v5, %v5589_v55  ;;  %10823 = vmatprep.mubr.f32.mxu1 %v17892_v39  ;;  %6552 = vmatprep.mubr.f32.mxu0 %v17892_v39  ;;  %v5908_v9 = vmul.f32 %v13265_v35, %v5892_v62  ;;  %v17908_v12 = vadd.f32 %v17869_v51, %v17799_v52 }
 0x7bf   : > { %v13283_v44 = vpop.eup %13282  ;;  %13302 = vrcp.f32 %v5800_v37  ;;  %6553 = vmatmul.mubr.f32.vlgmr.msra.gmra.mrb[0].mxu0 %v20140_v15  ;;  %v9667_v33 = vmul.f32 -1.442695, %v5462_v23  ;;  %v9681_v43 = vmul.f32 -1.442695, %v5452_v1  ;;  %v5458_v50 = vadd.f32 %v17862_v36, %v15233_v45 }
 0x7c0   : > { %v13285_v55 = vpop.eup %13284  ;;  %v5864_v32 = vadd.f32 %v5848_v41, %v5587_v46  ;;  %13304 = vpow2.f32 %v9666_v49  ;;  %v5473_v63 = vpop.f32.mrb[218].mxu1  ;;  %v5893_v59 = vsub.f32 %v17317_v53, %v13283_v44  ;;  %12158 = vmatpush3.bf16.msra.mxu0 %v14363_v3  ;;  %v17916_v37 = vadd.f32 %v13275_v47, %v5908_v9 }
 0x7c1   : > { %v13287_v2 = vpop.eup %13286  ;;  %13306 = vpow2.f32 %v9680_v14  ;;  %v17914_v35 = vpop.f32.mrb[219].mxu1  ;;  %12160 = vmatprep.subr.bf16.mxu0 %v20284_v54  ;;  %v5468_v6 = vadd.f32 %v5467_v26, %v15230_v18  ;;  %v5599_v42 = vadd.f32 %v17735_v16, %v15278_v17  ;;  %v17926_v36 = vadd.f32 %v17869_v51, %v17796_v58 }
 0x7c2   : > { %v13289_v52 = vpop.eup %13288  ;;  %13308 = vtanh.f32 %v5864_v32  ;;  %v5849_v46 = vmul.f32 %v13287_v2, %v5595_v48  ;;  %v5909_v53 = vmul.f32 %v13281_v13, %v5893_v59  ;;  %10824 = vmatmul.mubr.f32.vlgmr.msra.gmra.mrb[224].mxu1 %v17916_v37  ;;  %6558 = vmatprep.mubr.f32.mxu0 %v17916_v37  ;;  %v20136_v47 = vmax.f32 %v17908_v12, 0.0 }
 0x7c3   : > { %v13291_v49 = vpop.eup %13290  ;;  %13310 = vrcp.f32 %v5801_v10  ;;  %v5802_v26 = vadd.f32 1.0, %v13285_v55  ;;  %11998 = vmatpush1.bf16.msra.mxu1 %v14420_v21  ;;  %6559 = vmatmul.mubr.f32.gmra.mrb[2].mxu0 %v20139_v40  ;;  %v5464_v58 = vadd.f32 %v17884_v38, %v15233_v45  ;;  %v5601_v41 = vadd.f32 %v17738_v0, %v15273_v24 }
 0x7c4   : > { %v13293_v31 = vpop.eup %13292  ;;  %v5865_v23 = vadd.f32 %v5849_v46, %v17881_v28  ;;  %13312 = vpow2.f32 %v9667_v33  ;;  %v5479_v5 = vpop.f32.mrb[220].mxu1  ;;  %v17933_v16 = vadd.f32 %v13283_v44, %v5909_v53  ;;  %12000 = vmatprep.subr.bf16.mxu1 %v14431_v25  ;;  %v5894_v28 = vsub.f32 %v17343_v56, %v13291_v49  ;;  %12162 = vmatpush3.bf16.msra.mxu0 %v20284_v54 }
 0x7c5   : > { %v13295_v14 = vpop.eup %13294  ;;  %v5707_v1 = vadd.f32 1.0, %v13293_v31  ;;  %13314 = vpow2.f32 %v9681_v43  ;;  %v17938_v62 = vpop.f32.mrb[221].mxu1  ;;  %v9682_v48 = vmul.f32 -1.442695, %v5458_v50  ;;  %v9668_v44 = vmul.f32 -1.442695, %v5468_v6  ;;  %12164 = vmatprep.subr.bf16.mxu0 %v20546_v30 }
 0x7c6   : > { %v13297_v13 = vpop.eup %13296  ;;  %13316 = vtanh.f32 %v5865_v23  ;;  %10826 = vmatprep.mubr.f32.mxu1 %v17933_v16  ;;  %6564 = vmatprep.mubr.f32.mxu0 %v17933_v16  ;;  %v5474_v9 = vadd.f32 %v5473_v63, %v15230_v18  ;;  %v5910_v55 = vmul.f32 %v13289_v52, %v5894_v28  ;;  %v20135_v33 = vmax.f32 %v17926_v36, 0.0 }
 0x7c7   : > { %v13299_v38 = vpop.eup %13298  ;;  %13318 = vrcp.f32 %v5707_v1  ;;  %v5708_v10 = vadd.f32 1.0, %v13297_v13  ;;  %12002 = vmatpush1.bf16.msra.mxu1 %v20541_v4  ;;  %6565 = vmatmul.mubr.f32.gmra.mrb[4].mxu0 %v20136_v47  ;;  %v17954_v59 = vadd.f32 %v17869_v51, %v17805_v29  ;;  %v9683_v63 = vmul.f32 -1.442695, %v5464_v58 }
 0x7c8   : > { %v13301_v56 = vpop.eup %13300  ;;  %v5850_v32 = vmul.f32 %v13299_v38, %v5601_v41  ;;  %13320 = vrcp.f32 %v5802_v26  ;;  %v5485_v0 = vpop.f32.mrb[222].mxu1  ;;  %12004 = vmatprep.subr.bf16.mxu1 %v20543_v34  ;;  %v17959_v50 = vadd.f32 %v13291_v49, %v5910_v55  ;;  %12166 = vmatpush3.bf16.msra.mxu0 %v20546_v30  ;;  %v9669_v31 = vmul.f32 -1.442695, %v5474_v9  ;;  %v20845_v9 = vld [vmem:[#allocation26_spill] sm:$0xff] }
 0x7c9   : > { %v13303_v2 = vpop.eup %13302  ;;  %13322 = vrcp.f32 %v5708_v10  ;;  %v17956_v43 = vpop.f32.mrb[223].mxu1  ;;  %v5895_v52 = vsub.f32 %v17362_v19, %v13301_v56  ;;  %12232 = vmatprep.subr.bf16.mxu0 %v20555_v8  ;;  %v5480_v19 = vadd.f32 %v5479_v5, %v15230_v18  ;;  %v20134_v26 = vmax.f32 %v17954_v59, 0.0 }
 0x7ca   : > { %v13305_v46 = vpop.eup %13304  ;;  %v5866_v6 = vadd.f32 %v5850_v32, %v5599_v42  ;;  %13324 = vpow2.f32 %v9668_v44  ;;  %10827 = vmatmul.mubr.f32.gmra.mrb[226].mxu1 %v17959_v50  ;;  %6570 = vmatprep.mubr.f32.mxu0 %v17959_v50  ;;  %v17970_v42 = vadd.f32 %v17869_v51, %v17803_v11 }
 0x7cb   : > { %v13307_v29 = vpop.eup %13306  ;;  %v5709_v53 = vadd.f32 1.0, %v13305_v46  ;;  %13326 = vpow2.f32 %v9682_v48  ;;  %v5911_v23 = vmul.f32 %v13295_v14, %v5895_v52  ;;  %12006 = vmatpush1.bf16.msra.mxu1 %v20547_v57  ;;  %6571 = vmatmul.mubr.f32.gmra.mrb[6].mxu0 %v20135_v33  ;;  %v5470_v14 = vadd.f32 %v17896_v61, %v15233_v45 }
 0x7cc   : > { %v13309_v49 = vpop.eup %13308  ;;  %13328 = vtanh.f32 %v5866_v6  ;;  %12008 = vmatprep.subr.bf16.mxu1 %v20549_v60  ;;  %v5803_v13 = vadd.f32 1.0, %v13307_v29  ;;  %v5607_v61 = vadd.f32 %v17744_v20, %v15273_v24  ;;  %v9670_v38 = vmul.f32 -1.442695, %v5480_v19  ;;  %v20848_v20 = vld [vmem:[#allocation110_spill] sm:$0xff]  ;;  %v20849_v6 = vld [vmem:[#allocation15_spill] sm:$0xff] }
 0x7cd   : > { %v13311_v1 = vpop.eup %13310  ;;  %13330 = vpow2.f32 %v9683_v63  ;;  %v17978_v58 = vadd.f32 %v13301_v56, %v5911_v23  ;;  %v5896_v5 = vsub.f32 %v17378_v27, %v13309_v49  ;;  %v20133_v10 = vmax.f32 %v17970_v42, 0.0  ;;  %v20846_v27 = vld [vmem:[#allocation95_spill] sm:$0xff] }
 0x7ce   : > { %v13313_v28 = vpop.eup %13312  ;;  %13332 = vrcp.f32 %v5709_v53  ;;  %v17991_v55 = vadd.f32 %v17869_v51, %v20846_v27  ;;  %v9684_v32 = vmul.f32 -1.442695, %v5470_v14  ;;  %v5605_v29 = vadd.f32 %v20849_v6, %v15278_v17 }
 0x7cf   : > { %v13315_v11 = vpop.eup %13314  ;;  %v5710_v41 = vadd.f32 1.0, %v13313_v28  ;;  %13334 = vpow2.f32 %v9669_v31  ;;  %10829 = vmatprep.mubr.f32.mxu1 %v17978_v58  ;;  %6576 = vmatprep.mubr.f32.mxu0 %v17978_v58  ;;  %v5912_v48 = vmul.f32 %v13303_v2, %v5896_v5  ;;  %v20847_v2 = vld [vmem:[#allocation27_spill] sm:$0xff]  ;;  %v20850_v31 = vld [vmem:[#allocation102_spill] sm:$0xff]  ;;  %v5486_v19 = vadd.f32 %v5485_v0, %v15230_v18 }
 0x7d0   : > { %v13317_v44 = vpop.eup %13316  ;;  %12010 = vmatpush1.bf16.msra.mxu1 %v20845_v9  ;;  %6577 = vmatmul.mubr.f32.gmra.mrb[8].mxu0 %v20134_v26  ;;  %v5613_v23 = vadd.f32 %v20850_v31, %v15273_v24  ;;  %v20851_v28 = vld [vmem:[#allocation86_spill] sm:$0xff]  ;;  %v20137_v0 = vmax.f32 %v17991_v55, 0.0 }
 0x7d1   : > { %v13319_v56 = vpop.eup %13318  ;;  %13336 = vrcp.f32 %v5710_v41  ;;  %12012 = vmatprep.subr.bf16.mxu1 %v20847_v2  ;;  %v17994_v63 = vadd.f32 %v13309_v49, %v5912_v48  ;;  %v5897_v52 = vsub.f32 %v20848_v20, %v13317_v44  ;;  %v5611_v14 = vadd.f32 %v20851_v28, %v15278_v17 }
 0x7d2   : > { %v13321_v46 = vpop.eup %13320  ;;  %v5851_v53 = vmul.f32 %v13319_v56, %v5607_v61  ;;  %13338 = vrcp.f32 %v5803_v13  ;;  %v5476_v49 = vadd.f32 %v17914_v35, %v15233_v45  ;;  %v20852_v56 = vld [vmem:[#allocation30_spill] sm:$0xff]  ;;  %v5804_v20 = vadd.f32 1.0, %v13315_v11  ;;  %v20853_v35 = vld [vmem:[#allocation31_spill] sm:$0xff] }
 0x7d3   : > { %v13323_v5 = vpop.eup %13322  ;;  %10830 = vmatmul.mubr.f32.gmra.mrb[228].mxu1 %v17994_v63  ;;  %6582 = vmatprep.mubr.f32.mxu0 %v17994_v63  ;;  %v5913_v41 = vmul.f32 %v13311_v1, %v5897_v52  ;;  %13340 = vpow2.f32 %v9670_v38  ;;  %v20855_v38 = vld [vmem:[#allocation96_spill] sm:$0xff] }
 0x7d4   : > { %v13325_v48 = vpop.eup %13324  ;;  %v5867_v61 = vadd.f32 %v5851_v53, %v5605_v29  ;;  %v5852_v27 = vmul.f32 %v13323_v5, %v5613_v23  ;;  %12014 = vmatpush1.bf16.msra.mxu1 %v20852_v56  ;;  %6583 = vmatmul.mubr.f32.gmra.mrb[10].mxu0 %v20133_v10  ;;  %13342 = vpow2.f32 %v9684_v32  ;;  %v9671_v29 = vmul.f32 -1.442695, %v5486_v19  ;;  %v20856_v5 = vld [vmem:[#allocation112_spill] sm:$0xff] }
 0x7d5   : > { %v13327_v13 = vpop.eup %13326  ;;  %v5711_v6 = vadd.f32 1.0, %v13325_v48  ;;  %12016 = vmatprep.subr.bf16.mxu1 %v20853_v35  ;;  %v18013_v31 = vadd.f32 %v13317_v44, %v5913_v41  ;;  %v18017_v53 = vadd.f32 %v17869_v51, %v20855_v38  ;;  %v5619_v28 = vadd.f32 %v20856_v5, %v15273_v24  ;;  %v20857_v44 = vld [vmem:[#allocation92_spill] sm:$0xff]  ;;  %v20859_v48 = vld [vmem:[#allocation90_spill] sm:$0xff]  ;;  %v20861_v5 = vld [vmem:[#allocation35_spill] sm:$0xff] }
 0x7d6   : > { %v13329_v1 = vpop.eup %13328  ;;  %13344 = vtanh.f32 %v5867_v61  ;;  %v5868_v52 = vadd.f32 %v5852_v27, %v5611_v14  ;;  %v9685_v11 = vmul.f32 -1.442695, %v5476_v49  ;;  %v20858_v14 = vld [vmem:[#allocation12_spill] sm:$0xff]  ;;  %v5625_v61 = vadd.f32 %v20859_v48, %v15273_v24  ;;  %v20860_v27 = vld [vmem:[#allocation34_spill] sm:$0xff] }
 0x7d7   : > { %20854 = vst [vmem:[#allocation93_spill] sm:$0xff] %v18013_v31  ;;  %v13331_v23 = vpop.eup %13330  ;;  %13346 = vrcp.f32 %v5711_v6  ;;  %10832 = vmatprep.mubr.f32.mxu1 %v18013_v31  ;;  %6588 = vmatprep.mubr.f32.mxu0 %v18013_v31  ;;  %v5898_v32 = vsub.f32 %v20857_v44, %v13329_v1  ;;  %v5617_v19 = vadd.f32 %v20858_v14, %v15278_v17  ;;  %v5805_v10 = vadd.f32 1.0, %v13327_v13 }
 0x7d8   : > { %v13333_v41 = vpop.eup %13332  ;;  %13348 = vtanh.f32 %v5868_v52  ;;  %12018 = vmatpush1.bf16.msra.mxu1 %v20860_v27  ;;  %6589 = vmatmul.mubr.f32.gmra.mrb[12].mxu0 %v20137_v0  ;;  %v5482_v38 = vadd.f32 %v17938_v62, %v15233_v45  ;;  %v20138_v52 = vmax.f32 %v18017_v53, 0.0  ;;  %v5806_v33 = vadd.f32 1.0, %v13331_v23  ;;  %v20864_v62 = vld [vmem:[#allocation38_spill] sm:$0xff]  ;;  %v20865_v23 = vld [vmem:[#allocation39_spill] sm:$0xff] }
 0x7d9   : > { %v13335_v49 = vpop.eup %13334  ;;  %13350 = vrcp.f32 %v5804_v20  ;;  %v5853_v6 = vmul.f32 %v13333_v41, %v5619_v28  ;;  %12020 = vmatprep.subr.bf16.mxu1 %v20861_v5  ;;  %v5914_v44 = vmul.f32 %v13321_v46, %v5898_v32  ;;  %v20863_v20 = vld [vmem:[#allocation100_spill] sm:$0xff]  ;;  %v5488_v13 = vadd.f32 %v17956_v43, %v15233_v45  ;;  %v20867_v43 = vld [vmem:[#allocation98_spill] sm:$0xff] }
 0x7da   : > { %v5712_v14 = vadd.f32 1.0, %v13335_v49  ;;  %13352 = vpow2.f32 %v9671_v29  ;;  %v5623_v28 = vadd.f32 %v20863_v20, %v15278_v17  ;;  %v9686_v46 = vmul.f32 -1.442695, %v5482_v38  ;;  %v20871_v20 = vld [vmem:[#allocation89_spill] sm:$0xff] }
 0x7db   : > { %v13337_v48 = vpop.eup %13336  ;;  %v5869_v26 = vadd.f32 %v5853_v6, %v5617_v19  ;;  %13354 = vpow2.f32 %v9685_v11  ;;  %v18035_v47 = vadd.f32 %v13329_v1, %v5914_v44  ;;  %v20866_v19 = vld [vmem:[#allocation91_spill] sm:$0xff]  ;;  %v18051_v49 = vadd.f32 %v17869_v51, %v20867_v43  ;;  %v20868_v6 = vld [vmem:[#allocation42_spill] sm:$0xff] }
 0x7dc   : > { %v5854_v41 = vmul.f32 %v13337_v48, %v5625_v61  ;;  %13356 = vrcp.f32 %v5712_v14  ;;  %12022 = vmatpush1.bf16.msra.mxu1 %v20864_v62  ;;  %v13339_v0 = vpop.eup %13338  ;;  %v5631_v61 = vadd.f32 %v20866_v19, %v15273_v24  ;;  %v9687_v38 = vmul.f32 -1.442695, %v5488_v13  ;;  %v20869_v44 = vld [vmem:[#allocation111_spill] sm:$0xff]  ;;  %v20901_v62 = vld [vmem:[#allocation62_spill] sm:$0xff] }
 0x7dd   : > { %20862 = vst [vmem:[#allocation26_spill] sm:$0xff] %v18035_v47  ;;  %13358 = vtanh.f32 %v5869_v26  ;;  %10833 = vmatmul.mubr.f32.gmra.mrb[230].mxu1 %v18035_v47  ;;  %6594 = vmatprep.mubr.f32.mxu0 %v18035_v47  ;;  %v13341_v29 = vpop.eup %13340  ;;  %v20870_v48 = vld [vmem:[#allocation43_spill] sm:$0xff] }
 0x7de   : > { %13360 = vrcp.f32 %v5805_v10  ;;  %v5870_v1 = vadd.f32 %v5854_v41, %v5623_v28  ;;  %12024 = vmatprep.subr.bf16.mxu1 %v20865_v23  ;;  %6595 = vmatmul.mubr.f32.gmra.mrb[14].mxu0 %v20138_v52  ;;  %v13343_v11 = vpop.eup %13342  ;;  %v5713_v32 = vadd.f32 1.0, %v13341_v29  ;;  %v5629_v28 = vadd.f32 %v20871_v20, %v15278_v17  ;;  %v20873_v52 = vld [vmem:[#allocation23_spill] sm:$0xff]  ;;  %v20875_v23 = vld [vmem:[#allocation46_spill] sm:$0xff] }
 0x7df   : > { %13362 = vrcp.f32 %v5806_v33  ;;  %v5807_v13 = vadd.f32 1.0, %v13343_v11  ;;  %v20878_v11 = vld [vmem:[#allocation78_spill] sm:$0xff] }
 0x7e0   : > { %v13345_v26 = vpop.eup %13344  ;;  %13364 = vtanh.f32 %v5870_v1  ;;  %12026 = vmatpush1.bf16.msra.mxu1 %v20868_v6  ;;  %v20872_v1 = vld [vmem:[#allocation105_spill] sm:$0xff]  ;;  %v20874_v6 = vld [vmem:[#allocation107_spill] sm:$0xff] }
 0x7e1   : > { %v13347_v10 = vpop.eup %13346  ;;  %13366 = vpow2.f32 %v9686_v46  ;;  %v5899_v14 = vsub.f32 %v20869_v44, %v13345_v26  ;;  %12028 = vmatprep.subr.bf16.mxu1 %v20870_v48  ;;  %v5637_v19 = vadd.f32 %v20872_v1, %v15273_v24  ;;  %v18063_v44 = vadd.f32 %v17869_v51, %v20874_v6 }
 0x7e2   : > { %v13349_v33 = vpop.eup %13348  ;;  %v5855_v41 = vmul.f32 %v13347_v10, %v5631_v61  ;;  %13368 = vrcp.f32 %v5713_v32  ;;  %v20141_v48 = vmax.f32 %v18051_v49, 0.0 }
 0x7e3   : > { %v13351_v29 = vpop.eup %13350  ;;  %v5915_v43 = vmul.f32 %v13339_v0, %v5899_v14  ;;  %v5900_v40 = vsub.f32 %v20873_v52, %v13349_v33  ;;  %13370 = vpow2.f32 %v9687_v38  ;;  %v20877_v0 = vld [vmem:[#allocation47_spill] sm:$0xff] }
 0x7e4   : > { %v13353_v15 = vpop.eup %13352  ;;  %v5871_v46 = vadd.f32 %v5855_v41, %v5629_v28  ;;  %12030 = vmatpush1.bf16.msra.mxu1 %v20875_v23  ;;  %v5635_v28 = vadd.f32 %v20878_v11, %v15278_v17  ;;  %v20884_v11 = vld [vmem:[#allocation103_spill] sm:$0xff] }
 0x7e5   : > { %v13355_v61 = vpop.eup %13354  ;;  %v5714_v32 = vadd.f32 1.0, %v13353_v15  ;;  %v18067_v10 = vadd.f32 %v13345_v26, %v5915_v43  ;;  %v5916_v20 = vmul.f32 %v13351_v29, %v5900_v40  ;;  %12032 = vmatprep.subr.bf16.mxu1 %v20877_v0  ;;  %v20880_v26 = vld [vmem:[#allocation106_spill] sm:$0xff]  ;;  %v20881_v29 = vld [vmem:[#allocation85_spill] sm:$0xff]  ;;  %v20891_v0 = vld [vmem:[#allocation55_spill] sm:$0xff] }
 0x7e6   : > { %v13357_v52 = vpop.eup %13356  ;;  %13372 = vtanh.f32 %v5871_v46  ;;  %v18081_v38 = vadd.f32 %v17869_v51, %v20880_v26  ;;  %v5643_v26 = vadd.f32 %v20884_v11, %v15273_v24 }
 0x7e7   : > { %20876 = vst [vmem:[#allocation95_spill] sm:$0xff] %v18067_v10  ;;  %v13359_v14 = vpop.eup %13358  ;;  %v5856_v6 = vmul.f32 %v13357_v52, %v5637_v19  ;;  %13374 = vrcp.f32 %v5714_v32  ;;  %10835 = vmatprep.mubr.f32.mxu1 %v18067_v10  ;;  %6600 = vmatprep.mubr.f32.mxu0 %v18067_v10  ;;  %v18074_v41 = vadd.f32 %v13349_v33, %v5916_v20  ;;  %v20882_v19 = vld [vmem:[#allocation50_spill] sm:$0xff]  ;;  %v5808_v32 = vadd.f32 1.0, %v13355_v61  ;;  %v20883_v20 = vld [vmem:[#allocation51_spill] sm:$0xff] }
 0x7e8   : > { %v13361_v15 = vpop.eup %13360  ;;  %13376 = vrcp.f32 %v5807_v13  ;;  %6601 = vmatmul.mubr.f32.gmra.mrb[16].mxu0 %v20141_v48  ;;  %v5901_v1 = vsub.f32 %v20881_v29, %v13359_v14  ;;  %12034 = vmatpush1.bf16.msra.mxu1 %v20882_v19  ;;  %v20885_v48 = vld [vmem:[#allocation101_spill] sm:$0xff]  ;;  %v20886_v19 = vld [vmem:[#allocation94_spill] sm:$0xff] }
 0x7e9   : > { %20879 = vst [vmem:[#allocation110_spill] sm:$0xff] %v18074_v41  ;;  %v13363_v43 = vpop.eup %13362  ;;  %v5872_v46 = vadd.f32 %v5856_v6, %v5635_v28  ;;  %10836 = vmatmul.mubr.f32.gmra.mrb[232].mxu1 %v18074_v41  ;;  %6606 = vmatprep.mubr.f32.mxu0 %v18074_v41  ;;  %v18093_v28 = vadd.f32 %v17869_v51, %v20886_v19  ;;  %v20887_v6 = vmax.f32 %v18063_v44, 0.0 }
 0x7ea   : > { %v13365_v33 = vpop.eup %13364  ;;  %v5917_v13 = vmul.f32 %v13361_v15, %v5901_v1  ;;  %12036 = vmatprep.subr.bf16.mxu1 %v20883_v20  ;;  %v20889_v1 = vld [vmem:[#allocation54_spill] sm:$0xff]  ;;  %v20890_v20 = vld [vmem:[#allocation19_spill] sm:$0xff] }
 0x7eb   : > { %v13367_v52 = vpop.eup %13366  ;;  %13378 = vtanh.f32 %v5872_v46  ;;  %v5902_v29 = vsub.f32 %v20885_v48, %v13365_v33  ;;  %v5641_v11 = vadd.f32 %v20890_v20, %v15278_v17 }
 0x7ec   : > { %v13369_v40 = vpop.eup %13368  ;;  %6607 = vmatmul.mubr.f32.gmra.mrb[18].mxu0 %v20887_v6  ;;  %v18098_v15 = vadd.f32 %v13359_v14, %v5917_v13  ;;  %12038 = vmatpush1.bf16.msra.mxu1 %v20889_v1  ;;  %13380 = vrcp.f32 %v5808_v32  ;;  %v5809_v23 = vadd.f32 1.0, %v13367_v52  ;;  %v20893_v13 = vld [vmem:[#allocation87_spill] sm:$0xff] }
 0x7ed   : > { %v5857_v46 = vmul.f32 %v13369_v40, %v5643_v26  ;;  %v5918_v48 = vmul.f32 %v13363_v43, %v5902_v29  ;;  %12040 = vmatprep.subr.bf16.mxu1 %v20891_v0  ;;  %v13371_v19 = vpop.eup %13370  ;;  %v5649_v1 = vadd.f32 %v20893_v13, %v15273_v24  ;;  %v20894_v40 = vmax.f32 %v18081_v38, 0.0  ;;  %v20895_v43 = vld [vmem:[#allocation109_spill] sm:$0xff]  ;;  %v20896_v26 = vld [vmem:[#allocation58_spill] sm:$0xff] }
 0x7ee   : > { %20888 = vst [vmem:[#allocation15_spill] sm:$0xff] %v18098_v15  ;;  %10838 = vmatprep.mubr.f32.mxu1 %v18098_v15  ;;  %6612 = vmatprep.mubr.f32.mxu0 %v18098_v15  ;;  %v18115_v32 = vadd.f32 %v17869_v51, %v20895_v43  ;;  %v5810_v0 = vadd.f32 1.0, %v13371_v19 }
 0x7ef   : > { %v5873_v61 = vadd.f32 %v5857_v46, %v5641_v11  ;;  %v18106_v6 = vadd.f32 %v13365_v33, %v5918_v48  ;;  %v20897_v33 = vld [vmem:[#allocation104_spill] sm:$0xff]  ;;  %v20898_v46 = vld [vmem:[#allocation97_spill] sm:$0xff] }
 0x7f0   : > { %v13373_v14 = vpop.eup %13372  ;;  %6613 = vmatmul.mubr.f32.gmra.mrb[20].mxu0 %v20894_v40  ;;  %12042 = vmatpush1.bf16.msra.mxu1 %v20896_v26  ;;  %v5647_v48 = vadd.f32 %v20898_v46, %v15278_v17  ;;  %v20899_v40 = vld [vmem:[#allocation59_spill] sm:$0xff]  ;;  %v20142_v26 = vmax.f32 %v18115_v32, 0.0 }
 0x7f1   : > { %20892 = vst [vmem:[#allocation102_spill] sm:$0xff] %v18106_v6  ;;  %v13375_v29 = vpop.eup %13374  ;;  %13382 = vtanh.f32 %v5873_v61  ;;  %10839 = vmatmul.mubr.f32.gmra.mrb[234].mxu1 %v18106_v6  ;;  %6618 = vmatprep.mubr.f32.mxu0 %v18106_v6  ;;  %v5903_v52 = vsub.f32 %v20897_v33, %v13373_v14  ;;  %v20900_v61 = vmax.f32 %v18093_v28, 0.0  ;;  %v20902_v33 = vld [vmem:[#allocation14_spill] sm:$0xff] }
 0x7f2   : > { %v13377_v11 = vpop.eup %13376  ;;  %v5858_v13 = vmul.f32 %v13375_v29, %v5649_v1  ;;  %12044 = vmatprep.subr.bf16.mxu1 %v20899_v40  ;;  %13384 = vrcp.f32 %v5809_v23  ;;  %v18130_v27 = vadd.f32 %v17869_v51, %v20902_v33  ;;  %v20904_v1 = vld [vmem:[#allocation63_spill] sm:$0xff] }
 0x7f3   : > { %v5919_v43 = vmul.f32 %v13377_v11, %v5903_v52  ;;  %v20905_v23 = vld [vmem:[#allocation99_spill] sm:$0xff]  ;;  %v20906_v11 = vld [vmem:[#allocation66_spill] sm:$0xff] }
 0x7f4   : > { %v5874_v20 = vadd.f32 %v5858_v13, %v5647_v48  ;;  %6619 = vmatmul.mubr.f32.gmra.mrb[22].mxu0 %v20900_v61  ;;  %12046 = vmatpush1.bf16.msra.mxu1 %v20901_v62  ;;  %v20907_v48 = vld [vmem:[#allocation67_spill] sm:$0xff]  ;;  %v20916_v62 = vld [vmem:[#allocation74_spill] sm:$0xff] }
 0x7f5   : > { %v13379_v5 = vpop.eup %13378  ;;  %v18132_v46 = vadd.f32 %v13373_v14, %v5919_v43  ;;  %12048 = vmatprep.subr.bf16.mxu1 %v20904_v1  ;;  %v20143_v14 = vmax.f32 %v18130_v27, 0.0  ;;  %v20909_v43 = vld [vmem:[#allocation108_spill] sm:$0xff] }
 0x7f6   : > { %13386 = vtanh.f32 %v5874_v20  ;;  %v5904_v29 = vsub.f32 %v20905_v23, %v13379_v5  ;;  %v13381_v19 = vpop.eup %13380  ;;  %v18147_v61 = vadd.f32 %v17869_v51, %v20909_v43 }
 0x7f7   : > { %20903 = vst [vmem:[#allocation86_spill] sm:$0xff] %v18132_v46  ;;  %10841 = vmatprep.mubr.f32.mxu1 %v18132_v46  ;;  %6624 = vmatprep.mubr.f32.mxu0 %v18132_v46  ;;  %13388 = vrcp.f32 %v5810_v0  ;;  %v20910_v0 = vld [vmem:[#allocation18_spill] sm:$0xff] }
 0x7f8   : > { %6625 = vmatmul.mubr.f32.gmra.mrb[24].mxu0 %v20142_v26  ;;  %v5920_v52 = vmul.f32 %v13381_v19, %v5904_v29  ;;  %12050 = vmatpush1.bf16.msra.mxu1 %v20906_v11  ;;  %v20911_v29 = vld [vmem:[#allocation70_spill] sm:$0xff] }
 0x7f9   : > { %12052 = vmatprep.subr.bf16.mxu1 %v20907_v48  ;;  %v20913_v26 = vld [vmem:[#allocation22_spill] sm:$0xff] }
 0x7fa   : > { %v18143_v13 = vadd.f32 %v13379_v5, %v5920_v52  ;;  %v20912_v5 = vld [vmem:[#allocation72_spill] sm:$0xff]  ;;  %v20145_v52 = vmax.f32 %v18147_v61, 0.0  ;;  %v18159_v48 = vadd.f32 %v17869_v51, %v20913_v26 }
 0x7fb   : > { %v13383_v20 = vpop.eup %13382 }
 0x7fc   : > { %20908 = vst [vmem:[#allocation96_spill] sm:$0xff] %v18143_v13  ;;  %10842 = vmatmul.mubr.f32.gmra.mrb[236].mxu1 %v18143_v13  ;;  %6630 = vmatprep.mubr.f32.mxu0 %v18143_v13  ;;  %v5905_v33 = vsub.f32 %v20910_v0, %v13383_v20  ;;  %v13385_v23 = vpop.eup %13384  ;;  %v20915_v0 = vld [vmem:[#allocation88_spill] sm:$0xff]  ;;  %v20144_v51 = vmax.f32 %v18159_v48, 0.0 }
 0x7fd   : > { %6631 = vmatmul.mubr.f32.gmra.mrb[26].mxu0 %v20143_v14  ;;  %12054 = vmatpush1.bf16.msra.mxu1 %v20911_v29 }
 0x7fe   : > { %v5921_v19 = vmul.f32 %v13385_v23, %v5905_v33  ;;  %12056 = vmatprep.subr.bf16.mxu1 %v20912_v5  ;;  %v20917_v23 = vld [vmem:[#allocation76_spill] sm:$0xff] }
 0x800   : > { %v13387_v43 = vpop.eup %13386  ;;  %v18161_v11 = vadd.f32 %v13383_v20, %v5921_v19  ;;  %v9784_v20 = vld [vmem:[%s14386_s12 + $0x300] sm:$0xff]  ;;  %v20919_v19 = vmax.f32 %v17873_v22, 0.0  ;;  %v20923_v22 = vld [vmem:[#allocation17_spill] sm:$0xff] }
 0x801   : > { %v5906_v1 = vsub.f32 %v20915_v0, %v13387_v43  ;;  %12058 = vmatpush1.bf16.msra.mxu1 %v20916_v62  ;;  %v13389_v14 = vpop.eup %13388  ;;  %v9788_v0 = vld [vmem:[%s14386_s12 + $0x320] sm:$0xff] }
 0x802   : > { %20914 = vst [vmem:[#allocation112_spill] sm:$0xff] %v18161_v11  ;;  %10844 = vmatprep.mubr.f32.mxu1 %v18161_v11  ;;  %6636 = vmatprep.mubr.f32.mxu0 %v18161_v11 }
 0x803   : > { %6637 = vmatmul.mubr.f32.gmra.mrb[28].mxu0 %v20145_v52  ;;  %v5922_v33 = vmul.f32 %v13389_v14, %v5906_v1  ;;  %12124 = vmatprep.subr.bf16.mxu1 %v20917_v23  ;;  %v9785_v1 = vld [vmem:[%s14386_s12 + $0x308] sm:$0xff]  ;;  %v9786_v14 = vld [vmem:[%s14386_s12 + $0x310] sm:$0xff]  ;;  %v20925_v52 = vld [vmem:[#allocation79_spill] sm:$0xff] }
 0x805   : > { %v18171_v26 = vadd.f32 %v13387_v43, %v5922_v33  ;;  %v9787_v43 = vld [vmem:[%s14386_s12 + $0x318] sm:$0xff]  ;;  %v20920_v33 = vld [vmem:[#allocation16_spill] sm:$0xff] }
 0x807   : > { %20918 = vst [vmem:[#allocation92_spill] sm:$0xff] %v18171_v26  ;;  %10845 = vmatmul.mubr.f32.gmra.mrb[238].mxu1 %v18171_v26  ;;  %6642 = vmatprep.mubr.f32.mxu0 %v18171_v26 }
 0x808   : > { %6391 = vmatprep.mubr.f32.mxu1 %v17892_v39  ;;  %6643 = vmatmul.mubr.f32.gmra.mrb[30].mxu0 %v20144_v51  ;;  %v20922_v51 = vmax.f32 %v17888_v7, 0.0  ;;  %v20926_v7 = vmax.f32 %v17908_v12, 0.0  ;;  %v20930_v12 = vmax.f32 %v17926_v36, 0.0  ;;  %v20934_v36 = vmax.f32 %v17954_v59, 0.0 }
 0x809   : > { %10951 = vmatprep.mubr.msk.f32.mxu0 %vm1103_vm0, %v9784_v20  ;;  %v20921_v20 = vld [vmem:[#allocation77_spill] sm:$0xff]  ;;  %v20938_v59 = vmax.f32 %v17970_v42, 0.0  ;;  %v20942_v42 = vmax.f32 %v17991_v55, 0.0 }
 0x80a   : > { %v20947_v55 = vld [vmem:[#allocation41_spill] sm:$0xff] }
 0x80b   : > { %6392 = vmatmul.mubr.f32.vlgmr.msra.gmra.mrb[240].mxu1 %v20919_v19  ;;  %v20924_v19 = vld [vmem:[#allocation20_spill] sm:$0xff] }
 0x80c   : > { %6397 = vmatprep.mubr.f32.mxu1 %v17916_v37  ;;  %10952 = vmatmul.mubr.msk.f32.vlgmr.msra.gmra.mrb[32].mxu0 %vm1103_vm0, %v9785_v1  ;;  %v9789_v1 = vld [vmem:[%s14386_s12 + $0x328] sm:$0xff] }
 0x80d   : > { %10954 = vmatprep.mubr.msk.f32.mxu0 %vm1103_vm0, %v9786_v14  ;;  %12126 = vmatpush3.bf16.msra.mxu1 %v20917_v23  ;;  %v9790_v14 = vld [vmem:[%s14386_s12 + $0x330] sm:$0xff] }
 0x80e   : > { %12234 = vmatpush1.bf16.msra.mxu0 %v20920_v33  ;;  %12128 = vmatprep.subr.bf16.mxu1 %v20921_v20 }
 0x80f   : > { %6398 = vmatmul.mubr.f32.gmra.mrb[242].mxu1 %v20922_v51  ;;  %12236 = vmatprep.subr.bf16.mxu0 %v20923_v22  ;;  %v20927_v51 = vld [vmem:[#allocation21_spill] sm:$0xff]  ;;  %v20929_v22 = vld [vmem:[#allocation80_spill] sm:$0xff] }
 0x810   : > { %6403 = vmatprep.mubr.f32.mxu1 %v17933_v16  ;;  %10955 = vmatmul.mubr.msk.f32.gmra.mrb[34].mxu0 %vm1103_vm0, %v9787_v43  ;;  %v9791_v43 = vld [vmem:[%s14386_s12 + $0x338] sm:$0xff] }
 0x811   : > { %10957 = vmatprep.mubr.msk.f32.mxu0 %vm1103_vm0, %v9788_v0  ;;  %12130 = vmatpush3.bf16.msra.mxu1 %v20921_v20  ;;  %v9792_v0 = vld [vmem:[%s14386_s12 + $0x340] sm:$0xff] }
 0x812   : > { %12238 = vmatpush1.bf16.msra.mxu0 %v20924_v19  ;;  %12132 = vmatprep.subr.bf16.mxu1 %v20925_v52  ;;  %v20928_v19 = vld [vmem:[#allocation24_spill] sm:$0xff] }
 0x813   : > { %6404 = vmatmul.mubr.f32.gmra.mrb[244].mxu1 %v20926_v7  ;;  %12240 = vmatprep.subr.bf16.mxu0 %v20927_v51  ;;  %v20931_v7 = vld [vmem:[#allocation25_spill] sm:$0xff] }
 0x814   : > { %6409 = vmatprep.mubr.f32.mxu1 %v17959_v50  ;;  %10958 = vmatmul.mubr.msk.f32.gmra.mrb[36].mxu0 %vm1103_vm0, %v9789_v1  ;;  %v9793_v1 = vld [vmem:[%s14386_s12 + $0x348] sm:$0xff] }
 0x815   : > { %10960 = vmatprep.mubr.msk.f32.mxu0 %vm1103_vm0, %v9790_v14  ;;  %12134 = vmatpush3.bf16.msra.mxu1 %v20925_v52  ;;  %v9794_v14 = vld [vmem:[%s14386_s12 + $0x350] sm:$0xff]  ;;  %v20933_v51 = vld [vmem:[#allocation81_spill] sm:$0xff] }
 0x816   : > { %12242 = vmatpush1.bf16.msra.mxu0 %v20928_v19  ;;  %12136 = vmatprep.subr.bf16.mxu1 %v20929_v22  ;;  %v20932_v19 = vld [vmem:[#allocation28_spill] sm:$0xff] }
 0x817   : > { %6410 = vmatmul.mubr.f32.gmra.mrb[246].mxu1 %v20930_v12  ;;  %12244 = vmatprep.subr.bf16.mxu0 %v20931_v7  ;;  %v20935_v12 = vld [vmem:[#allocation29_spill] sm:$0xff]  ;;  %v20937_v7 = vld [vmem:[#allocation82_spill] sm:$0xff] }
 0x818   : > { %6415 = vmatprep.mubr.f32.mxu1 %v17978_v58  ;;  %10961 = vmatmul.mubr.msk.f32.gmra.mrb[38].mxu0 %vm1103_vm0, %v9791_v43  ;;  %v9795_v43 = vld [vmem:[%s14386_s12 + $0x358] sm:$0xff] }
 0x819   : > { %10963 = vmatprep.mubr.msk.f32.mxu0 %vm1103_vm0, %v9792_v0  ;;  %12138 = vmatpush3.bf16.msra.mxu1 %v20929_v22  ;;  %v9796_v0 = vld [vmem:[%s14386_s12 + $0x360] sm:$0xff] }
 0x81a   : > { %12246 = vmatpush1.bf16.msra.mxu0 %v20932_v19  ;;  %12140 = vmatprep.subr.bf16.mxu1 %v20933_v51  ;;  %v20936_v19 = vld [vmem:[#allocation32_spill] sm:$0xff] }
 0x81b   : > { %6416 = vmatmul.mubr.f32.gmra.mrb[248].mxu1 %v20934_v36  ;;  %12248 = vmatprep.subr.bf16.mxu0 %v20935_v12  ;;  %v20939_v36 = vld [vmem:[#allocation33_spill] sm:$0xff]  ;;  %v20940_v12 = vld [vmem:[#allocation36_spill] sm:$0xff] }
 0x81c   : > { %6421 = vmatprep.mubr.f32.mxu1 %v17994_v63  ;;  %10964 = vmatmul.mubr.msk.f32.gmra.mrb[40].mxu0 %vm1103_vm0, %v9793_v1  ;;  %v9797_v1 = vld [vmem:[%s14386_s12 + $0x368] sm:$0xff] }
 0x81d   : > { %10966 = vmatprep.mubr.msk.f32.mxu0 %vm1103_vm0, %v9794_v14  ;;  %12142 = vmatpush3.bf16.msra.mxu1 %v20933_v51  ;;  %v9798_v14 = vld [vmem:[%s14386_s12 + $0x370] sm:$0xff] }
 0x81e   : > { %12250 = vmatpush1.bf16.msra.mxu0 %v20936_v19  ;;  %12144 = vmatprep.subr.bf16.mxu1 %v20937_v7  ;;  %v20941_v19 = vld [vmem:[#allocation83_spill] sm:$0xff] }
 0x81f   : > { %6422 = vmatmul.mubr.f32.gmra.mrb[250].mxu1 %v20938_v59  ;;  %12252 = vmatprep.subr.bf16.mxu0 %v20939_v36  ;;  %v20943_v59 = vld [vmem:[#allocation37_spill] sm:$0xff]  ;;  %v20945_v36 = vld [vmem:[#allocation84_spill] sm:$0xff] }
 0x820   : > { %6427 = vmatprep.mubr.f32.mxu1 %v18013_v31  ;;  %10967 = vmatmul.mubr.msk.f32.gmra.mrb[42].mxu0 %vm1103_vm0, %v9795_v43  ;;  %v9799_v43 = vld [vmem:[%s14386_s12 + $0x378] sm:$0xff] }
 0x821   : > { %10969 = vmatprep.mubr.msk.f32.mxu0 %vm1103_vm0, %v9796_v0  ;;  %12146 = vmatpush3.bf16.msra.mxu1 %v20937_v7  ;;  %v20944_v0 = vld [vmem:[#allocation40_spill] sm:$0xff] }
 0x822   : > { %12254 = vmatpush1.bf16.msra.mxu0 %v20940_v12  ;;  %12148 = vmatprep.subr.bf16.mxu1 %v20941_v19  ;;  %v20946_v12 = vmax.f32 %v18017_v53, 0.0  ;;  %v20952_v53 = vld [vmem:[#allocation48_spill] sm:$0xff] }
 0x823   : > { %6428 = vmatmul.mubr.f32.gmra.mrb[252].mxu1 %v20942_v42  ;;  %12256 = vmatprep.subr.bf16.mxu0 %v20943_v59  ;;  %v20950_v42 = vmax.f32 %v18051_v49, 0.0  ;;  %v20957_v49 = vld [vmem:[#allocation53_spill] sm:$0xff] }
 0x824   : > { %6433 = vmatprep.mubr.f32.mxu1 %v18035_v47  ;;  %10970 = vmatmul.mubr.msk.f32.gmra.mrb[44].mxu0 %vm1103_vm0, %v9797_v1  ;;  %v20948_v1 = vld [vmem:[#allocation44_spill] sm:$0xff] }
 0x825   : > { %10972 = vmatprep.mubr.msk.f32.mxu0 %vm1103_vm0, %v9798_v14  ;;  %12150 = vmatpush3.bf16.msra.mxu1 %v20941_v19  ;;  %v20949_v14 = vld [vmem:[#allocation13_spill] sm:$0xff] }
 0x826   : > { %12258 = vmatpush1.bf16.msra.mxu0 %v20944_v0  ;;  %12152 = vmatprep.subr.bf16.mxu1 %v20945_v36  ;;  %v20951_v0 = vld [vmem:[#allocation45_spill] sm:$0xff] }
 0x827   : > { %6434 = vmatmul.mubr.f32.gmra.mrb[254].mxu1 %v20946_v12  ;;  %12260 = vmatprep.subr.bf16.mxu0 %v20947_v55  ;;  %v20953_v12 = vmax.f32 %v18063_v44, 0.0  ;;  %v20954_v55 = vld [vmem:[#allocation49_spill] sm:$0xff] }
 0x828   : > { %6439 = vmatprep.mubr.f32.mxu1 %v18067_v10  ;;  %10973 = vmatmul.mubr.msk.f32.gmra.mrb[46].mxu0 %vm1103_vm0, %v9799_v43  ;;  %v20955_v43 = vld [vmem:[#allocation52_spill] sm:$0xff]  ;;  %v20960_v44 = vld [vmem:[#allocation57_spill] sm:$0xff] }
 0x829   : > { %12154 = vmatpush3.bf16.msra.mxu1 %v20945_v36 }
 0x82a   : > { %12262 = vmatpush1.bf16.msra.mxu0 %v20948_v1  ;;  %12168 = vmatprep.subr.bf16.mxu1 %v20949_v14  ;;  %v20956_v14 = vmax.f32 %v18081_v38, 0.0  ;;  %v20963_v38 = vld [vmem:[#allocation61_spill] sm:$0xff] }
 0x82b   : > { %6440 = vmatmul.mubr.f32.gmra.mrb[0].mxu1 %v20950_v42  ;;  %12264 = vmatprep.subr.bf16.mxu0 %v20951_v0  ;;  %v20958_v42 = vld [vmem:[#allocation56_spill] sm:$0xff] }
 0x82c   : > { %6445 = vmatprep.mubr.f32.mxu1 %v18074_v41 }
 0x82e   : > { %12266 = vmatpush1.bf16.msra.mxu0 %v20952_v53  ;;  %v20959_v53 = vmax.f32 %v18093_v28, 0.0  ;;  %v20966_v28 = vld [vmem:[#allocation65_spill] sm:$0xff] }
 0x82f   : > { %6446 = vmatmul.mubr.f32.gmra.mrb[2].mxu1 %v20953_v12  ;;  %12268 = vmatprep.subr.bf16.mxu0 %v20954_v55  ;;  %v20961_v12 = vld [vmem:[#allocation60_spill] sm:$0xff] }
 0x830   : > { %6451 = vmatprep.mubr.f32.mxu1 %v18098_v15 }
 0x832   : > { %12270 = vmatpush1.bf16.msra.mxu0 %v20955_v43  ;;  %v20962_v43 = vmax.f32 %v18115_v32, 0.0  ;;  %v20969_v32 = vld [vmem:[#allocation69_spill] sm:$0xff] }
 0x833   : > { %6452 = vmatmul.mubr.f32.gmra.mrb[4].mxu1 %v20956_v14  ;;  %12272 = vmatprep.subr.bf16.mxu0 %v20957_v49  ;;  %v20964_v14 = vld [vmem:[#allocation64_spill] sm:$0xff] }
 0x834   : > { %6457 = vmatprep.mubr.f32.mxu1 %v18106_v6 }
 0x836   : > { %12274 = vmatpush1.bf16.msra.mxu0 %v20958_v42  ;;  %v20965_v42 = vmax.f32 %v18130_v27, 0.0  ;;  %v20971_v27 = vmax.f32 %v18159_v48, 0.0 }
 0x837   : > { %6458 = vmatmul.mubr.f32.gmra.mrb[6].mxu1 %v20959_v53  ;;  %12276 = vmatprep.subr.bf16.mxu0 %v20960_v44  ;;  %v20967_v53 = vld [vmem:[#allocation68_spill] sm:$0xff] }
 0x838   : > { %6463 = vmatprep.mubr.f32.mxu1 %v18132_v46 }
 0x83a   : > { %12278 = vmatpush1.bf16.msra.mxu0 %v20961_v12  ;;  %v20968_v12 = vmax.f32 %v18147_v61, 0.0 }
 0x83b   : > { %6464 = vmatmul.mubr.f32.gmra.mrb[8].mxu1 %v20962_v43  ;;  %12280 = vmatprep.subr.bf16.mxu0 %v20963_v38  ;;  %v20970_v43 = vld [vmem:[#allocation71_spill] sm:$0xff] }
 0x83c   : > { %6469 = vmatprep.mubr.f32.mxu1 %v18143_v13 }
 0x83e   : > { %12282 = vmatpush1.bf16.msra.mxu0 %v20964_v14 }
 0x83f   : > { %6470 = vmatmul.mubr.f32.gmra.mrb[10].mxu1 %v20965_v42  ;;  %12284 = vmatprep.subr.bf16.mxu0 %v20966_v28  ;;  %v20972_v42 = vld [vmem:[#allocation73_spill] sm:$0xff]  ;;  %v20973_v28 = vld [vmem:[#allocation75_spill] sm:$0xff] }
 0x840   : > { %6475 = vmatprep.mubr.f32.mxu1 %v18161_v11 }
 0x842   : > { %12286 = vmatpush1.bf16.msra.mxu0 %v20967_v53 }
 0x843   : > { %6476 = vmatmul.mubr.f32.gmra.mrb[12].mxu1 %v20968_v12  ;;  %12288 = vmatprep.subr.bf16.mxu0 %v20969_v32  ;;  %v18312_v32 = vld [vmem:[%s19859_s5 + $0x2] ss:$0 sm:$0xff] }
 0x844   : > { %6481 = vmatprep.mubr.f32.mxu1 %v18171_v26 }
 0x846   : > { %12290 = vmatpush1.bf16.msra.mxu0 %v20970_v43 }
 0x847   : > { %6482 = vmatmul.mubr.f32.gmra.mrb[14].mxu1 %v20971_v27  ;;  %12292 = vmatprep.subr.bf16.mxu0 %v20972_v42 }
 0x84a   : > { %12294 = vmatpush1.bf16.msra.mxu0 %v20973_v28 }
 0x84b   : > { %12328 = vmatprep.subr.bf16.mxu0 %v14363_v3 }
 0x892   : > { %v18305_v53 = vpop.f32.mrb[0].mxu0 }
 0x893   : > { %v18307_v61 = vpop.f32.mrb[1].mxu0 }
 0x895   : > { %v10825_v12 = vpop.f32.mrb[224].mxu1 }
 0x896   : > { %v6011_v48 = vadd.f32 %v18312_v32, %v10825_v12  ;;  %v6005_v27 = vpop.f32.mrb[225].mxu1  ;;  %v18315_v42 = vpop.f32.mrb[2].mxu0 }
 0x897   : > { %v6006_v28 = vadd.f32 %v18312_v32, %v6005_v27  ;;  %v18318_v43 = vpop.f32.mrb[3].mxu0 }
 0x898   : > { %9689 = vst [vmem:[%s15816_s23 + $0x208] sm:$0xff] %v6011_v48 }
 0x899   : > { %9688 = vst [vmem:[%s15816_s23 + $0x200] sm:$0xff] %v6006_v28 }
 0x89a   : > { %v18322_v14 = vpop.f32.mrb[4].mxu0 }
 0x89b   : > { %v18324_v38 = vpop.f32.mrb[5].mxu0 }
 0x89d   : > { %v10828_v44 = vpop.f32.mrb[226].mxu1 }
 0x89e   : > { %v6021_v49 = vadd.f32 %v18312_v32, %v10828_v44  ;;  %v6015_v12 = vpop.f32.mrb[227].mxu1  ;;  %v18327_v55 = vpop.f32.mrb[6].mxu0 }
 0x89f   : > { %v6016_v0 = vadd.f32 %v18312_v32, %v6015_v12  ;;  %v18330_v1 = vpop.f32.mrb[7].mxu0 }
 0x8a0   : > { %9691 = vst [vmem:[%s15816_s23 + $0x218] sm:$0xff] %v6021_v49 }
 0x8a1   : > { %9690 = vst [vmem:[%s15816_s23 + $0x210] sm:$0xff] %v6016_v0 }
 0x8a3   : > { %v18334_v48 = vpop.f32.mrb[8].mxu0 }
 0x8a4   : > { %v18336_v28 = vpop.f32.mrb[9].mxu0 }
 0x8a6   : > { %v10831_v27 = vpop.f32.mrb[228].mxu1 }
 0x8a7   : > { %v6031_v36 = vadd.f32 %v18312_v32, %v10831_v27  ;;  %v6025_v44 = vpop.f32.mrb[229].mxu1  ;;  %v18339_v59 = vpop.f32.mrb[10].mxu0 }
 0x8a8   : > { %v6026_v19 = vadd.f32 %v18312_v32, %v6025_v44  ;;  %v18342_v7 = vpop.f32.mrb[11].mxu0 }
 0x8a9   : > { %9693 = vst [vmem:[%s15816_s23 + $0x228] sm:$0xff] %v6031_v36 }
 0x8aa   : > { %9692 = vst [vmem:[%s15816_s23 + $0x220] sm:$0xff] %v6026_v19 }
 0x8ab   : > { %v18346_v49 = vpop.f32.mrb[12].mxu0 }
 0x8ac   : > { %v18348_v0 = vpop.f32.mrb[13].mxu0 }
 0x8b0   : > { %v10834_v12 = vpop.f32.mrb[230].mxu1 }
 0x8b1   : > { %v6041_v51 = vadd.f32 %v18312_v32, %v10834_v12  ;;  %v6035_v27 = vpop.f32.mrb[231].mxu1  ;;  %v18351_v22 = vpop.f32.mrb[14].mxu0 }
 0x8b2   : > { %v6036_v52 = vadd.f32 %v18312_v32, %v6035_v27  ;;  %v18354_v20 = vpop.f32.mrb[15].mxu0 }
 0x8b3   : > { %9695 = vst [vmem:[%s15816_s23 + $0x238] sm:$0xff] %v6041_v51 }
 0x8b4   : > { %9694 = vst [vmem:[%s15816_s23 + $0x230] sm:$0xff] %v6036_v52 }
 0x8bb   : > { %v18358_v36 = vpop.f32.mrb[16].mxu0 }
 0x8bc   : > { %20974 = vst [vmem:[#allocation12_spill] sm:$0xff] %v18358_v36  ;;  %v10837_v19 = vpop.f32.mrb[232].mxu1  ;;  %v18360_v44 = vpop.f32.mrb[17].mxu0 }
 0x8bd   : > { %20975 = vst [vmem:[#allocation90_spill] sm:$0xff] %v18360_v44  ;;  %v6051_v33 = vadd.f32 %v18312_v32, %v10837_v19  ;;  %v6045_v23 = vpop.f32.mrb[233].mxu1 }
 0x8be   : > { %v6046_v12 = vadd.f32 %v18312_v32, %v6045_v23 }
 0x8bf   : > { %9697 = vst [vmem:[%s15816_s23 + $0x248] sm:$0xff] %v6051_v33  ;;  %v18365_v62 = vpop.f32.mrb[18].mxu0 }
 0x8c0   : > { %20976 = vst [vmem:[#allocation100_spill] sm:$0xff] %v18365_v62  ;;  %9696 = vst [vmem:[%s15816_s23 + $0x240] sm:$0xff] %v6046_v12  ;;  %v18368_v27 = vpop.f32.mrb[19].mxu0 }
 0x8c1   : > { %20977 = vst [vmem:[#allocation91_spill] sm:$0xff] %v18368_v27 }
 0x8c3   : > { %v18370_v51 = vpop.f32.mrb[20].mxu0 }
 0x8c4   : > { %20978 = vst [vmem:[#allocation98_spill] sm:$0xff] %v18370_v51  ;;  %v10840_v52 = vpop.f32.mrb[234].mxu1  ;;  %v18372_v26 = vpop.f32.mrb[21].mxu0 }
 0x8c5   : > { %20979 = vst [vmem:[#allocation111_spill] sm:$0xff] %v18372_v26  ;;  %v6061_v5 = vadd.f32 %v18312_v32, %v10840_v52  ;;  %v6055_v29 = vpop.f32.mrb[235].mxu1 }
 0x8c6   : > { %v6056_v19 = vadd.f32 %v18312_v32, %v6055_v29 }
 0x8c7   : > { %9699 = vst [vmem:[%s15816_s23 + $0x258] sm:$0xff] %v6061_v5  ;;  %v18377_v23 = vpop.f32.mrb[22].mxu0 }
 0x8c8   : > { %20980 = vst [vmem:[#allocation89_spill] sm:$0xff] %v18377_v23  ;;  %9698 = vst [vmem:[%s15816_s23 + $0x250] sm:$0xff] %v6056_v19  ;;  %v18380_v33 = vpop.f32.mrb[23].mxu0 }
 0x8c9   : > { %20981 = vst [vmem:[#allocation105_spill] sm:$0xff] %v18380_v33 }
 0x8cb   : > { %v18382_v12 = vpop.f32.mrb[24].mxu0 }
 0x8cc   : > { %20982 = vst [vmem:[#allocation23_spill] sm:$0xff] %v18382_v12  ;;  %v18384_v11 = vpop.f32.mrb[25].mxu0 }
 0x8cd   : > { %20983 = vst [vmem:[#allocation107_spill] sm:$0xff] %v18384_v11 }
 0x8cf   : > { %v10843_v13 = vpop.f32.mrb[236].mxu1 }
 0x8d0   : > { %v6071_v40 = vadd.f32 %v18312_v32, %v10843_v13  ;;  %v6065_v52 = vpop.f32.mrb[237].mxu1  ;;  %v18387_v46 = vpop.f32.mrb[26].mxu0 }
 0x8d1   : > { %20984 = vst [vmem:[#allocation78_spill] sm:$0xff] %v18387_v46  ;;  %v6066_v29 = vadd.f32 %v18312_v32, %v6065_v52  ;;  %v18390_v5 = vpop.f32.mrb[27].mxu0 }
 0x8d2   : > { %20985 = vst [vmem:[#allocation106_spill] sm:$0xff] %v18390_v5  ;;  %9701 = vst [vmem:[%s15816_s23 + $0x268] sm:$0xff] %v6071_v40 }
 0x8d3   : > { %9700 = vst [vmem:[%s15816_s23 + $0x260] sm:$0xff] %v6066_v29 }
 0x8d6   : > { %v18394_v19 = vpop.f32.mrb[28].mxu0 }
 0x8d7   : > { %20986 = vst [vmem:[#allocation85_spill] sm:$0xff] %v18394_v19  ;;  %v18396_v6 = vpop.f32.mrb[29].mxu0 }
 0x8d8   : > { %20987 = vst [vmem:[#allocation103_spill] sm:$0xff] %v18396_v6 }
 0x8da   : > { %v10846_v15 = vpop.f32.mrb[238].mxu1 }
 0x8db   : > { %v6081_v41 = vadd.f32 %v18312_v32, %v10846_v15  ;;  %v6075_v12 = vpop.f32.mrb[239].mxu1  ;;  %v18399_v10 = vpop.f32.mrb[30].mxu0 }
 0x8dc   : > { %20988 = vst [vmem:[#allocation101_spill] sm:$0xff] %v18399_v10  ;;  %v6076_v13 = vadd.f32 %v18312_v32, %v6075_v12  ;;  %v18402_v11 = vpop.f32.mrb[31].mxu0 }
 0x8dd   : > { %20989 = vst [vmem:[#allocation94_spill] sm:$0xff] %v18402_v11  ;;  %9703 = vst [vmem:[%s15816_s23 + $0x278] sm:$0xff] %v6081_v41 }
 0x8de   : > { %9702 = vst [vmem:[%s15816_s23 + $0x270] sm:$0xff] %v6076_v13  ;;  %v6393_v52 = vpop.f32.mrb[240].mxu1 }
 0x8df   : > { %v6394_v40 = vadd.f32 %v6393_v52, %v15230_v18  ;;  %v6395_v29 = vpop.f32.mrb[241].mxu1  ;;  %v18407_v46 = vpop.f32.mrb[32].mxu0 }
 0x8e0   : > { %v18409_v19 = vpop.f32.mrb[33].mxu0  ;;  %v6396_v32 = vadd.f32 %v6395_v29, %v15233_v45 }
 0x8e1   : > { %v9736_v6 = vmul.f32 -1.442695, %v6394_v40 }
 0x8e2   : > { %v6399_v5 = vpop.f32.mrb[242].mxu1 }
 0x8e3   : > { %13390 = vpow2.f32 %v9736_v6  ;;  %v6400_v15 = vadd.f32 %v6399_v5, %v15230_v18  ;;  %v6401_v10 = vpop.f32.mrb[243].mxu1  ;;  %v18412_v23 = vpop.f32.mrb[34].mxu0  ;;  %v9752_v6 = vmul.f32 -1.442695, %v6396_v32 }
 0x8e4   : > { %v18415_v41 = vpop.f32.mrb[35].mxu0  ;;  %v6402_v13 = vadd.f32 %v6401_v10, %v15233_v45 }
 0x8e5   : > { %v9737_v12 = vmul.f32 -1.442695, %v6400_v15 }
 0x8e6   : > { %v6405_v52 = vpop.f32.mrb[244].mxu1  ;;  %v9753_v5 = vmul.f32 -1.442695, %v6402_v13 }
 0x8e7   : > { %13392 = vpow2.f32 %v9737_v12  ;;  %v6406_v11 = vadd.f32 %v6405_v52, %v15230_v18  ;;  %v6407_v33 = vpop.f32.mrb[245].mxu1  ;;  %v18419_v40 = vpop.f32.mrb[36].mxu0 }
 0x8e8   : > { %v18421_v51 = vpop.f32.mrb[37].mxu0  ;;  %v6408_v52 = vadd.f32 %v6407_v33, %v15233_v45 }
 0x8e9   : > { %v9738_v47 = vmul.f32 -1.442695, %v6406_v11 }
 0x8ea   : > { %v6411_v26 = vpop.f32.mrb[246].mxu1 }
 0x8eb   : > { %13394 = vpow2.f32 %v9738_v47  ;;  %v6412_v29 = vadd.f32 %v6411_v26, %v15230_v18  ;;  %v6413_v35 = vpop.f32.mrb[247].mxu1  ;;  %v18424_v15 = vpop.f32.mrb[38].mxu0 }
 0x8ec   : > { %20990 = vst [vmem:[#allocation19_spill] sm:$0xff] %v18424_v15  ;;  %13396 = vpow2.f32 %v9752_v6  ;;  %v18426_v10 = vpop.f32.mrb[39].mxu0  ;;  %v9754_v6 = vmul.f32 -1.442695, %v6408_v52  ;;  %v6414_v27 = vadd.f32 %v6413_v35, %v15233_v45 }
 0x8ed   : > { %20991 = vst [vmem:[#allocation87_spill] sm:$0xff] %v18426_v10  ;;  %v13391_v12 = vpop.eup %13390  ;;  %13398 = vpow2.f32 %v9753_v5  ;;  %v9739_v56 = vmul.f32 -1.442695, %v6412_v29 }
 0x8ee   : > { %v6697_v32 = vadd.f32 1.0, %v13391_v12  ;;  %v6417_v62 = vpop.f32.mrb[248].mxu1 }
 0x8ef   : > { %13400 = vpow2.f32 %v9739_v56  ;;  %v6418_v11 = vadd.f32 %v6417_v62, %v15230_v18  ;;  %v6419_v13 = vpop.f32.mrb[249].mxu1  ;;  %v18430_v47 = vpop.f32.mrb[40].mxu0 }
 0x8f0   : > { %20992 = vst [vmem:[#allocation109_spill] sm:$0xff] %v18430_v47  ;;  %13402 = vrcp.f32 %v6697_v32  ;;  %v18432_v26 = vpop.f32.mrb[41].mxu0  ;;  %v6420_v33 = vadd.f32 %v6419_v13, %v15233_v45 }
 0x8f1   : > { %20993 = vst [vmem:[#allocation104_spill] sm:$0xff] %v18432_v26  ;;  %v13393_v15 = vpop.eup %13392  ;;  %v9740_v36 = vmul.f32 -1.442695, %v6418_v11  ;;  %v9755_v26 = vmul.f32 -1.442695, %v6414_v27  ;;  %v6557_v27 = vadd.f32 %v18307_v61, %v15273_v24 }
 0x8f2   : > { %v6698_v5 = vadd.f32 1.0, %v13393_v15  ;;  %v6423_v29 = vpop.f32.mrb[250].mxu1  ;;  %v9756_v11 = vmul.f32 -1.442695, %v6420_v33 }
 0x8f3   : > { %13404 = vpow2.f32 %v9740_v36  ;;  %v6424_v56 = vadd.f32 %v6423_v29, %v15230_v18  ;;  %v6425_v12 = vpop.f32.mrb[251].mxu1  ;;  %v18437_v62 = vpop.f32.mrb[42].mxu0 }
 0x8f4   : > { %20994 = vst [vmem:[#allocation97_spill] sm:$0xff] %v18437_v62  ;;  %13406 = vrcp.f32 %v6698_v5  ;;  %v18439_v47 = vpop.f32.mrb[43].mxu0  ;;  %v6426_v5 = vadd.f32 %v6425_v12, %v15233_v45 }
 0x8f5   : > { %20995 = vst [vmem:[#allocation14_spill] sm:$0xff] %v18439_v47  ;;  %v13395_v32 = vpop.eup %13394  ;;  %13408 = vpow2.f32 %v9754_v6  ;;  %v9741_v52 = vmul.f32 -1.442695, %v6424_v56 }
 0x8f6   : > { %v13397_v31 = vpop.eup %13396  ;;  %v6699_v35 = vadd.f32 1.0, %v13395_v32  ;;  %v6429_v15 = vpop.f32.mrb[252].mxu1  ;;  %v9757_v61 = vmul.f32 -1.442695, %v6426_v5 }
 0x8f7   : > { %v13399_v10 = vpop.eup %13398  ;;  %13410 = vpow2.f32 %v9741_v52  ;;  %v6430_v36 = vadd.f32 %v6429_v15, %v15230_v18  ;;  %v6431_v13 = vpop.f32.mrb[253].mxu1  ;;  %v6793_v6 = vadd.f32 1.0, %v13397_v31 }
 0x8f8   : > { %v18442_v29 = vpop.f32.mrb[44].mxu0  ;;  %13412 = vrcp.f32 %v6699_v35  ;;  %v6794_v32 = vadd.f32 1.0, %v13399_v10  ;;  %v6432_v31 = vadd.f32 %v6431_v13, %v15233_v45 }
 0x8f9   : > { %20996 = vst [vmem:[#allocation99_spill] sm:$0xff] %v18442_v29  ;;  %v18445_v62 = vpop.f32.mrb[45].mxu0  ;;  %v13401_v47 = vpop.eup %13400  ;;  %13414 = vpow2.f32 %v9755_v26  ;;  %v9742_v33 = vmul.f32 -1.442695, %v6430_v36  ;;  %v6555_v29 = vadd.f32 %v18305_v53, %v15278_v17 }
 0x8fa   : > { %20997 = vst [vmem:[#allocation108_spill] sm:$0xff] %v18445_v62  ;;  %v13403_v56 = vpop.eup %13402  ;;  %v6700_v52 = vadd.f32 1.0, %v13401_v47  ;;  %13416 = vpow2.f32 %v9756_v11  ;;  %v6435_v15 = vpop.f32.mrb[254].mxu1  ;;  %v6563_v47 = vadd.f32 %v18318_v43, %v15273_v24 }
 0x8fb   : > { %v6841_v35 = vmul.f32 %v13403_v56, %v6557_v27  ;;  %13418 = vpow2.f32 %v9742_v33  ;;  %v6436_v12 = vadd.f32 %v6435_v15, %v15230_v18  ;;  %v6437_v62 = vpop.f32.mrb[255].mxu1  ;;  %v18452_v2 = vpop.f32.mrb[46].mxu0  ;;  %v9758_v15 = vmul.f32 -1.442695, %v6432_v31 }
 0x8fc   : > { %20998 = vst [vmem:[#allocation18_spill] sm:$0xff] %v18452_v2  ;;  %13420 = vrcp.f32 %v6700_v52  ;;  %v18455_v26 = vpop.f32.mrb[47].mxu0  ;;  %v6561_v52 = vadd.f32 %v18315_v42, %v15278_v17  ;;  %v6438_v2 = vadd.f32 %v6437_v62, %v15233_v45  ;;  %v6567_v42 = vadd.f32 %v18322_v14, %v15278_v17 }
 0x8fd   : > { %20999 = vst [vmem:[#allocation22_spill] sm:$0xff] %v18455_v26  ;;  %v13405_v10 = vpop.eup %13404  ;;  %v6857_v11 = vadd.f32 %v6841_v35, %v6555_v29  ;;  %13422 = vrcp.f32 %v6793_v6  ;;  %v9743_v27 = vmul.f32 -1.442695, %v6436_v12  ;;  %v6569_v29 = vadd.f32 %v18324_v38, %v15273_v24 }
 0x8fe   : > { %v13407_v53 = vpop.eup %13406  ;;  %13424 = vrcp.f32 %v6794_v32  ;;  %v6701_v36 = vadd.f32 1.0, %v13405_v10  ;;  %v6441_v33 = vpop.f32.mrb[0].mxu1 }
 0x8ff   : > { %v13409_v56 = vpop.eup %13408  ;;  %13426 = vtanh.f32 %v6857_v11  ;;  %v6842_v5 = vmul.f32 %v13407_v53, %v6563_v47  ;;  %v6443_v13 = vpop.f32.mrb[1].mxu1  ;;  %v9759_v47 = vmul.f32 -1.442695, %v6438_v2  ;;  %v6442_v11 = vadd.f32 %v6441_v33, %v15230_v18 }
 0x900   : > { %13428 = vpow2.f32 %v9757_v61  ;;  %v6795_v32 = vadd.f32 1.0, %v13409_v56  ;;  %v6579_v33 = vadd.f32 %v18334_v48, %v15278_v17 }
 0x901   : > { %v13411_v26 = vpop.eup %13410  ;;  %v6858_v43 = vadd.f32 %v6842_v5, %v6561_v52  ;;  %13430 = vrcp.f32 %v6701_v36  ;;  %v6575_v36 = vadd.f32 %v18330_v1, %v15273_v24 }
 0x902   : > { %v13413_v6 = vpop.eup %13412  ;;  %v6702_v35 = vadd.f32 1.0, %v13411_v26  ;;  %13432 = vpow2.f32 %v9743_v27  ;;  %v6447_v12 = vpop.f32.mrb[2].mxu1  ;;  %v6573_v26 = vadd.f32 %v18327_v55, %v15278_v17  ;;  %v6581_v55 = vadd.f32 %v18336_v28, %v15273_v24 }
 0x903   : > { %v13415_v10 = vpop.eup %13414  ;;  %13434 = vtanh.f32 %v6858_v43  ;;  %v6843_v61 = vmul.f32 %v13413_v6, %v6569_v29  ;;  %v18466_v31 = vpop.f32.mrb[3].mxu1  ;;  %v6448_v52 = vadd.f32 %v6447_v12, %v15230_v18  ;;  %v6585_v29 = vadd.f32 %v18339_v59, %v15278_v17 }
 0x904   : > { %v13417_v62 = vpop.eup %13416  ;;  %13436 = vpow2.f32 %v9758_v15  ;;  %v6796_v14 = vadd.f32 1.0, %v13415_v10  ;;  %v9744_v6 = vmul.f32 -1.442695, %v6442_v11  ;;  %v6587_v59 = vadd.f32 %v18342_v7, %v15273_v24 }
 0x905   : > { %v13419_v38 = vpop.eup %13418  ;;  %v6859_v53 = vadd.f32 %v6843_v61, %v6567_v42  ;;  %13438 = vrcp.f32 %v6702_v35  ;;  %v6797_v28 = vadd.f32 1.0, %v13417_v62  ;;  %v9745_v61 = vmul.f32 -1.442695, %v6448_v52 }
 0x906   : > { %v13421_v27 = vpop.eup %13420  ;;  %13440 = vrcp.f32 %v6795_v32  ;;  %v6703_v56 = vadd.f32 1.0, %v13419_v38  ;;  %v6453_v5 = vpop.f32.mrb[4].mxu1  ;;  %v18485_v32 = vld [vmem:[%s19859_s5] ss:$0 sm:$0xff]  ;;  %v6444_v62 = vadd.f32 %v6443_v13, %v15233_v45 }
 0x907   : > { %v13423_v15 = vpop.eup %13422  ;;  %13442 = vtanh.f32 %v6859_v53  ;;  %v6844_v2 = vmul.f32 %v13421_v27, %v6575_v36  ;;  %v18478_v43 = vpop.f32.mrb[5].mxu1  ;;  %v18489_v35 = vadd.f32 %v18485_v32, %v18409_v19  ;;  %v6454_v10 = vadd.f32 %v6453_v5, %v15230_v18 }
 0x908   : > { %v13425_v1 = vpop.eup %13424  ;;  %13444 = vpow2.f32 %v9759_v47  ;;  %v18497_v19 = vadd.f32 %v18346_v49, %v15278_v17 }
 0x909   : > { %v13427_v48 = vpop.eup %13426  ;;  %v6860_v12 = vadd.f32 %v6844_v2, %v6573_v26  ;;  %13446 = vrcp.f32 %v6703_v56  ;;  %v18504_v26 = vadd.f32 %v18485_v32, %v18407_v46  ;;  %v20172_v27 = vmax.f32 %v18489_v35, 0.0 }
 0x90a   : > { %v13429_v42 = vpop.eup %13428  ;;  %13448 = vrcp.f32 %v6796_v14  ;;  %v6459_v47 = vpop.f32.mrb[6].mxu1  ;;  %v6889_v11 = vsub.f32 %v17892_v39, %v13427_v48  ;;  %v9746_v49 = vmul.f32 -1.442695, %v6454_v10 }
 0x90b   : > { %v13431_v38 = vpop.eup %13430  ;;  %13450 = vtanh.f32 %v6860_v12  ;;  %v18500_v53 = vpop.f32.mrb[7].mxu1  ;;  %v6798_v56 = vadd.f32 1.0, %v13429_v42  ;;  %v6460_v12 = vadd.f32 %v6459_v47, %v15230_v18  ;;  %v20170_v47 = vmax.f32 %v18504_v26, 0.0 }
 0x90c   : > { %v13433_v36 = vpop.eup %13432  ;;  %v6845_v7 = vmul.f32 %v13431_v38, %v6581_v55  ;;  %13452 = vpow2.f32 %v9744_v6  ;;  %v6905_v39 = vmul.f32 %v13423_v15, %v6889_v11  ;;  %v9760_v55 = vmul.f32 -1.442695, %v6444_v62 }
 0x90d   : > { %v13435_v14 = vpop.eup %13434  ;;  %13454 = vrcp.f32 %v6797_v28  ;;  %v6704_v52 = vadd.f32 1.0, %v13433_v36  ;;  %v6450_v6 = vadd.f32 %v18466_v31, %v15233_v45  ;;  %v18522_v31 = vadd.f32 %v18485_v32, %v18415_v41 }
 0x90e   : > { %v13437_v5 = vpop.eup %13436  ;;  %v6890_v13 = vsub.f32 %v17916_v37, %v13435_v14  ;;  %v6861_v2 = vadd.f32 %v6845_v7, %v6579_v33  ;;  %13456 = vpow2.f32 %v9745_v61  ;;  %v6465_v46 = vpop.f32.mrb[8].mxu1  ;;  %v18513_v28 = vadd.f32 %v13427_v48, %v6905_v39 }
 0x90f   : > { %v13439_v44 = vpop.eup %13438  ;;  %13458 = vrcp.f32 %v6704_v52  ;;  %v18511_v15 = vpop.f32.mrb[9].mxu1  ;;  %v6593_v37 = vadd.f32 %v18348_v0, %v15273_v24  ;;  %v6799_v61 = vadd.f32 1.0, %v13437_v5  ;;  %v18530_v62 = vadd.f32 %v18351_v22, %v15278_v17 }
 0x910   : > { %v13441_v42 = vpop.eup %13440  ;;  %v6906_v10 = vmul.f32 %v13425_v1, %v6890_v13  ;;  %13460 = vtanh.f32 %v6861_v2  ;;  %v6846_v11 = vmul.f32 %v13439_v44, %v6587_v59  ;;  %10915 = vmatprep.mubr.f32.mxu1 %v18513_v28  ;;  %7550 = vmatprep.mubr.f32.mxu0 %v18513_v28  ;;  %v9747_v59 = vmul.f32 -1.442695, %v6460_v12 }
 0x911   : > { %v13443_v33 = vpop.eup %13442  ;;  %13462 = vrcp.f32 %v6798_v56  ;;  %7551 = vmatmul.mubr.f32.vlgmr.msra.gmra.mrb[48].mxu0 %v20172_v27  ;;  %v9761_v36 = vmul.f32 -1.442695, %v6450_v6  ;;  %v18541_v22 = vadd.f32 %v18485_v32, %v18412_v23 }
 0x912   : > { %v13445_v48 = vpop.eup %13444  ;;  %v18524_v1 = vadd.f32 %v13435_v14, %v6906_v10  ;;  %v6862_v44 = vadd.f32 %v6846_v11, %v6585_v29  ;;  %13464 = vpow2.f32 %v9746_v49  ;;  %v6471_v0 = vpop.f32.mrb[10].mxu1  ;;  %v6891_v41 = vsub.f32 %v17933_v16, %v13443_v33  ;;  %12330 = vmatpush3.bf16.msra.mxu0 %v14363_v3 }
 0x913   : > { %v13447_v38 = vpop.eup %13446  ;;  %13466 = vpow2.f32 %v9760_v55  ;;  %v18532_v7 = vpop.f32.mrb[11].mxu1  ;;  %v6466_v14 = vadd.f32 %v6465_v46, %v15230_v18  ;;  %v6456_v16 = vadd.f32 %v18478_v43, %v15233_v45  ;;  %v20169_v3 = vmax.f32 %v18522_v31, 0.0  ;;  %12332 = vmatprep.subr.bf16.mxu0 %v20284_v54 }
 0x914   : > { %v13449_v29 = vpop.eup %13448  ;;  %13468 = vtanh.f32 %v6862_v44  ;;  %v6847_v39 = vmul.f32 %v13447_v38, %v6593_v37  ;;  %10916 = vmatmul.mubr.f32.vlgmr.msra.gmra.mrb[16].mxu1 %v18524_v1  ;;  %7556 = vmatprep.mubr.f32.mxu0 %v18524_v1  ;;  %v6907_v52 = vmul.f32 %v13441_v42, %v6891_v41  ;;  %v6800_v13 = vadd.f32 1.0, %v13445_v48 }
 0x915   : > { %v13451_v56 = vpop.eup %13450  ;;  %13470 = vrcp.f32 %v6799_v61  ;;  %12170 = vmatpush1.bf16.msra.mxu1 %v14420_v21  ;;  %7557 = vmatmul.mubr.f32.gmra.mrb[50].mxu0 %v20170_v47  ;;  %v6462_v46 = vadd.f32 %v18500_v53, %v15233_v45  ;;  %v6599_v42 = vadd.f32 %v18354_v20, %v15273_v24  ;;  %v9748_v10 = vmul.f32 -1.442695, %v6466_v14  ;;  %v21030_v47 = vld [vmem:[#allocation46_spill] sm:$0xff] }
 0x916   : > { %v13453_v49 = vpop.eup %13452  ;;  %v6863_v5 = vadd.f32 %v6847_v39, %v18497_v19  ;;  %13472 = vpow2.f32 %v9747_v59  ;;  %v6477_v2 = vpop.f32.mrb[12].mxu1  ;;  %12172 = vmatprep.subr.bf16.mxu1 %v14431_v25  ;;  %v6892_v23 = vsub.f32 %v17959_v50, %v13451_v56  ;;  %v18557_v6 = vadd.f32 %v13443_v33, %v6907_v52  ;;  %12334 = vmatpush3.bf16.msra.mxu0 %v20284_v54 }
 0x917   : > { %v13455_v43 = vpop.eup %13454  ;;  %v6705_v12 = vadd.f32 1.0, %v13453_v49  ;;  %13474 = vpow2.f32 %v9761_v36  ;;  %v18555_v55 = vpop.f32.mrb[13].mxu1  ;;  %12336 = vmatprep.subr.bf16.mxu0 %v20546_v30  ;;  %v9762_v61 = vmul.f32 -1.442695, %v6456_v16  ;;  %v6472_v53 = vadd.f32 %v6471_v0, %v15230_v18 }
 0x918   : > { %v13457_v19 = vpop.eup %13456  ;;  %13476 = vtanh.f32 %v6863_v5  ;;  %v6908_v11 = vmul.f32 %v13449_v29, %v6892_v23  ;;  %10918 = vmatprep.mubr.f32.mxu1 %v18557_v6  ;;  %7562 = vmatprep.mubr.f32.mxu0 %v18557_v6  ;;  %v18572_v44 = vadd.f32 %v18485_v32, %v18421_v51  ;;  %v9763_v0 = vmul.f32 -1.442695, %v6462_v46 }
 0x919   : > { %v13459_v50 = vpop.eup %13458  ;;  %13478 = vrcp.f32 %v6705_v12  ;;  %v6706_v37 = vadd.f32 1.0, %v13457_v19  ;;  %12174 = vmatpush1.bf16.msra.mxu1 %v20541_v4  ;;  %v20168_v38 = vmax.f32 %v18541_v22, 0.0  ;;  %7563 = vmatmul.mubr.f32.gmra.mrb[52].mxu0 %v20169_v3 }
 0x91a   : > { %v13461_v54 = vpop.eup %13460  ;;  %v6848_v33 = vmul.f32 %v13459_v50, %v6599_v42  ;;  %13480 = vrcp.f32 %v6800_v13  ;;  %v6483_v20 = vpop.f32.mrb[14].mxu1  ;;  %12176 = vmatprep.subr.bf16.mxu1 %v20543_v34  ;;  %v18568_v48 = vadd.f32 %v13451_v56, %v6908_v11  ;;  %v9749_v56 = vmul.f32 -1.442695, %v6472_v53  ;;  %12338 = vmatpush3.bf16.msra.mxu0 %v20546_v30  ;;  %v21002_v11 = vld [vmem:[#allocation87_spill] sm:$0xff] }
 0x91b   : > { %v13463_v59 = vpop.eup %13462  ;;  %13482 = vrcp.f32 %v6706_v37  ;;  %v18575_v36 = vpop.f32.mrb[15].mxu1  ;;  %v6893_v41 = vsub.f32 %v17978_v58, %v13461_v54  ;;  %v6478_v58 = vadd.f32 %v6477_v2, %v15230_v18  ;;  %v20167_v49 = vmax.f32 %v18572_v44, 0.0  ;;  %12404 = vmatprep.subr.bf16.mxu0 %v20555_v8 }
 0x91c   : > { %v13465_v29 = vpop.eup %13464  ;;  %v6864_v39 = vadd.f32 %v6848_v33, %v18530_v62  ;;  %13484 = vpow2.f32 %v9748_v10  ;;  %10919 = vmatmul.mubr.f32.gmra.mrb[18].mxu1 %v18568_v48  ;;  %7568 = vmatprep.mubr.f32.mxu0 %v18568_v48  ;;  %v18588_v62 = vadd.f32 %v18485_v32, %v18419_v40  ;;  %v6468_v13 = vadd.f32 %v18511_v15, %v15233_v45  ;;  %v21000_v15 = vld [vmem:[#allocation90_spill] sm:$0xff] }
 0x91d   : > { %v13467_v51 = vpop.eup %13466  ;;  %v6707_v14 = vadd.f32 1.0, %v13465_v29  ;;  %13486 = vpow2.f32 %v9762_v61  ;;  %12178 = vmatpush1.bf16.msra.mxu1 %v20547_v57  ;;  %v6909_v16 = vmul.f32 %v13455_v43, %v6893_v41  ;;  %7569 = vmatmul.mubr.f32.gmra.mrb[54].mxu0 %v20168_v38  ;;  %v6605_v19 = vadd.f32 %v21000_v15, %v15273_v24  ;;  %v21029_v38 = vld [vmem:[#allocation109_spill] sm:$0xff] }
 0x91e   : > { %v13469_v52 = vpop.eup %13468  ;;  %13488 = vtanh.f32 %v6864_v39  ;;  %12180 = vmatprep.subr.bf16.mxu1 %v20549_v60  ;;  %v6801_v43 = vadd.f32 1.0, %v13467_v51  ;;  %v9750_v42 = vmul.f32 -1.442695, %v6478_v58  ;;  %v20166_v10 = vmax.f32 %v18588_v62, 0.0  ;;  %v21005_v39 = vld [vmem:[#allocation91_spill] sm:$0xff] }
 0x91f   : > { %v13471_v5 = vpop.eup %13470  ;;  %13490 = vpow2.f32 %v9763_v0  ;;  %v18597_v30 = vadd.f32 %v13461_v54, %v6909_v16  ;;  %v6894_v2 = vsub.f32 %v17994_v63, %v13469_v52  ;;  %v21001_v63 = vld [vmem:[#allocation27_spill] sm:$0xff]  ;;  %v18609_v50 = vadd.f32 %v18485_v32, %v21002_v11  ;;  %v21003_v54 = vld [vmem:[#allocation93_spill] sm:$0xff]  ;;  %v21004_v0 = vld [vmem:[#allocation12_spill] sm:$0xff] }
 0x920   : > { %v13473_v40 = vpop.eup %13472  ;;  %13492 = vrcp.f32 %v6707_v14  ;;  %v9764_v61 = vmul.f32 -1.442695, %v6468_v13  ;;  %v6603_v41 = vadd.f32 %v21004_v0, %v15278_v17  ;;  %v6611_v51 = vadd.f32 %v21005_v39, %v15273_v24  ;;  %v21006_v16 = vld [vmem:[#allocation100_spill] sm:$0xff] }
 0x921   : > { %v13475_v23 = vpop.eup %13474  ;;  %v6708_v12 = vadd.f32 1.0, %v13473_v40  ;;  %13494 = vpow2.f32 %v9749_v56  ;;  %10921 = vmatprep.mubr.f32.mxu1 %v18597_v30  ;;  %12182 = vmatpush1.bf16.msra.mxu1 %v20845_v9  ;;  %v6910_v8 = vmul.f32 %v13463_v59, %v6894_v2  ;;  %v6484_v14 = vadd.f32 %v6483_v20, %v15230_v18 }
 0x922   : > { %v13477_v46 = vpop.eup %13476  ;;  %7574 = vmatprep.mubr.f32.mxu0 %v18597_v30  ;;  %12184 = vmatprep.subr.bf16.mxu1 %v21001_v63  ;;  %v6609_v58 = vadd.f32 %v21006_v16, %v15278_v17  ;;  %v20164_v20 = vmax.f32 %v18609_v50, 0.0 }
 0x923   : > { %v13479_v37 = vpop.eup %13478  ;;  %13496 = vrcp.f32 %v6708_v12  ;;  %7575 = vmatmul.mubr.f32.gmra.mrb[56].mxu0 %v20167_v49  ;;  %v18613_v53 = vadd.f32 %v13469_v52, %v6910_v8  ;;  %v6895_v33 = vsub.f32 %v21003_v54, %v13477_v46  ;;  %v6474_v52 = vadd.f32 %v18532_v7, %v15233_v45  ;;  %v21007_v8 = vld [vmem:[#allocation30_spill] sm:$0xff] }
 0x924   : > { %v13481_v59 = vpop.eup %13480  ;;  %v6849_v29 = vmul.f32 %v13479_v37, %v6605_v19  ;;  %13498 = vrcp.f32 %v6801_v43  ;;  %v6802_v19 = vadd.f32 1.0, %v13475_v23  ;;  %v21008_v43 = vld [vmem:[#allocation31_spill] sm:$0xff]  ;;  %v9751_v54 = vmul.f32 -1.442695, %v6484_v14 }
 0x925   : > { %v13483_v56 = vpop.eup %13482  ;;  %10922 = vmatmul.mubr.f32.gmra.mrb[20].mxu1 %v18613_v53  ;;  %7580 = vmatprep.mubr.f32.mxu0 %v18613_v53  ;;  %v6911_v13 = vmul.f32 %v13471_v5, %v6895_v33  ;;  %13500 = vpow2.f32 %v9750_v42  ;;  %v21010_v42 = vld [vmem:[#allocation19_spill] sm:$0xff] }
 0x926   : > { %v13485_v2 = vpop.eup %13484  ;;  %v6865_v40 = vadd.f32 %v6849_v29, %v6603_v41  ;;  %v6850_v12 = vmul.f32 %v13483_v56, %v6611_v51  ;;  %12186 = vmatpush1.bf16.msra.mxu1 %v21007_v8  ;;  %13502 = vpow2.f32 %v9764_v61  ;;  %v18636_v33 = vadd.f32 %v18485_v32, %v21010_v42  ;;  %v21011_v23 = vld [vmem:[#allocation111_spill] sm:$0xff]  ;;  %v21013_v51 = vld [vmem:[#allocation98_spill] sm:$0xff]  ;;  %v21014_v56 = vld [vmem:[#allocation105_spill] sm:$0xff] }
 0x927   : > { %v13487_v15 = vpop.eup %13486  ;;  %v6709_v11 = vadd.f32 1.0, %v13485_v2  ;;  %12188 = vmatprep.subr.bf16.mxu1 %v21008_v43  ;;  %7581 = vmatmul.mubr.f32.gmra.mrb[58].mxu0 %v20166_v10  ;;  %v18632_v7 = vadd.f32 %v13477_v46, %v6911_v13  ;;  %v6617_v41 = vadd.f32 %v21011_v23, %v15273_v24  ;;  %v9765_v61 = vmul.f32 -1.442695, %v6474_v52  ;;  %v21012_v46 = vld [vmem:[#allocation26_spill] sm:$0xff] }
 0x928   : > { %v13489_v5 = vpop.eup %13488  ;;  %13504 = vtanh.f32 %v6865_v40  ;;  %v6866_v37 = vadd.f32 %v6850_v12, %v6609_v58  ;;  %v6615_v14 = vadd.f32 %v21013_v51, %v15278_v17  ;;  %v6623_v16 = vadd.f32 %v21014_v56, %v15273_v24  ;;  %v21015_v58 = vld [vmem:[#allocation34_spill] sm:$0xff]  ;;  %v21016_v40 = vld [vmem:[#allocation35_spill] sm:$0xff] }
 0x929   : > { %21009 = vst [vmem:[#allocation88_spill] sm:$0xff] %v18632_v7  ;;  %v13491_v0 = vpop.eup %13490  ;;  %13506 = vrcp.f32 %v6709_v11  ;;  %10924 = vmatprep.mubr.f32.mxu1 %v18632_v7  ;;  %7586 = vmatprep.mubr.f32.mxu0 %v18632_v7  ;;  %v6896_v29 = vsub.f32 %v21012_v46, %v13489_v5  ;;  %v6480_v52 = vadd.f32 %v18555_v55, %v15233_v45  ;;  %v6803_v11 = vadd.f32 1.0, %v13487_v15  ;;  %v21019_v56 = vld [vmem:[#allocation38_spill] sm:$0xff] }
 0x92a   : > { %v13493_v39 = vpop.eup %13492  ;;  %13508 = vtanh.f32 %v6866_v37  ;;  %12190 = vmatpush1.bf16.msra.mxu1 %v21015_v58  ;;  %v20165_v37 = vmax.f32 %v18636_v33, 0.0  ;;  %v6804_v51 = vadd.f32 1.0, %v13491_v0  ;;  %v6486_v15 = vadd.f32 %v18575_v36, %v15233_v45  ;;  %v21020_v0 = vld [vmem:[#allocation39_spill] sm:$0xff]  ;;  %v21022_v36 = vld [vmem:[#allocation104_spill] sm:$0xff] }
 0x92b   : > { %v13495_v13 = vpop.eup %13494  ;;  %13510 = vrcp.f32 %v6802_v19  ;;  %v6851_v2 = vmul.f32 %v13493_v39, %v6617_v41  ;;  %12192 = vmatprep.subr.bf16.mxu1 %v21016_v40  ;;  %7587 = vmatmul.mubr.f32.gmra.mrb[60].mxu0 %v20164_v20  ;;  %v6912_v12 = vmul.f32 %v13481_v59, %v6896_v29  ;;  %v21018_v41 = vld [vmem:[#allocation89_spill] sm:$0xff]  ;;  %v9766_v59 = vmul.f32 -1.442695, %v6480_v52  ;;  %v21023_v52 = vld [vmem:[#allocation42_spill] sm:$0xff] }
 0x92c   : > { %v6710_v42 = vadd.f32 1.0, %v13495_v13  ;;  %13512 = vpow2.f32 %v9751_v54  ;;  %v6621_v55 = vadd.f32 %v21018_v41, %v15278_v17  ;;  %v21026_v41 = vld [vmem:[#allocation23_spill] sm:$0xff] }
 0x92d   : > { %v13497_v23 = vpop.eup %13496  ;;  %v6867_v46 = vadd.f32 %v6851_v2, %v6615_v14  ;;  %13514 = vpow2.f32 %v9765_v61  ;;  %v18654_v19 = vadd.f32 %v13489_v5, %v6912_v12  ;;  %v18670_v2 = vadd.f32 %v18485_v32, %v21022_v36 }
 0x92e   : > { %v6852_v39 = vmul.f32 %v13497_v23, %v6623_v16  ;;  %13516 = vrcp.f32 %v6710_v42  ;;  %12194 = vmatpush1.bf16.msra.mxu1 %v21019_v56  ;;  %v13499_v20 = vpop.eup %13498  ;;  %v21021_v16 = vld [vmem:[#allocation107_spill] sm:$0xff] }
 0x92f   : > { %21017 = vst [vmem:[#allocation90_spill] sm:$0xff] %v18654_v19  ;;  %13518 = vtanh.f32 %v6867_v46  ;;  %10925 = vmatmul.mubr.f32.gmra.mrb[22].mxu1 %v18654_v19  ;;  %7592 = vmatprep.mubr.f32.mxu0 %v18654_v19  ;;  %v13501_v54 = vpop.eup %13500  ;;  %v6629_v13 = vadd.f32 %v21021_v16, %v15273_v24  ;;  %v21024_v42 = vld [vmem:[#allocation95_spill] sm:$0xff]  ;;  %v20171_v3 = vmax.f32 %v18670_v2, 0.0 }
 0x930   : > { %13520 = vrcp.f32 %v6803_v11  ;;  %v6868_v5 = vadd.f32 %v6852_v39, %v6621_v55  ;;  %12196 = vmatprep.subr.bf16.mxu1 %v21020_v0  ;;  %7593 = vmatmul.mubr.f32.gmra.mrb[62].mxu0 %v20165_v37  ;;  %v13503_v61 = vpop.eup %13502  ;;  %v6711_v29 = vadd.f32 1.0, %v13501_v54  ;;  %v9767_v11 = vmul.f32 -1.442695, %v6486_v15  ;;  %v21025_v46 = vld [vmem:[#allocation43_spill] sm:$0xff]  ;;  %v21028_v37 = vld [vmem:[#allocation110_spill] sm:$0xff] }
 0x931   : > { %13522 = vrcp.f32 %v6804_v51  ;;  %v6627_v55 = vadd.f32 %v21026_v41, %v15278_v17  ;;  %v6805_v15 = vadd.f32 1.0, %v13503_v61  ;;  %v21033_v61 = vld [vmem:[#allocation78_spill] sm:$0xff] }
 0x932   : > { %v13505_v14 = vpop.eup %13504  ;;  %13524 = vtanh.f32 %v6868_v5  ;;  %12198 = vmatpush1.bf16.msra.mxu1 %v21023_v52  ;;  %v21027_v5 = vld [vmem:[#allocation106_spill] sm:$0xff] }
 0x933   : > { %v13507_v12 = vpop.eup %13506  ;;  %13526 = vpow2.f32 %v9766_v59  ;;  %v6897_v23 = vsub.f32 %v21024_v42, %v13505_v14  ;;  %12200 = vmatprep.subr.bf16.mxu1 %v21025_v46  ;;  %v6635_v16 = vadd.f32 %v21027_v5, %v15273_v24  ;;  %v18682_v42 = vadd.f32 %v18485_v32, %v21029_v38 }
 0x934   : > { %v13509_v51 = vpop.eup %13508  ;;  %v6853_v39 = vmul.f32 %v13507_v12, %v6629_v13  ;;  %13528 = vrcp.f32 %v6711_v29 }
 0x935   : > { %v13511_v54 = vpop.eup %13510  ;;  %v6913_v36 = vmul.f32 %v13499_v20, %v6897_v23  ;;  %v6898_v10 = vsub.f32 %v21028_v37, %v13509_v51  ;;  %13530 = vpow2.f32 %v9767_v11  ;;  %v21032_v20 = vld [vmem:[#allocation47_spill] sm:$0xff] }
 0x936   : > { %v13513_v49 = vpop.eup %13512  ;;  %v6869_v59 = vadd.f32 %v6853_v39, %v6627_v55  ;;  %12202 = vmatpush1.bf16.msra.mxu1 %v21030_v47  ;;  %v6633_v55 = vadd.f32 %v21033_v61, %v15278_v17  ;;  %v21039_v61 = vld [vmem:[#allocation103_spill] sm:$0xff]  ;;  %v21056_v47 = vld [vmem:[#allocation62_spill] sm:$0xff] }
 0x937   : > { %v13515_v13 = vpop.eup %13514  ;;  %v6712_v29 = vadd.f32 1.0, %v13513_v49  ;;  %v18686_v12 = vadd.f32 %v13505_v14, %v6913_v36  ;;  %v6914_v41 = vmul.f32 %v13511_v54, %v6898_v10  ;;  %12204 = vmatprep.subr.bf16.mxu1 %v21032_v20  ;;  %v21035_v14 = vld [vmem:[#allocation14_spill] sm:$0xff]  ;;  %v21036_v54 = vld [vmem:[#allocation15_spill] sm:$0xff]  ;;  %v21041_v10 = vld [vmem:[#allocation97_spill] sm:$0xff] }
 0x938   : > { %v13517_v37 = vpop.eup %13516  ;;  %13532 = vtanh.f32 %v6869_v59  ;;  %v18700_v11 = vadd.f32 %v18485_v32, %v21035_v14  ;;  %v6641_v14 = vadd.f32 %v21039_v61, %v15273_v24 }
 0x939   : > { %21031 = vst [vmem:[#allocation87_spill] sm:$0xff] %v18686_v12  ;;  %v13519_v23 = vpop.eup %13518  ;;  %v6854_v38 = vmul.f32 %v13517_v37, %v6635_v16  ;;  %13534 = vrcp.f32 %v6712_v29  ;;  %10927 = vmatprep.mubr.f32.mxu1 %v18686_v12  ;;  %7598 = vmatprep.mubr.f32.mxu0 %v18686_v12  ;;  %v18693_v39 = vadd.f32 %v13509_v51, %v6914_v41  ;;  %v21037_v16 = vld [vmem:[#allocation50_spill] sm:$0xff]  ;;  %v6806_v29 = vadd.f32 1.0, %v13515_v13  ;;  %v21038_v41 = vld [vmem:[#allocation51_spill] sm:$0xff] }
 0x93a   : > { %v13521_v49 = vpop.eup %13520  ;;  %13536 = vrcp.f32 %v6805_v15  ;;  %7599 = vmatmul.mubr.f32.gmra.mrb[64].mxu0 %v20171_v3  ;;  %v6899_v5 = vsub.f32 %v21036_v54, %v13519_v23  ;;  %12206 = vmatpush1.bf16.msra.mxu1 %v21037_v16  ;;  %v21040_v3 = vld [vmem:[#allocation102_spill] sm:$0xff]  ;;  %v21046_v16 = vld [vmem:[#allocation55_spill] sm:$0xff] }
 0x93b   : > { %21034 = vst [vmem:[#allocation93_spill] sm:$0xff] %v18693_v39  ;;  %v13523_v36 = vpop.eup %13522  ;;  %v6870_v59 = vadd.f32 %v6854_v38, %v6633_v55  ;;  %10928 = vmatmul.mubr.f32.gmra.mrb[24].mxu1 %v18693_v39  ;;  %7604 = vmatprep.mubr.f32.mxu0 %v18693_v39  ;;  %v18712_v55 = vadd.f32 %v18485_v32, %v21041_v10  ;;  %v21042_v38 = vmax.f32 %v18682_v42, 0.0 }
 0x93c   : > { %v13525_v51 = vpop.eup %13524  ;;  %v6915_v15 = vmul.f32 %v13521_v49, %v6899_v5  ;;  %12208 = vmatprep.subr.bf16.mxu1 %v21038_v41  ;;  %v21044_v5 = vld [vmem:[#allocation54_spill] sm:$0xff]  ;;  %v21045_v41 = vld [vmem:[#allocation85_spill] sm:$0xff] }
 0x93d   : > { %v13527_v37 = vpop.eup %13526  ;;  %13538 = vtanh.f32 %v6870_v59  ;;  %v6900_v54 = vsub.f32 %v21040_v3, %v13525_v51  ;;  %v6639_v61 = vadd.f32 %v21045_v41, %v15278_v17 }
 0x93e   : > { %v13529_v27 = vpop.eup %13528  ;;  %7605 = vmatmul.mubr.f32.gmra.mrb[66].mxu0 %v21042_v38  ;;  %v18717_v49 = vadd.f32 %v13519_v23, %v6915_v15  ;;  %12210 = vmatpush1.bf16.msra.mxu1 %v21044_v5  ;;  %13540 = vrcp.f32 %v6806_v29  ;;  %v6807_v20 = vadd.f32 1.0, %v13527_v37  ;;  %v21048_v15 = vld [vmem:[#allocation94_spill] sm:$0xff] }
 0x93f   : > { %v6855_v59 = vmul.f32 %v13529_v27, %v6641_v14  ;;  %v6916_v3 = vmul.f32 %v13523_v36, %v6900_v54  ;;  %12212 = vmatprep.subr.bf16.mxu1 %v21046_v16  ;;  %v13531_v10 = vpop.eup %13530  ;;  %v6647_v5 = vadd.f32 %v21048_v15, %v15273_v24  ;;  %v21049_v27 = vmax.f32 %v18700_v11, 0.0  ;;  %v21050_v36 = vld [vmem:[#allocation108_spill] sm:$0xff]  ;;  %v21051_v14 = vld [vmem:[#allocation58_spill] sm:$0xff] }
 0x940   : > { %21043 = vst [vmem:[#allocation12_spill] sm:$0xff] %v18717_v49  ;;  %10930 = vmatprep.mubr.f32.mxu1 %v18717_v49  ;;  %7610 = vmatprep.mubr.f32.mxu0 %v18717_v49  ;;  %v18734_v29 = vadd.f32 %v18485_v32, %v21050_v36  ;;  %v6808_v16 = vadd.f32 1.0, %v13531_v10 }
 0x941   : > { %v6871_v13 = vadd.f32 %v6855_v59, %v6639_v61  ;;  %v18725_v38 = vadd.f32 %v13525_v51, %v6916_v3  ;;  %v21052_v51 = vld [vmem:[#allocation86_spill] sm:$0xff]  ;;  %v21053_v59 = vld [vmem:[#allocation101_spill] sm:$0xff] }
 0x942   : > { %v13533_v23 = vpop.eup %13532  ;;  %7611 = vmatmul.mubr.f32.gmra.mrb[68].mxu0 %v21049_v27  ;;  %12214 = vmatpush1.bf16.msra.mxu1 %v21051_v14  ;;  %v6645_v3 = vadd.f32 %v21053_v59, %v15278_v17  ;;  %v21054_v27 = vld [vmem:[#allocation59_spill] sm:$0xff]  ;;  %v20173_v14 = vmax.f32 %v18734_v29, 0.0 }
 0x943   : > { %21047 = vst [vmem:[#allocation91_spill] sm:$0xff] %v18725_v38  ;;  %v13535_v54 = vpop.eup %13534  ;;  %13542 = vtanh.f32 %v6871_v13  ;;  %10931 = vmatmul.mubr.f32.gmra.mrb[26].mxu1 %v18725_v38  ;;  %7616 = vmatprep.mubr.f32.mxu0 %v18725_v38  ;;  %v6901_v37 = vsub.f32 %v21052_v51, %v13533_v23  ;;  %v21055_v13 = vmax.f32 %v18712_v55, 0.0  ;;  %v21057_v51 = vld [vmem:[#allocation99_spill] sm:$0xff] }
 0x944   : > { %v13537_v61 = vpop.eup %13536  ;;  %v6856_v15 = vmul.f32 %v13535_v54, %v6647_v5  ;;  %12216 = vmatprep.subr.bf16.mxu1 %v21054_v27  ;;  %13544 = vrcp.f32 %v6807_v20  ;;  %v18749_v52 = vadd.f32 %v18485_v32, %v21057_v51  ;;  %v21059_v5 = vld [vmem:[#allocation63_spill] sm:$0xff]  ;;  %v21060_v20 = vld [vmem:[#allocation96_spill] sm:$0xff] }
 0x945   : > { %v6917_v36 = vmul.f32 %v13537_v61, %v6901_v37  ;;  %v21061_v61 = vld [vmem:[#allocation66_spill] sm:$0xff] }
 0x946   : > { %v6872_v41 = vadd.f32 %v6856_v15, %v6645_v3  ;;  %7617 = vmatmul.mubr.f32.gmra.mrb[70].mxu0 %v21055_v13  ;;  %12218 = vmatpush1.bf16.msra.mxu1 %v21056_v47  ;;  %v21062_v3 = vld [vmem:[#allocation67_spill] sm:$0xff]  ;;  %v21071_v47 = vld [vmem:[#allocation74_spill] sm:$0xff] }
 0x947   : > { %v13539_v46 = vpop.eup %13538  ;;  %v18751_v59 = vadd.f32 %v13533_v23, %v6917_v36  ;;  %12220 = vmatprep.subr.bf16.mxu1 %v21059_v5  ;;  %v20174_v23 = vmax.f32 %v18749_v52, 0.0  ;;  %v21064_v36 = vld [vmem:[#allocation22_spill] sm:$0xff] }
 0x948   : > { %13546 = vtanh.f32 %v6872_v41  ;;  %v6902_v54 = vsub.f32 %v21060_v20, %v13539_v46  ;;  %v13541_v10 = vpop.eup %13540  ;;  %v18766_v13 = vadd.f32 %v18485_v32, %v21064_v36 }
 0x949   : > { %21058 = vst [vmem:[#allocation100_spill] sm:$0xff] %v18751_v59  ;;  %10933 = vmatprep.mubr.f32.mxu1 %v18751_v59  ;;  %7622 = vmatprep.mubr.f32.mxu0 %v18751_v59  ;;  %13548 = vrcp.f32 %v6808_v16  ;;  %v21065_v16 = vld [vmem:[#allocation112_spill] sm:$0xff] }
 0x94a   : > { %7623 = vmatmul.mubr.f32.gmra.mrb[72].mxu0 %v20173_v14  ;;  %v6918_v37 = vmul.f32 %v13541_v10, %v6902_v54  ;;  %12222 = vmatpush1.bf16.msra.mxu1 %v21061_v61  ;;  %v21066_v54 = vld [vmem:[#allocation70_spill] sm:$0xff] }
 0x94b   : > { %12224 = vmatprep.subr.bf16.mxu1 %v21062_v3  ;;  %v21068_v14 = vld [vmem:[#allocation18_spill] sm:$0xff] }
 0x94c   : > { %v18762_v15 = vadd.f32 %v13539_v46, %v6918_v37  ;;  %v21067_v46 = vld [vmem:[#allocation72_spill] sm:$0xff]  ;;  %v7323_v37 = vmax.f32 %v18766_v13, 0.0  ;;  %v18778_v3 = vadd.f32 %v18485_v32, %v21068_v14 }
 0x94d   : > { %v13543_v41 = vpop.eup %13542 }
 0x94e   : > { %21063 = vst [vmem:[#allocation19_spill] sm:$0xff] %v18762_v15  ;;  %10934 = vmatmul.mubr.f32.gmra.mrb[28].mxu1 %v18762_v15  ;;  %7628 = vmatprep.mubr.f32.mxu0 %v18762_v15  ;;  %v6903_v51 = vsub.f32 %v21065_v16, %v13543_v41  ;;  %v13545_v20 = vpop.eup %13544  ;;  %v21070_v16 = vld [vmem:[#allocation92_spill] sm:$0xff]  ;;  %v20175_v32 = vmax.f32 %v18778_v3, 0.0 }
 0x94f   : > { %7629 = vmatmul.mubr.f32.gmra.mrb[74].mxu0 %v20174_v23  ;;  %12226 = vmatpush1.bf16.msra.mxu1 %v21066_v54 }
 0x950   : > { %v6919_v10 = vmul.f32 %v13545_v20, %v6903_v51  ;;  %12228 = vmatprep.subr.bf16.mxu1 %v21067_v46  ;;  %v21072_v20 = vld [vmem:[#allocation76_spill] sm:$0xff] }
 0x952   : > { %v13547_v36 = vpop.eup %13546  ;;  %v18780_v61 = vadd.f32 %v13543_v41, %v6919_v10  ;;  %v9864_v41 = vld [vmem:[%s14386_s12 + $0x380] sm:$0xff]  ;;  %v21074_v10 = vmax.f32 %v18489_v35, 0.0  ;;  %v21078_v35 = vld [vmem:[#allocation17_spill] sm:$0xff] }
 0x953   : > { %v6904_v5 = vsub.f32 %v21070_v16, %v13547_v36  ;;  %12230 = vmatpush1.bf16.msra.mxu1 %v21071_v47  ;;  %v13549_v23 = vpop.eup %13548  ;;  %v9868_v16 = vld [vmem:[%s14386_s12 + $0x3a0] sm:$0xff] }
 0x954   : > { %21069 = vst [vmem:[#allocation111_spill] sm:$0xff] %v18780_v61  ;;  %10936 = vmatprep.mubr.f32.mxu1 %v18780_v61  ;;  %7634 = vmatprep.mubr.f32.mxu0 %v18780_v61 }
 0x955   : > { %7635 = vmatmul.mubr.f32.gmra.mrb[76].mxu0 %v7323_v37  ;;  %v6920_v51 = vmul.f32 %v13549_v23, %v6904_v5  ;;  %12296 = vmatprep.subr.bf16.mxu1 %v21072_v20  ;;  %v9865_v5 = vld [vmem:[%s14386_s12 + $0x388] sm:$0xff]  ;;  %v9866_v23 = vld [vmem:[%s14386_s12 + $0x390] sm:$0xff] }
 0x957   : > { %v18790_v14 = vadd.f32 %v13547_v36, %v6920_v51  ;;  %v9867_v36 = vld [vmem:[%s14386_s12 + $0x398] sm:$0xff]  ;;  %v21075_v51 = vld [vmem:[#allocation16_spill] sm:$0xff] }
 0x959   : > { %21073 = vst [vmem:[#allocation26_spill] sm:$0xff] %v18790_v14  ;;  %10937 = vmatmul.mubr.f32.gmra.mrb[30].mxu1 %v18790_v14  ;;  %7640 = vmatprep.mubr.f32.mxu0 %v18790_v14 }
 0x95a   : > { %7389 = vmatprep.mubr.f32.mxu1 %v18513_v28  ;;  %7641 = vmatmul.mubr.f32.gmra.mrb[78].mxu0 %v20175_v32  ;;  %v21077_v32 = vmax.f32 %v18504_v26, 0.0  ;;  %v21081_v26 = vmax.f32 %v18522_v31, 0.0  ;;  %v21085_v31 = vmax.f32 %v18541_v22, 0.0  ;;  %v21089_v22 = vmax.f32 %v18572_v44, 0.0 }
 0x95b   : > { %11043 = vmatprep.mubr.msk.f32.mxu0 %vm1103_vm0, %v9864_v41  ;;  %v21076_v41 = vld [vmem:[#allocation77_spill] sm:$0xff]  ;;  %v21093_v44 = vmax.f32 %v18588_v62, 0.0  ;;  %v21097_v62 = vmax.f32 %v18609_v50, 0.0 }
 0x95c   : > { %v21102_v50 = vld [vmem:[#allocation41_spill] sm:$0xff] }
 0x95d   : > { %7390 = vmatmul.mubr.f32.vlgmr.msra.gmra.mrb[32].mxu1 %v21074_v10  ;;  %v21079_v10 = vld [vmem:[#allocation20_spill] sm:$0xff] }
 0x95e   : > { %7395 = vmatprep.mubr.f32.mxu1 %v18524_v1  ;;  %11044 = vmatmul.mubr.msk.f32.vlgmr.msra.gmra.mrb[80].mxu0 %vm1103_vm0, %v9865_v5  ;;  %v9869_v5 = vld [vmem:[%s14386_s12 + $0x3a8] sm:$0xff] }
 0x95f   : > { %11046 = vmatprep.mubr.msk.f32.mxu0 %vm1103_vm0, %v9866_v23  ;;  %12298 = vmatpush3.bf16.msra.mxu1 %v21072_v20  ;;  %v9870_v23 = vld [vmem:[%s14386_s12 + $0x3b0] sm:$0xff] }
 0x960   : > { %12406 = vmatpush1.bf16.msra.mxu0 %v21075_v51  ;;  %12300 = vmatprep.subr.bf16.mxu1 %v21076_v41  ;;  %v21080_v51 = vld [vmem:[#allocation79_spill] sm:$0xff] }
 0x961   : > { %7396 = vmatmul.mubr.f32.gmra.mrb[34].mxu1 %v21077_v32  ;;  %12408 = vmatprep.subr.bf16.mxu0 %v21078_v35  ;;  %v21082_v32 = vld [vmem:[#allocation21_spill] sm:$0xff]  ;;  %v21083_v35 = vld [vmem:[#allocation24_spill] sm:$0xff] }
 0x962   : > { %7401 = vmatprep.mubr.f32.mxu1 %v18557_v6  ;;  %11047 = vmatmul.mubr.msk.f32.gmra.mrb[82].mxu0 %vm1103_vm0, %v9867_v36  ;;  %v9871_v36 = vld [vmem:[%s14386_s12 + $0x3b8] sm:$0xff] }
 0x963   : > { %11049 = vmatprep.mubr.msk.f32.mxu0 %vm1103_vm0, %v9868_v16  ;;  %12302 = vmatpush3.bf16.msra.mxu1 %v21076_v41  ;;  %v9872_v16 = vld [vmem:[%s14386_s12 + $0x3c0] sm:$0xff] }
 0x964   : > { %12410 = vmatpush1.bf16.msra.mxu0 %v21079_v10  ;;  %12304 = vmatprep.subr.bf16.mxu1 %v21080_v51  ;;  %v21084_v10 = vld [vmem:[#allocation80_spill] sm:$0xff] }
 0x965   : > { %7402 = vmatmul.mubr.f32.gmra.mrb[36].mxu1 %v21081_v26  ;;  %12412 = vmatprep.subr.bf16.mxu0 %v21082_v32  ;;  %v21086_v26 = vld [vmem:[#allocation25_spill] sm:$0xff]  ;;  %v21087_v32 = vld [vmem:[#allocation28_spill] sm:$0xff] }
 0x966   : > { %7407 = vmatprep.mubr.f32.mxu1 %v18568_v48  ;;  %11050 = vmatmul.mubr.msk.f32.gmra.mrb[84].mxu0 %vm1103_vm0, %v9869_v5  ;;  %v9873_v5 = vld [vmem:[%s14386_s12 + $0x3c8] sm:$0xff] }
 0x967   : > { %11052 = vmatprep.mubr.msk.f32.mxu0 %vm1103_vm0, %v9870_v23  ;;  %12306 = vmatpush3.bf16.msra.mxu1 %v21080_v51  ;;  %v9874_v23 = vld [vmem:[%s14386_s12 + $0x3d0] sm:$0xff] }
 0x968   : > { %12414 = vmatpush1.bf16.msra.mxu0 %v21083_v35  ;;  %12308 = vmatprep.subr.bf16.mxu1 %v21084_v10  ;;  %v21088_v35 = vld [vmem:[#allocation81_spill] sm:$0xff] }
 0x969   : > { %7408 = vmatmul.mubr.f32.gmra.mrb[38].mxu1 %v21085_v31  ;;  %12416 = vmatprep.subr.bf16.mxu0 %v21086_v26  ;;  %v21090_v31 = vld [vmem:[#allocation29_spill] sm:$0xff]  ;;  %v21091_v26 = vld [vmem:[#allocation32_spill] sm:$0xff] }
 0x96a   : > { %7413 = vmatprep.mubr.f32.mxu1 %v18597_v30  ;;  %11053 = vmatmul.mubr.msk.f32.gmra.mrb[86].mxu0 %vm1103_vm0, %v9871_v36  ;;  %v9875_v36 = vld [vmem:[%s14386_s12 + $0x3d8] sm:$0xff] }
 0x96b   : > { %11055 = vmatprep.mubr.msk.f32.mxu0 %vm1103_vm0, %v9872_v16  ;;  %12310 = vmatpush3.bf16.msra.mxu1 %v21084_v10  ;;  %v9876_v16 = vld [vmem:[%s14386_s12 + $0x3e0] sm:$0xff] }
 0x96c   : > { %12418 = vmatpush1.bf16.msra.mxu0 %v21087_v32  ;;  %12312 = vmatprep.subr.bf16.mxu1 %v21088_v35  ;;  %v21092_v32 = vld [vmem:[#allocation82_spill] sm:$0xff] }
 0x96d   : > { %7414 = vmatmul.mubr.f32.gmra.mrb[40].mxu1 %v21089_v22  ;;  %12420 = vmatprep.subr.bf16.mxu0 %v21090_v31  ;;  %v21094_v22 = vld [vmem:[#allocation33_spill] sm:$0xff]  ;;  %v21095_v31 = vld [vmem:[#allocation36_spill] sm:$0xff] }
 0x96e   : > { %7419 = vmatprep.mubr.f32.mxu1 %v18613_v53  ;;  %11056 = vmatmul.mubr.msk.f32.gmra.mrb[88].mxu0 %vm1103_vm0, %v9873_v5  ;;  %v9877_v5 = vld [vmem:[%s14386_s12 + $0x3e8] sm:$0xff] }
 0x96f   : > { %11058 = vmatprep.mubr.msk.f32.mxu0 %vm1103_vm0, %v9874_v23  ;;  %12314 = vmatpush3.bf16.msra.mxu1 %v21088_v35  ;;  %v9878_v23 = vld [vmem:[%s14386_s12 + $0x3f0] sm:$0xff] }
 0x970   : > { %12422 = vmatpush1.bf16.msra.mxu0 %v21091_v26  ;;  %12316 = vmatprep.subr.bf16.mxu1 %v21092_v32  ;;  %v21096_v26 = vld [vmem:[#allocation83_spill] sm:$0xff] }
 0x971   : > { %7420 = vmatmul.mubr.f32.gmra.mrb[42].mxu1 %v21093_v44  ;;  %12424 = vmatprep.subr.bf16.mxu0 %v21094_v22  ;;  %v21098_v44 = vld [vmem:[#allocation37_spill] sm:$0xff]  ;;  %v21100_v22 = vld [vmem:[#allocation84_spill] sm:$0xff] }
 0x972   : > { %7425 = vmatprep.mubr.f32.mxu1 %v18632_v7  ;;  %11059 = vmatmul.mubr.msk.f32.gmra.mrb[90].mxu0 %vm1103_vm0, %v9875_v36  ;;  %v9879_v36 = vld [vmem:[%s14386_s12 + $0x3f8] sm:$0xff] }
 0x973   : > { %11061 = vmatprep.mubr.msk.f32.mxu0 %vm1103_vm0, %v9876_v16  ;;  %12318 = vmatpush3.bf16.msra.mxu1 %v21092_v32  ;;  %v21099_v16 = vld [vmem:[#allocation40_spill] sm:$0xff] }
 0x974   : > { %12426 = vmatpush1.bf16.msra.mxu0 %v21095_v31  ;;  %12320 = vmatprep.subr.bf16.mxu1 %v21096_v26  ;;  %v21101_v31 = vmax.f32 %v18636_v33, 0.0  ;;  %v21107_v33 = vld [vmem:[#allocation48_spill] sm:$0xff] }
 0x975   : > { %7426 = vmatmul.mubr.f32.gmra.mrb[44].mxu1 %v21097_v62  ;;  %12428 = vmatprep.subr.bf16.mxu0 %v21098_v44  ;;  %v21105_v62 = vmax.f32 %v18670_v2, 0.0  ;;  %v21106_v44 = vld [vmem:[#allocation45_spill] sm:$0xff] }
 0x976   : > { %7431 = vmatprep.mubr.f32.mxu1 %v18654_v19  ;;  %11062 = vmatmul.mubr.msk.f32.gmra.mrb[92].mxu0 %vm1103_vm0, %v9877_v5  ;;  %v21103_v5 = vld [vmem:[#allocation44_spill] sm:$0xff]  ;;  %v21112_v2 = vld [vmem:[#allocation53_spill] sm:$0xff] }
 0x977   : > { %11064 = vmatprep.mubr.msk.f32.mxu0 %vm1103_vm0, %v9878_v23  ;;  %12322 = vmatpush3.bf16.msra.mxu1 %v21096_v26  ;;  %v21104_v23 = vld [vmem:[#allocation13_spill] sm:$0xff] }
 0x978   : > { %12430 = vmatpush1.bf16.msra.mxu0 %v21099_v16  ;;  %12324 = vmatprep.subr.bf16.mxu1 %v21100_v22  ;;  %v21108_v16 = vmax.f32 %v18682_v42, 0.0  ;;  %v21115_v42 = vld [vmem:[#allocation57_spill] sm:$0xff] }
 0x979   : > { %7432 = vmatmul.mubr.f32.gmra.mrb[46].mxu1 %v21101_v31  ;;  %12432 = vmatprep.subr.bf16.mxu0 %v21102_v50  ;;  %v21109_v31 = vld [vmem:[#allocation49_spill] sm:$0xff]  ;;  %v21111_v50 = vmax.f32 %v18700_v11, 0.0 }
 0x97a   : > { %7437 = vmatprep.mubr.f32.mxu1 %v18686_v12  ;;  %11065 = vmatmul.mubr.msk.f32.gmra.mrb[94].mxu0 %vm1103_vm0, %v9879_v36  ;;  %v21110_v36 = vld [vmem:[#allocation52_spill] sm:$0xff]  ;;  %v21118_v11 = vld [vmem:[#allocation61_spill] sm:$0xff] }
 0x97b   : > { %12326 = vmatpush3.bf16.msra.mxu1 %v21100_v22 }
 0x97c   : > { %12434 = vmatpush1.bf16.msra.mxu0 %v21103_v5  ;;  %12340 = vmatprep.subr.bf16.mxu1 %v21104_v23  ;;  %v21113_v5 = vld [vmem:[#allocation56_spill] sm:$0xff]  ;;  %v21114_v23 = vmax.f32 %v18712_v55, 0.0  ;;  %v21121_v55 = vld [vmem:[#allocation65_spill] sm:$0xff] }
 0x97d   : > { %7438 = vmatmul.mubr.f32.gmra.mrb[48].mxu1 %v21105_v62  ;;  %12436 = vmatprep.subr.bf16.mxu0 %v21106_v44  ;;  %v21116_v62 = vld [vmem:[#allocation60_spill] sm:$0xff]  ;;  %v21117_v44 = vmax.f32 %v18734_v29, 0.0  ;;  %v21123_v29 = vld [vmem:[#allocation69_spill] sm:$0xff] }
 0x97e   : > { %7443 = vmatprep.mubr.f32.mxu1 %v18693_v39 }
 0x980   : > { %12438 = vmatpush1.bf16.msra.mxu0 %v21107_v33  ;;  %v21119_v33 = vld [vmem:[#allocation64_spill] sm:$0xff] }
 0x981   : > { %7444 = vmatmul.mubr.f32.gmra.mrb[50].mxu1 %v21108_v16  ;;  %12440 = vmatprep.subr.bf16.mxu0 %v21109_v31  ;;  %v21120_v16 = vmax.f32 %v18749_v52, 0.0  ;;  %v21122_v31 = vld [vmem:[#allocation68_spill] sm:$0xff]  ;;  %v21125_v52 = vmax.f32 %v18778_v3, 0.0 }
 0x982   : > { %7449 = vmatprep.mubr.f32.mxu1 %v18717_v49 }
 0x984   : > { %12442 = vmatpush1.bf16.msra.mxu0 %v21110_v36  ;;  %v21124_v36 = vld [vmem:[#allocation71_spill] sm:$0xff] }
 0x985   : > { %7450 = vmatmul.mubr.f32.gmra.mrb[52].mxu1 %v21111_v50  ;;  %12444 = vmatprep.subr.bf16.mxu0 %v21112_v2  ;;  %v21126_v50 = vld [vmem:[#allocation73_spill] sm:$0xff]  ;;  %v21127_v2 = vld [vmem:[#allocation75_spill] sm:$0xff] }
 0x986   : > { %7455 = vmatprep.mubr.f32.mxu1 %v18725_v38 }
 0x988   : > { %12446 = vmatpush1.bf16.msra.mxu0 %v21113_v5 }
 0x989   : > { %7456 = vmatmul.mubr.f32.gmra.mrb[54].mxu1 %v21114_v23  ;;  %12448 = vmatprep.subr.bf16.mxu0 %v21115_v42  ;;  %v18931_v23 = vld [vmem:[%s19859_s5 + $0x2] ss:$0 sm:$0xff] }
 0x98a   : > { %7461 = vmatprep.mubr.f32.mxu1 %v18751_v59 }
 0x98c   : > { %12450 = vmatpush1.bf16.msra.mxu0 %v21116_v62 }
 0x98d   : > { %7462 = vmatmul.mubr.f32.gmra.mrb[56].mxu1 %v21117_v44  ;;  %12452 = vmatprep.subr.bf16.mxu0 %v21118_v11 }
 0x98e   : > { %7467 = vmatprep.mubr.f32.mxu1 %v18762_v15 }
 0x990   : > { %12454 = vmatpush1.bf16.msra.mxu0 %v21119_v33 }
 0x991   : > { %7468 = vmatmul.mubr.f32.gmra.mrb[58].mxu1 %v21120_v16  ;;  %12456 = vmatprep.subr.bf16.mxu0 %v21121_v55 }
 0x992   : > { %7473 = vmatprep.mubr.f32.mxu1 %v18780_v61 }
 0x994   : > { %12458 = vmatpush1.bf16.msra.mxu0 %v21122_v31 }
 0x995   : > { %7474 = vmatmul.mubr.f32.gmra.mrb[60].mxu1 %v7323_v37  ;;  %12460 = vmatprep.subr.bf16.mxu0 %v21123_v29 }
 0x996   : > { %7479 = vmatprep.mubr.f32.mxu1 %v18790_v14 }
 0x998   : > { %12462 = vmatpush1.bf16.msra.mxu0 %v21124_v36 }
 0x999   : > { %7480 = vmatmul.mubr.f32.gmra.mrb[62].mxu1 %v21125_v52  ;;  %12464 = vmatprep.subr.bf16.mxu0 %v21126_v50 }
 0x99c   : > { %12466 = vmatpush1.bf16.msra.mxu0 %v21127_v2 }
 0x99d   : > { %12468 = vmatprep.subr.bf16.mxu0 %v21072_v20 }
 0x9e4   : > { %v18924_v5 = vpop.f32.mrb[48].mxu0 }
 0x9e5   : > { %v18926_v13 = vpop.f32.mrb[49].mxu0 }
 0x9e7   : > { %v10917_v37 = vpop.f32.mrb[16].mxu1 }
 0x9e8   : > { %v7009_v3 = vadd.f32 %v18931_v23, %v10917_v37  ;;  %v7003_v42 = vpop.f32.mrb[17].mxu1  ;;  %v18935_v44 = vpop.f32.mrb[50].mxu0 }
 0x9e9   : > { %v7004_v62 = vadd.f32 %v18931_v23, %v7003_v42  ;;  %v18938_v11 = vpop.f32.mrb[51].mxu0 }
 0x9ea   : > { %9769 = vst [vmem:[%s15816_s23 + $0x288] sm:$0xff] %v7009_v3 }
 0x9eb   : > { %9768 = vst [vmem:[%s15816_s23 + $0x280] sm:$0xff] %v7004_v62 }
 0x9ec   : > { %v18941_v33 = vpop.f32.mrb[52].mxu0 }
 0x9ed   : > { %v18943_v55 = vpop.f32.mrb[53].mxu0 }
 0x9ef   : > { %v10920_v16 = vpop.f32.mrb[18].mxu1 }
 0x9f0   : > { %v7019_v31 = vadd.f32 %v18931_v23, %v10920_v16  ;;  %v7013_v29 = vpop.f32.mrb[19].mxu1  ;;  %v18948_v52 = vpop.f32.mrb[54].mxu0 }
 0x9f1   : > { %v7014_v36 = vadd.f32 %v18931_v23, %v7013_v29  ;;  %v18951_v50 = vpop.f32.mrb[55].mxu0 }
 0x9f2   : > { %9771 = vst [vmem:[%s15816_s23 + $0x298] sm:$0xff] %v7019_v31 }
 0x9f3   : > { %9770 = vst [vmem:[%s15816_s23 + $0x290] sm:$0xff] %v7014_v36 }
 0x9f6   : > { %v18953_v2 = vpop.f32.mrb[56].mxu0 }
 0x9f7   : > { %v18955_v37 = vpop.f32.mrb[57].mxu0 }
 0x9f8   : > { %v10923_v3 = vpop.f32.mrb[20].mxu1 }
 0x9f9   : > { %v7029_v42 = vadd.f32 %v18931_v23, %v10923_v3  ;;  %v7023_v62 = vpop.f32.mrb[21].mxu1 }
 0x9fa   : > { %v7024_v16 = vadd.f32 %v18931_v23, %v7023_v62  ;;  %v18959_v47 = vpop.f32.mrb[58].mxu0 }
 0x9fb   : > { %9773 = vst [vmem:[%s15816_s23 + $0x2a8] sm:$0xff] %v7029_v42  ;;  %v18962_v31 = vpop.f32.mrb[59].mxu0 }
 0x9fc   : > { %9772 = vst [vmem:[%s15816_s23 + $0x2a0] sm:$0xff] %v7024_v16 }
 0x9fe   : > { %v18965_v29 = vpop.f32.mrb[60].mxu0 }
 0x9ff   : > { %v18967_v36 = vpop.f32.mrb[61].mxu0 }
 0xa02   : > { %v10926_v14 = vpop.f32.mrb[22].mxu1 }
 0xa03   : > { %v7039_v46 = vadd.f32 %v18931_v23, %v10926_v14  ;;  %v7033_v3 = vpop.f32.mrb[23].mxu1  ;;  %v18970_v54 = vpop.f32.mrb[62].mxu0 }
 0xa04   : > { %v7034_v62 = vadd.f32 %v18931_v23, %v7033_v3  ;;  %v18973_v61 = vpop.f32.mrb[63].mxu0 }
 0xa05   : > { %9775 = vst [vmem:[%s15816_s23 + $0x2b8] sm:$0xff] %v7039_v46 }
 0xa06   : > { %9774 = vst [vmem:[%s15816_s23 + $0x2b0] sm:$0xff] %v7034_v62 }
 0xa0d   : > { %v18977_v42 = vpop.f32.mrb[64].mxu0 }
 0xa0e   : > { %21128 = vst [vmem:[#allocation98_spill] sm:$0xff] %v18977_v42  ;;  %v10929_v16 = vpop.f32.mrb[24].mxu1  ;;  %v18979_v15 = vpop.f32.mrb[65].mxu0 }
 0xa0f   : > { %21129 = vst [vmem:[#allocation105_spill] sm:$0xff] %v18979_v15  ;;  %v7049_v27 = vadd.f32 %v18931_v23, %v10929_v16  ;;  %v7043_v59 = vpop.f32.mrb[25].mxu1 }
 0xa10   : > { %v7044_v14 = vadd.f32 %v18931_v23, %v7043_v59 }
 0xa11   : > { %9777 = vst [vmem:[%s15816_s23 + $0x2c8] sm:$0xff] %v7049_v27  ;;  %v18984_v38 = vpop.f32.mrb[66].mxu0 }
 0xa12   : > { %21130 = vst [vmem:[#allocation89_spill] sm:$0xff] %v18984_v38  ;;  %9776 = vst [vmem:[%s15816_s23 + $0x2c0] sm:$0xff] %v7044_v14  ;;  %v18987_v3 = vpop.f32.mrb[67].mxu0 }
 0xa13   : > { %21131 = vst [vmem:[#allocation107_spill] sm:$0xff] %v18987_v3 }
 0xa15   : > { %v18989_v46 = vpop.f32.mrb[68].mxu0 }
 0xa16   : > { %21132 = vst [vmem:[#allocation104_spill] sm:$0xff] %v18989_v46  ;;  %v10932_v62 = vpop.f32.mrb[26].mxu1  ;;  %v18991_v49 = vpop.f32.mrb[69].mxu0 }
 0xa17   : > { %21133 = vst [vmem:[#allocation95_spill] sm:$0xff] %v18991_v49  ;;  %v7059_v39 = vadd.f32 %v18931_v23, %v10932_v62  ;;  %v7053_v12 = vpop.f32.mrb[27].mxu1 }
 0xa18   : > { %v7054_v16 = vadd.f32 %v18931_v23, %v7053_v12 }
 0xa19   : > { %9779 = vst [vmem:[%s15816_s23 + $0x2d8] sm:$0xff] %v7059_v39  ;;  %v18996_v59 = vpop.f32.mrb[70].mxu0 }
 0xa1a   : > { %21134 = vst [vmem:[#allocation23_spill] sm:$0xff] %v18996_v59  ;;  %9778 = vst [vmem:[%s15816_s23 + $0x2d0] sm:$0xff] %v7054_v16  ;;  %v18999_v27 = vpop.f32.mrb[71].mxu0 }
 0xa1b   : > { %21135 = vst [vmem:[#allocation106_spill] sm:$0xff] %v18999_v27 }
 0xa1d   : > { %v19001_v14 = vpop.f32.mrb[72].mxu0 }
 0xa1e   : > { %21136 = vst [vmem:[#allocation110_spill] sm:$0xff] %v19001_v14  ;;  %v19003_v22 = vpop.f32.mrb[73].mxu0 }
 0xa1f   : > { %21137 = vst [vmem:[#allocation109_spill] sm:$0xff] %v19003_v22 }
 0xa21   : > { %v10935_v0 = vpop.f32.mrb[28].mxu1 }
 0xa22   : > { %v7069_v56 = vadd.f32 %v18931_v23, %v10935_v0  ;;  %v7063_v62 = vpop.f32.mrb[29].mxu1  ;;  %v19006_v26 = vpop.f32.mrb[74].mxu0 }
 0xa23   : > { %21138 = vst [vmem:[#allocation78_spill] sm:$0xff] %v19006_v26  ;;  %v7064_v12 = vadd.f32 %v18931_v23, %v7063_v62  ;;  %v19009_v39 = vpop.f32.mrb[75].mxu0 }
 0xa24   : > { %21139 = vst [vmem:[#allocation14_spill] sm:$0xff] %v19009_v39  ;;  %9781 = vst [vmem:[%s15816_s23 + $0x2e8] sm:$0xff] %v7069_v56 }
 0xa25   : > { %9780 = vst [vmem:[%s15816_s23 + $0x2e0] sm:$0xff] %v7064_v12 }
 0xa28   : > { %v19013_v16 = vpop.f32.mrb[76].mxu0 }
 0xa29   : > { %21140 = vst [vmem:[#allocation15_spill] sm:$0xff] %v19013_v16  ;;  %v19015_v59 = vpop.f32.mrb[77].mxu0 }
 0xa2a   : > { %21141 = vst [vmem:[#allocation103_spill] sm:$0xff] %v19015_v59 }
 0xa2c   : > { %v10938_v14 = vpop.f32.mrb[30].mxu1 }
 0xa2d   : > { %v7079_v22 = vadd.f32 %v18931_v23, %v10938_v14  ;;  %v7073_v40 = vpop.f32.mrb[31].mxu1  ;;  %v19018_v32 = vpop.f32.mrb[78].mxu0 }
 0xa2e   : > { %21142 = vst [vmem:[#allocation102_spill] sm:$0xff] %v19018_v32  ;;  %v7074_v0 = vadd.f32 %v18931_v23, %v7073_v40  ;;  %v19021_v58 = vpop.f32.mrb[79].mxu0 }
 0xa2f   : > { %21143 = vst [vmem:[#allocation97_spill] sm:$0xff] %v19021_v58  ;;  %9783 = vst [vmem:[%s15816_s23 + $0x2f8] sm:$0xff] %v7079_v22 }
 0xa30   : > { %9782 = vst [vmem:[%s15816_s23 + $0x2f0] sm:$0xff] %v7074_v0  ;;  %v7391_v62 = vpop.f32.mrb[32].mxu1 }
 0xa31   : > { %v7392_v56 = vadd.f32 %v7391_v62, %v15230_v18  ;;  %v7393_v12 = vpop.f32.mrb[33].mxu1  ;;  %v19026_v26 = vpop.f32.mrb[80].mxu0 }
 0xa32   : > { %v19028_v16 = vpop.f32.mrb[81].mxu0  ;;  %v7394_v40 = vadd.f32 %v7393_v12, %v15233_v45 }
 0xa33   : > { %v9816_v59 = vmul.f32 -1.442695, %v7392_v56 }
 0xa34   : > { %v7397_v39 = vpop.f32.mrb[34].mxu1 }
 0xa35   : > { %13550 = vpow2.f32 %v9816_v59  ;;  %v7398_v14 = vadd.f32 %v7397_v39, %v15230_v18  ;;  %v7399_v32 = vpop.f32.mrb[35].mxu1  ;;  %v19031_v27 = vpop.f32.mrb[82].mxu0  ;;  %v9832_v59 = vmul.f32 -1.442695, %v7394_v40 }
 0xa36   : > { %v19034_v22 = vpop.f32.mrb[83].mxu0  ;;  %v7400_v0 = vadd.f32 %v7399_v32, %v15233_v45 }
 0xa37   : > { %v9817_v23 = vmul.f32 -1.442695, %v7398_v14 }
 0xa38   : > { %v7403_v62 = vpop.f32.mrb[36].mxu1  ;;  %v9833_v39 = vmul.f32 -1.442695, %v7400_v0 }
 0xa39   : > { %13552 = vpow2.f32 %v9817_v23  ;;  %v7404_v58 = vadd.f32 %v7403_v62, %v15230_v18  ;;  %v7405_v46 = vpop.f32.mrb[37].mxu1  ;;  %v19038_v56 = vpop.f32.mrb[84].mxu0 }
 0xa3a   : > { %v19040_v19 = vpop.f32.mrb[85].mxu0  ;;  %v7406_v62 = vadd.f32 %v7405_v46, %v15233_v45 }
 0xa3b   : > { %v9818_v49 = vmul.f32 -1.442695, %v7404_v58 }
 0xa3c   : > { %v7409_v43 = vpop.f32.mrb[38].mxu1 }
 0xa3d   : > { %13554 = vpow2.f32 %v9818_v49  ;;  %v7410_v12 = vadd.f32 %v7409_v43, %v15230_v18  ;;  %v7411_v35 = vpop.f32.mrb[39].mxu1  ;;  %v19043_v14 = vpop.f32.mrb[86].mxu0 }
 0xa3e   : > { %21144 = vst [vmem:[#allocation85_spill] sm:$0xff] %v19043_v14  ;;  %13556 = vpow2.f32 %v9832_v59  ;;  %v19045_v32 = vpop.f32.mrb[87].mxu0  ;;  %v9834_v59 = vmul.f32 -1.442695, %v7406_v62  ;;  %v7412_v3 = vadd.f32 %v7411_v35, %v15233_v45 }
 0xa3f   : > { %21145 = vst [vmem:[#allocation94_spill] sm:$0xff] %v19045_v32  ;;  %v13551_v23 = vpop.eup %13550  ;;  %13558 = vpow2.f32 %v9833_v39  ;;  %v9819_v8 = vmul.f32 -1.442695, %v7410_v12 }
 0xa40   : > { %v7695_v40 = vadd.f32 1.0, %v13551_v23  ;;  %v7415_v38 = vpop.f32.mrb[40].mxu1 }
 0xa41   : > { %13560 = vpow2.f32 %v9819_v8  ;;  %v7416_v58 = vadd.f32 %v7415_v38, %v15230_v18  ;;  %v7417_v0 = vpop.f32.mrb[41].mxu1  ;;  %v19049_v49 = vpop.f32.mrb[88].mxu0 }
 0xa42   : > { %21146 = vst [vmem:[#allocation108_spill] sm:$0xff] %v19049_v49  ;;  %13562 = vrcp.f32 %v7695_v40  ;;  %v19051_v43 = vpop.f32.mrb[89].mxu0  ;;  %v7418_v46 = vadd.f32 %v7417_v0, %v15233_v45 }
 0xa43   : > { %21147 = vst [vmem:[#allocation86_spill] sm:$0xff] %v19051_v43  ;;  %v13553_v14 = vpop.eup %13552  ;;  %v9820_v42 = vmul.f32 -1.442695, %v7416_v58  ;;  %v9835_v43 = vmul.f32 -1.442695, %v7412_v3  ;;  %v7555_v3 = vadd.f32 %v18926_v13, %v15273_v24 }
 0xa44   : > { %v7696_v39 = vadd.f32 1.0, %v13553_v14  ;;  %v7421_v12 = vpop.f32.mrb[42].mxu1  ;;  %v9836_v58 = vmul.f32 -1.442695, %v7418_v46 }
 0xa45   : > { %13564 = vpow2.f32 %v9820_v42  ;;  %v7422_v8 = vadd.f32 %v7421_v12, %v15230_v18  ;;  %v7423_v23 = vpop.f32.mrb[43].mxu1  ;;  %v19056_v38 = vpop.f32.mrb[90].mxu0 }
 0xa46   : > { %21148 = vst [vmem:[#allocation101_spill] sm:$0xff] %v19056_v38  ;;  %13566 = vrcp.f32 %v7696_v39  ;;  %v19058_v49 = vpop.f32.mrb[91].mxu0  ;;  %v7424_v39 = vadd.f32 %v7423_v23, %v15233_v45 }
 0xa47   : > { %21149 = vst [vmem:[#allocation99_spill] sm:$0xff] %v19058_v49  ;;  %v13555_v40 = vpop.eup %13554  ;;  %13568 = vpow2.f32 %v9834_v59  ;;  %v9821_v62 = vmul.f32 -1.442695, %v7422_v8 }
 0xa48   : > { %v13557_v7 = vpop.eup %13556  ;;  %v7697_v35 = vadd.f32 1.0, %v13555_v40  ;;  %v7427_v14 = vpop.f32.mrb[44].mxu1  ;;  %v9837_v13 = vmul.f32 -1.442695, %v7424_v39 }
 0xa49   : > { %v13559_v32 = vpop.eup %13558  ;;  %13570 = vpow2.f32 %v9821_v62  ;;  %v7428_v42 = vadd.f32 %v7427_v14, %v15230_v18  ;;  %v7429_v0 = vpop.f32.mrb[45].mxu1  ;;  %v7791_v59 = vadd.f32 1.0, %v13557_v7 }
 0xa4a   : > { %v19061_v12 = vpop.f32.mrb[92].mxu0  ;;  %13572 = vrcp.f32 %v7697_v35  ;;  %v7792_v40 = vadd.f32 1.0, %v13559_v32  ;;  %v7430_v7 = vadd.f32 %v7429_v0, %v15233_v45 }
 0xa4b   : > { %21150 = vst [vmem:[#allocation96_spill] sm:$0xff] %v19061_v12  ;;  %v19064_v38 = vpop.f32.mrb[93].mxu0  ;;  %v13561_v49 = vpop.eup %13560  ;;  %13574 = vpow2.f32 %v9835_v43  ;;  %v9822_v46 = vmul.f32 -1.442695, %v7428_v42  ;;  %v7553_v12 = vadd.f32 %v18924_v5, %v15278_v17 }
 0xa4c   : > { %21151 = vst [vmem:[#allocation22_spill] sm:$0xff] %v19064_v38  ;;  %v13563_v8 = vpop.eup %13562  ;;  %v7698_v62 = vadd.f32 1.0, %v13561_v49  ;;  %13576 = vpow2.f32 %v9836_v58  ;;  %v7433_v14 = vpop.f32.mrb[46].mxu1  ;;  %v7561_v49 = vadd.f32 %v18938_v11, %v15273_v24 }
 0xa4d   : > { %v7839_v35 = vmul.f32 %v13563_v8, %v7555_v3  ;;  %13578 = vpow2.f32 %v9822_v46  ;;  %v7434_v23 = vadd.f32 %v7433_v14, %v15230_v18  ;;  %v7435_v38 = vpop.f32.mrb[47].mxu1  ;;  %v19071_v63 = vpop.f32.mrb[94].mxu0  ;;  %v9838_v14 = vmul.f32 -1.442695, %v7430_v7 }
 0xa4e   : > { %21152 = vst [vmem:[#allocation112_spill] sm:$0xff] %v19071_v63  ;;  %13580 = vrcp.f32 %v7698_v62  ;;  %v19074_v43 = vpop.f32.mrb[95].mxu0  ;;  %v7559_v62 = vadd.f32 %v18935_v44, %v15278_v17  ;;  %v7436_v63 = vadd.f32 %v7435_v38, %v15233_v45  ;;  %v7565_v44 = vadd.f32 %v18941_v33, %v15278_v17 }
 0xa4f   : > { %21153 = vst [vmem:[#allocation18_spill] sm:$0xff] %v19074_v43  ;;  %v13565_v32 = vpop.eup %13564  ;;  %v7855_v58 = vadd.f32 %v7839_v35, %v7553_v12  ;;  %13582 = vrcp.f32 %v7791_v59  ;;  %v9823_v3 = vmul.f32 -1.442695, %v7434_v23  ;;  %v7567_v12 = vadd.f32 %v18943_v55, %v15273_v24 }
 0xa50   : > { %v13567_v5 = vpop.eup %13566  ;;  %13584 = vrcp.f32 %v7792_v40  ;;  %v7699_v42 = vadd.f32 1.0, %v13565_v32  ;;  %v7439_v46 = vpop.f32.mrb[48].mxu1 }
 0xa51   : > { %v13569_v8 = vpop.eup %13568  ;;  %13586 = vtanh.f32 %v7855_v58  ;;  %v7840_v39 = vmul.f32 %v13567_v5, %v7561_v49  ;;  %v7441_v0 = vpop.f32.mrb[49].mxu1  ;;  %v9839_v49 = vmul.f32 -1.442695, %v7436_v63  ;;  %v7440_v58 = vadd.f32 %v7439_v46, %v15230_v18 }
 0xa52   : > { %13588 = vpow2.f32 %v9837_v13  ;;  %v7793_v40 = vadd.f32 1.0, %v13569_v8  ;;  %v7577_v46 = vadd.f32 %v18953_v2, %v15278_v17 }
 0xa53   : > { %v13571_v43 = vpop.eup %13570  ;;  %v7856_v11 = vadd.f32 %v7840_v39, %v7559_v62  ;;  %13590 = vrcp.f32 %v7699_v42  ;;  %v7573_v42 = vadd.f32 %v18951_v50, %v15273_v24 }
 0xa54   : > { %v13573_v59 = vpop.eup %13572  ;;  %v7700_v35 = vadd.f32 1.0, %v13571_v43  ;;  %13592 = vpow2.f32 %v9823_v3  ;;  %v7445_v23 = vpop.f32.mrb[50].mxu1  ;;  %v7571_v43 = vadd.f32 %v18948_v52, %v15278_v17  ;;  %v7579_v52 = vadd.f32 %v18955_v37, %v15273_v24 }
 0xa55   : > { %v13575_v32 = vpop.eup %13574  ;;  %13594 = vtanh.f32 %v7856_v11  ;;  %v7841_v13 = vmul.f32 %v13573_v59, %v7567_v12  ;;  %v19085_v7 = vpop.f32.mrb[51].mxu1  ;;  %v7446_v62 = vadd.f32 %v7445_v23, %v15230_v18  ;;  %v7583_v12 = vadd.f32 %v18959_v47, %v15278_v17 }
 0xa56   : > { %v13577_v38 = vpop.eup %13576  ;;  %13596 = vpow2.f32 %v9838_v14  ;;  %v7794_v33 = vadd.f32 1.0, %v13575_v32  ;;  %v9824_v59 = vmul.f32 -1.442695, %v7440_v58  ;;  %v7585_v47 = vadd.f32 %v18962_v31, %v15273_v24 }
 0xa57   : > { %v13579_v55 = vpop.eup %13578  ;;  %v7857_v5 = vadd.f32 %v7841_v13, %v7565_v44  ;;  %13598 = vrcp.f32 %v7700_v35  ;;  %v7795_v37 = vadd.f32 1.0, %v13577_v38  ;;  %v9825_v13 = vmul.f32 -1.442695, %v7446_v62 }
 0xa58   : > { %v13581_v3 = vpop.eup %13580  ;;  %13600 = vrcp.f32 %v7793_v40  ;;  %v7701_v8 = vadd.f32 1.0, %v13579_v55  ;;  %v7451_v39 = vpop.f32.mrb[52].mxu1  ;;  %v19104_v40 = vld [vmem:[%s19859_s5] ss:$0 sm:$0xff]  ;;  %v7442_v38 = vadd.f32 %v7441_v0, %v15233_v45 }
 0xa59   : > { %v13583_v14 = vpop.eup %13582  ;;  %13602 = vtanh.f32 %v7857_v5  ;;  %v7842_v63 = vmul.f32 %v13581_v3, %v7573_v42  ;;  %v19097_v11 = vpop.f32.mrb[53].mxu1  ;;  %v19108_v35 = vadd.f32 %v19104_v40, %v19028_v16  ;;  %v7452_v32 = vadd.f32 %v7451_v39, %v15230_v18 }
 0xa5a   : > { %v13585_v50 = vpop.eup %13584  ;;  %13604 = vpow2.f32 %v9839_v49  ;;  %v19116_v16 = vadd.f32 %v18965_v29, %v15278_v17 }
 0xa5b   : > { %v13587_v2 = vpop.eup %13586  ;;  %v7858_v23 = vadd.f32 %v7842_v63, %v7571_v43  ;;  %13606 = vrcp.f32 %v7701_v8  ;;  %v19123_v43 = vadd.f32 %v19104_v40, %v19026_v26  ;;  %v8307_v3 = vmax.f32 %v19108_v35, 0.0 }
 0xa5c   : > { %v13589_v44 = vpop.eup %13588  ;;  %13608 = vrcp.f32 %v7794_v33  ;;  %v7457_v49 = vpop.f32.mrb[54].mxu1  ;;  %v7887_v58 = vsub.f32 %v18513_v28, %v13587_v2  ;;  %v9826_v29 = vmul.f32 -1.442695, %v7452_v32 }
 0xa5d   : > { %v13591_v55 = vpop.eup %13590  ;;  %13610 = vtanh.f32 %v7858_v23  ;;  %v19119_v5 = vpop.f32.mrb[55].mxu1  ;;  %v7796_v8 = vadd.f32 1.0, %v13589_v44  ;;  %v7458_v23 = vadd.f32 %v7457_v49, %v15230_v18  ;;  %v8308_v49 = vmax.f32 %v19123_v43, 0.0 }
 0xa5e   : > { %v13593_v42 = vpop.eup %13592  ;;  %v7843_v31 = vmul.f32 %v13591_v55, %v7579_v52  ;;  %13612 = vpow2.f32 %v9824_v59  ;;  %v7903_v28 = vmul.f32 %v13583_v14, %v7887_v58  ;;  %v9840_v52 = vmul.f32 -1.442695, %v7442_v38 }
 0xa5f   : > { %v13595_v33 = vpop.eup %13594  ;;  %13614 = vrcp.f32 %v7795_v37  ;;  %v7702_v62 = vadd.f32 1.0, %v13593_v42  ;;  %v7448_v59 = vadd.f32 %v19085_v7, %v15233_v45  ;;  %v19141_v7 = vadd.f32 %v19104_v40, %v19034_v22 }
 0xa60   : > { %v13597_v39 = vpop.eup %13596  ;;  %v7888_v0 = vsub.f32 %v18524_v1, %v13595_v33  ;;  %v7859_v63 = vadd.f32 %v7843_v31, %v7577_v46  ;;  %13616 = vpow2.f32 %v9825_v13  ;;  %v7463_v26 = vpop.f32.mrb[56].mxu1  ;;  %v19132_v37 = vadd.f32 %v13587_v2, %v7903_v28 }
 0xa61   : > { %v13599_v15 = vpop.eup %13598  ;;  %13618 = vrcp.f32 %v7702_v62  ;;  %v19130_v14 = vpop.f32.mrb[57].mxu1  ;;  %v7591_v1 = vadd.f32 %v18967_v36, %v15273_v24  ;;  %v7797_v13 = vadd.f32 1.0, %v13597_v39  ;;  %v19149_v38 = vadd.f32 %v18970_v54, %v15278_v17 }
 0xa62   : > { %v13601_v44 = vpop.eup %13600  ;;  %v7904_v32 = vmul.f32 %v13585_v50, %v7888_v0  ;;  %13620 = vtanh.f32 %v7859_v63  ;;  %v7844_v58 = vmul.f32 %v13599_v15, %v7585_v47  ;;  %11007 = vmatprep.mubr.f32.mxu1 %v19132_v37  ;;  %8548 = vmatprep.mubr.f32.mxu0 %v19132_v37  ;;  %v9827_v47 = vmul.f32 -1.442695, %v7458_v23 }
 0xa63   : > { %v13603_v46 = vpop.eup %13602  ;;  %13622 = vrcp.f32 %v7796_v8  ;;  %8549 = vmatmul.mubr.f32.vlgmr.msra.gmra.mrb[96].mxu0 %v8307_v3  ;;  %v9841_v42 = vmul.f32 -1.442695, %v7448_v59  ;;  %v19160_v54 = vadd.f32 %v19104_v40, %v19031_v27  ;;  %v8309_v62 = vmax.f32 %v19141_v7, 0.0 }
 0xa64   : > { %v13605_v2 = vpop.eup %13604  ;;  %v19143_v50 = vadd.f32 %v13595_v33, %v7904_v32  ;;  %v7860_v15 = vadd.f32 %v7844_v58, %v7583_v12  ;;  %13624 = vpow2.f32 %v9826_v29  ;;  %v7469_v36 = vpop.f32.mrb[58].mxu1  ;;  %v7889_v22 = vsub.f32 %v18557_v6, %v13603_v46  ;;  %12470 = vmatpush3.bf16.msra.mxu0 %v21072_v20 }
 0xa65   : > { %v13607_v55 = vpop.eup %13606  ;;  %13626 = vpow2.f32 %v9840_v52  ;;  %v19151_v31 = vpop.f32.mrb[59].mxu1  ;;  %v7464_v33 = vadd.f32 %v7463_v26, %v15230_v18  ;;  %v7454_v6 = vadd.f32 %v19097_v11, %v15233_v45  ;;  %12472 = vmatprep.subr.bf16.mxu0 %v21076_v41  ;;  %v7798_v63 = vadd.f32 1.0, %v13605_v2 }
 0xa66   : > { %v13609_v12 = vpop.eup %13608  ;;  %13628 = vtanh.f32 %v7860_v15  ;;  %v7845_v28 = vmul.f32 %v13607_v55, %v7591_v1  ;;  %11008 = vmatmul.mubr.f32.vlgmr.msra.gmra.mrb[64].mxu1 %v19143_v50  ;;  %8554 = vmatprep.mubr.f32.mxu0 %v19143_v50  ;;  %v7905_v29 = vmul.f32 %v13601_v44, %v7889_v22  ;;  %v7460_v26 = vadd.f32 %v19119_v5, %v15233_v45 }
 0xa67   : > { %v13611_v8 = vpop.eup %13610  ;;  %13630 = vrcp.f32 %v7797_v13  ;;  %12342 = vmatpush1.bf16.msra.mxu1 %v14420_v21  ;;  %8555 = vmatmul.mubr.f32.gmra.mrb[98].mxu0 %v8308_v49  ;;  %v9828_v44 = vmul.f32 -1.442695, %v7464_v33  ;;  %v9842_v1 = vmul.f32 -1.442695, %v7454_v6  ;;  %v7470_v5 = vadd.f32 %v7469_v36, %v15230_v18 }
 0xa68   : > { %v13613_v39 = vpop.eup %13612  ;;  %v7861_v0 = vadd.f32 %v7845_v28, %v19116_v16  ;;  %13632 = vpow2.f32 %v9827_v47  ;;  %v7475_v23 = vpop.f32.mrb[60].mxu1  ;;  %12344 = vmatprep.subr.bf16.mxu1 %v14431_v25  ;;  %v7890_v27 = vsub.f32 %v18568_v48, %v13611_v8  ;;  %v19176_v59 = vadd.f32 %v13603_v46, %v7905_v29  ;;  %12474 = vmatpush3.bf16.msra.mxu0 %v21076_v41 }
 0xa69   : > { %v13615_v11 = vpop.eup %13614  ;;  %v7703_v21 = vadd.f32 1.0, %v13613_v39  ;;  %13634 = vpow2.f32 %v9841_v42  ;;  %v19174_v52 = vpop.f32.mrb[61].mxu1  ;;  %v7597_v25 = vadd.f32 %v18973_v61, %v15273_v24  ;;  %12476 = vmatprep.subr.bf16.mxu0 %v21080_v51  ;;  %v19191_v15 = vadd.f32 %v19104_v40, %v19040_v19 }
 0xa6a   : > { %v13617_v16 = vpop.eup %13616  ;;  %13636 = vtanh.f32 %v7861_v0  ;;  %v7906_v32 = vmul.f32 %v13609_v12, %v7890_v27  ;;  %11010 = vmatprep.mubr.f32.mxu1 %v19176_v59  ;;  %8560 = vmatprep.mubr.f32.mxu0 %v19176_v59  ;;  %v9843_v36 = vmul.f32 -1.442695, %v7460_v26  ;;  %v8310_v55 = vmax.f32 %v19160_v54, 0.0  ;;  %v19483_v54 = vld [vmem:[%s19859_s5 + $0x2] ss:$0 sm:$0xff] }
 0xa6b   : > { %v13619_v48 = vpop.eup %13618  ;;  %13638 = vrcp.f32 %v7703_v21  ;;  %v7704_v58 = vadd.f32 1.0, %v13617_v16  ;;  %12346 = vmatpush1.bf16.msra.mxu1 %v20541_v4  ;;  %8561 = vmatmul.mubr.f32.gmra.mrb[100].mxu0 %v8309_v62  ;;  %v9829_v28 = vmul.f32 -1.442695, %v7470_v5  ;;  %v8311_v6 = vmax.f32 %v19191_v15, 0.0 }
 0xa6c   : > { %v13621_v46 = vpop.eup %13620  ;;  %v7846_v13 = vmul.f32 %v13619_v48, %v7597_v25  ;;  %13640 = vrcp.f32 %v7798_v63  ;;  %v7481_v61 = vpop.f32.mrb[62].mxu1  ;;  %12348 = vmatprep.subr.bf16.mxu1 %v20543_v34  ;;  %v19187_v2 = vadd.f32 %v13611_v8, %v7906_v32  ;;  %12478 = vmatpush3.bf16.msra.mxu0 %v21080_v51  ;;  %v21156_v25 = vld [vmem:[#allocation94_spill] sm:$0xff] }
 0xa6d   : > { %v13623_v47 = vpop.eup %13622  ;;  %13642 = vrcp.f32 %v7704_v58  ;;  %v19194_v4 = vpop.f32.mrb[63].mxu1  ;;  %v7891_v42 = vsub.f32 %v18597_v30, %v13621_v46  ;;  %v7476_v30 = vadd.f32 %v7475_v23, %v15230_v18  ;;  %12480 = vmatprep.subr.bf16.mxu0 %v21084_v10  ;;  %v21157_v58 = vld [vmem:[#allocation88_spill] sm:$0xff] }
 0xa6e   : > { %v13625_v22 = vpop.eup %13624  ;;  %v7862_v34 = vadd.f32 %v7846_v13, %v19149_v38  ;;  %13644 = vpow2.f32 %v9828_v44  ;;  %11011 = vmatmul.mubr.f32.gmra.mrb[66].mxu1 %v19187_v2  ;;  %8566 = vmatprep.mubr.f32.mxu0 %v19187_v2  ;;  %v19207_v38 = vadd.f32 %v19104_v40, %v19038_v56  ;;  %v19228_v44 = vadd.f32 %v19104_v40, %v21156_v25 }
 0xa6f   : > { %v13627_v19 = vpop.eup %13626  ;;  %v7705_v12 = vadd.f32 1.0, %v13625_v22  ;;  %13646 = vpow2.f32 %v9842_v1  ;;  %12350 = vmatpush1.bf16.msra.mxu1 %v20547_v57  ;;  %v7907_v33 = vmul.f32 %v13615_v11, %v7891_v42  ;;  %v7466_v57 = vadd.f32 %v19130_v14, %v15233_v45  ;;  %8567 = vmatmul.mubr.f32.gmra.mrb[102].mxu0 %v8310_v55  ;;  %v21154_v14 = vld [vmem:[#allocation105_spill] sm:$0xff] }
 0xa70   : > { %v13629_v8 = vpop.eup %13628  ;;  %13648 = vtanh.f32 %v7862_v34  ;;  %12352 = vmatprep.subr.bf16.mxu1 %v20549_v60  ;;  %v7799_v23 = vadd.f32 1.0, %v13627_v19  ;;  %v7603_v21 = vadd.f32 %v21154_v14, %v15273_v24  ;;  %v9830_v26 = vmul.f32 -1.442695, %v7476_v30  ;;  %12482 = vmatpush3.bf16.msra.mxu0 %v21084_v10  ;;  %v21160_v19 = vld [vmem:[#allocation89_spill] sm:$0xff] }
 0xa71   : > { %v13631_v29 = vpop.eup %13630  ;;  %13650 = vpow2.f32 %v9843_v36  ;;  %v19216_v39 = vadd.f32 %v13621_v46, %v7907_v33  ;;  %v7892_v0 = vsub.f32 %v18613_v53, %v13629_v8  ;;  %v8312_v16 = vmax.f32 %v19207_v38, 0.0  ;;  %v21155_v53 = vld [vmem:[#allocation27_spill] sm:$0xff]  ;;  %v21158_v46 = vld [vmem:[#allocation98_spill] sm:$0xff] }
 0xa72   : > { %v13633_v56 = vpop.eup %13632  ;;  %13652 = vrcp.f32 %v7705_v12  ;;  %v9844_v48 = vmul.f32 -1.442695, %v7466_v57  ;;  %v7601_v13 = vadd.f32 %v21158_v46, %v15278_v17  ;;  %v21159_v36 = vld [vmem:[#allocation107_spill] sm:$0xff]  ;;  %v7482_v22 = vadd.f32 %v7481_v61, %v15230_v18  ;;  %v21161_v61 = vld [vmem:[#allocation30_spill] sm:$0xff] }
 0xa73   : > { %v13635_v63 = vpop.eup %13634  ;;  %v7706_v27 = vadd.f32 1.0, %v13633_v56  ;;  %13654 = vpow2.f32 %v9829_v28  ;;  %11013 = vmatprep.mubr.f32.mxu1 %v19216_v39  ;;  %12354 = vmatpush1.bf16.msra.mxu1 %v20845_v9  ;;  %v7908_v60 = vmul.f32 %v13623_v47, %v7892_v0  ;;  %v7609_v42 = vadd.f32 %v21159_v36, %v15273_v24  ;;  %v21162_v56 = vld [vmem:[#allocation81_spill] sm:$0xff]  ;;  %v21168_v36 = vld [vmem:[#allocation106_spill] sm:$0xff] }
 0xa74   : > { %v13637_v11 = vpop.eup %13636  ;;  %8572 = vmatprep.mubr.f32.mxu0 %v19216_v39  ;;  %12356 = vmatprep.subr.bf16.mxu1 %v21155_v53  ;;  %v7607_v12 = vadd.f32 %v21160_v19, %v15278_v17  ;;  %v7472_v28 = vadd.f32 %v19151_v31, %v15233_v45  ;;  %v20194_v0 = vmax.f32 %v19228_v44, 0.0  ;;  %v21163_v31 = vld [vmem:[#allocation31_spill] sm:$0xff]  ;;  %v21164_v53 = vld [vmem:[#allocation85_spill] sm:$0xff] }
 0xa75   : > { %v13639_v32 = vpop.eup %13638  ;;  %13656 = vrcp.f32 %v7706_v27  ;;  %8573 = vmatmul.mubr.f32.gmra.mrb[104].mxu0 %v8311_v6  ;;  %v19232_v9 = vadd.f32 %v13629_v8, %v7908_v60  ;;  %v7893_v1 = vsub.f32 %v21157_v58, %v13637_v11  ;;  %12484 = vmatprep.subr.bf16.mxu0 %v21162_v56  ;;  %v19257_v25 = vadd.f32 %v19104_v40, %v21164_v53  ;;  %v21173_v53 = vld [vmem:[#allocation23_spill] sm:$0xff] }
 0xa76   : > { %v13641_v5 = vpop.eup %13640  ;;  %v7847_v47 = vmul.f32 %v13639_v32, %v7603_v21  ;;  %13658 = vrcp.f32 %v7799_v23  ;;  %v7800_v23 = vadd.f32 1.0, %v13635_v63  ;;  %12486 = vmatpush3.bf16.msra.mxu0 %v21162_v56  ;;  %v21165_v32 = vld [vmem:[#allocation95_spill] sm:$0xff]  ;;  %v9845_v58 = vmul.f32 -1.442695, %v7472_v28 }
 0xa77   : > { %v13643_v34 = vpop.eup %13642  ;;  %11014 = vmatmul.mubr.f32.gmra.mrb[68].mxu1 %v19232_v9  ;;  %8578 = vmatprep.mubr.f32.mxu0 %v19232_v9  ;;  %v7909_v33 = vmul.f32 %v13631_v29, %v7893_v1  ;;  %13660 = vpow2.f32 %v9830_v26  ;;  %v9831_v26 = vmul.f32 -1.442695, %v7482_v22  ;;  %v21169_v22 = vld [vmem:[#allocation34_spill] sm:$0xff]  ;;  %v7478_v28 = vadd.f32 %v19174_v52, %v15233_v45  ;;  %v21172_v52 = vld [vmem:[#allocation83_spill] sm:$0xff] }
 0xa78   : > { %v13645_v8 = vpop.eup %13644  ;;  %v7863_v30 = vadd.f32 %v7847_v47, %v7601_v13  ;;  %v7848_v57 = vmul.f32 %v13643_v34, %v7609_v42  ;;  %12358 = vmatpush1.bf16.msra.mxu1 %v21161_v61  ;;  %13662 = vpow2.f32 %v9844_v48  ;;  %v7615_v48 = vadd.f32 %v21165_v32, %v15273_v24  ;;  %v21167_v13 = vld [vmem:[#allocation104_spill] sm:$0xff]  ;;  %v21170_v34 = vld [vmem:[#allocation82_spill] sm:$0xff] }
 0xa79   : > { %v13647_v27 = vpop.eup %13646  ;;  %v7707_v60 = vadd.f32 1.0, %v13645_v8  ;;  %12360 = vmatprep.subr.bf16.mxu1 %v21163_v31  ;;  %8579 = vmatmul.mubr.f32.gmra.mrb[106].mxu0 %v8312_v16  ;;  %v19253_v29 = vadd.f32 %v13637_v11, %v7909_v33  ;;  %v21166_v11 = vld [vmem:[#allocation90_spill] sm:$0xff]  ;;  %v7613_v47 = vadd.f32 %v21167_v13, %v15278_v17  ;;  %v7621_v42 = vadd.f32 %v21168_v36, %v15273_v24  ;;  %v21171_v33 = vld [vmem:[#allocation35_spill] sm:$0xff] }
 0xa7a   : > { %v13649_v14 = vpop.eup %13648  ;;  %13664 = vtanh.f32 %v7863_v30  ;;  %v7864_v21 = vadd.f32 %v7848_v57, %v7607_v12  ;;  %12488 = vmatprep.subr.bf16.mxu0 %v21170_v34  ;;  %v7801_v30 = vadd.f32 1.0, %v13647_v27  ;;  %v20193_v61 = vmax.f32 %v19257_v25, 0.0  ;;  %v21177_v36 = vld [vmem:[#allocation86_spill] sm:$0xff] }
 0xa7b   : > { %v13651_v63 = vpop.eup %13650  ;;  %13666 = vrcp.f32 %v7707_v60  ;;  %11016 = vmatprep.mubr.f32.mxu1 %v19253_v29  ;;  %8584 = vmatprep.mubr.f32.mxu0 %v19253_v29  ;;  %v7894_v1 = vsub.f32 %v21166_v11, %v13649_v14  ;;  %v7619_v32 = vadd.f32 %v21173_v53, %v15278_v17  ;;  %v7484_v11 = vadd.f32 %v19194_v4, %v15233_v45  ;;  %v21176_v4 = vld [vmem:[#allocation109_spill] sm:$0xff] }
 0xa7c   : > { %v13653_v46 = vpop.eup %13652  ;;  %13668 = vtanh.f32 %v7864_v21  ;;  %12362 = vmatpush1.bf16.msra.mxu1 %v21169_v22  ;;  %12490 = vmatpush3.bf16.msra.mxu0 %v21170_v34  ;;  %v21178_v22 = vld [vmem:[#allocation42_spill] sm:$0xff] }
 0xa7d   : > { %v13655_v19 = vpop.eup %13654  ;;  %13670 = vrcp.f32 %v7800_v23  ;;  %v7849_v12 = vmul.f32 %v13653_v46, %v7615_v48  ;;  %12364 = vmatprep.subr.bf16.mxu1 %v21171_v33  ;;  %8585 = vmatmul.mubr.f32.gmra.mrb[108].mxu0 %v20194_v0  ;;  %v7910_v8 = vmul.f32 %v13641_v5, %v7894_v1  ;;  %v7802_v23 = vadd.f32 1.0, %v13651_v63  ;;  %v21174_v5 = vld [vmem:[#allocation38_spill] sm:$0xff]  ;;  %v21180_v33 = vld [vmem:[#allocation87_spill] sm:$0xff] }
 0xa7e   : > { %v7708_v57 = vadd.f32 1.0, %v13655_v19  ;;  %13672 = vpow2.f32 %v9831_v26  ;;  %12492 = vmatprep.subr.bf16.mxu0 %v21172_v52  ;;  %v9846_v26 = vmul.f32 -1.442695, %v7478_v28  ;;  %v21179_v19 = vld [vmem:[#allocation84_spill] sm:$0xff]  ;;  %v9847_v28 = vmul.f32 -1.442695, %v7484_v11 }
 0xa7f   : > { %v13657_v60 = vpop.eup %13656  ;;  %v7865_v31 = vadd.f32 %v7849_v12, %v7613_v47  ;;  %13674 = vpow2.f32 %v9845_v58  ;;  %v19278_v21 = vadd.f32 %v13649_v14, %v7910_v8  ;;  %v21175_v58 = vld [vmem:[#allocation39_spill] sm:$0xff]  ;;  %v7627_v47 = vadd.f32 %v21176_v4, %v15273_v24  ;;  %v21185_v4 = vld [vmem:[#allocation108_spill] sm:$0xff] }
 0xa80   : > { %v7850_v48 = vmul.f32 %v13657_v60, %v7621_v42  ;;  %13676 = vrcp.f32 %v7708_v57  ;;  %12366 = vmatpush1.bf16.msra.mxu1 %v21174_v5  ;;  %v13659_v27 = vpop.eup %13658  ;;  %12494 = vmatpush3.bf16.msra.mxu0 %v21172_v52  ;;  %v19296_v42 = vadd.f32 %v19104_v40, %v21177_v36  ;;  %v21182_v60 = vld [vmem:[#allocation110_spill] sm:$0xff]  ;;  %v19310_v36 = vadd.f32 %v19104_v40, %v21185_v4 }
 0xa81   : > { %13678 = vtanh.f32 %v7865_v31  ;;  %11017 = vmatmul.mubr.f32.gmra.mrb[70].mxu1 %v19278_v21  ;;  %8590 = vmatprep.mubr.f32.mxu0 %v19278_v21  ;;  %v13661_v14 = vpop.eup %13660  ;;  %v7625_v31 = vadd.f32 %v21182_v60, %v15278_v17 }
 0xa82   : > { %13680 = vrcp.f32 %v7801_v30  ;;  %v7866_v63 = vadd.f32 %v7850_v48, %v7619_v32  ;;  %12368 = vmatprep.subr.bf16.mxu1 %v21175_v58  ;;  %8591 = vmatmul.mubr.f32.gmra.mrb[110].mxu0 %v20193_v61  ;;  %v13663_v1 = vpop.eup %13662  ;;  %v7709_v46 = vadd.f32 1.0, %v13661_v14  ;;  %v21181_v30 = vld [vmem:[#allocation43_spill] sm:$0xff]  ;;  %v21183_v32 = vld [vmem:[#allocation14_spill] sm:$0xff]  ;;  %v21184_v14 = vld [vmem:[#allocation93_spill] sm:$0xff] }
 0xa83   : > { %13682 = vrcp.f32 %v7802_v23  ;;  %12496 = vmatprep.subr.bf16.mxu0 %v21179_v19  ;;  %v7633_v48 = vadd.f32 %v21183_v32, %v15273_v24  ;;  %v7803_v58 = vadd.f32 1.0, %v13663_v1  ;;  %v21189_v1 = vld [vmem:[#allocation78_spill] sm:$0xff] }
 0xa84   : > { %v13665_v13 = vpop.eup %13664  ;;  %13684 = vtanh.f32 %v7866_v63  ;;  %12370 = vmatpush1.bf16.msra.mxu1 %v21178_v22  ;;  %12498 = vmatpush3.bf16.msra.mxu0 %v21179_v19  ;;  %v20190_v22 = vmax.f32 %v19296_v42, 0.0 }
 0xa85   : > { %v13667_v12 = vpop.eup %13666  ;;  %13686 = vpow2.f32 %v9846_v26  ;;  %v7895_v8 = vsub.f32 %v21180_v33, %v13665_v13  ;;  %12372 = vmatprep.subr.bf16.mxu1 %v21181_v30 }
 0xa86   : > { %v13669_v57 = vpop.eup %13668  ;;  %v7851_v23 = vmul.f32 %v13667_v12, %v7627_v47  ;;  %13688 = vrcp.f32 %v7709_v46  ;;  %v21186_v47 = vld [vmem:[#allocation46_spill] sm:$0xff] }
 0xa87   : > { %v13671_v53 = vpop.eup %13670  ;;  %v7911_v5 = vmul.f32 %v13659_v27, %v7895_v8  ;;  %v7896_v63 = vsub.f32 %v21184_v14, %v13669_v57  ;;  %13690 = vpow2.f32 %v9847_v28  ;;  %v21188_v8 = vld [vmem:[#allocation47_spill] sm:$0xff]  ;;  %v21191_v14 = vld [vmem:[#allocation12_spill] sm:$0xff] }
 0xa88   : > { %v13673_v26 = vpop.eup %13672  ;;  %v7867_v11 = vadd.f32 %v7851_v23, %v7625_v31  ;;  %12374 = vmatpush1.bf16.msra.mxu1 %v21186_v47  ;;  %v7631_v31 = vadd.f32 %v21189_v1, %v15278_v17  ;;  %v21193_v47 = vld [vmem:[#allocation51_spill] sm:$0xff] }
 0xa89   : > { %v13675_v46 = vpop.eup %13674  ;;  %v7710_v12 = vadd.f32 1.0, %v13673_v26  ;;  %v19314_v33 = vadd.f32 %v13665_v13, %v7911_v5  ;;  %v7912_v27 = vmul.f32 %v13671_v53, %v7896_v63  ;;  %12376 = vmatprep.subr.bf16.mxu1 %v21188_v8  ;;  %v20191_v13 = vmax.f32 %v19310_v36, 0.0  ;;  %v21190_v53 = vld [vmem:[#allocation99_spill] sm:$0xff]  ;;  %v21192_v63 = vld [vmem:[#allocation50_spill] sm:$0xff] }
 0xa8a   : > { %v13677_v30 = vpop.eup %13676  ;;  %13692 = vtanh.f32 %v7867_v11  ;;  %v19328_v5 = vadd.f32 %v19104_v40, %v21190_v53  ;;  %v7804_v4 = vadd.f32 1.0, %v13675_v46 }
 0xa8b   : > { %21187 = vst [vmem:[#allocation92_spill] sm:$0xff] %v19314_v33  ;;  %v13679_v60 = vpop.eup %13678  ;;  %v7852_v23 = vmul.f32 %v13677_v30, %v7633_v48  ;;  %13694 = vrcp.f32 %v7710_v12  ;;  %11019 = vmatprep.mubr.f32.mxu1 %v19314_v33  ;;  %8596 = vmatprep.mubr.f32.mxu0 %v19314_v33  ;;  %v19321_v32 = vadd.f32 %v13669_v57, %v7912_v27  ;;  %v21194_v27 = vld [vmem:[#allocation103_spill] sm:$0xff] }
 0xa8c   : > { %v13681_v28 = vpop.eup %13680  ;;  %13696 = vrcp.f32 %v7803_v58  ;;  %8597 = vmatmul.mubr.f32.gmra.mrb[112].mxu0 %v20190_v22  ;;  %v7897_v48 = vsub.f32 %v21191_v14, %v13679_v60  ;;  %12378 = vmatpush1.bf16.msra.mxu1 %v21192_v63  ;;  %v7639_v8 = vadd.f32 %v21194_v27, %v15273_v24  ;;  %v21195_v30 = vld [vmem:[#allocation91_spill] sm:$0xff]  ;;  %v21196_v14 = vld [vmem:[#allocation101_spill] sm:$0xff]  ;;  %v20192_v46 = vmax.f32 %v19328_v5, 0.0 }
 0xa8d   : > { %v13683_v26 = vpop.eup %13682  ;;  %v7868_v11 = vadd.f32 %v7852_v23, %v7631_v31  ;;  %11020 = vmatmul.mubr.f32.gmra.mrb[72].mxu1 %v19321_v32  ;;  %8602 = vmatprep.mubr.f32.mxu0 %v19321_v32  ;;  %v19340_v31 = vadd.f32 %v19104_v40, %v21196_v14  ;;  %v21200_v27 = vld [vmem:[#allocation55_spill] sm:$0xff] }
 0xa8e   : > { %v13685_v57 = vpop.eup %13684  ;;  %v7913_v58 = vmul.f32 %v13681_v28, %v7897_v48  ;;  %12380 = vmatprep.subr.bf16.mxu1 %v21193_v47  ;;  %v21198_v28 = vld [vmem:[#allocation54_spill] sm:$0xff]  ;;  %v21199_v48 = vld [vmem:[#allocation15_spill] sm:$0xff] }
 0xa8f   : > { %v13687_v12 = vpop.eup %13686  ;;  %13698 = vtanh.f32 %v7868_v11  ;;  %v7898_v1 = vsub.f32 %v21195_v30, %v13685_v57  ;;  %v7637_v63 = vadd.f32 %v21199_v48, %v15278_v17  ;;  %v20196_v48 = vmax.f32 %v19340_v31, 0.0 }
 0xa90   : > { %v13689_v53 = vpop.eup %13688  ;;  %8603 = vmatmul.mubr.f32.gmra.mrb[114].mxu0 %v20191_v13  ;;  %v19345_v23 = vadd.f32 %v13679_v60, %v7913_v58  ;;  %12382 = vmatpush1.bf16.msra.mxu1 %v21198_v28  ;;  %13700 = vrcp.f32 %v7804_v4  ;;  %v7805_v22 = vadd.f32 1.0, %v13687_v12  ;;  %v21201_v58 = vld [vmem:[#allocation97_spill] sm:$0xff]  ;;  %v21229_v35 = vmax.f32 %v19340_v31, 0.0 }
 0xa91   : > { %v7853_v11 = vmul.f32 %v13689_v53, %v7639_v8  ;;  %v7914_v47 = vmul.f32 %v13683_v26, %v7898_v1  ;;  %12384 = vmatprep.subr.bf16.mxu1 %v21200_v27  ;;  %v13691_v30 = vpop.eup %13690  ;;  %v7645_v28 = vadd.f32 %v21201_v58, %v15273_v24  ;;  %v21202_v26 = vld [vmem:[#allocation22_spill] sm:$0xff]  ;;  %v21206_v27 = vld [vmem:[#allocation59_spill] sm:$0xff] }
 0xa92   : > { %21197 = vst [vmem:[#allocation76_spill] sm:$0xff] %v19345_v23  ;;  %11022 = vmatprep.mubr.f32.mxu1 %v19345_v23  ;;  %8608 = vmatprep.mubr.f32.mxu0 %v19345_v23  ;;  %v19362_v4 = vadd.f32 %v19104_v40, %v21202_v26  ;;  %v21203_v8 = vld [vmem:[#allocation58_spill] sm:$0xff] }
 0xa93   : > { %v7869_v14 = vadd.f32 %v7853_v11, %v7637_v63  ;;  %v19353_v13 = vadd.f32 %v13685_v57, %v7914_v47  ;;  %v21204_v57 = vld [vmem:[#allocation100_spill] sm:$0xff]  ;;  %v21205_v63 = vld [vmem:[#allocation102_spill] sm:$0xff] }
 0xa94   : > { %v13693_v60 = vpop.eup %13692  ;;  %8609 = vmatmul.mubr.f32.gmra.mrb[116].mxu0 %v20192_v46  ;;  %12386 = vmatpush1.bf16.msra.mxu1 %v21203_v8  ;;  %v7643_v11 = vadd.f32 %v21205_v63, %v15278_v17  ;;  %v7806_v46 = vadd.f32 1.0, %v13691_v30  ;;  %v20195_v8 = vmax.f32 %v19362_v4, 0.0  ;;  %v21230_v43 = vmax.f32 %v19362_v4, 0.0 }
 0xa95   : > { %v13695_v1 = vpop.eup %13694  ;;  %13702 = vtanh.f32 %v7869_v14  ;;  %11023 = vmatmul.mubr.f32.gmra.mrb[74].mxu1 %v19353_v13  ;;  %8614 = vmatprep.mubr.f32.mxu0 %v19353_v13  ;;  %v7899_v12 = vsub.f32 %v21204_v57, %v13693_v60  ;;  %v21207_v14 = vld [vmem:[#allocation62_spill] sm:$0xff]  ;;  %v21208_v57 = vld [vmem:[#allocation96_spill] sm:$0xff] }
 0xa96   : > { %v13697_v53 = vpop.eup %13696  ;;  %v7854_v47 = vmul.f32 %v13695_v1, %v7645_v28  ;;  %12388 = vmatprep.subr.bf16.mxu1 %v21206_v27  ;;  %13704 = vrcp.f32 %v7805_v22  ;;  %v19377_v0 = vadd.f32 %v19104_v40, %v21208_v57  ;;  %v21210_v28 = vld [vmem:[#allocation63_spill] sm:$0xff] }
 0xa97   : > { %v7915_v58 = vmul.f32 %v13697_v53, %v7899_v12  ;;  %v21211_v22 = vld [vmem:[#allocation19_spill] sm:$0xff]  ;;  %v21212_v53 = vld [vmem:[#allocation66_spill] sm:$0xff] }
 0xa98   : > { %v7870_v26 = vadd.f32 %v7854_v47, %v7643_v11  ;;  %8615 = vmatmul.mubr.f32.gmra.mrb[118].mxu0 %v20196_v48  ;;  %12390 = vmatpush1.bf16.msra.mxu1 %v21207_v14  ;;  %v21213_v11 = vld [vmem:[#allocation67_spill] sm:$0xff] }
 0xa99   : > { %v13699_v61 = vpop.eup %13698  ;;  %v19379_v63 = vadd.f32 %v13693_v60, %v7915_v58  ;;  %12392 = vmatprep.subr.bf16.mxu1 %v21210_v28  ;;  %v8320_v60 = vmax.f32 %v19377_v0, 0.0  ;;  %v21215_v58 = vld [vmem:[#allocation18_spill] sm:$0xff] }
 0xa9a   : > { %13706 = vtanh.f32 %v7870_v26  ;;  %v7900_v1 = vsub.f32 %v21211_v22, %v13699_v61  ;;  %v13701_v30 = vpop.eup %13700  ;;  %v19394_v26 = vadd.f32 %v19104_v40, %v21215_v58  ;;  %v21217_v28 = vld [vmem:[#allocation70_spill] sm:$0xff] }
 0xa9b   : > { %21209 = vst [vmem:[#allocation16_spill] sm:$0xff] %v19379_v63  ;;  %11025 = vmatprep.mubr.f32.mxu1 %v19379_v63  ;;  %8620 = vmatprep.mubr.f32.mxu0 %v19379_v63  ;;  %13708 = vrcp.f32 %v7806_v46  ;;  %v21216_v46 = vld [vmem:[#allocation111_spill] sm:$0xff]  ;;  %v21221_v58 = vld [vmem:[#allocation26_spill] sm:$0xff] }
 0xa9c   : > { %8621 = vmatmul.mubr.f32.gmra.mrb[120].mxu0 %v20195_v8  ;;  %v7916_v12 = vmul.f32 %v13701_v30, %v7900_v1  ;;  %12394 = vmatpush1.bf16.msra.mxu1 %v21212_v53  ;;  %v8321_v1 = vmax.f32 %v19394_v26, 0.0 }
 0xa9d   : > { %12396 = vmatprep.subr.bf16.mxu1 %v21213_v11 }
 0xa9e   : > { %v19390_v47 = vadd.f32 %v13699_v61, %v7916_v12  ;;  %v21218_v61 = vld [vmem:[#allocation72_spill] sm:$0xff] }
 0xa9f   : > { %v13703_v27 = vpop.eup %13702  ;;  %v21219_v12 = vld [vmem:[#allocation112_spill] sm:$0xff] }
 0xaa0   : > { %21214 = vst [vmem:[#allocation77_spill] sm:$0xff] %v19390_v47  ;;  %11026 = vmatmul.mubr.f32.gmra.mrb[76].mxu1 %v19390_v47  ;;  %8626 = vmatprep.mubr.f32.mxu0 %v19390_v47  ;;  %v7901_v14 = vsub.f32 %v21216_v46, %v13703_v27  ;;  %v13705_v57 = vpop.eup %13704  ;;  %v8304_v53 = vadd.f32 %v19104_v40, %v21219_v12  ;;  %v21222_v46 = vld [vmem:[#allocation74_spill] sm:$0xff]  ;;  %v21228_v40 = vmax.f32 %v19328_v5, 0.0 }
 0xaa1   : > { %8627 = vmatmul.mubr.f32.gmra.mrb[122].mxu0 %v8320_v60  ;;  %12398 = vmatpush1.bf16.msra.mxu1 %v21217_v28 }
 0xaa2   : > { %v7917_v22 = vmul.f32 %v13705_v57, %v7901_v14  ;;  %12400 = vmatprep.subr.bf16.mxu1 %v21218_v61  ;;  %v8322_v26 = vmax.f32 %v8304_v53, 0.0 }
 0xaa4   : > { %v13707_v30 = vpop.eup %13706  ;;  %v19406_v11 = vadd.f32 %v13703_v27, %v7917_v22 }
 0xaa5   : > { %v7902_v8 = vsub.f32 %v21221_v58, %v13707_v30  ;;  %12402 = vmatpush1.bf16.msra.mxu1 %v21222_v46  ;;  %v13709_v48 = vpop.eup %13708 }
 0xaa6   : > { %21220 = vst [vmem:[#allocation17_spill] sm:$0xff] %v19406_v11  ;;  %11028 = vmatprep.mubr.f32.mxu1 %v19406_v11  ;;  %8632 = vmatprep.mubr.f32.mxu0 %v19406_v11 }
 0xaa7   : > { %8633 = vmatmul.mubr.f32.gmra.mrb[124].mxu0 %v8321_v1  ;;  %v7918_v14 = vmul.f32 %v13709_v48, %v7902_v8  ;;  %12499 = vmatprep.subr.bf16.mxu1 %v21072_v20 }
 0xaa9   : > { %v19413_v57 = vadd.f32 %v13707_v30, %v7918_v14 }
 0xaab   : > { %21223 = vst [vmem:[#allocation20_spill] sm:$0xff] %v19413_v57  ;;  %11029 = vmatmul.mubr.f32.gmra.mrb[78].mxu1 %v19413_v57  ;;  %8638 = vmatprep.mubr.f32.mxu0 %v19413_v57 }
 0xaac   : > { %8387 = vmatprep.mubr.f32.mxu1 %v19132_v37  ;;  %8639 = vmatmul.mubr.f32.gmra.mrb[126].mxu0 %v8322_v26 }
 0xaaf   : > { %8388 = vmatmul.mubr.f32.vlgmr.msra.gmra.mrb[80].mxu1 %v8307_v3 }
 0xab0   : > { %8393 = vmatprep.mubr.f32.mxu1 %v19143_v50  ;;  %12507 = vmatpush3.bf16.msra.mxu1 %v21072_v20  ;;  %v21224_v20 = vmax.f32 %v19228_v44, 0.0 }
 0xab1   : > { %12500 = vmatprep.subr.bf16.mxu1 %v21076_v41 }
 0xab3   : > { %8394 = vmatmul.mubr.f32.gmra.mrb[82].mxu1 %v8308_v49 }
 0xab4   : > { %8399 = vmatprep.mubr.f32.mxu1 %v19176_v59  ;;  %12508 = vmatpush3.bf16.msra.mxu1 %v21076_v41  ;;  %v21225_v41 = vmax.f32 %v19257_v25, 0.0 }
 0xab5   : > { %12501 = vmatprep.subr.bf16.mxu1 %v21080_v51 }
 0xab7   : > { %8400 = vmatmul.mubr.f32.gmra.mrb[84].mxu1 %v8309_v62 }
 0xab8   : > { %8405 = vmatprep.mubr.f32.mxu1 %v19187_v2  ;;  %12509 = vmatpush3.bf16.msra.mxu1 %v21080_v51  ;;  %v21226_v51 = vmax.f32 %v19296_v42, 0.0 }
 0xab9   : > { %12502 = vmatprep.subr.bf16.mxu1 %v21084_v10 }
 0xabb   : > { %8406 = vmatmul.mubr.f32.gmra.mrb[86].mxu1 %v8310_v55 }
 0xabc   : > { %8411 = vmatprep.mubr.f32.mxu1 %v19216_v39  ;;  %12510 = vmatpush3.bf16.msra.mxu1 %v21084_v10  ;;  %v21227_v10 = vmax.f32 %v19310_v36, 0.0 }
 0xabd   : > { %12503 = vmatprep.subr.bf16.mxu1 %v21162_v56 }
 0xabf   : > { %8412 = vmatmul.mubr.f32.gmra.mrb[88].mxu1 %v8311_v6 }
 0xac0   : > { %8417 = vmatprep.mubr.f32.mxu1 %v19232_v9  ;;  %12511 = vmatpush3.bf16.msra.mxu1 %v21162_v56 }
 0xac1   : > { %12504 = vmatprep.subr.bf16.mxu1 %v21170_v34 }
 0xac3   : > { %8418 = vmatmul.mubr.f32.gmra.mrb[90].mxu1 %v8312_v16 }
 0xac4   : > { %8423 = vmatprep.mubr.f32.mxu1 %v19253_v29  ;;  %12512 = vmatpush3.bf16.msra.mxu1 %v21170_v34 }
 0xac5   : > { %12505 = vmatprep.subr.bf16.mxu1 %v21172_v52 }
 0xac7   : > { %8424 = vmatmul.mubr.f32.gmra.mrb[92].mxu1 %v21224_v20 }
 0xac8   : > { %8429 = vmatprep.mubr.f32.mxu1 %v19278_v21  ;;  %12513 = vmatpush3.bf16.msra.mxu1 %v21172_v52 }
 0xac9   : > { %12506 = vmatprep.subr.bf16.mxu1 %v21179_v19 }
 0xacb   : > { %8430 = vmatmul.mubr.f32.gmra.mrb[94].mxu1 %v21225_v41 }
 0xacc   : > { %8435 = vmatprep.mubr.f32.mxu1 %v19314_v33  ;;  %12514 = vmatpush3.bf16.msra.mxu1 %v21179_v19 }
 0xacf   : > { %8436 = vmatmul.mubr.f32.gmra.mrb[96].mxu1 %v21226_v51 }
 0xad0   : > { %8441 = vmatprep.mubr.f32.mxu1 %v19321_v32 }
 0xad3   : > { %8442 = vmatmul.mubr.f32.gmra.mrb[98].mxu1 %v21227_v10 }
 0xad4   : > { %8447 = vmatprep.mubr.f32.mxu1 %v19345_v23 }
 0xad7   : > { %8448 = vmatmul.mubr.f32.gmra.mrb[100].mxu1 %v21228_v40 }
 0xad8   : > { %8453 = vmatprep.mubr.f32.mxu1 %v19353_v13 }
 0xadb   : > { %8454 = vmatmul.mubr.f32.gmra.mrb[102].mxu1 %v21229_v35 }
 0xadc   : > { %8459 = vmatprep.mubr.f32.mxu1 %v19379_v63 }
 0xadf   : > { %8460 = vmatmul.mubr.f32.gmra.mrb[104].mxu1 %v21230_v43 }
 0xae0   : > { %8465 = vmatprep.mubr.f32.mxu1 %v19390_v47 }
 0xae3   : > { %8466 = vmatmul.mubr.f32.gmra.mrb[106].mxu1 %v8320_v60 }
 0xae4   : > { %8471 = vmatprep.mubr.f32.mxu1 %v19406_v11 }
 0xae7   : > { %8472 = vmatmul.mubr.f32.gmra.mrb[108].mxu1 %v8321_v1 }
 0xae8   : > { %8477 = vmatprep.mubr.f32.mxu1 %v19413_v57 }
 0xaeb   : > { %8478 = vmatmul.mubr.f32.gmra.mrb[110].mxu1 %v8322_v26 }
 0xb36   : > { %v19476_v3 = vpop.f32.mrb[96].mxu0 }
 0xb37   : > { %v19478_v49 = vpop.f32.mrb[97].mxu0 }
 0xb39   : > { %v11009_v7 = vpop.f32.mrb[64].mxu1 }
 0xb3a   : > { %v8007_v62 = vadd.f32 %v19483_v54, %v11009_v7  ;;  %v8001_v15 = vpop.f32.mrb[65].mxu1  ;;  %v19487_v38 = vpop.f32.mrb[98].mxu0 }
 0xb3b   : > { %v8002_v55 = vadd.f32 %v19483_v54, %v8001_v15  ;;  %v19490_v6 = vpop.f32.mrb[99].mxu0 }
 0xb3c   : > { %9849 = vst [vmem:[%s15816_s23 + $0x308] sm:$0xff] %v8007_v62 }
 0xb3d   : > { %9848 = vst [vmem:[%s15816_s23 + $0x300] sm:$0xff] %v8002_v55 }
 0xb3e   : > { %v19493_v16 = vpop.f32.mrb[100].mxu0 }
 0xb3f   : > { %v19495_v0 = vpop.f32.mrb[101].mxu0 }
 0xb41   : > { %v11012_v44 = vpop.f32.mrb[66].mxu1 }
 0xb42   : > { %v8017_v56 = vadd.f32 %v19483_v54, %v11012_v44  ;;  %v8011_v25 = vpop.f32.mrb[67].mxu1  ;;  %v19500_v52 = vpop.f32.mrb[102].mxu0 }
 0xb43   : > { %v8012_v34 = vadd.f32 %v19483_v54, %v8011_v25  ;;  %v19503_v42 = vpop.f32.mrb[103].mxu0 }
 0xb44   : > { %9851 = vst [vmem:[%s15816_s23 + $0x318] sm:$0xff] %v8017_v56 }
 0xb45   : > { %9850 = vst [vmem:[%s15816_s23 + $0x310] sm:$0xff] %v8012_v34 }
 0xb48   : > { %v19505_v19 = vpop.f32.mrb[104].mxu0 }
 0xb49   : > { %v19507_v36 = vpop.f32.mrb[105].mxu0 }
 0xb4a   : > { %v11015_v5 = vpop.f32.mrb[68].mxu1 }
 0xb4b   : > { %v8027_v31 = vadd.f32 %v19483_v54, %v11015_v5  ;;  %v8021_v48 = vpop.f32.mrb[69].mxu1 }
 0xb4c   : > { %v8022_v4 = vadd.f32 %v19483_v54, %v8021_v48  ;;  %v19511_v8 = vpop.f32.mrb[106].mxu0 }
 0xb4d   : > { %9853 = vst [vmem:[%s15816_s23 + $0x328] sm:$0xff] %v8027_v31  ;;  %v19514_v60 = vpop.f32.mrb[107].mxu0 }
 0xb4e   : > { %9852 = vst [vmem:[%s15816_s23 + $0x320] sm:$0xff] %v8022_v4 }
 0xb50   : > { %v19517_v27 = vpop.f32.mrb[108].mxu0 }
 0xb51   : > { %v19519_v28 = vpop.f32.mrb[109].mxu0 }
 0xb54   : > { %v11018_v22 = vpop.f32.mrb[70].mxu1 }
 0xb55   : > { %v8037_v61 = vadd.f32 %v19483_v54, %v11018_v22  ;;  %v8031_v1 = vpop.f32.mrb[71].mxu1  ;;  %v19522_v30 = vpop.f32.mrb[110].mxu0 }
 0xb56   : > { %v8032_v12 = vadd.f32 %v19483_v54, %v8031_v1  ;;  %v19525_v53 = vpop.f32.mrb[111].mxu0 }
 0xb57   : > { %9855 = vst [vmem:[%s15816_s23 + $0x338] sm:$0xff] %v8037_v61 }
 0xb58   : > { %9854 = vst [vmem:[%s15816_s23 + $0x330] sm:$0xff] %v8032_v12 }
 0xb5f   : > { %v19529_v58 = vpop.f32.mrb[112].mxu0 }
 0xb60   : > { %v11021_v46 = vpop.f32.mrb[72].mxu1  ;;  %v19531_v14 = vpop.f32.mrb[113].mxu0 }
 0xb61   : > { %v8047_v26 = vadd.f32 %v19483_v54, %v11021_v46  ;;  %v8041_v20 = vpop.f32.mrb[73].mxu1 }
 0xb62   : > { %v8042_v41 = vadd.f32 %v19483_v54, %v8041_v20 }
 0xb63   : > { %9857 = vst [vmem:[%s15816_s23 + $0x348] sm:$0xff] %v8047_v26  ;;  %v19536_v51 = vpop.f32.mrb[114].mxu0 }
 0xb64   : > { %9856 = vst [vmem:[%s15816_s23 + $0x340] sm:$0xff] %v8042_v41  ;;  %v19539_v10 = vpop.f32.mrb[115].mxu0 }
 0xb67   : > { %v19541_v40 = vpop.f32.mrb[116].mxu0 }
 0xb68   : > { %v11024_v35 = vpop.f32.mrb[74].mxu1  ;;  %v19543_v43 = vpop.f32.mrb[117].mxu0 }
 0xb69   : > { %v8057_v7 = vadd.f32 %v19483_v54, %v11024_v35  ;;  %v8051_v62 = vpop.f32.mrb[75].mxu1 }
 0xb6a   : > { %v8052_v15 = vadd.f32 %v19483_v54, %v8051_v62 }
 0xb6b   : > { %9859 = vst [vmem:[%s15816_s23 + $0x358] sm:$0xff] %v8057_v7  ;;  %v19548_v55 = vpop.f32.mrb[118].mxu0 }
 0xb6c   : > { %9858 = vst [vmem:[%s15816_s23 + $0x350] sm:$0xff] %v8052_v15  ;;  %v19551_v44 = vpop.f32.mrb[119].mxu0 }
 0xb6f   : > { %v19553_v56 = vpop.f32.mrb[120].mxu0 }
 0xb70   : > { %v19555_v25 = vpop.f32.mrb[121].mxu0 }
 0xb73   : > { %v11027_v34 = vpop.f32.mrb[76].mxu1 }
 0xb74   : > { %v8067_v5 = vadd.f32 %v19483_v54, %v11027_v34  ;;  %v8061_v31 = vpop.f32.mrb[77].mxu1  ;;  %v19558_v48 = vpop.f32.mrb[122].mxu0 }
 0xb75   : > { %v8062_v4 = vadd.f32 %v19483_v54, %v8061_v31  ;;  %v19561_v22 = vpop.f32.mrb[123].mxu0 }
 0xb76   : > { %9861 = vst [vmem:[%s15816_s23 + $0x368] sm:$0xff] %v8067_v5 }
 0xb77   : > { %9860 = vst [vmem:[%s15816_s23 + $0x360] sm:$0xff] %v8062_v4 }
 0xb7a   : > { %v19565_v61 = vpop.f32.mrb[124].mxu0 }
 0xb7b   : > { %21231 = vst [vmem:[#allocation79_spill] sm:$0xff] %v19565_v61  ;;  %v19567_v1 = vpop.f32.mrb[125].mxu0 }
 0xb7e   : > { %v11030_v12 = vpop.f32.mrb[78].mxu1 }
 0xb7f   : > { %v8077_v46 = vadd.f32 %v19483_v54, %v11030_v12  ;;  %v8071_v26 = vpop.f32.mrb[79].mxu1  ;;  %v19570_v20 = vpop.f32.mrb[126].mxu0 }
 0xb80   : > { %21232 = vst [vmem:[#allocation21_spill] sm:$0xff] %v19570_v20  ;;  %v8072_v41 = vadd.f32 %v19483_v54, %v8071_v26  ;;  %v19573_v35 = vpop.f32.mrb[127].mxu0 }
 0xb81   : > { %21233 = vst [vmem:[#allocation24_spill] sm:$0xff] %v19573_v35  ;;  %9863 = vst [vmem:[%s15816_s23 + $0x378] sm:$0xff] %v8077_v46 }
 0xb82   : > { %9862 = vst [vmem:[%s15816_s23 + $0x370] sm:$0xff] %v8072_v41  ;;  %v8389_v7 = vpop.f32.mrb[80].mxu1 }
 0xb83   : > { %v8390_v62 = vadd.f32 %v8389_v7, %v15230_v18  ;;  %v8391_v15 = vpop.f32.mrb[81].mxu1 }
 0xb84   : > { %v8392_v12 = vadd.f32 %v8391_v15, %v15233_v45 }
 0xb85   : > { %v9896_v34 = vmul.f32 -1.442695, %v8390_v62 }
 0xb86   : > { %v8395_v5 = vpop.f32.mrb[82].mxu1  ;;  %v9912_v41 = vmul.f32 -1.442695, %v8392_v12 }
 0xb87   : > { %13710 = vpow2.f32 %v9896_v34  ;;  %v8396_v31 = vadd.f32 %v8395_v5, %v15230_v18  ;;  %v8397_v4 = vpop.f32.mrb[83].mxu1 }
 0xb88   : > { %v8398_v11 = vadd.f32 %v8397_v4, %v15233_v45 }
 0xb89   : > { %v9897_v57 = vmul.f32 -1.442695, %v8396_v31 }
 0xb8a   : > { %v8401_v54 = vpop.f32.mrb[84].mxu1  ;;  %v9913_v7 = vmul.f32 -1.442695, %v8398_v11 }
 0xb8b   : > { %13712 = vpow2.f32 %v9897_v57  ;;  %v8402_v46 = vadd.f32 %v8401_v54, %v15230_v18  ;;  %v8403_v26 = vpop.f32.mrb[85].mxu1 }
 0xb8c   : > { %v8404_v31 = vadd.f32 %v8403_v26, %v15233_v45 }
 0xb8d   : > { %v9898_v47 = vmul.f32 -1.442695, %v8402_v46 }
 0xb8e   : > { %v8407_v20 = vpop.f32.mrb[86].mxu1 }
 0xb8f   : > { %13714 = vpow2.f32 %v9898_v47  ;;  %v8408_v62 = vadd.f32 %v8407_v20, %v15230_v18  ;;  %v8409_v34 = vpop.f32.mrb[87].mxu1  ;;  %v9914_v20 = vmul.f32 -1.442695, %v8404_v31 }
 0xb90   : > { %13716 = vpow2.f32 %v9912_v41  ;;  %v8410_v11 = vadd.f32 %v8409_v34, %v15233_v45 }
 0xb91   : > { %v13711_v5 = vpop.eup %13710  ;;  %v9899_v35 = vmul.f32 -1.442695, %v8408_v62  ;;  %13718 = vpow2.f32 %v9913_v7 }
 0xb92   : > { %v8693_v15 = vadd.f32 1.0, %v13711_v5  ;;  %v8413_v4 = vpop.f32.mrb[88].mxu1 }
 0xb93   : > { %13720 = vpow2.f32 %v9899_v35  ;;  %v8414_v57 = vadd.f32 %v8413_v4, %v15230_v18  ;;  %v8415_v54 = vpop.f32.mrb[89].mxu1  ;;  %v9915_v35 = vmul.f32 -1.442695, %v8410_v11 }
 0xb94   : > { %13722 = vrcp.f32 %v8693_v15  ;;  %v8416_v63 = vadd.f32 %v8415_v54, %v15233_v45 }
 0xb95   : > { %v13713_v12 = vpop.eup %13712  ;;  %v9900_v47 = vmul.f32 -1.442695, %v8414_v57 }
 0xb96   : > { %v8694_v46 = vadd.f32 1.0, %v13713_v12  ;;  %v8419_v41 = vpop.f32.mrb[90].mxu1  ;;  %v9916_v15 = vmul.f32 -1.442695, %v8416_v63  ;;  %v8551_v12 = vadd.f32 %v19476_v3, %v15278_v17 }
 0xb97   : > { %13724 = vpow2.f32 %v9900_v47  ;;  %v8420_v7 = vadd.f32 %v8419_v41, %v15230_v18  ;;  %v8421_v62 = vpop.f32.mrb[91].mxu1  ;;  %v8553_v47 = vadd.f32 %v19478_v49, %v15273_v24  ;;  %v8559_v49 = vadd.f32 %v19490_v6, %v15273_v24 }
 0xb98   : > { %13726 = vrcp.f32 %v8694_v46  ;;  %v8422_v41 = vadd.f32 %v8421_v62, %v15233_v45  ;;  %v8557_v62 = vadd.f32 %v19487_v38, %v15278_v17 }
 0xb99   : > { %v13715_v26 = vpop.eup %13714  ;;  %v9901_v5 = vmul.f32 -1.442695, %v8420_v7  ;;  %13728 = vpow2.f32 %v9914_v20 }
 0xb9a   : > { %v8695_v4 = vadd.f32 1.0, %v13715_v26  ;;  %v8425_v23 = vpop.f32.mrb[92].mxu1  ;;  %v13717_v33 = vpop.eup %13716 }
 0xb9b   : > { %13730 = vpow2.f32 %v9901_v5  ;;  %v8426_v34 = vadd.f32 %v8425_v23, %v15230_v18  ;;  %v8427_v31 = vpop.f32.mrb[93].mxu1  ;;  %v13719_v57 = vpop.eup %13718  ;;  %v8789_v20 = vadd.f32 1.0, %v13717_v33 }
 0xb9c   : > { %13732 = vrcp.f32 %v8695_v4  ;;  %v8790_v26 = vadd.f32 1.0, %v13719_v57  ;;  %v8428_v3 = vadd.f32 %v8427_v31, %v15233_v45  ;;  %v9917_v57 = vmul.f32 -1.442695, %v8422_v41 }
 0xb9d   : > { %v13721_v54 = vpop.eup %13720  ;;  %13734 = vpow2.f32 %v9915_v35  ;;  %v9902_v11 = vmul.f32 -1.442695, %v8426_v34 }
 0xb9e   : > { %v13723_v46 = vpop.eup %13722  ;;  %v8696_v63 = vadd.f32 1.0, %v13721_v54  ;;  %13736 = vpow2.f32 %v9916_v15  ;;  %v8431_v7 = vpop.f32.mrb[94].mxu1  ;;  %v9918_v6 = vmul.f32 -1.442695, %v8428_v3 }
 0xb9f   : > { %v8837_v23 = vmul.f32 %v13723_v46, %v8553_v47  ;;  %13738 = vpow2.f32 %v9902_v11  ;;  %v8432_v5 = vadd.f32 %v8431_v7, %v15230_v18  ;;  %v8433_v4 = vpop.f32.mrb[95].mxu1 }
 0xba0   : > { %13740 = vrcp.f32 %v8696_v63  ;;  %v8434_v11 = vadd.f32 %v8433_v4, %v15233_v45 }
 0xba1   : > { %v13725_v61 = vpop.eup %13724  ;;  %v9903_v35 = vmul.f32 -1.442695, %v8432_v5  ;;  %v19598_v33 = vadd.f32 %v8837_v23, %v8551_v12  ;;  %13742 = vrcp.f32 %v8789_v20  ;;  %v8565_v23 = vadd.f32 %v19495_v0, %v15273_v24 }
 0xba2   : > { %v13727_v15 = vpop.eup %13726  ;;  %v8697_v34 = vadd.f32 1.0, %v13725_v61  ;;  %v8437_v54 = vpop.f32.mrb[96].mxu1  ;;  %13744 = vrcp.f32 %v8790_v26  ;;  %v8563_v5 = vadd.f32 %v19493_v16, %v15278_v17  ;;  %v8571_v0 = vadd.f32 %v19503_v42, %v15273_v24 }
 0xba3   : > { %v8838_v47 = vmul.f32 %v13727_v15, %v8559_v49  ;;  %v8438_v31 = vadd.f32 %v8437_v54, %v15230_v18  ;;  %v8439_v46 = vpop.f32.mrb[97].mxu1  ;;  %v13729_v63 = vpop.eup %13728  ;;  %v9919_v49 = vmul.f32 -1.442695, %v8434_v11  ;;  %v8569_v11 = vadd.f32 %v19500_v52, %v15278_v17 }
 0xba4   : > { %13746 = vrcp.f32 %v8697_v34  ;;  %v8577_v42 = vadd.f32 %v19507_v36, %v15273_v24 }
 0xba5   : > { %v13731_v12 = vpop.eup %13730  ;;  %v8854_v7 = vadd.f32 %v8838_v47, %v8557_v62  ;;  %13748 = vpow2.f32 %v9903_v35  ;;  %v9904_v20 = vmul.f32 -1.442695, %v8438_v31  ;;  %v8791_v35 = vadd.f32 1.0, %v13729_v63 }
 0xba6   : > { %v13733_v38 = vpop.eup %13732  ;;  %v8698_v61 = vadd.f32 1.0, %v13731_v12  ;;  %13750 = vpow2.f32 %v9917_v57  ;;  %v8443_v41 = vpop.f32.mrb[98].mxu1 }
 0xba7   : > { %v13735_v26 = vpop.eup %13734  ;;  %13752 = vtanh.f32 %v8854_v7  ;;  %v8839_v4 = vmul.f32 %v13733_v38, %v8565_v23  ;;  %v8445_v15 = vpop.f32.mrb[99].mxu1  ;;  %v8444_v62 = vadd.f32 %v8443_v41, %v15230_v18 }
 0xba8   : > { %v13737_v3 = vpop.eup %13736  ;;  %13754 = vpow2.f32 %v9918_v6  ;;  %v8792_v47 = vadd.f32 1.0, %v13735_v26  ;;  %v8440_v6 = vadd.f32 %v8439_v46, %v15233_v45  ;;  %v8446_v52 = vadd.f32 %v8445_v15, %v15233_v45 }
 0xba9   : > { %v13739_v34 = vpop.eup %13738  ;;  %13756 = vrcp.f32 %v8698_v61  ;;  %v19611_v57 = vadd.f32 %v8839_v4, %v8563_v5  ;;  %v9905_v63 = vmul.f32 -1.442695, %v8444_v62  ;;  %v8793_v41 = vadd.f32 1.0, %v13737_v3 }
 0xbaa   : > { %v13741_v54 = vpop.eup %13740  ;;  %v8699_v31 = vadd.f32 1.0, %v13739_v34  ;;  %13758 = vpow2.f32 %v9904_v20  ;;  %v8449_v16 = vpop.f32.mrb[100].mxu1  ;;  %v8575_v46 = vadd.f32 %v19505_v19, %v15278_v17  ;;  %v9920_v36 = vmul.f32 -1.442695, %v8440_v6 }
 0xbab   : > { %v8840_v12 = vmul.f32 %v13741_v54, %v8571_v0  ;;  %13760 = vpow2.f32 %v9919_v49  ;;  %v19616_v7 = vpop.f32.mrb[101].mxu1  ;;  %v19618_v23 = vpop.eup %13742  ;;  %v8450_v38 = vadd.f32 %v8449_v16, %v15230_v18  ;;  %v9921_v15 = vmul.f32 -1.442695, %v8446_v52 }
 0xbac   : > { %13762 = vrcp.f32 %v8699_v31  ;;  %v13745_v61 = vpop.eup %13744  ;;  %v8583_v16 = vadd.f32 %v19514_v60, %v15273_v24 }
 0xbad   : > { %13764 = vrcp.f32 %v8791_v35  ;;  %v8856_v20 = vadd.f32 %v8840_v12, %v8569_v11  ;;  %v9906_v35 = vmul.f32 -1.442695, %v8450_v38 }
 0xbae   : > { %v13747_v26 = vpop.eup %13746  ;;  %13766 = vrcp.f32 %v8792_v47  ;;  %v8455_v5 = vpop.f32.mrb[102].mxu1 }
 0xbaf   : > { %v13749_v4 = vpop.eup %13748  ;;  %13768 = vtanh.f32 %v8856_v20  ;;  %v8841_v49 = vmul.f32 %v13747_v26, %v8577_v42  ;;  %v8456_v62 = vadd.f32 %v8455_v5, %v15230_v18  ;;  %v8457_v34 = vpop.f32.mrb[103].mxu1  ;;  %v8581_v42 = vadd.f32 %v19511_v8, %v15278_v17 }
 0xbb0   : > { %v13751_v0 = vpop.eup %13750  ;;  %v8700_v54 = vadd.f32 1.0, %v13749_v4  ;;  %13770 = vpow2.f32 %v9905_v63 }
 0xbb1   : > { %v13753_v3 = vpop.eup %13752  ;;  %13772 = vrcp.f32 %v8793_v41  ;;  %v19627_v31 = vadd.f32 %v8841_v49, %v8575_v46  ;;  %v9907_v11 = vmul.f32 -1.442695, %v8456_v62  ;;  %v8794_v26 = vadd.f32 1.0, %v13751_v0 }
 0xbb2   : > { %v13755_v19 = vpop.eup %13754  ;;  %v8886_v47 = vsub.f32 %v19143_v50, %v13753_v3  ;;  %13774 = vrcp.f32 %v8700_v54  ;;  %v8461_v12 = vpop.f32.mrb[104].mxu1  ;;  %v8589_v50 = vadd.f32 %v19519_v28, %v15273_v24 }
 0xbb3   : > { %v13757_v6 = vpop.eup %13756  ;;  %13776 = vpow2.f32 %v9920_v36  ;;  %v8462_v63 = vadd.f32 %v8461_v12, %v15230_v18  ;;  %v8463_v38 = vpop.f32.mrb[105].mxu1  ;;  %v8795_v46 = vadd.f32 1.0, %v13755_v19  ;;  %v8458_v36 = vadd.f32 %v8457_v34, %v15233_v45 }
 0xbb4   : > { %v13759_v20 = vpop.eup %13758  ;;  %v8902_v41 = vmul.f32 %v13745_v61, %v8886_v47  ;;  %v8842_v52 = vmul.f32 %v13757_v6, %v8583_v16  ;;  %13778 = vpow2.f32 %v9906_v35  ;;  %v8587_v61 = vadd.f32 %v19517_v27, %v15278_v17 }
 0xbb5   : > { %v13761_v60 = vpop.eup %13760  ;;  %v8701_v5 = vadd.f32 1.0, %v13759_v20  ;;  %13780 = vpow2.f32 %v9921_v15  ;;  %v9908_v35 = vmul.f32 -1.442695, %v8462_v63  ;;  %v8452_v27 = vadd.f32 %v19616_v7, %v15233_v45 }
 0xbb6   : > { %v13763_v4 = vpop.eup %13762  ;;  %v19638_v49 = vadd.f32 %v13753_v3, %v8902_v41  ;;  %v8858_v8 = vadd.f32 %v8842_v52, %v8581_v42  ;;  %13782 = vpow2.f32 %v9907_v11  ;;  %v8467_v62 = vpop.f32.mrb[106].mxu1  ;;  %v8796_v3 = vadd.f32 1.0, %v13761_v60 }
 0xbb7   : > { %v19641_v54 = vpop.eup %13764  ;;  %v8843_v28 = vmul.f32 %v13763_v4, %v8589_v50  ;;  %13784 = vrcp.f32 %v8701_v5  ;;  %v8469_v0 = vpop.f32.mrb[107].mxu1  ;;  %v8468_v34 = vadd.f32 %v8467_v62, %v15230_v18  ;;  %v9923_v11 = vmul.f32 -1.442695, %v8458_v36 }
 0xbb8   : > { %v13767_v19 = vpop.eup %13766  ;;  %9112 = vst [vmem:[%s19645_s17 + $0x8] sm:$0xff] %v19638_v49  ;;  %13786 = vtanh.f32 %v8858_v8  ;;  %v8595_v63 = vadd.f32 %v19525_v53, %v15273_v24  ;;  %v8593_v7 = vadd.f32 %v19522_v30, %v15278_v17  ;;  %v9922_v5 = vmul.f32 -1.442695, %v8452_v27 }
 0xbb9   : > { %v13769_v15 = vpop.eup %13768  ;;  %13788 = vrcp.f32 %v8794_v26  ;;  %v19650_v47 = vadd.f32 %v8843_v28, %v8587_v61  ;;  %v9909_v50 = vmul.f32 -1.442695, %v8468_v34  ;;  %v8464_v4 = vadd.f32 %v8463_v38, %v15233_v45 }
 0xbba   : > { %v13771_v16 = vpop.eup %13770  ;;  %13790 = vrcp.f32 %v8795_v46  ;;  %v8473_v12 = vpop.f32.mrb[108].mxu1  ;;  %v8888_v6 = vsub.f32 %v19187_v2, %v13769_v15 }
 0xbbb   : > { %v19655_v42 = vpop.eup %13772  ;;  %v8702_v20 = vadd.f32 1.0, %v13771_v16  ;;  %13792 = vpow2.f32 %v9908_v35  ;;  %v8475_v41 = vpop.f32.mrb[109].mxu1  ;;  %v8474_v28 = vadd.f32 %v8473_v12, %v15230_v18  ;;  %v9924_v27 = vmul.f32 -1.442695, %v8464_v4 }
 0xbbc   : > { %v13775_v52 = vpop.eup %13774  ;;  %13794 = vrcp.f32 %v8796_v3  ;;  %v8904_v60 = vmul.f32 %v13767_v19, %v8888_v6  ;;  %v8601_v19 = vadd.f32 %v19531_v14, %v15273_v24  ;;  %v8599_v3 = vadd.f32 %v19529_v58, %v15278_v17 }
 0xbbd   : > { %v13777_v26 = vpop.eup %13776  ;;  %v8844_v46 = vmul.f32 %v13775_v52, %v8595_v63  ;;  %13796 = vrcp.f32 %v8702_v20  ;;  %v9910_v14 = vmul.f32 -1.442695, %v8474_v28  ;;  %v8605_v4 = vadd.f32 %v19536_v51, %v15278_v17 }
 0xbbe   : > { %v13779_v2 = vpop.eup %13778  ;;  %13798 = vpow2.f32 %v9923_v11  ;;  %v8479_v53 = vpop.f32.mrb[110].mxu1  ;;  %v19662_v8 = vadd.f32 %v13769_v15, %v8904_v60  ;;  %v8797_v34 = vadd.f32 1.0, %v13777_v26  ;;  %v8470_v11 = vadd.f32 %v8469_v0, %v15233_v45 }
 0xbbf   : > { %v13781_v36 = vpop.eup %13780  ;;  %v8860_v62 = vadd.f32 %v8844_v46, %v8593_v7  ;;  %v8703_v61 = vadd.f32 1.0, %v13779_v2  ;;  %13800 = vtanh.f32 %v19598_v33  ;;  %v19666_v35 = vpop.f32.mrb[111].mxu1 }
 0xbc0   : > { %v13783_v30 = vpop.eup %13782  ;;  %13802 = vpow2.f32 %v9909_v50  ;;  %9114 = vst [vmem:[%s19645_s17 + $0x18] sm:$0xff] %v19662_v8  ;;  %v8607_v50 = vadd.f32 %v19539_v10, %v15273_v24  ;;  %v8798_v60 = vadd.f32 1.0, %v13781_v36  ;;  %v9925_v7 = vmul.f32 -1.442695, %v8470_v11 }
 0xbc1   : > { %v13785_v38 = vpop.eup %13784  ;;  %13804 = vtanh.f32 %v8860_v62  ;;  %v8704_v15 = vadd.f32 1.0, %v13783_v30  ;;  %v8476_v36 = vadd.f32 %v8475_v41, %v15233_v45 }
 0xbc2   : > { %v13787_v16 = vpop.eup %13786  ;;  %v8845_v33 = vmul.f32 %v13785_v38, %v8601_v19  ;;  %13806 = vrcp.f32 %v8703_v61  ;;  %v8613_v19 = vadd.f32 %v19543_v43, %v15273_v24 }
 0xbc3   : > { %v13789_v12 = vpop.eup %13788  ;;  %v8890_v6 = vsub.f32 %v19232_v9, %v13787_v16  ;;  %13808 = vpow2.f32 %v9922_v5  ;;  %v8480_v9 = vadd.f32 %v8479_v53, %v15230_v18  ;;  %v9926_v11 = vmul.f32 -1.442695, %v8476_v36 }
 0xbc4   : > { %v19676_v63 = vpop.eup %13790  ;;  %13810 = vrcp.f32 %v8704_v15  ;;  %v19678_v20 = vadd.f32 %v8845_v33, %v8599_v3 }
 0xbc5   : > { %v13793_v52 = vpop.eup %13792  ;;  %v8906_v58 = vmul.f32 %v13789_v12, %v8890_v6  ;;  %13812 = vrcp.f32 %v8797_v34  ;;  %v9911_v53 = vmul.f32 -1.442695, %v8480_v9 }
 0xbc6   : > { %v13795_v26 = vpop.eup %13794  ;;  %v8705_v0 = vadd.f32 1.0, %v13793_v52  ;;  %13814 = vpow2.f32 %v9924_v27 }
 0xbc7   : > { %v13797_v46 = vpop.eup %13796  ;;  %v19683_v2 = vadd.f32 %v13787_v16, %v8906_v58  ;;  %13816 = vpow2.f32 %v9910_v14  ;;  %v8619_v16 = vadd.f32 %v19551_v44, %v15273_v24  ;;  %v8625_v58 = vadd.f32 %v19555_v25, %v15273_v24 }
 0xbc8   : > { %v13799_v5 = vpop.eup %13798  ;;  %v8846_v62 = vmul.f32 %v13797_v46, %v8607_v50  ;;  %13818 = vrcp.f32 %v8705_v0  ;;  %v8623_v0 = vadd.f32 %v19553_v56, %v15278_v17 }
 0xbc9   : > { %v13801_v10 = vpop.eup %13800  ;;  %9116 = vst [vmem:[%s19645_s17 + $0x28] sm:$0xff] %v19683_v2  ;;  %13820 = vrcp.f32 %v8798_v60  ;;  %v8800_v38 = vadd.f32 1.0, %v13799_v5  ;;  %v8482_v60 = vadd.f32 %v19666_v35, %v15233_v45  ;;  %v8631_v45 = vadd.f32 %v19561_v22, %v15273_v24 }
 0xbca   : > { %v13803_v61 = vpop.eup %13802  ;;  %v8862_v28 = vadd.f32 %v8846_v62, %v8605_v4  ;;  %v8885_v18 = vsub.f32 %v19132_v37, %v13801_v10  ;;  %13822 = vpow2.f32 %v9925_v7  ;;  %v8611_v37 = vadd.f32 %v19541_v40, %v15278_v17 }
 0xbcb   : > { %v13805_v30 = vpop.eup %13804  ;;  %v8706_v51 = vadd.f32 1.0, %v13803_v61  ;;  %13824 = vtanh.f32 %v19611_v57  ;;  %v9927_v5 = vmul.f32 -1.442695, %v8482_v60 }
 0xbcc   : > { %v13807_v3 = vpop.eup %13806  ;;  %13826 = vtanh.f32 %v8862_v28  ;;  %v8901_v34 = vmul.f32 %v19618_v23, %v8885_v18  ;;  %v8892_v41 = vsub.f32 %v19278_v21, %v13805_v30  ;;  %v8617_v21 = vadd.f32 %v19548_v55, %v15278_v17 }
 0xbcd   : > { %v13809_v15 = vpop.eup %13808  ;;  %v8847_v33 = vmul.f32 %v13807_v3, %v8613_v19  ;;  %13828 = vrcp.f32 %v8706_v51  ;;  %v8637_v3 = vadd.f32 %v19567_v1, %v15273_v24 }
 0xbce   : > { %v13811_v43 = vpop.eup %13810  ;;  %v8917_v27 = vadd.f32 %v13801_v10, %v8901_v34  ;;  %13830 = vpow2.f32 %v9911_v53  ;;  %v8908_v57 = vmul.f32 %v13795_v26, %v8892_v41  ;;  %v8799_v26 = vadd.f32 1.0, %v13809_v15 }
 0xbcf   : > { %v19700_v12 = vpop.eup %13812  ;;  %v8848_v23 = vmul.f32 %v13811_v43, %v8619_v16  ;;  %13832 = vrcp.f32 %v8800_v38  ;;  %v8863_v40 = vadd.f32 %v8847_v33, %v8611_v37  ;;  %v8629_v10 = vadd.f32 %v19558_v48, %v15278_v17  ;;  %v21234_v16 = vld [vmem:[#allocation79_spill] sm:$0xff] }
 0xbd0   : > { %v13815_v6 = vpop.eup %13814  ;;  %11099 = vmatprep.mubr.f32.mxu0 %v8917_v27  ;;  %9111 = vst [vmem:[%s19645_s17] sm:$0xff] %v8917_v27  ;;  %13834 = vtanh.f32 %v19627_v31  ;;  %v19706_v44 = vadd.f32 %v13805_v30, %v8908_v57 }
 0xbd1   : > { %v13817_v14 = vpop.eup %13816  ;;  %v8864_v52 = vadd.f32 %v8848_v23, %v8617_v21  ;;  %11100 = vmatmul.mubr.f32.vlgmr.msra.gmra.mrb[128].mxu0 %v19638_v49  ;;  %13836 = vtanh.f32 %v19650_v47  ;;  %v8801_v9 = vadd.f32 1.0, %v13815_v6  ;;  %v21236_v23 = vld [vmem:[#allocation76_spill] sm:$0xff] }
 0xbd2   : > { %v13819_v55 = vpop.eup %13818  ;;  %v8707_v50 = vadd.f32 1.0, %v13817_v14  ;;  %13838 = vpow2.f32 %v9926_v11  ;;  %9118 = vst [vmem:[%s19645_s17 + $0x38] sm:$0xff] %v19706_v44 }
 0xbd3   : > { %v13821_v31 = vpop.eup %13820  ;;  %13840 = vtanh.f32 %v8864_v52  ;;  %v8849_v7 = vmul.f32 %v13819_v55, %v8625_v58  ;;  %v21237_v55 = vld [vmem:[#allocation16_spill] sm:$0xff] }
 0xbd4   : > { %v13823_v25 = vpop.eup %13822  ;;  %13842 = vrcp.f32 %v8707_v50 }
 0xbd5   : > { %v13825_v49 = vpop.eup %13824  ;;  %13844 = vtanh.f32 %v19678_v20  ;;  %v8865_v47 = vadd.f32 %v8849_v7, %v8623_v0  ;;  %v8802_v53 = vadd.f32 1.0, %v13823_v25 }
 0xbd6   : > { %v13827_v46 = vpop.eup %13826  ;;  %v8887_v35 = vsub.f32 %v19176_v59, %v13825_v49  ;;  %13846 = vtanh.f32 %v8863_v40 }
 0xbd7   : > { %v13829_v4 = vpop.eup %13828  ;;  %13848 = vrcp.f32 %v8799_v26  ;;  %v8894_v56 = vsub.f32 %v19321_v32, %v13827_v46 }
 0xbd8   : > { %v13831_v62 = vpop.eup %13830  ;;  %v8850_v36 = vmul.f32 %v13829_v4, %v8631_v45  ;;  %v8903_v20 = vmul.f32 %v19641_v54, %v8887_v35  ;;  %13850 = vtanh.f32 %v8865_v47 }
 0xbd9   : > { %v13833_v61 = vpop.eup %13832  ;;  %13852 = vrcp.f32 %v8801_v9  ;;  %v8708_v22 = vadd.f32 1.0, %v13831_v62  ;;  %v8910_v28 = vmul.f32 %v13821_v31, %v8894_v56  ;;  %v21238_v31 = vld [vmem:[#allocation24_spill] sm:$0xff] }
 0xbda   : > { %v13835_v59 = vpop.eup %13834  ;;  %v8866_v18 = vadd.f32 %v8850_v36, %v8629_v10  ;;  %v8919_v30 = vadd.f32 %v13825_v49, %v8903_v20  ;;  %13854 = vpow2.f32 %v9927_v5  ;;  %v8643_v26 = vadd.f32 %v21238_v31, %v15273_v24  ;;  %v21239_v49 = vld [vmem:[#allocation21_spill] sm:$0xff] }
 0xbdb   : > { %v13837_v32 = vpop.eup %13836  ;;  %13856 = vrcp.f32 %v8708_v22  ;;  %v8889_v19 = vsub.f32 %v19216_v39, %v13835_v59  ;;  %v8926_v48 = vadd.f32 %v13827_v46, %v8910_v28  ;;  %v8641_v9 = vadd.f32 %v21239_v49, %v15278_v17  ;;  %v21240_v24 = vld [vmem:[#allocation77_spill] sm:$0xff]  ;;  %v21242_v28 = vld [vmem:[#allocation20_spill] sm:$0xff] }
 0xbdc   : > { %v13839_v38 = vpop.eup %13838  ;;  %13858 = vtanh.f32 %v8866_v18  ;;  %11102 = vmatprep.mubr.f32.mxu0 %v8919_v30  ;;  %9113 = vst [vmem:[%s19645_s17 + $0x10] sm:$0xff] %v8919_v30  ;;  %v8891_v54 = vsub.f32 %v19253_v29, %v13837_v32  ;;  %v8635_v29 = vadd.f32 %v21234_v16, %v15278_v17 }
 0xbdd   : > { %v13841_v51 = vpop.eup %13840  ;;  %11103 = vmatmul.mubr.f32.gmra.mrb[130].mxu0 %v19662_v8  ;;  %v8905_v34 = vmul.f32 %v19655_v42, %v8889_v19  ;;  %9120 = vst [vmem:[%s19645_s17 + $0x48] sm:$0xff] %v8926_v48  ;;  %13860 = vrcp.f32 %v8802_v53  ;;  %v21235_v8 = vld [vmem:[#allocation92_spill] sm:$0xff]  ;;  %v8803_v21 = vadd.f32 1.0, %v13839_v38 }
 0xbde   : > { %v13843_v41 = vpop.eup %13842  ;;  %v8907_v39 = vmul.f32 %v19676_v63, %v8891_v54  ;;  %v8896_v15 = vsub.f32 %v19353_v13, %v13841_v51  ;;  %v13892_v19 = vld [vmem:[%s19859_s5 + $0x2] ss:$0 sm:$0xff] }
 0xbdf   : > { %v13845_v37 = vpop.eup %13844  ;;  %v8851_v33 = vmul.f32 %v13843_v41, %v8637_v3  ;;  %v8921_v43 = vadd.f32 %v13835_v59, %v8905_v34 }
 0xbe0   : > { %v13847_v1 = vpop.eup %13846  ;;  %v8923_v27 = vadd.f32 %v13837_v32, %v8907_v39  ;;  %v8893_v11 = vsub.f32 %v21235_v8, %v13845_v37  ;;  %v8912_v42 = vmul.f32 %v13833_v61, %v8896_v15 }
 0xbe1   : > { %v13849_v57 = vpop.eup %13848  ;;  %11105 = vmatprep.mubr.f32.mxu1 %v8921_v43  ;;  %9115 = vst [vmem:[%s19645_s17 + $0x20] sm:$0xff] %v8921_v43  ;;  %v8895_v63 = vsub.f32 %v21236_v23, %v13847_v1  ;;  %v8867_v13 = vadd.f32 %v8851_v33, %v8635_v29 }
 0xbe2   : > { %v13851_v40 = vpop.eup %13850  ;;  %11106 = vmatmul.mubr.f32.vlgmr.msra.gmra.mrb[112].mxu1 %v19683_v2  ;;  %9117 = vst [vmem:[%s19645_s17 + $0x30] sm:$0xff] %v8923_v27  ;;  %v8909_v6 = vmul.f32 %v19700_v12, %v8893_v11  ;;  %v8928_v14 = vadd.f32 %v13841_v51, %v8912_v42 }
 0xbe3   : > { %v13853_v52 = vpop.eup %13852  ;;  %11108 = vmatprep.mubr.f32.mxu1 %v8923_v27  ;;  %v8911_v58 = vmul.f32 %v13849_v57, %v8895_v63  ;;  %v8897_v50 = vsub.f32 %v21237_v55, %v13851_v40  ;;  %13862 = vtanh.f32 %v8867_v13 }
 0xbe4   : > { %v13855_v60 = vpop.eup %13854  ;;  %v8925_v0 = vadd.f32 %v13845_v37, %v8909_v6  ;;  %9122 = vst [vmem:[%s19645_s17 + $0x58] sm:$0xff] %v8928_v14  ;;  %13864 = vrcp.f32 %v8803_v21 }
 0xbe5   : > { %v13857_v7 = vpop.eup %13856  ;;  %v8927_v2 = vadd.f32 %v13847_v1, %v8911_v58  ;;  %v8913_v12 = vmul.f32 %v13853_v52, %v8897_v50  ;;  %v8804_v4 = vadd.f32 1.0, %v13855_v60 }
 0xbe6   : > { %v13859_v25 = vpop.eup %13858  ;;  %v8852_v47 = vmul.f32 %v13857_v7, %v8643_v26  ;;  %11109 = vmatmul.mubr.f32.gmra.mrb[114].mxu1 %v19706_v44  ;;  %9119 = vst [vmem:[%s19645_s17 + $0x40] sm:$0xff] %v8925_v0  ;;  %v21241_v44 = vld [vmem:[#allocation17_spill] sm:$0xff] }
 0xbe7   : > { %11111 = vmatprep.mubr.f32.mxu1 %v8925_v0  ;;  %9121 = vst [vmem:[%s19645_s17 + $0x50] sm:$0xff] %v8927_v2  ;;  %v8929_v46 = vadd.f32 %v13851_v40, %v8913_v12  ;;  %v8898_v45 = vsub.f32 %v21240_v24, %v13859_v25  ;;  %v13861_v35 = vpop.eup %13860 }
 0xbe8   : > { %v8868_v5 = vadd.f32 %v8852_v47, %v8641_v9 }
 0xbe9   : > { %9123 = vst [vmem:[%s19645_s17 + $0x60] sm:$0xff] %v8929_v46  ;;  %v8914_v56 = vmul.f32 %v13861_v35, %v8898_v45 }
 0xbea   : > { %13866 = vtanh.f32 %v8868_v5  ;;  %11112 = vmatmul.mubr.f32.gmra.mrb[116].mxu1 %v8926_v48 }
 0xbeb   : > { %11114 = vmatprep.mubr.f32.mxu1 %v8927_v2  ;;  %v8930_v17 = vadd.f32 %v13859_v25, %v8914_v56  ;;  %13868 = vrcp.f32 %v8804_v4 }
 0xbed   : > { %v13863_v62 = vpop.eup %13862  ;;  %9124 = vst [vmem:[%s19645_s17 + $0x68] sm:$0xff] %v8930_v17 }
 0xbee   : > { %11115 = vmatmul.mubr.f32.gmra.mrb[118].mxu1 %v8928_v14  ;;  %v8899_v10 = vsub.f32 %v21241_v44, %v13863_v62  ;;  %v13865_v36 = vpop.eup %13864 }
 0xbef   : > { %11117 = vmatprep.mubr.f32.mxu1 %v8929_v46 }
 0xbf0   : > { %v8915_v20 = vmul.f32 %v13865_v36, %v8899_v10 }
 0xbf2   : > { %11118 = vmatmul.mubr.f32.gmra.mrb[120].mxu1 %v8930_v17  ;;  %v8931_v61 = vadd.f32 %v13863_v62, %v8915_v20 }
 0xbf4   : > { %v13867_v22 = vpop.eup %13866  ;;  %11120 = vmatprep.mubr.f32.mxu1 %v8931_v61  ;;  %9125 = vst [vmem:[%s19645_s17 + $0x70] sm:$0xff] %v8931_v61 }
 0xbf5   : > { %v8900_v59 = vsub.f32 %v21242_v28, %v13867_v22  ;;  %v13869_v18 = vpop.eup %13868 }
 0xbf7   : > { %v8916_v53 = vmul.f32 %v13869_v18, %v8900_v59 }
 0xbf9   : > { %v8932_v30 = vadd.f32 %v13867_v22, %v8916_v53 }
 0xbfb   : > { %11121 = vmatmul.mubr.f32.gmra.mrb[122].mxu1 %v8932_v30  ;;  %9126 = vst [vmem:[%s19645_s17 + $0x78] sm:$0xff] %v8932_v30 }
 0xca4   : > { %v11101_v32 = vpop.f32.mrb[128].mxu0 }
 0xca5   : > { %v9005_v48 = vadd.f32 %v13892_v19, %v11101_v32  ;;  %v8999_v38 = vpop.f32.mrb[129].mxu0 }
 0xca6   : > { %v9000_v54 = vadd.f32 %v13892_v19, %v8999_v38 }
 0xca7   : > { %9929 = vst [vmem:[%s15816_s23 + $0x388] sm:$0xff] %v9005_v48 }
 0xca8   : > { %9928 = vst [vmem:[%s15816_s23 + $0x380] sm:$0xff] %v9000_v54 }
 0xcb0   : > { %v11104_v51 = vpop.f32.mrb[130].mxu0 }
 0xcb1   : > { %v9015_v3 = vadd.f32 %v13892_v19, %v11104_v51  ;;  %v9009_v34 = vpop.f32.mrb[131].mxu0 }
 0xcb2   : > { %v9010_v41 = vadd.f32 %v13892_v19, %v9009_v34 }
 0xcb3   : > { %9931 = vst [vmem:[%s15816_s23 + $0x398] sm:$0xff] %v9015_v3 }
 0xcb4   : > { %9930 = vst [vmem:[%s15816_s23 + $0x390] sm:$0xff] %v9010_v41 }
 0xcb5   : > { %v11107_v39 = vpop.f32.mrb[112].mxu1 }
 0xcb6   : > { %v9025_v15 = vadd.f32 %v13892_v19, %v11107_v39  ;;  %v9019_v37 = vpop.f32.mrb[113].mxu1 }
 0xcb7   : > { %v9020_v16 = vadd.f32 %v13892_v19, %v9019_v37 }
 0xcb8   : > { %9933 = vst [vmem:[%s15816_s23 + $0x3a8] sm:$0xff] %v9025_v15 }
 0xcb9   : > { %9932 = vst [vmem:[%s15816_s23 + $0x3a0] sm:$0xff] %v9020_v16  ;;  %v11110_v29 = vpop.f32.mrb[114].mxu1 }
 0xcba   : > { %v9035_v33 = vadd.f32 %v13892_v19, %v11110_v29  ;;  %v9029_v43 = vpop.f32.mrb[115].mxu1 }
 0xcbb   : > { %v9030_v1 = vadd.f32 %v13892_v19, %v9029_v43 }
 0xcbc   : > { %9935 = vst [vmem:[%s15816_s23 + $0x3b8] sm:$0xff] %v9035_v33 }
 0xcbd   : > { %9934 = vst [vmem:[%s15816_s23 + $0x3b0] sm:$0xff] %v9030_v1  ;;  %v11113_v27 = vpop.f32.mrb[116].mxu1 }
 0xcbe   : > { %v9045_v8 = vadd.f32 %v13892_v19, %v11113_v27  ;;  %v9039_v11 = vpop.f32.mrb[117].mxu1 }
 0xcbf   : > { %v9040_v42 = vadd.f32 %v13892_v19, %v9039_v11 }
 0xcc0   : > { %9937 = vst [vmem:[%s15816_s23 + $0x3c8] sm:$0xff] %v9045_v8 }
 0xcc1   : > { %9936 = vst [vmem:[%s15816_s23 + $0x3c0] sm:$0xff] %v9040_v42  ;;  %v11116_v57 = vpop.f32.mrb[118].mxu1 }
 0xcc2   : > { %v9055_v21 = vadd.f32 %v13892_v19, %v11116_v57  ;;  %v9049_v23 = vpop.f32.mrb[119].mxu1 }
 0xcc3   : > { %v9050_v63 = vadd.f32 %v13892_v19, %v9049_v23 }
 0xcc4   : > { %9939 = vst [vmem:[%s15816_s23 + $0x3d8] sm:$0xff] %v9055_v21 }
 0xcc5   : > { %9938 = vst [vmem:[%s15816_s23 + $0x3d0] sm:$0xff] %v9050_v63  ;;  %v11119_v13 = vpop.f32.mrb[120].mxu1 }
 0xcc6   : > { %v9065_v40 = vadd.f32 %v13892_v19, %v11119_v13  ;;  %v9059_v6 = vpop.f32.mrb[121].mxu1 }
 0xcc7   : > { %v9060_v14 = vadd.f32 %v13892_v19, %v9059_v6 }
 0xcc8   : > { %9941 = vst [vmem:[%s15816_s23 + $0x3e8] sm:$0xff] %v9065_v40 }
 0xcc9   : > { %9940 = vst [vmem:[%s15816_s23 + $0x3e0] sm:$0xff] %v9060_v14 }
 0xcce   : > { %v11122_v52 = vpop.f32.mrb[122].mxu1 }
 0xccf   : > { %v9075_v58 = vadd.f32 %v13892_v19, %v11122_v52  ;;  %v9069_v55 = vpop.f32.mrb[123].mxu1 }
 0xcd0   : > { %v9070_v50 = vadd.f32 %v13892_v19, %v9069_v55 }
 0xcd1   : > { %9943 = vst [vmem:[%s15816_s23 + $0x3f8] sm:$0xff] %v9075_v58 }
 0xcd2   : > { %9942 = vst [vmem:[%s15816_s23 + $0x3f0] sm:$0xff] %v9070_v50 }
 0xcd3   : > { %s9953_s19 = sshll.u32 %s13967_s27, 11  ;;  %s9165_s21 = sshll.u32 %s15816_s23, 4  ;;  %s9166_s21 = int_to_ptr.vmem [resolvable:$true] %s9165_s21 }
 0xcd4   : > { %s9148_s10 = scalar_lea.hbm %s19860_s6, %s9953_s19  ;;  %s13977_s16 = smov 2048  }
 0xcd5   : > { %12515 = sst [smem:[#allocation9]] (%p14066_p5), %s13977_s16  ;;  %s13978_s18 = smov 4096  }
 0xcd6   : > { %12516 = sst [smem:[#allocation9 + $0x1]] (%p14066_p5), %s13978_s18  ;;  %s13979_s20 = smov 16  }
 0xcd7   : > { %12517 = sst [smem:[#allocation9 + $0x2]] (%p14066_p5), %s13979_s20  ;;  %s13980_s12 = smov 128  }
 0xcd8   : > { %12518 = sst [smem:[#allocation9 + $0x3]] (%p14066_p5), %s13980_s12  ;;  %s13981_s27 = smov 8  }
 0xcd9   : > { %12519 = sst [smem:[#allocation9 + $0x4]] (%p14066_p5), %s13980_s12  ;;  %s13982_s23 = smov [#allocation8]  }
 0xcda   : > { %12520 = sst [smem:[#allocation9 + $0x5]] (%p14066_p5), %s13981_s27  ;;  %s13983_s30 = smov 0  }
 0xcdb   : > { %12521 = dma.general (%p14066_p5), %s9166_s21, 16384, %s9148_s10, %s9128_s22, %s13982_s23, [#allocation9], %s13983_s30, 0  }
 0xcdc   : > { %s19803_s18 = scalar_lea.hbm %s19861_s7, %s9953_s19  ;;  %s9194_s20 = sshll.u32 %s19645_s17, 4  ;;  %s19806_s20 = int_to_ptr.vmem [resolvable:$true] %s9194_s20 }
 0xcdd   : > { %s13893_s12 = scalar_lea.vmem %s19806_s20, 2048  ;;  %s13984_s27 = smov [#allocation6]  }
 0xcde   : > { %p13894_p1 = scmp.ne.s32.totalorder %s19806_s20, %s13893_s12  ;;  %s13897_s22 = sshll.u32 %s13984_s27, 4  ;;  %s13898_s22 = int_to_ptr.vmem [resolvable:$false] %s13897_s22 }
 0xcdf   : > { %s13899_s21 = scalar_lea.vmem %s13898_s22, 4096  ;;  %p13900_p4 = scmp.lt.s32.totalorder %s19806_s20, %s13898_s22 }
 0xce0   : > { %p13895_p2 = pnand %p13894_p1, %p14066_p5  ;;  %p13901_p6 = scmp.lt.s32.totalorder %s13899_s21, %s13893_s12 }
 0xce2   : > { %p13896_p3 = pneg %p13895_p2  ;;  %p13902_p7 = por %p13901_p6, %p13900_p4 }
 0xce4   : > { %p13903_p8 = pnand %p13902_p7, %p13896_p3 }
 0xce6   : > { %13906 = shalt.err (!%p13903_p8)
}
 0xce7   : > { %s13907_s17 = scalar_lea.hbm %s19803_s18, 2048  ;;  %s13911_s23 = scalar_lea.hbm %s19861_s7, 4096 }
 0xce8   : > { %p13908_p11 = scmp.ne.s32.totalorder %s19803_s18, %s13907_s17  ;;  %p13912_p0 = scmp.lt.u32.totalorder %s19803_s18, %s19861_s7 }
 0xce9   : > { %p13913_p1 = scmp.lt.u32.totalorder %s13911_s23, %s13907_s17  ;;  %p13915_p3 = scmp.lt.u32.totalorder %s13907_s17, %s19803_s18 }
 0xcea   : > { %p13909_p12 = pnand %p13908_p11, %p14066_p5 }
 0xceb   : > { %p13914_p2 = por %p13913_p1, %p13912_p0 }
 0xcec   : > { %p13910_p13 = pneg %p13909_p12 }
 0xced   : > { %p13916_p4 = por %p13915_p3, %p13914_p2 }
 0xcef   : > { %p13917_p6 = pnand %p13916_p4, %p13910_p13 }
 0xcf1   : > { %13920 = shalt.err (!%p13917_p6)
}
 0xcf2   : > { %s13985_s16 = smov 128   ;;  %s13986_s12 = smov 8  }
 0xcf3   : > { %s21243_s27 = scalar_lea.sflag [#allocation7], %s14361_s15 }
 0xcf4   : > { %12522 = dma.vmem_to_hbm [thread:$0]  (%p14066_p5), %s19806_s20, 2048, %s19803_s18, %s21243_s27, %s13985_s16, %s13985_s16, %s13986_s12  }
 0xcf5 PF: > { %s9209_s22 = sand.u32 1, %s13955_s24   ;;  %p12526_p7 = pnand %p9323_p10, %p14077_p9 }
 0xcf6   : > { %s9210_s21 = scalar_lea.sflag [#allocation5], %s9209_s22 }
 0xcf7   : > { %13946 = dma.done.wait (!%p12526_p7), %s9210_s21, 16384  }
 0xcf8   : > { %13948 = vsyncadd (!%p12526_p7), %s9210_s21, 4294950912  ;;  %s9219_s17 = scalar_lea.sflag [#allocation7], %s9209_s22 }
 0xcf9   : > { %13950 = dma.done.wait (!%p12526_p7), %s9219_s17, 2048  }
 0xcfa   : > { %13952 = vsyncadd (!%p12526_p7), %s9219_s17, 4294965248  ;;  %s24_s29 = sadd.s32 1, %s13975_s29   ;;  %s21244_s24 = smov %s13959_s25 }
 0xcfb   : > { %p21_p8 = scmp.ge.s32.totalorder %s24_s29, 4   ;;  %s21245_s25 = smov %s13963_s26 }
 0xcfc   : > { %s21246_s26 = smov %s14075_s13  ;;  %s21247_s27 = smov %s13971_s28 }
 0xcfd   : > { %s21248_s28 = smov %s21250_s9  ;;  %23 = sbr.rel (!%p21_p8) target bundleno = 6 (0x6), region = 166 }
 0xd04   :  { %9224 = vsyncpa [#allocation5], 1 }
 0xd05   :  { %9226 = vsyncpa [#allocation5 + $0x1], 1 }
 0xd06   :  { %9227 = vsyncpa [#allocation7], 1 }
 0xd07   :  { %9229 = vsyncpa [#allocation7 + $0x1], 1 }

</bundles_post_ra>
